<compile_context>
chip_gen: v7x
topology: tpu7x:2x2x1
jax: 0.10.0
libtpu: 0.0.40
codegen_flags: <defaults>
</compile_context>

<pallas_src>
import functools

import jax
import jax.numpy as jnp
from jax import lax
from jax.experimental import pallas as pl
from jax.experimental.pallas import tpu as pltpu

NUM_OUTPUTS = 1

_TAPS = tuple((di, dj) for di in (-1, 0, 1) for dj in (-1, 0, 1))


# ------------------------------------------------------------------ in-kernel helpers
def _shift_rows(y, k):
    """result[r] = y[r + k] with zero fill outside [0, R)."""
    r, c = y.shape
    if k == 0:
        return y
    if abs(k) >= r:
        return jnp.zeros_like(y)
    z = jnp.zeros((abs(k), c), y.dtype)
    if k > 0:
        return jnp.concatenate([y[k:, :], z], axis=0)
    return jnp.concatenate([z, y[:k, :]], axis=0)


def _conv3x3_s1(x, w_ref, m_not_last, m_not_first, W):
    """Implicit-GEMM 3x3 / stride-1 / pad-1 conv on a flattened (R=H*W, Cin) bf16 tile.

    w_ref: (9, Cin, Cout) bf16, tap index = (di+1)*3 + (dj+1).
    m_not_last / m_not_first: (R, 1) bf16 column-validity masks (zero where the
    source pixel would wrap around a row edge).  Returns (R, Cout) f32.
    """
    x_by_dj = {-1: x * m_not_last, 0: x, 1: x * m_not_first}
    acc = None
    for t, (di, dj) in enumerate(_TAPS):
        y = jnp.dot(x_by_dj[dj], w_ref[t], preferred_element_type=jnp.float32)
        y = _shift_rows(y, di * W + dj)
        acc = y if acc is None else acc + y
    return acc


# ------------------------------------------------------------------------ Pallas kernels
def _matmul_bn_act_kernel(a_ref, w_ref, s_ref, b_ref, o_ref, *, relu):
    # rows-tiled (tile, K) @ (K, C) on the MXU (bf16 operands, f32 accumulate)
    # with the folded-BatchNorm scale/bias (+ ReLU) epilogue fused.
    y = jnp.dot(a_ref[...], w_ref[...], preferred_element_type=jnp.float32)
    y = y * s_ref[...] + b_ref[...]
    if relu:
        y = jnp.maximum(y, 0.0)
    o_ref[...] = y.astype(o_ref.dtype)


def _identity_block_kernel(x_ref, ml_ref, mf_ref, w1_ref, s1_ref, b1_ref,
                           w2_ref, s2_ref, b2_ref, o_ref, *, W):
    # One whole BasicBlock (stride 1): conv1/BN1/ReLU -> conv2/BN2 -> +x -> ReLU,
    # all on VMEM-resident activations (no im2col HBM round trip).
    x = x_ref[0]                          # (R, C) bf16
    ml = ml_ref[...]
    mf = mf_ref[...]
    h1 = _conv3x3_s1(x, w1_ref, ml, mf, W)
    h1 = jnp.maximum(h1 * s1_ref[...] + b1_ref[...], 0.0)
    h2 = _conv3x3_s1(h1.astype(jnp.bfloat16), w2_ref, ml, mf, W)
    y = jnp.maximum(h2 * s2_ref[...] + b2_ref[...] + x.astype(jnp.float32), 0.0)
    o_ref[0] = y.astype(o_ref.dtype)


def _down_block_kernel(a_ref, ml_ref, mf_ref, w1_ref, wd_ref, s1_ref, b1_ref,
                       sd_ref, bd_ref, w2_ref, s2_ref, b2_ref, o_ref, *, W, cin):
    # Transition BasicBlock: stride-2 conv1 as one dot on the (im2col) LHS, the
    # 1x1/stride-2 projection reuses only the centre-tap columns of that LHS
    # (static slice, 1/9 of the MACs), conv2 is implicit GEMM on the VMEM-resident
    # conv1 output.  Everything fused in one call per image.
    a = a_ref[0]                          # (R, 9*cin) bf16
    h1 = jnp.dot(a, w1_ref[...], preferred_element_type=jnp.float32)
    h1 = jnp.maximum(h1 * s1_ref[...] + b1_ref[...], 0.0)
    ident = jnp.dot(a[:, 4 * cin:5 * cin], wd_ref[...],
                    preferred_element_type=jnp.float32) * sd_ref[...] + bd_ref[...]
    h2 = _conv3x3_s1(h1.astype(jnp.bfloat16), w2_ref, ml_ref[...], mf_ref[...], W)
    y = jnp.maximum(h2 * s2_ref[...] + b2_ref[...] + ident, 0.0)
    o_ref[0] = y.astype(o_ref.dtype)


def _head_kernel(x_ref, s_ref, b_ref, w_ref, fb_ref, o_ref):
    # Global average pool -> BatchNorm1d -> ReLU -> Linear (lane-dense padded), fused.
    feat = jnp.mean(x_ref[...].astype(jnp.float32), axis=1)          # (N, C)
    h = jnp.maximum(feat * s_ref[...] + b_ref[...], 0.0)
    o_ref[...] = jnp.dot(h.astype(jnp.bfloat16), w_ref[...],
                         preferred_element_type=jnp.float32) + fb_ref[...]


# ----------------------------------------------------------------------- Pallas wrappers
def conv_bn_act(a, w, scale, bias, relu=True, tile_rows=256):
    rows, k = a.shape
    c = w.shape[1]
    if rows <= tile_rows:
        tr, grid = rows, (1,)
    else:
        tr, grid = tile_rows, (pl.cdiv(rows, tile_rows),)   # tile_rows multiple of 8
    return pl.pallas_call(
        functools.partial(_matmul_bn_act_kernel, relu=relu),
        out_shape=jax.ShapeDtypeStruct((rows, c), jnp.bfloat16),
        grid_spec=pltpu.PrefetchScalarGridSpec(
            num_scalar_prefetch=0, grid=grid,
            in_specs=[pl.BlockSpec((tr, k), lambda i: (i, 0)),
                      pl.BlockSpec((k, c), lambda i: (0, 0)),
                      pl.BlockSpec((1, c), lambda i: (0, 0)),
                      pl.BlockSpec((1, c), lambda i: (0, 0))],
            out_specs=pl.BlockSpec((tr, c), lambda i: (i, 0)),
        ),
        compiler_params=pltpu.CompilerParams(dimension_semantics=("parallel",)),
        cost_estimate=pl.CostEstimate(flops=2 * rows * k * c, transcendentals=0,
                                      bytes_accessed=2 * (rows * k + rows * c + k * c)),
    )(a, w, scale, bias)


def col_masks(h, w):
    w_idx = jnp.tile(jnp.arange(w), h).reshape(h * w, 1)
    m_not_last = (w_idx != (w - 1)).astype(jnp.bfloat16)
    m_not_first = (w_idx != 0).astype(jnp.bfloat16)
    return m_not_last, m_not_first


def identity_block(x, blk, H, W):
    n, R, C = x.shape
    ml, mf = col_masks(H, W)
    s1, b1 = blk["bn1"]
    s2, b2 = blk["bn2"]
    flops = 2 * n * R * 9 * C * C * 2
    bytes_acc = 2 * n * R * C * 2 + 2 * 9 * C * C * 2
    return pl.pallas_call(
        functools.partial(_identity_block_kernel, W=W),
        out_shape=jax.ShapeDtypeStruct((n, R, C), jnp.bfloat16),
        grid_spec=pltpu.PrefetchScalarGridSpec(
            num_scalar_prefetch=0, grid=(n,),
            in_specs=[
                pl.BlockSpec((1, R, C), lambda i: (i, 0, 0)),
                pl.BlockSpec((R, 1), lambda i: (0, 0)),
                pl.BlockSpec((R, 1), lambda i: (0, 0)),
                pl.BlockSpec((9, C, C), lambda i: (0, 0, 0)),
                pl.BlockSpec((1, C), lambda i: (0, 0)),
                pl.BlockSpec((1, C), lambda i: (0, 0)),
                pl.BlockSpec((9, C, C), lambda i: (0, 0, 0)),
                pl.BlockSpec((1, C), lambda i: (0, 0)),
                pl.BlockSpec((1, C), lambda i: (0, 0)),
            ],
            out_specs=pl.BlockSpec((1, R, C), lambda i: (i, 0, 0)),
        ),
        compiler_params=pltpu.CompilerParams(dimension_semantics=("parallel",)),
        cost_estimate=pl.CostEstimate(flops=flops, transcendentals=0,
                                      bytes_accessed=bytes_acc),
    )(x, ml, mf, blk["w1"], s1, b1, blk["w2"], s2, b2)


def down_block(a1, blk, OH, OW, cin, cout):
    n, R, K = a1.shape                     # K = 9 * cin
    ml, mf = col_masks(OH, OW)
    s1, b1 = blk["bn1"]
    sd, bd = blk["bnd"]
    s2, b2 = blk["bn2"]
    flops = 2 * n * R * (K * cout + cin * cout + 9 * cout * cout)
    bytes_acc = n * R * (K + cout) * 2 + (K * cout + cin * cout + 9 * cout * cout) * 2
    return pl.pallas_call(
        functools.partial(_down_block_kernel, W=OW, cin=cin),
        out_shape=jax.ShapeDtypeStruct((n, R, cout), jnp.bfloat16),
        grid_spec=pltpu.PrefetchScalarGridSpec(
            num_scalar_prefetch=0, grid=(n,),
            in_specs=[
                pl.BlockSpec((1, R, K), lambda i: (i, 0, 0)),
                pl.BlockSpec((R, 1), lambda i: (0, 0)),
                pl.BlockSpec((R, 1), lambda i: (0, 0)),
                pl.BlockSpec((K, cout), lambda i: (0, 0)),
                pl.BlockSpec((cin, cout), lambda i: (0, 0)),
                pl.BlockSpec((1, cout), lambda i: (0, 0)),
                pl.BlockSpec((1, cout), lambda i: (0, 0)),
                pl.BlockSpec((1, cout), lambda i: (0, 0)),
                pl.BlockSpec((1, cout), lambda i: (0, 0)),
                pl.BlockSpec((9, cout, cout), lambda i: (0, 0, 0)),
                pl.BlockSpec((1, cout), lambda i: (0, 0)),
                pl.BlockSpec((1, cout), lambda i: (0, 0)),
            ],
            out_specs=pl.BlockSpec((1, R, cout), lambda i: (i, 0, 0)),
        ),
        compiler_params=pltpu.CompilerParams(dimension_semantics=("parallel",)),
        cost_estimate=pl.CostEstimate(flops=flops, transcendentals=0,
                                      bytes_accessed=bytes_acc),
    )(a1, ml, mf, blk["w1"], blk["wd"], s1, b1, sd, bd, blk["w2"], s2, b2)


def fused_head(x3d, scale, bias, fc_w, fc_b, num_outputs):
    n, hw, c = x3d.shape
    op = fc_w.shape[1]                     # lane-dense padded output width (128)
    out = pl.pallas_call(
        _head_kernel,
        out_shape=jax.ShapeDtypeStruct((n, op), jnp.float32),
        cost_estimate=pl.CostEstimate(flops=2 * n * c * op, transcendentals=0,
                                      bytes_accessed=2 * n * hw * c + 2 * c * op + 4 * n * op),
    )(x3d, scale, bias, fc_w, fc_b)
    return out[:, :num_outputs]


# --------------------------------------------------------------------------- XLA glue
def im2col(x, kh, kw, stride, padding):
    """Patch extraction (bf16). Column order: (kh, kw) major, channel fastest."""
    n, h, w, c = x.shape
    oh = (h + 2 * padding - kh) // stride + 1
    ow = (w + 2 * padding - kw) // stride + 1
    xp = jnp.pad(x, ((0, 0), (padding, padding), (padding, padding), (0, 0)))
    cols = []
    for i in range(kh):
        for j in range(kw):
            cols.append(lax.slice(
                xp, (0, i, j, 0),
                (n, i + stride * (oh - 1) + 1, j + stride * (ow - 1) + 1, c),
                (1, stride, stride, 1)))
    a = jnp.concatenate(cols, axis=-1).reshape(n * oh * ow, kh * kw * c)
    return a, oh, ow


def maxpool3x3s2(x):
    # TODO(synk): 3x3/s2/p1 max-pool left as XLA reduce_window glue (tiny reduction).
    y = lax.reduce_window(
        x.astype(jnp.float32), -jnp.inf, lax.max, (1, 3, 3, 1), (1, 2, 2, 1),
        ((0, 0), (1, 1), (1, 1), (0, 0)))
    return y.astype(jnp.bfloat16)


# ----------------------------------------------------------------------------- network
def audra_forward(params, x_nchw, *, num_outputs):
    x = jnp.transpose(x_nchw, (0, 2, 3, 1)).astype(jnp.bfloat16)     # NCHW -> NHWC bf16
    n = x.shape[0]
    # stem: 7x7/s2/p3 conv + folded BN + ReLU, rows-tiled fused matmul
    a, oh, ow = im2col(x, 7, 7, 2, 3)
    h = conv_bn_act(a, params["stem_w"], *params["stem_bn"], relu=True)
    x = maxpool3x3s2(h.reshape(n, oh, ow, -1))
    n_, H, W, C = x.shape
    x = x.reshape(n_, H * W, C)                                       # flattened spatial
    for blocks in params["layers"]:
        for blk in blocks:
            if "wd" in blk:
                # transition block (stride 2): conv1 via a small XLA im2col, the rest fused.
                # TODO(synk): the stride-2 conv1 im2col could also move in-kernel
                # (strided implicit GEMM) to remove the last HBM im2col expansion.
                cin, cout = C, blk["w1"].shape[1]
                a1, oh2, ow2 = im2col(x.reshape(n_, H, W, C), 3, 3, 2, 1)
                a1 = a1.reshape(n_, oh2 * ow2, 9 * cin)
                x = down_block(a1, blk, oh2, ow2, cin, cout)
                H, W, C = oh2, ow2, cout
            else:
                x = identity_block(x, blk, H, W)
    # TODO(synk): global avg-pool could be fused into the last block's epilogue.
    return fused_head(x, *params["head_bn"], params["fc_w"], params["fc_b"], num_outputs)


# -------------------------------------------------------------------------------- init
def init_params(key, widths=(8, 16, 32, 64), num_outputs=1, in_ch=3):
    keys = iter(jax.random.split(key, 256))
    eps = 1e-5
    lane_pad = 128   # head Linear padded once to a lane-dense width

    def conv_oihw(cout, cin, k):
        fan_in = cin * k * k
        return jax.random.normal(next(keys), (cout, cin, k, k), jnp.float32) * (2.0 / fan_in) ** 0.5

    def conv_mat(cout, cin, k):
        # OIHW -> (k*k*cin, cout) im2col matmul weight; row = (kh*k + kw)*cin + ci.
        w = conv_oihw(cout, cin, k)
        return jnp.transpose(w, (2, 3, 1, 0)).reshape(k * k * cin, cout).astype(jnp.bfloat16)

    def conv_taps(cout, cin):
        # OIHW -> (9, cin, cout) per-tap weights for in-kernel implicit GEMM.
        w = conv_oihw(cout, cin, 3)
        return jnp.transpose(w, (2, 3, 1, 0)).reshape(9, cin, cout).astype(jnp.bfloat16)

    def proj_mat(cout, cin):
        # plain (cin, cout) 1x1 projection (uses the centre-tap im2col columns).
        w = conv_oihw(cout, cin, 1)
        return jnp.transpose(w, (2, 3, 1, 0)).reshape(cin, cout).astype(jnp.bfloat16)

    def bn(c):
        gamma = 1.0 + 0.1 * jax.random.normal(next(keys), (c,), jnp.float32)
        beta = 0.1 * jax.random.normal(next(keys), (c,), jnp.float32)
        # inference-mode BatchNorm (running_mean=0, running_var=1) folded to scale/bias.
        # TODO(synk): re-fold with real running stats if a trained checkpoint is loaded.
        scale = (gamma / jnp.sqrt(1.0 + eps)).reshape(1, c)
        bias = beta.reshape(1, c)
        return scale, bias

    params = {"stem_w": conv_mat(widths[0], in_ch, 7), "stem_bn": bn(widths[0])}
    layers = []
    in_c = widths[0]
    for li, c in enumerate(widths):
        blocks = []
        for bi in range(2):
            stride = 2 if (li > 0 and bi == 0) else 1
            if stride != 1 or in_c != c:          # downsample <=> stride 2 in this config
                blk = {"w1": conv_mat(c, in_c, 3), "bn1": bn(c),
                       "wd": proj_mat(c, in_c), "bnd": bn(c),
                       "w2": conv_taps(c, c), "bn2": bn(c)}
            else:
                blk = {"w1": conv_taps(c, in_c), "bn1": bn(c),
                       "w2": conv_taps(c, c), "bn2": bn(c)}
            blocks.append(blk)
            in_c = c
        layers.append(blocks)
    params["layers"] = layers
    params["head_bn"] = bn(in_c)
    fc_w = 0.1 * jax.random.normal(next(keys), (in_c, num_outputs), jnp.float32)
    params["fc_w"] = (jnp.zeros((in_c, lane_pad), jnp.float32)
                      .at[:, :num_outputs].set(fc_w).astype(jnp.bfloat16))
    params["fc_b"] = jnp.zeros((1, lane_pad), jnp.float32)
    return params


if __name__ == "__main__":
    key = jax.random.PRNGKey(0)
    pkey, xkey = jax.random.split(key)
    params = init_params(pkey, num_outputs=NUM_OUTPUTS)
    # PyTorch-convention NCHW input (batch=2, RGB, 32x32)
    x = jax.random.normal(xkey, (2, 3, 32, 32), jnp.float32)
    forward = jax.jit(functools.partial(audra_forward, num_outputs=NUM_OUTPUTS))
    pred = jax.block_until_ready(forward(params, x))
    assert pred.shape == (2, NUM_OUTPUTS) and pred.dtype == jnp.float32
    assert bool(jnp.all(jnp.isfinite(pred)))
    print("KERNEL_OK")
</pallas_src>

<mosaic_0001>
module attributes {stable_mosaic.version = 11 : i64} {
  func.func @_matmul_bn_act_kernel(%arg0: i32, %arg1: memref<256x147xbf16, #tpu.memory_space<vmem>>, %arg2: memref<147x8xbf16, #tpu.memory_space<vmem>>, %arg3: memref<1x8xf32, #tpu.memory_space<vmem>>, %arg4: memref<1x8xf32, #tpu.memory_space<vmem>>, %arg5: memref<256x8xbf16, #tpu.memory_space<vmem>>) attributes {dimension_semantics = [#tpu.dimension_semantics<parallel>], iteration_bounds = array<i64: 2>, scalar_prefetch = 0 : i64, scratch_operands = 0 : i64, tpu.core_type = #tpu.core_type<tc>, window_params = [{transform_indices = @transform_0, window_bounds = array<i64: 256, 147>}, {pipeline_mode = #tpu.pipeline_mode<synchronous>, transform_indices = @transform_1, window_bounds = array<i64: 147, 8>}, {pipeline_mode = #tpu.pipeline_mode<synchronous>, transform_indices = @transform_2, window_bounds = array<i64: 1, 8>}, {pipeline_mode = #tpu.pipeline_mode<synchronous>, transform_indices = @transform_3, window_bounds = array<i64: 1, 8>}, {transform_indices = @transform_4, window_bounds = array<i64: 256, 8>}]} {
    %c0 = arith.constant 0 : index
    %c0_0 = arith.constant 0 : index
    %0 = vector.load %arg1[%c0, %c0_0] : memref<256x147xbf16, #tpu.memory_space<vmem>>, vector<256x147xbf16>
    %c0_1 = arith.constant 0 : index
    %c0_2 = arith.constant 0 : index
    %1 = vector.load %arg2[%c0_1, %c0_2] : memref<147x8xbf16, #tpu.memory_space<vmem>>, vector<147x8xbf16>
    %cst = arith.constant dense<0.000000e+00> : vector<256x8xf32>
    %2 = tpu.matmul %0, %1, %cst {dimension_numbers = #tpu.dot_dimension_numbers<[1], [0], [0], [1], [0, 0, 1, 1], [], []>} : vector<256x147xbf16>, vector<147x8xbf16>, vector<256x8xf32> -> vector<256x8xf32>
    %c0_3 = arith.constant 0 : index
    %c0_4 = arith.constant 0 : index
    %3 = vector.load %arg3[%c0_3, %c0_4] : memref<1x8xf32, #tpu.memory_space<vmem>>, vector<1x8xf32>
    %4 = vector.broadcast %3 : vector<1x8xf32> to vector<256x8xf32>
    %5 = arith.mulf %2, %4 : vector<256x8xf32>
    %c0_5 = arith.constant 0 : index
    %c0_6 = arith.constant 0 : index
    %6 = vector.load %arg4[%c0_5, %c0_6] : memref<1x8xf32, #tpu.memory_space<vmem>>, vector<1x8xf32>
    %7 = vector.broadcast %6 : vector<1x8xf32> to vector<256x8xf32>
    %8 = arith.addf %5, %7 : vector<256x8xf32>
    %cst_7 = arith.constant 0.000000e+00 : f32
    %9 = vector.broadcast %cst_7 : f32 to vector<256x8xf32>
    %10 = arith.maximumf %8, %9 : vector<256x8xf32>
    %11 = arith.truncf %10 : vector<256x8xf32> to vector<256x8xbf16>
    %c0_8 = arith.constant 0 : index
    %c0_9 = arith.constant 0 : index
    %12 = vector.load %arg5[%c0_8, %c0_9] : memref<256x8xbf16, #tpu.memory_space<vmem>>, vector<256x8xbf16>
    tpu.vector_store %arg5[%c0_8, %c0_9], %11 {strides = array<i32>} : memref<256x8xbf16, #tpu.memory_space<vmem>>, vector<256x8xbf16>,
    return
  }
  func.func @transform_0(%arg0: i32) -> (i32, i32) {
    %c0_i32 = arith.constant 0 : i32
    %c0_i32_0 = arith.constant 0 : i32
    return %arg0, %c0_i32 : i32, i32
  }
  func.func @transform_1(%arg0: i32) -> (i32, i32) {
    %c0_i32 = arith.constant 0 : i32
    %c0_i32_0 = arith.constant 0 : i32
    %c0_i32_1 = arith.constant 0 : i32
    return %c0_i32, %c0_i32_0 : i32, i32
  }
  func.func @transform_2(%arg0: i32) -> (i32, i32) {
    %c0_i32 = arith.constant 0 : i32
    %c0_i32_0 = arith.constant 0 : i32
    %c0_i32_1 = arith.constant 0 : i32
    return %c0_i32, %c0_i32_0 : i32, i32
  }
  func.func @transform_3(%arg0: i32) -> (i32, i32) {
    %c0_i32 = arith.constant 0 : i32
    %c0_i32_0 = arith.constant 0 : i32
    %c0_i32_1 = arith.constant 0 : i32
    return %c0_i32, %c0_i32_0 : i32, i32
  }
  func.func @transform_4(%arg0: i32) -> (i32, i32) {
    %c0_i32 = arith.constant 0 : i32
    %c0_i32_0 = arith.constant 0 : i32
    return %arg0, %c0_i32 : i32, i32
  }
}

module attributes {stable_mosaic.version = 11 : i64} {
  func.func @_identity_block_kernel(%arg0: i32, %arg1: memref<1x64x8xbf16, #tpu.memory_space<vmem>>, %arg2: memref<64x1xbf16, #tpu.memory_space<vmem>>, %arg3: memref<64x1xbf16, #tpu.memory_space<vmem>>, %arg4: memref<9x8x8xbf16, #tpu.memory_space<vmem>>, %arg5: memref<1x8xf32, #tpu.memory_space<vmem>>, %arg6: memref<1x8xf32, #tpu.memory_space<vmem>>, %arg7: memref<9x8x8xbf16, #tpu.memory_space<vmem>>, %arg8: memref<1x8xf32, #tpu.memory_space<vmem>>, %arg9: memref<1x8xf32, #tpu.memory_space<vmem>>, %arg10: memref<1x64x8xbf16, #tpu.memory_space<vmem>>) attributes {dimension_semantics = [#tpu.dimension_semantics<parallel>], iteration_bounds = array<i64: 2>, scalar_prefetch = 0 : i64, scratch_operands = 0 : i64, tpu.core_type = #tpu.core_type<tc>, window_params = [{transform_indices = @transform_0, window_bounds = array<i64: 1, 64, 8>}, {pipeline_mode = #tpu.pipeline_mode<synchronous>, transform_indices = @transform_1, window_bounds = array<i64: 64, 1>}, {pipeline_mode = #tpu.pipeline_mode<synchronous>, transform_indices = @transform_2, window_bounds = array<i64: 64, 1>}, {pipeline_mode = #tpu.pipeline_mode<synchronous>, transform_indices = @transform_3, window_bounds = array<i64: 9, 8, 8>}, {pipeline_mode = #tpu.pipeline_mode<synchronous>, transform_indices = @transform_4, window_bounds = array<i64: 1, 8>}, {pipeline_mode = #tpu.pipeline_mode<synchronous>, transform_indices = @transform_5, window_bounds = array<i64: 1, 8>}, {pipeline_mode = #tpu.pipeline_mode<synchronous>, transform_indices = @transform_6, window_bounds = array<i64: 9, 8, 8>}, {pipeline_mode = #tpu.pipeline_mode<synchronous>, transform_indices = @transform_7, window_bounds = array<i64: 1, 8>}, {pipeline_mode = #tpu.pipeline_mode<synchronous>, transform_indices = @transform_8, window_bounds = array<i64: 1, 8>}, {transform_indices = @transform_9, window_bounds = array<i64: 1, 64, 8>}]} {
    %c0 = arith.constant 0 : index
    %c0_0 = arith.constant 0 : index
    %c0_1 = arith.constant 0 : index
    %0 = vector.load %arg1[%c0, %c0_0, %c0_1] : memref<1x64x8xbf16, #tpu.memory_space<vmem>>, vector<1x64x8xbf16>
    %1 = vector.shape_cast %0 : vector<1x64x8xbf16> to vector<64x8xbf16>
    %c0_2 = arith.constant 0 : index
    %c0_3 = arith.constant 0 : index
    %2 = vector.load %arg2[%c0_2, %c0_3] : memref<64x1xbf16, #tpu.memory_space<vmem>>, vector<64x1xbf16>
    %c0_4 = arith.constant 0 : index
    %c0_5 = arith.constant 0 : index
    %3 = vector.load %arg3[%c0_4, %c0_5] : memref<64x1xbf16, #tpu.memory_space<vmem>>, vector<64x1xbf16>
    %4 = vector.broadcast %2 : vector<64x1xbf16> to vector<64x8xbf16>
    %5 = arith.mulf %1, %4 : vector<64x8xbf16>
    %6 = vector.broadcast %3 : vector<64x1xbf16> to vector<64x8xbf16>
    %7 = arith.mulf %1, %6 : vector<64x8xbf16>
    %c0_6 = arith.constant 0 : index
    %c0_7 = arith.constant 0 : index
    %c0_8 = arith.constant 0 : index
    %8 = vector.load %arg4[%c0_6, %c0_7, %c0_8] : memref<9x8x8xbf16, #tpu.memory_space<vmem>>, vector<1x8x8xbf16>
    %9 = vector.shape_cast %8 : vector<1x8x8xbf16> to vector<8x8xbf16>
    %cst = arith.constant dense<0.000000e+00> : vector<64x8xf32>
    %10 = tpu.matmul %5, %9, %cst {dimension_numbers = #tpu.dot_dimension_numbers<[1], [0], [0], [1], [0, 0, 1, 1], [], []>} : vector<64x8xbf16>, vector<8x8xbf16>, vector<64x8xf32> -> vector<64x8xf32>
    %cst_9 = arith.constant 0.000000e+00 : f32
    %11 = vector.broadcast %cst_9 : f32 to vector<9x8xf32>
    %12 = vector.extract_strided_slice %10 {offsets = [0, 0], sizes = [55, 8], strides = [1, 1]} : vector<64x8xf32> to vector<55x8xf32>
    %13 = tpu.concatenate %11, %12 in 0 : vector<9x8xf32>, vector<55x8xf32> -> vector<64x8xf32>
    %c1 = arith.constant 1 : index
    %c0_10 = arith.constant 0 : index
    %c0_11 = arith.constant 0 : index
    %14 = vector.load %arg4[%c1, %c0_10, %c0_11] : memref<9x8x8xbf16, #tpu.memory_space<vmem>>, vector<1x8x8xbf16>
    %15 = vector.shape_cast %14 : vector<1x8x8xbf16> to vector<8x8xbf16>
    %cst_12 = arith.constant dense<0.000000e+00> : vector<64x8xf32>
    %16 = tpu.matmul %1, %15, %cst_12 {dimension_numbers = #tpu.dot_dimension_numbers<[1], [0], [0], [1], [0, 0, 1, 1], [], []>} : vector<64x8xbf16>, vector<8x8xbf16>, vector<64x8xf32> -> vector<64x8xf32>
    %cst_13 = arith.constant 0.000000e+00 : f32
    %17 = vector.broadcast %cst_13 : f32 to vector<8x8xf32>
    %18 = vector.extract_strided_slice %16 {offsets = [0, 0], sizes = [56, 8], strides = [1, 1]} : vector<64x8xf32> to vector<56x8xf32>
    %19 = tpu.concatenate %17, %18 in 0 : vector<8x8xf32>, vector<56x8xf32> -> vector<64x8xf32>
    %20 = arith.addf %13, %19 : vector<64x8xf32>
    %c2 = arith.constant 2 : index
    %c0_14 = arith.constant 0 : index
    %c0_15 = arith.constant 0 : index
    %21 = vector.load %arg4[%c2, %c0_14, %c0_15] : memref<9x8x8xbf16, #tpu.memory_space<vmem>>, vector<1x8x8xbf16>
    %22 = vector.shape_cast %21 : vector<1x8x8xbf16> to vector<8x8xbf16>
    %cst_16 = arith.constant dense<0.000000e+00> : vector<64x8xf32>
    %23 = tpu.matmul %7, %22, %cst_16 {dimension_numbers = #tpu.dot_dimension_numbers<[1], [0], [0], [1], [0, 0, 1, 1], [], []>} : vector<64x8xbf16>, vector<8x8xbf16>, vector<64x8xf32> -> vector<64x8xf32>
    %cst_17 = arith.constant 0.000000e+00 : f32
    %24 = vector.broadcast %cst_17 : f32 to vector<7x8xf32>
    %25 = vector.extract_strided_slice %23 {offsets = [0, 0], sizes = [57, 8], strides = [1, 1]} : vector<64x8xf32> to vector<57x8xf32>
    %26 = tpu.concatenate %24, %25 in 0 : vector<7x8xf32>, vector<57x8xf32> -> vector<64x8xf32>
    %27 = arith.addf %20, %26 : vector<64x8xf32>
    %c3 = arith.constant 3 : index
    %c0_18 = arith.constant 0 : index
    %c0_19 = arith.constant 0 : index
    %28 = vector.load %arg4[%c3, %c0_18, %c0_19] : memref<9x8x8xbf16, #tpu.memory_space<vmem>>, vector<1x8x8xbf16>
    %29 = vector.shape_cast %28 : vector<1x8x8xbf16> to vector<8x8xbf16>
    %cst_20 = arith.constant dense<0.000000e+00> : vector<64x8xf32>
    %30 = tpu.matmul %5, %29, %cst_20 {dimension_numbers = #tpu.dot_dimension_numbers<[1], [0], [0], [1], [0, 0, 1, 1], [], []>} : vector<64x8xbf16>, vector<8x8xbf16>, vector<64x8xf32> -> vector<64x8xf32>
    %cst_21 = arith.constant 0.000000e+00 : f32
    %31 = vector.broadcast %cst_21 : f32 to vector<1x8xf32>
    %32 = vector.extract_strided_slice %30 {offsets = [0, 0], sizes = [63, 8], strides = [1, 1]} : vector<64x8xf32> to vector<63x8xf32>
    %33 = tpu.concatenate %31, %32 in 0 : vector<1x8xf32>, vector<63x8xf32> -> vector<64x8xf32>
    %34 = arith.addf %27, %33 : vector<64x8xf32>
    %c4 = arith.constant 4 : index
    %c0_22 = arith.constant 0 : index
    %c0_23 = arith.constant 0 : index
    %35 = vector.load %arg4[%c4, %c0_22, %c0_23] : memref<9x8x8xbf16, #tpu.memory_space<vmem>>, vector<1x8x8xbf16>
    %36 = vector.shape_cast %35 : vector<1x8x8xbf16> to vector<8x8xbf16>
    %cst_24 = arith.constant dense<0.000000e+00> : vector<64x8xf32>
    %37 = tpu.matmul %1, %36, %cst_24 {dimension_numbers = #tpu.dot_dimension_numbers<[1], [0], [0], [1], [0, 0, 1, 1], [], []>} : vector<64x8xbf16>, vector<8x8xbf16>, vector<64x8xf32> -> vector<64x8xf32>
    %38 = arith.addf %34, %37 : vector<64x8xf32>
    %c5 = arith.constant 5 : index
    %c0_25 = arith.constant 0 : index
    %c0_26 = arith.constant 0 : index
    %39 = vector.load %arg4[%c5, %c0_25, %c0_26] : memref<9x8x8xbf16, #tpu.memory_space<vmem>>, vector<1x8x8xbf16>
    %40 = vector.shape_cast %39 : vector<1x8x8xbf16> to vector<8x8xbf16>
    %cst_27 = arith.constant dense<0.000000e+00> : vector<64x8xf32>
    %41 = tpu.matmul %7, %40, %cst_27 {dimension_numbers = #tpu.dot_dimension_numbers<[1], [0], [0], [1], [0, 0, 1, 1], [], []>} : vector<64x8xbf16>, vector<8x8xbf16>, vector<64x8xf32> -> vector<64x8xf32>
    %cst_28 = arith.constant 0.000000e+00 : f32
    %42 = vector.broadcast %cst_28 : f32 to vector<1x8xf32>
    %43 = vector.extract_strided_slice %41 {offsets = [1, 0], sizes = [63, 8], strides = [1, 1]} : vector<64x8xf32> to vector<63x8xf32>
    %44 = tpu.concatenate %43, %42 in 0 : vector<63x8xf32>, vector<1x8xf32> -> vector<64x8xf32>
    %45 = arith.addf %38, %44 : vector<64x8xf32>
    %c6 = arith.constant 6 : index
    %c0_29 = arith.constant 0 : index
    %c0_30 = arith.constant 0 : index
    %46 = vector.load %arg4[%c6, %c0_29, %c0_30] : memref<9x8x8xbf16, #tpu.memory_space<vmem>>, vector<1x8x8xbf16>
    %47 = vector.shape_cast %46 : vector<1x8x8xbf16> to vector<8x8xbf16>
    %cst_31 = arith.constant dense<0.000000e+00> : vector<64x8xf32>
    %48 = tpu.matmul %5, %47, %cst_31 {dimension_numbers = #tpu.dot_dimension_numbers<[1], [0], [0], [1], [0, 0, 1, 1], [], []>} : vector<64x8xbf16>, vector<8x8xbf16>, vector<64x8xf32> -> vector<64x8xf32>
    %cst_32 = arith.constant 0.000000e+00 : f32
    %49 = vector.broadcast %cst_32 : f32 to vector<7x8xf32>
    %50 = vector.extract_strided_slice %48 {offsets = [7, 0], sizes = [57, 8], strides = [1, 1]} : vector<64x8xf32> to vector<57x8xf32>
    %51 = tpu.concatenate %50, %49 in 0 : vector<57x8xf32>, vector<7x8xf32> -> vector<64x8xf32>
    %52 = arith.addf %45, %51 : vector<64x8xf32>
    %c7 = arith.constant 7 : index
    %c0_33 = arith.constant 0 : index
    %c0_34 = arith.constant 0 : index
    %53 = vector.load %arg4[%c7, %c0_33, %c0_34] : memref<9x8x8xbf16, #tpu.memory_space<vmem>>, vector<1x8x8xbf16>
    %54 = vector.shape_cast %53 : vector<1x8x8xbf16> to vector<8x8xbf16>
    %cst_35 = arith.constant dense<0.000000e+00> : vector<64x8xf32>
    %55 = tpu.matmul %1, %54, %cst_35 {dimension_numbers = #tpu.dot_dimension_numbers<[1], [0], [0], [1], [0, 0, 1, 1], [], []>} : vector<64x8xbf16>, vector<8x8xbf16>, vector<64x8xf32> -> vector<64x8xf32>
    %cst_36 = arith.constant 0.000000e+00 : f32
    %56 = vector.broadcast %cst_36 : f32 to vector<8x8xf32>
    %57 = vector.extract_strided_slice %55 {offsets = [8, 0], sizes = [56, 8], strides = [1, 1]} : vector<64x8xf32> to vector<56x8xf32>
    %58 = tpu.concatenate %57, %56 in 0 : vector<56x8xf32>, vector<8x8xf32> -> vector<64x8xf32>
    %59 = arith.addf %52, %58 : vector<64x8xf32>
    %c8 = arith.constant 8 : index
    %c0_37 = arith.constant 0 : index
    %c0_38 = arith.constant 0 : index
    %60 = vector.load %arg4[%c8, %c0_37, %c0_38] : memref<9x8x8xbf16, #tpu.memory_space<vmem>>, vector<1x8x8xbf16>
    %61 = vector.shape_cast %60 : vector<1x8x8xbf16> to vector<8x8xbf16>
    %cst_39 = arith.constant dense<0.000000e+00> : vector<64x8xf32>
    %62 = tpu.matmul %7, %61, %cst_39 {dimension_numbers = #tpu.dot_dimension_numbers<[1], [0], [0], [1], [0, 0, 1, 1], [], []>} : vector<64x8xbf16>, vector<8x8xbf16>, vector<64x8xf32> -> vector<64x8xf32>
    %cst_40 = arith.constant 0.000000e+00 : f32
    %63 = vector.broadcast %cst_40 : f32 to vector<9x8xf32>
    %64 = vector.extract_strided_slice %62 {offsets = [9, 0], sizes = [55, 8], strides = [1, 1]} : vector<64x8xf32> to vector<55x8xf32>
    %65 = tpu.concatenate %64, %63 in 0 : vector<55x8xf32>, vector<9x8xf32> -> vector<64x8xf32>
    %66 = arith.addf %59, %65 : vector<64x8xf32>
    %c0_41 = arith.constant 0 : index
    %c0_42 = arith.constant 0 : index
    %67 = vector.load %arg5[%c0_41, %c0_42] : memref<1x8xf32, #tpu.memory_space<vmem>>, vector<1x8xf32>
    %68 = vector.broadcast %67 : vector<1x8xf32> to vector<64x8xf32>
    %69 = arith.mulf %66, %68 : vector<64x8xf32>
    %c0_43 = arith.constant 0 : index
    %c0_44 = arith.constant 0 : index
    %70 = vector.load %arg6[%c0_43, %c0_44] : memref<1x8xf32, #tpu.memory_space<vmem>>, vector<1x8xf32>
    %71 = vector.broadcast %70 : vector<1x8xf32> to vector<64x8xf32>
    %72 = arith.addf %69, %71 : vector<64x8xf32>
    %cst_45 = arith.constant 0.000000e+00 : f32
    %73 = vector.broadcast %cst_45 : f32 to vector<64x8xf32>
    %74 = arith.maximumf %72, %73 : vector<64x8xf32>
    %75 = arith.truncf %74 : vector<64x8xf32> to vector<64x8xbf16>
    %76 = vector.broadcast %2 : vector<64x1xbf16> to vector<64x8xbf16>
    %77 = arith.mulf %75, %76 : vector<64x8xbf16>
    %78 = vector.broadcast %3 : vector<64x1xbf16> to vector<64x8xbf16>
    %79 = arith.mulf %75, %78 : vector<64x8xbf16>
    %c0_46 = arith.constant 0 : index
    %c0_47 = arith.constant 0 : index
    %c0_48 = arith.constant 0 : index
    %80 = vector.load %arg7[%c0_46, %c0_47, %c0_48] : memref<9x8x8xbf16, #tpu.memory_space<vmem>>, vector<1x8x8xbf16>
    %81 = vector.shape_cast %80 : vector<1x8x8xbf16> to vector<8x8xbf16>
    %cst_49 = arith.constant dense<0.000000e+00> : vector<64x8xf32>
    %82 = tpu.matmul %77, %81, %cst_49 {dimension_numbers = #tpu.dot_dimension_numbers<[1], [0], [0], [1], [0, 0, 1, 1], [], []>} : vector<64x8xbf16>, vector<8x8xbf16>, vector<64x8xf32> -> vector<64x8xf32>
    %cst_50 = arith.constant 0.000000e+00 : f32
    %83 = vector.broadcast %cst_50 : f32 to vector<9x8xf32>
    %84 = vector.extract_strided_slice %82 {offsets = [0, 0], sizes = [55, 8], strides = [1, 1]} : vector<64x8xf32> to vector<55x8xf32>
    %85 = tpu.concatenate %83, %84 in 0 : vector<9x8xf32>, vector<55x8xf32> -> vector<64x8xf32>
    %c1_51 = arith.constant 1 : index
    %c0_52 = arith.constant 0 : index
    %c0_53 = arith.constant 0 : index
    %86 = vector.load %arg7[%c1_51, %c0_52, %c0_53] : memref<9x8x8xbf16, #tpu.memory_space<vmem>>, vector<1x8x8xbf16>
    %87 = vector.shape_cast %86 : vector<1x8x8xbf16> to vector<8x8xbf16>
    %cst_54 = arith.constant dense<0.000000e+00> : vector<64x8xf32>
    %88 = tpu.matmul %75, %87, %cst_54 {dimension_numbers = #tpu.dot_dimension_numbers<[1], [0], [0], [1], [0, 0, 1, 1], [], []>} : vector<64x8xbf16>, vector<8x8xbf16>, vector<64x8xf32> -> vector<64x8xf32>
    %cst_55 = arith.constant 0.000000e+00 : f32
    %89 = vector.broadcast %cst_55 : f32 to vector<8x8xf32>
    %90 = vector.extract_strided_slice %88 {offsets = [0, 0], sizes = [56, 8], strides = [1, 1]} : vector<64x8xf32> to vector<56x8xf32>
    %91 = tpu.concatenate %89, %90 in 0 : vector<8x8xf32>, vector<56x8xf32> -> vector<64x8xf32>
    %92 = arith.addf %85, %91 : vector<64x8xf32>
    %c2_56 = arith.constant 2 : index
    %c0_57 = arith.constant 0 : index
    %c0_58 = arith.constant 0 : index
    %93 = vector.load %arg7[%c2_56, %c0_57, %c0_58] : memref<9x8x8xbf16, #tpu.memory_space<vmem>>, vector<1x8x8xbf16>
    %94 = vector.shape_cast %93 : vector<1x8x8xbf16> to vector<8x8xbf16>
    %cst_59 = arith.constant dense<0.000000e+00> : vector<64x8xf32>
    %95 = tpu.matmul %79, %94, %cst_59 {dimension_numbers = #tpu.dot_dimension_numbers<[1], [0], [0], [1], [0, 0, 1, 1], [], []>} : vector<64x8xbf16>, vector<8x8xbf16>, vector<64x8xf32> -> vector<64x8xf32>
    %cst_60 = arith.constant 0.000000e+00 : f32
    %96 = vector.broadcast %cst_60 : f32 to vector<7x8xf32>
    %97 = vector.extract_strided_slice %95 {offsets = [0, 0], sizes = [57, 8], strides = [1, 1]} : vector<64x8xf32> to vector<57x8xf32>
    %98 = tpu.concatenate %96, %97 in 0 : vector<7x8xf32>, vector<57x8xf32> -> vector<64x8xf32>
    %99 = arith.addf %92, %98 : vector<64x8xf32>
    %c3_61 = arith.constant 3 : index
    %c0_62 = arith.constant 0 : index
    %c0_63 = arith.constant 0 : index
    %100 = vector.load %arg7[%c3_61, %c0_62, %c0_63] : memref<9x8x8xbf16, #tpu.memory_space<vmem>>, vector<1x8x8xbf16>
    %101 = vector.shape_cast %100 : vector<1x8x8xbf16> to vector<8x8xbf16>
    %cst_64 = arith.constant dense<0.000000e+00> : vector<64x8xf32>
    %102 = tpu.matmul %77, %101, %cst_64 {dimension_numbers = #tpu.dot_dimension_numbers<[1], [0], [0], [1], [0, 0, 1, 1], [], []>} : vector<64x8xbf16>, vector<8x8xbf16>, vector<64x8xf32> -> vector<64x8xf32>
    %cst_65 = arith.constant 0.000000e+00 : f32
    %103 = vector.broadcast %cst_65 : f32 to vector<1x8xf32>
    %104 = vector.extract_strided_slice %102 {offsets = [0, 0], sizes = [63, 8], strides = [1, 1]} : vector<64x8xf32> to vector<63x8xf32>
    %105 = tpu.concatenate %103, %104 in 0 : vector<1x8xf32>, vector<63x8xf32> -> vector<64x8xf32>
    %106 = arith.addf %99, %105 : vector<64x8xf32>
    %c4_66 = arith.constant 4 : index
    %c0_67 = arith.constant 0 : index
    %c0_68 = arith.constant 0 : index
    %107 = vector.load %arg7[%c4_66, %c0_67, %c0_68] : memref<9x8x8xbf16, #tpu.memory_space<vmem>>, vector<1x8x8xbf16>
    %108 = vector.shape_cast %107 : vector<1x8x8xbf16> to vector<8x8xbf16>
    %cst_69 = arith.constant dense<0.000000e+00> : vector<64x8xf32>
    %109 = tpu.matmul %75, %108, %cst_69 {dimension_numbers = #tpu.dot_dimension_numbers<[1], [0], [0], [1], [0, 0, 1, 1], [], []>} : vector<64x8xbf16>, vector<8x8xbf16>, vector<64x8xf32> -> vector<64x8xf32>
    %110 = arith.addf %106, %109 : vector<64x8xf32>
    %c5_70 = arith.constant 5 : index
    %c0_71 = arith.constant 0 : index
    %c0_72 = arith.constant 0 : index
    %111 = vector.load %arg7[%c5_70, %c0_71, %c0_72] : memref<9x8x8xbf16, #tpu.memory_space<vmem>>, vector<1x8x8xbf16>
    %112 = vector.shape_cast %111 : vector<1x8x8xbf16> to vector<8x8xbf16>
    %cst_73 = arith.constant dense<0.000000e+00> : vector<64x8xf32>
    %113 = tpu.matmul %79, %112, %cst_73 {dimension_numbers = #tpu.dot_dimension_numbers<[1], [0], [0], [1], [0, 0, 1, 1], [], []>} : vector<64x8xbf16>, vector<8x8xbf16>, vector<64x8xf32> -> vector<64x8xf32>
    %cst_74 = arith.constant 0.000000e+00 : f32
    %114 = vector.broadcast %cst_74 : f32 to vector<1x8xf32>
    %115 = vector.extract_strided_slice %113 {offsets = [1, 0], sizes = [63, 8], strides = [1, 1]} : vector<64x8xf32> to vector<63x8xf32>
    %116 = tpu.concatenate %115, %114 in 0 : vector<63x8xf32>, vector<1x8xf32> -> vector<64x8xf32>
    %117 = arith.addf %110, %116 : vector<64x8xf32>
    %c6_75 = arith.constant 6 : index
    %c0_76 = arith.constant 0 : index
    %c0_77 = arith.constant 0 : index
    %118 = vector.load %arg7[%c6_75, %c0_76, %c0_77] : memref<9x8x8xbf16, #tpu.memory_space<vmem>>, vector<1x8x8xbf16>
    %119 = vector.shape_cast %118 : vector<1x8x8xbf16> to vector<8x8xbf16>
    %cst_78 = arith.constant dense<0.000000e+00> : vector<64x8xf32>
    %120 = tpu.matmul %77, %119, %cst_78 {dimension_numbers = #tpu.dot_dimension_numbers<[1], [0], [0], [1], [0, 0, 1, 1], [], []>} : vector<64x8xbf16>, vector<8x8xbf16>, vector<64x8xf32> -> vector<64x8xf32>
    %cst_79 = arith.constant 0.000000e+00 : f32
    %121 = vector.broadcast %cst_79 : f32 to vector<7x8xf32>
    %122 = vector.extract_strided_slice %120 {offsets = [7, 0], sizes = [57, 8], strides = [1, 1]} : vector<64x8xf32> to vector<57x8xf32>
    %123 = tpu.concatenate %122, %121 in 0 : vector<57x8xf32>, vector<7x8xf32> -> vector<64x8xf32>
    %124 = arith.addf %117, %123 : vector<64x8xf32>
    %c7_80 = arith.constant 7 : index
    %c0_81 = arith.constant 0 : index
    %c0_82 = arith.constant 0 : index
    %125 = vector.load %arg7[%c7_80, %c0_81, %c0_82] : memref<9x8x8xbf16, #tpu.memory_space<vmem>>, vector<1x8x8xbf16>
    %126 = vector.shape_cast %125 : vector<1x8x8xbf16> to vector<8x8xbf16>
    %cst_83 = arith.constant dense<0.000000e+00> : vector<64x8xf32>
    %127 = tpu.matmul %75, %126, %cst_83 {dimension_numbers = #tpu.dot_dimension_numbers<[1], [0], [0], [1], [0, 0, 1, 1], [], []>} : vector<64x8xbf16>, vector<8x8xbf16>, vector<64x8xf32> -> vector<64x8xf32>
    %cst_84 = arith.constant 0.000000e+00 : f32
    %128 = vector.broadcast %cst_84 : f32 to vector<8x8xf32>
    %129 = vector.extract_strided_slice %127 {offsets = [8, 0], sizes = [56, 8], strides = [1, 1]} : vector<64x8xf32> to vector<56x8xf32>
    %130 = tpu.concatenate %129, %128 in 0 : vector<56x8xf32>, vector<8x8xf32> -> vector<64x8xf32>
    %131 = arith.addf %124, %130 : vector<64x8xf32>
    %c8_85 = arith.constant 8 : index
    %c0_86 = arith.constant 0 : index
    %c0_87 = arith.constant 0 : index
    %132 = vector.load %arg7[%c8_85, %c0_86, %c0_87] : memref<9x8x8xbf16, #tpu.memory_space<vmem>>, vector<1x8x8xbf16>
    %133 = vector.shape_cast %132 : vector<1x8x8xbf16> to vector<8x8xbf16>
    %cst_88 = arith.constant dense<0.000000e+00> : vector<64x8xf32>
    %134 = tpu.matmul %79, %133, %cst_88 {dimension_numbers = #tpu.dot_dimension_numbers<[1], [0], [0], [1], [0, 0, 1, 1], [], []>} : vector<64x8xbf16>, vector<8x8xbf16>, vector<64x8xf32> -> vector<64x8xf32>
    %cst_89 = arith.constant 0.000000e+00 : f32
    %135 = vector.broadcast %cst_89 : f32 to vector<9x8xf32>
    %136 = vector.extract_strided_slice %134 {offsets = [9, 0], sizes = [55, 8], strides = [1, 1]} : vector<64x8xf32> to vector<55x8xf32>
    %137 = tpu.concatenate %136, %135 in 0 : vector<55x8xf32>, vector<9x8xf32> -> vector<64x8xf32>
    %138 = arith.addf %131, %137 : vector<64x8xf32>
    %c0_90 = arith.constant 0 : index
    %c0_91 = arith.constant 0 : index
    %139 = vector.load %arg8[%c0_90, %c0_91] : memref<1x8xf32, #tpu.memory_space<vmem>>, vector<1x8xf32>
    %140 = vector.broadcast %139 : vector<1x8xf32> to vector<64x8xf32>
    %141 = arith.mulf %138, %140 : vector<64x8xf32>
    %c0_92 = arith.constant 0 : index
    %c0_93 = arith.constant 0 : index
    %142 = vector.load %arg9[%c0_92, %c0_93] : memref<1x8xf32, #tpu.memory_space<vmem>>, vector<1x8xf32>
    %143 = vector.broadcast %142 : vector<1x8xf32> to vector<64x8xf32>
    %144 = arith.addf %141, %143 : vector<64x8xf32>
    %145 = arith.extf %1 : vector<64x8xbf16> to vector<64x8xf32>
    %146 = arith.addf %144, %145 : vector<64x8xf32>
    %cst_94 = arith.constant 0.000000e+00 : f32
    %147 = vector.broadcast %cst_94 : f32 to vector<64x8xf32>
    %148 = arith.maximumf %146, %147 : vector<64x8xf32>
    %149 = arith.truncf %148 : vector<64x8xf32> to vector<64x8xbf16>
    %c0_95 = arith.constant 0 : index
    %c0_96 = arith.constant 0 : index
    %c0_97 = arith.constant 0 : index
    %150 = vector.load %arg10[%c0_95, %c0_96, %c0_97] : memref<1x64x8xbf16, #tpu.memory_space<vmem>>, vector<1x64x8xbf16>
    %151 = vector.shape_cast %150 : vector<1x64x8xbf16> to vector<64x8xbf16>
    %152 = vector.shape_cast %149 : vector<64x8xbf16> to vector<1x64x8xbf16>
    tpu.vector_store %arg10[%c0_95, %c0_96, %c0_97], %152 {strides = array<i32>} : memref<1x64x8xbf16, #tpu.memory_space<vmem>>, vector<1x64x8xbf16>,
    return
  }
  func.func @transform_0(%arg0: i32) -> (i32, i32, i32) {
    %c0_i32 = arith.constant 0 : i32
    %c0_i32_0 = arith.constant 0 : i32
    %c0_i32_1 = arith.constant 0 : i32
    return %arg0, %c0_i32, %c0_i32_0 : i32, i32, i32
  }
  func.func @transform_1(%arg0: i32) -> (i32, i32) {
    %c0_i32 = arith.constant 0 : i32
    %c0_i32_0 = arith.constant 0 : i32
    %c0_i32_1 = arith.constant 0 : i32
    return %c0_i32, %c0_i32_0 : i32, i32
  }
  func.func @transform_2(%arg0: i32) -> (i32, i32) {
    %c0_i32 = arith.constant 0 : i32
    %c0_i32_0 = arith.constant 0 : i32
    %c0_i32_1 = arith.constant 0 : i32
    return %c0_i32, %c0_i32_0 : i32, i32
  }
  func.func @transform_3(%arg0: i32) -> (i32, i32, i32) {
    %c0_i32 = arith.constant 0 : i32
    %c0_i32_0 = arith.constant 0 : i32
    %c0_i32_1 = arith.constant 0 : i32
    %c0_i32_2 = arith.constant 0 : i32
    return %c0_i32, %c0_i32_0, %c0_i32_1 : i32, i32, i32
  }
  func.func @transform_4(%arg0: i32) -> (i32, i32) {
    %c0_i32 = arith.constant 0 : i32
    %c0_i32_0 = arith.constant 0 : i32
    %c0_i32_1 = arith.constant 0 : i32
    return %c0_i32, %c0_i32_0 : i32, i32
  }
  func.func @transform_5(%arg0: i32) -> (i32, i32) {
    %c0_i32 = arith.constant 0 : i32
    %c0_i32_0 = arith.constant 0 : i32
    %c0_i32_1 = arith.constant 0 : i32
    return %c0_i32, %c0_i32_0 : i32, i32
  }
  func.func @transform_6(%arg0: i32) -> (i32, i32, i32) {
    %c0_i32 = arith.constant 0 : i32
    %c0_i32_0 = arith.constant 0 : i32
    %c0_i32_1 = arith.constant 0 : i32
    %c0_i32_2 = arith.constant 0 : i32
    return %c0_i32, %c0_i32_0, %c0_i32_1 : i32, i32, i32
  }
  func.func @transform_7(%arg0: i32) -> (i32, i32) {
    %c0_i32 = arith.constant 0 : i32
    %c0_i32_0 = arith.constant 0 : i32
    %c0_i32_1 = arith.constant 0 : i32
    return %c0_i32, %c0_i32_0 : i32, i32
  }
  func.func @transform_8(%arg0: i32) -> (i32, i32) {
    %c0_i32 = arith.constant 0 : i32
    %c0_i32_0 = arith.constant 0 : i32
    %c0_i32_1 = arith.constant 0 : i32
    return %c0_i32, %c0_i32_0 : i32, i32
  }
  func.func @transform_9(%arg0: i32) -> (i32, i32, i32) {
    %c0_i32 = arith.constant 0 : i32
    %c0_i32_0 = arith.constant 0 : i32
    %c0_i32_1 = arith.constant 0 : i32
    return %arg0, %c0_i32, %c0_i32_0 : i32, i32, i32
  }
}

module attributes {stable_mosaic.version = 11 : i64} {
  func.func @_identity_block_kernel(%arg0: i32, %arg1: memref<1x16x16xbf16, #tpu.memory_space<vmem>>, %arg2: memref<16x1xbf16, #tpu.memory_space<vmem>>, %arg3: memref<16x1xbf16, #tpu.memory_space<vmem>>, %arg4: memref<9x16x16xbf16, #tpu.memory_space<vmem>>, %arg5: memref<1x16xf32, #tpu.memory_space<vmem>>, %arg6: memref<1x16xf32, #tpu.memory_space<vmem>>, %arg7: memref<9x16x16xbf16, #tpu.memory_space<vmem>>, %arg8: memref<1x16xf32, #tpu.memory_space<vmem>>, %arg9: memref<1x16xf32, #tpu.memory_space<vmem>>, %arg10: memref<1x16x16xbf16, #tpu.memory_space<vmem>>) attributes {dimension_semantics = [#tpu.dimension_semantics<parallel>], iteration_bounds = array<i64: 2>, scalar_prefetch = 0 : i64, scratch_operands = 0 : i64, tpu.core_type = #tpu.core_type<tc>, window_params = [{transform_indices = @transform_0, window_bounds = array<i64: 1, 16, 16>}, {pipeline_mode = #tpu.pipeline_mode<synchronous>, transform_indices = @transform_1, window_bounds = array<i64: 16, 1>}, {pipeline_mode = #tpu.pipeline_mode<synchronous>, transform_indices = @transform_2, window_bounds = array<i64: 16, 1>}, {pipeline_mode = #tpu.pipeline_mode<synchronous>, transform_indices = @transform_3, window_bounds = array<i64: 9, 16, 16>}, {pipeline_mode = #tpu.pipeline_mode<synchronous>, transform_indices = @transform_4, window_bounds = array<i64: 1, 16>}, {pipeline_mode = #tpu.pipeline_mode<synchronous>, transform_indices = @transform_5, window_bounds = array<i64: 1, 16>}, {pipeline_mode = #tpu.pipeline_mode<synchronous>, transform_indices = @transform_6, window_bounds = array<i64: 9, 16, 16>}, {pipeline_mode = #tpu.pipeline_mode<synchronous>, transform_indices = @transform_7, window_bounds = array<i64: 1, 16>}, {pipeline_mode = #tpu.pipeline_mode<synchronous>, transform_indices = @transform_8, window_bounds = array<i64: 1, 16>}, {transform_indices = @transform_9, window_bounds = array<i64: 1, 16, 16>}]} {
    %c0 = arith.constant 0 : index
    %c0_0 = arith.constant 0 : index
    %c0_1 = arith.constant 0 : index
    %0 = vector.load %arg1[%c0, %c0_0, %c0_1] : memref<1x16x16xbf16, #tpu.memory_space<vmem>>, vector<1x16x16xbf16>
    %1 = vector.shape_cast %0 : vector<1x16x16xbf16> to vector<16x16xbf16>
    %c0_2 = arith.constant 0 : index
    %c0_3 = arith.constant 0 : index
    %2 = vector.load %arg2[%c0_2, %c0_3] : memref<16x1xbf16, #tpu.memory_space<vmem>>, vector<16x1xbf16>
    %c0_4 = arith.constant 0 : index
    %c0_5 = arith.constant 0 : index
    %3 = vector.load %arg3[%c0_4, %c0_5] : memref<16x1xbf16, #tpu.memory_space<vmem>>, vector<16x1xbf16>
    %4 = vector.broadcast %2 : vector<16x1xbf16> to vector<16x16xbf16>
    %5 = arith.mulf %1, %4 : vector<16x16xbf16>
    %6 = vector.broadcast %3 : vector<16x1xbf16> to vector<16x16xbf16>
    %7 = arith.mulf %1, %6 : vector<16x16xbf16>
    %c0_6 = arith.constant 0 : index
    %c0_7 = arith.constant 0 : index
    %c0_8 = arith.constant 0 : index
    %8 = vector.load %arg4[%c0_6, %c0_7, %c0_8] : memref<9x16x16xbf16, #tpu.memory_space<vmem>>, vector<1x16x16xbf16>
    %9 = vector.shape_cast %8 : vector<1x16x16xbf16> to vector<16x16xbf16>
    %cst = arith.constant dense<0.000000e+00> : vector<16x16xf32>
    %10 = tpu.matmul %5, %9, %cst {dimension_numbers = #tpu.dot_dimension_numbers<[1], [0], [0], [1], [0, 0, 1, 1], [], []>} : vector<16x16xbf16>, vector<16x16xbf16>, vector<16x16xf32> -> vector<16x16xf32>
    %cst_9 = arith.constant 0.000000e+00 : f32
    %11 = vector.broadcast %cst_9 : f32 to vector<5x16xf32>
    %12 = vector.extract_strided_slice %10 {offsets = [0, 0], sizes = [11, 16], strides = [1, 1]} : vector<16x16xf32> to vector<11x16xf32>
    %13 = tpu.concatenate %11, %12 in 0 : vector<5x16xf32>, vector<11x16xf32> -> vector<16x16xf32>
    %c1 = arith.constant 1 : index
    %c0_10 = arith.constant 0 : index
    %c0_11 = arith.constant 0 : index
    %14 = vector.load %arg4[%c1, %c0_10, %c0_11] : memref<9x16x16xbf16, #tpu.memory_space<vmem>>, vector<1x16x16xbf16>
    %15 = vector.shape_cast %14 : vector<1x16x16xbf16> to vector<16x16xbf16>
    %cst_12 = arith.constant dense<0.000000e+00> : vector<16x16xf32>
    %16 = tpu.matmul %1, %15, %cst_12 {dimension_numbers = #tpu.dot_dimension_numbers<[1], [0], [0], [1], [0, 0, 1, 1], [], []>} : vector<16x16xbf16>, vector<16x16xbf16>, vector<16x16xf32> -> vector<16x16xf32>
    %cst_13 = arith.constant 0.000000e+00 : f32
    %17 = vector.broadcast %cst_13 : f32 to vector<4x16xf32>
    %18 = vector.extract_strided_slice %16 {offsets = [0, 0], sizes = [12, 16], strides = [1, 1]} : vector<16x16xf32> to vector<12x16xf32>
    %19 = tpu.concatenate %17, %18 in 0 : vector<4x16xf32>, vector<12x16xf32> -> vector<16x16xf32>
    %20 = arith.addf %13, %19 : vector<16x16xf32>
    %c2 = arith.constant 2 : index
    %c0_14 = arith.constant 0 : index
    %c0_15 = arith.constant 0 : index
    %21 = vector.load %arg4[%c2, %c0_14, %c0_15] : memref<9x16x16xbf16, #tpu.memory_space<vmem>>, vector<1x16x16xbf16>
    %22 = vector.shape_cast %21 : vector<1x16x16xbf16> to vector<16x16xbf16>
    %cst_16 = arith.constant dense<0.000000e+00> : vector<16x16xf32>
    %23 = tpu.matmul %7, %22, %cst_16 {dimension_numbers = #tpu.dot_dimension_numbers<[1], [0], [0], [1], [0, 0, 1, 1], [], []>} : vector<16x16xbf16>, vector<16x16xbf16>, vector<16x16xf32> -> vector<16x16xf32>
    %cst_17 = arith.constant 0.000000e+00 : f32
    %24 = vector.broadcast %cst_17 : f32 to vector<3x16xf32>
    %25 = vector.extract_strided_slice %23 {offsets = [0, 0], sizes = [13, 16], strides = [1, 1]} : vector<16x16xf32> to vector<13x16xf32>
    %26 = tpu.concatenate %24, %25 in 0 : vector<3x16xf32>, vector<13x16xf32> -> vector<16x16xf32>
    %27 = arith.addf %20, %26 : vector<16x16xf32>
    %c3 = arith.constant 3 : index
    %c0_18 = arith.constant 0 : index
    %c0_19 = arith.constant 0 : index
    %28 = vector.load %arg4[%c3, %c0_18, %c0_19] : memref<9x16x16xbf16, #tpu.memory_space<vmem>>, vector<1x16x16xbf16>
    %29 = vector.shape_cast %28 : vector<1x16x16xbf16> to vector<16x16xbf16>
    %cst_20 = arith.constant dense<0.000000e+00> : vector<16x16xf32>
    %30 = tpu.matmul %5, %29, %cst_20 {dimension_numbers = #tpu.dot_dimension_numbers<[1], [0], [0], [1], [0, 0, 1, 1], [], []>} : vector<16x16xbf16>, vector<16x16xbf16>, vector<16x16xf32> -> vector<16x16xf32>
    %cst_21 = arith.constant 0.000000e+00 : f32
    %31 = vector.broadcast %cst_21 : f32 to vector<1x16xf32>
    %32 = vector.extract_strided_slice %30 {offsets = [0, 0], sizes = [15, 16], strides = [1, 1]} : vector<16x16xf32> to vector<15x16xf32>
    %33 = tpu.concatenate %31, %32 in 0 : vector<1x16xf32>, vector<15x16xf32> -> vector<16x16xf32>
    %34 = arith.addf %27, %33 : vector<16x16xf32>
    %c4 = arith.constant 4 : index
    %c0_22 = arith.constant 0 : index
    %c0_23 = arith.constant 0 : index
    %35 = vector.load %arg4[%c4, %c0_22, %c0_23] : memref<9x16x16xbf16, #tpu.memory_space<vmem>>, vector<1x16x16xbf16>
    %36 = vector.shape_cast %35 : vector<1x16x16xbf16> to vector<16x16xbf16>
    %cst_24 = arith.constant dense<0.000000e+00> : vector<16x16xf32>
    %37 = tpu.matmul %1, %36, %cst_24 {dimension_numbers = #tpu.dot_dimension_numbers<[1], [0], [0], [1], [0, 0, 1, 1], [], []>} : vector<16x16xbf16>, vector<16x16xbf16>, vector<16x16xf32> -> vector<16x16xf32>
    %38 = arith.addf %34, %37 : vector<16x16xf32>
    %c5 = arith.constant 5 : index
    %c0_25 = arith.constant 0 : index
    %c0_26 = arith.constant 0 : index
    %39 = vector.load %arg4[%c5, %c0_25, %c0_26] : memref<9x16x16xbf16, #tpu.memory_space<vmem>>, vector<1x16x16xbf16>
    %40 = vector.shape_cast %39 : vector<1x16x16xbf16> to vector<16x16xbf16>
    %cst_27 = arith.constant dense<0.000000e+00> : vector<16x16xf32>
    %41 = tpu.matmul %7, %40, %cst_27 {dimension_numbers = #tpu.dot_dimension_numbers<[1], [0], [0], [1], [0, 0, 1, 1], [], []>} : vector<16x16xbf16>, vector<16x16xbf16>, vector<16x16xf32> -> vector<16x16xf32>
    %cst_28 = arith.constant 0.000000e+00 : f32
    %42 = vector.broadcast %cst_28 : f32 to vector<1x16xf32>
    %43 = vector.extract_strided_slice %41 {offsets = [1, 0], sizes = [15, 16], strides = [1, 1]} : vector<16x16xf32> to vector<15x16xf32>
    %44 = tpu.concatenate %43, %42 in 0 : vector<15x16xf32>, vector<1x16xf32> -> vector<16x16xf32>
    %45 = arith.addf %38, %44 : vector<16x16xf32>
    %c6 = arith.constant 6 : index
    %c0_29 = arith.constant 0 : index
    %c0_30 = arith.constant 0 : index
    %46 = vector.load %arg4[%c6, %c0_29, %c0_30] : memref<9x16x16xbf16, #tpu.memory_space<vmem>>, vector<1x16x16xbf16>
    %47 = vector.shape_cast %46 : vector<1x16x16xbf16> to vector<16x16xbf16>
    %cst_31 = arith.constant dense<0.000000e+00> : vector<16x16xf32>
    %48 = tpu.matmul %5, %47, %cst_31 {dimension_numbers = #tpu.dot_dimension_numbers<[1], [0], [0], [1], [0, 0, 1, 1], [], []>} : vector<16x16xbf16>, vector<16x16xbf16>, vector<16x16xf32> -> vector<16x16xf32>
    %cst_32 = arith.constant 0.000000e+00 : f32
    %49 = vector.broadcast %cst_32 : f32 to vector<3x16xf32>
    %50 = vector.extract_strided_slice %48 {offsets = [3, 0], sizes = [13, 16], strides = [1, 1]} : vector<16x16xf32> to vector<13x16xf32>
    %51 = tpu.concatenate %50, %49 in 0 : vector<13x16xf32>, vector<3x16xf32> -> vector<16x16xf32>
    %52 = arith.addf %45, %51 : vector<16x16xf32>
    %c7 = arith.constant 7 : index
    %c0_33 = arith.constant 0 : index
    %c0_34 = arith.constant 0 : index
    %53 = vector.load %arg4[%c7, %c0_33, %c0_34] : memref<9x16x16xbf16, #tpu.memory_space<vmem>>, vector<1x16x16xbf16>
    %54 = vector.shape_cast %53 : vector<1x16x16xbf16> to vector<16x16xbf16>
    %cst_35 = arith.constant dense<0.000000e+00> : vector<16x16xf32>
    %55 = tpu.matmul %1, %54, %cst_35 {dimension_numbers = #tpu.dot_dimension_numbers<[1], [0], [0], [1], [0, 0, 1, 1], [], []>} : vector<16x16xbf16>, vector<16x16xbf16>, vector<16x16xf32> -> vector<16x16xf32>
    %cst_36 = arith.constant 0.000000e+00 : f32
    %56 = vector.broadcast %cst_36 : f32 to vector<4x16xf32>
    %57 = vector.extract_strided_slice %55 {offsets = [4, 0], sizes = [12, 16], strides = [1, 1]} : vector<16x16xf32> to vector<12x16xf32>
    %58 = tpu.concatenate %57, %56 in 0 : vector<12x16xf32>, vector<4x16xf32> -> vector<16x16xf32>
    %59 = arith.addf %52, %58 : vector<16x16xf32>
    %c8 = arith.constant 8 : index
    %c0_37 = arith.constant 0 : index
    %c0_38 = arith.constant 0 : index
    %60 = vector.load %arg4[%c8, %c0_37, %c0_38] : memref<9x16x16xbf16, #tpu.memory_space<vmem>>, vector<1x16x16xbf16>
    %61 = vector.shape_cast %60 : vector<1x16x16xbf16> to vector<16x16xbf16>
    %cst_39 = arith.constant dense<0.000000e+00> : vector<16x16xf32>
    %62 = tpu.matmul %7, %61, %cst_39 {dimension_numbers = #tpu.dot_dimension_numbers<[1], [0], [0], [1], [0, 0, 1, 1], [], []>} : vector<16x16xbf16>, vector<16x16xbf16>, vector<16x16xf32> -> vector<16x16xf32>
    %cst_40 = arith.constant 0.000000e+00 : f32
    %63 = vector.broadcast %cst_40 : f32 to vector<5x16xf32>
    %64 = vector.extract_strided_slice %62 {offsets = [5, 0], sizes = [11, 16], strides = [1, 1]} : vector<16x16xf32> to vector<11x16xf32>
    %65 = tpu.concatenate %64, %63 in 0 : vector<11x16xf32>, vector<5x16xf32> -> vector<16x16xf32>
    %66 = arith.addf %59, %65 : vector<16x16xf32>
    %c0_41 = arith.constant 0 : index
    %c0_42 = arith.constant 0 : index
    %67 = vector.load %arg5[%c0_41, %c0_42] : memref<1x16xf32, #tpu.memory_space<vmem>>, vector<1x16xf32>
    %68 = vector.broadcast %67 : vector<1x16xf32> to vector<16x16xf32>
    %69 = arith.mulf %66, %68 : vector<16x16xf32>
    %c0_43 = arith.constant 0 : index
    %c0_44 = arith.constant 0 : index
    %70 = vector.load %arg6[%c0_43, %c0_44] : memref<1x16xf32, #tpu.memory_space<vmem>>, vector<1x16xf32>
    %71 = vector.broadcast %70 : vector<1x16xf32> to vector<16x16xf32>
    %72 = arith.addf %69, %71 : vector<16x16xf32>
    %cst_45 = arith.constant 0.000000e+00 : f32
    %73 = vector.broadcast %cst_45 : f32 to vector<16x16xf32>
    %74 = arith.maximumf %72, %73 : vector<16x16xf32>
    %75 = arith.truncf %74 : vector<16x16xf32> to vector<16x16xbf16>
    %76 = vector.broadcast %2 : vector<16x1xbf16> to vector<16x16xbf16>
    %77 = arith.mulf %75, %76 : vector<16x16xbf16>
    %78 = vector.broadcast %3 : vector<16x1xbf16> to vector<16x16xbf16>
    %79 = arith.mulf %75, %78 : vector<16x16xbf16>
    %c0_46 = arith.constant 0 : index
    %c0_47 = arith.constant 0 : index
    %c0_48 = arith.constant 0 : index
    %80 = vector.load %arg7[%c0_46, %c0_47, %c0_48] : memref<9x16x16xbf16, #tpu.memory_space<vmem>>, vector<1x16x16xbf16>
    %81 = vector.shape_cast %80 : vector<1x16x16xbf16> to vector<16x16xbf16>
    %cst_49 = arith.constant dense<0.000000e+00> : vector<16x16xf32>
    %82 = tpu.matmul %77, %81, %cst_49 {dimension_numbers = #tpu.dot_dimension_numbers<[1], [0], [0], [1], [0, 0, 1, 1], [], []>} : vector<16x16xbf16>, vector<16x16xbf16>, vector<16x16xf32> -> vector<16x16xf32>
    %cst_50 = arith.constant 0.000000e+00 : f32
    %83 = vector.broadcast %cst_50 : f32 to vector<5x16xf32>
    %84 = vector.extract_strided_slice %82 {offsets = [0, 0], sizes = [11, 16], strides = [1, 1]} : vector<16x16xf32> to vector<11x16xf32>
    %85 = tpu.concatenate %83, %84 in 0 : vector<5x16xf32>, vector<11x16xf32> -> vector<16x16xf32>
    %c1_51 = arith.constant 1 : index
    %c0_52 = arith.constant 0 : index
    %c0_53 = arith.constant 0 : index
    %86 = vector.load %arg7[%c1_51, %c0_52, %c0_53] : memref<9x16x16xbf16, #tpu.memory_space<vmem>>, vector<1x16x16xbf16>
    %87 = vector.shape_cast %86 : vector<1x16x16xbf16> to vector<16x16xbf16>
    %cst_54 = arith.constant dense<0.000000e+00> : vector<16x16xf32>
    %88 = tpu.matmul %75, %87, %cst_54 {dimension_numbers = #tpu.dot_dimension_numbers<[1], [0], [0], [1], [0, 0, 1, 1], [], []>} : vector<16x16xbf16>, vector<16x16xbf16>, vector<16x16xf32> -> vector<16x16xf32>
    %cst_55 = arith.constant 0.000000e+00 : f32
    %89 = vector.broadcast %cst_55 : f32 to vector<4x16xf32>
    %90 = vector.extract_strided_slice %88 {offsets = [0, 0], sizes = [12, 16], strides = [1, 1]} : vector<16x16xf32> to vector<12x16xf32>
    %91 = tpu.concatenate %89, %90 in 0 : vector<4x16xf32>, vector<12x16xf32> -> vector<16x16xf32>
    %92 = arith.addf %85, %91 : vector<16x16xf32>
    %c2_56 = arith.constant 2 : index
    %c0_57 = arith.constant 0 : index
    %c0_58 = arith.constant 0 : index
    %93 = vector.load %arg7[%c2_56, %c0_57, %c0_58] : memref<9x16x16xbf16, #tpu.memory_space<vmem>>, vector<1x16x16xbf16>
    %94 = vector.shape_cast %93 : vector<1x16x16xbf16> to vector<16x16xbf16>
    %cst_59 = arith.constant dense<0.000000e+00> : vector<16x16xf32>
    %95 = tpu.matmul %79, %94, %cst_59 {dimension_numbers = #tpu.dot_dimension_numbers<[1], [0], [0], [1], [0, 0, 1, 1], [], []>} : vector<16x16xbf16>, vector<16x16xbf16>, vector<16x16xf32> -> vector<16x16xf32>
    %cst_60 = arith.constant 0.000000e+00 : f32
    %96 = vector.broadcast %cst_60 : f32 to vector<3x16xf32>
    %97 = vector.extract_strided_slice %95 {offsets = [0, 0], sizes = [13, 16], strides = [1, 1]} : vector<16x16xf32> to vector<13x16xf32>
    %98 = tpu.concatenate %96, %97 in 0 : vector<3x16xf32>, vector<13x16xf32> -> vector<16x16xf32>
    %99 = arith.addf %92, %98 : vector<16x16xf32>
    %c3_61 = arith.constant 3 : index
    %c0_62 = arith.constant 0 : index
    %c0_63 = arith.constant 0 : index
    %100 = vector.load %arg7[%c3_61, %c0_62, %c0_63] : memref<9x16x16xbf16, #tpu.memory_space<vmem>>, vector<1x16x16xbf16>
    %101 = vector.shape_cast %100 : vector<1x16x16xbf16> to vector<16x16xbf16>
    %cst_64 = arith.constant dense<0.000000e+00> : vector<16x16xf32>
    %102 = tpu.matmul %77, %101, %cst_64 {dimension_numbers = #tpu.dot_dimension_numbers<[1], [0], [0], [1], [0, 0, 1, 1], [], []>} : vector<16x16xbf16>, vector<16x16xbf16>, vector<16x16xf32> -> vector<16x16xf32>
    %cst_65 = arith.constant 0.000000e+00 : f32
    %103 = vector.broadcast %cst_65 : f32 to vector<1x16xf32>
    %104 = vector.extract_strided_slice %102 {offsets = [0, 0], sizes = [15, 16], strides = [1, 1]} : vector<16x16xf32> to vector<15x16xf32>
    %105 = tpu.concatenate %103, %104 in 0 : vector<1x16xf32>, vector<15x16xf32> -> vector<16x16xf32>
    %106 = arith.addf %99, %105 : vector<16x16xf32>
    %c4_66 = arith.constant 4 : index
    %c0_67 = arith.constant 0 : index
    %c0_68 = arith.constant 0 : index
    %107 = vector.load %arg7[%c4_66, %c0_67, %c0_68] : memref<9x16x16xbf16, #tpu.memory_space<vmem>>, vector<1x16x16xbf16>
    %108 = vector.shape_cast %107 : vector<1x16x16xbf16> to vector<16x16xbf16>
    %cst_69 = arith.constant dense<0.000000e+00> : vector<16x16xf32>
    %109 = tpu.matmul %75, %108, %cst_69 {dimension_numbers = #tpu.dot_dimension_numbers<[1], [0], [0], [1], [0, 0, 1, 1], [], []>} : vector<16x16xbf16>, vector<16x16xbf16>, vector<16x16xf32> -> vector<16x16xf32>
    %110 = arith.addf %106, %109 : vector<16x16xf32>
    %c5_70 = arith.constant 5 : index
    %c0_71 = arith.constant 0 : index
    %c0_72 = arith.constant 0 : index
    %111 = vector.load %arg7[%c5_70, %c0_71, %c0_72] : memref<9x16x16xbf16, #tpu.memory_space<vmem>>, vector<1x16x16xbf16>
    %112 = vector.shape_cast %111 : vector<1x16x16xbf16> to vector<16x16xbf16>
    %cst_73 = arith.constant dense<0.000000e+00> : vector<16x16xf32>
    %113 = tpu.matmul %79, %112, %cst_73 {dimension_numbers = #tpu.dot_dimension_numbers<[1], [0], [0], [1], [0, 0, 1, 1], [], []>} : vector<16x16xbf16>, vector<16x16xbf16>, vector<16x16xf32> -> vector<16x16xf32>
    %cst_74 = arith.constant 0.000000e+00 : f32
    %114 = vector.broadcast %cst_74 : f32 to vector<1x16xf32>
    %115 = vector.extract_strided_slice %113 {offsets = [1, 0], sizes = [15, 16], strides = [1, 1]} : vector<16x16xf32> to vector<15x16xf32>
    %116 = tpu.concatenate %115, %114 in 0 : vector<15x16xf32>, vector<1x16xf32> -> vector<16x16xf32>
    %117 = arith.addf %110, %116 : vector<16x16xf32>
    %c6_75 = arith.constant 6 : index
    %c0_76 = arith.constant 0 : index
    %c0_77 = arith.constant 0 : index
    %118 = vector.load %arg7[%c6_75, %c0_76, %c0_77] : memref<9x16x16xbf16, #tpu.memory_space<vmem>>, vector<1x16x16xbf16>
    %119 = vector.shape_cast %118 : vector<1x16x16xbf16> to vector<16x16xbf16>
    %cst_78 = arith.constant dense<0.000000e+00> : vector<16x16xf32>
    %120 = tpu.matmul %77, %119, %cst_78 {dimension_numbers = #tpu.dot_dimension_numbers<[1], [0], [0], [1], [0, 0, 1, 1], [], []>} : vector<16x16xbf16>, vector<16x16xbf16>, vector<16x16xf32> -> vector<16x16xf32>
    %cst_79 = arith.constant 0.000000e+00 : f32
    %121 = vector.broadcast %cst_79 : f32 to vector<3x16xf32>
    %122 = vector.extract_strided_slice %120 {offsets = [3, 0], sizes = [13, 16], strides = [1, 1]} : vector<16x16xf32> to vector<13x16xf32>
    %123 = tpu.concatenate %122, %121 in 0 : vector<13x16xf32>, vector<3x16xf32> -> vector<16x16xf32>
    %124 = arith.addf %117, %123 : vector<16x16xf32>
    %c7_80 = arith.constant 7 : index
    %c0_81 = arith.constant 0 : index
    %c0_82 = arith.constant 0 : index
    %125 = vector.load %arg7[%c7_80, %c0_81, %c0_82] : memref<9x16x16xbf16, #tpu.memory_space<vmem>>, vector<1x16x16xbf16>
    %126 = vector.shape_cast %125 : vector<1x16x16xbf16> to vector<16x16xbf16>
    %cst_83 = arith.constant dense<0.000000e+00> : vector<16x16xf32>
    %127 = tpu.matmul %75, %126, %cst_83 {dimension_numbers = #tpu.dot_dimension_numbers<[1], [0], [0], [1], [0, 0, 1, 1], [], []>} : vector<16x16xbf16>, vector<16x16xbf16>, vector<16x16xf32> -> vector<16x16xf32>
    %cst_84 = arith.constant 0.000000e+00 : f32
    %128 = vector.broadcast %cst_84 : f32 to vector<4x16xf32>
    %129 = vector.extract_strided_slice %127 {offsets = [4, 0], sizes = [12, 16], strides = [1, 1]} : vector<16x16xf32> to vector<12x16xf32>
    %130 = tpu.concatenate %129, %128 in 0 : vector<12x16xf32>, vector<4x16xf32> -> vector<16x16xf32>
    %131 = arith.addf %124, %130 : vector<16x16xf32>
    %c8_85 = arith.constant 8 : index
    %c0_86 = arith.constant 0 : index
    %c0_87 = arith.constant 0 : index
    %132 = vector.load %arg7[%c8_85, %c0_86, %c0_87] : memref<9x16x16xbf16, #tpu.memory_space<vmem>>, vector<1x16x16xbf16>
    %133 = vector.shape_cast %132 : vector<1x16x16xbf16> to vector<16x16xbf16>
    %cst_88 = arith.constant dense<0.000000e+00> : vector<16x16xf32>
    %134 = tpu.matmul %79, %133, %cst_88 {dimension_numbers = #tpu.dot_dimension_numbers<[1], [0], [0], [1], [0, 0, 1, 1], [], []>} : vector<16x16xbf16>, vector<16x16xbf16>, vector<16x16xf32> -> vector<16x16xf32>
    %cst_89 = arith.constant 0.000000e+00 : f32
    %135 = vector.broadcast %cst_89 : f32 to vector<5x16xf32>
    %136 = vector.extract_strided_slice %134 {offsets = [5, 0], sizes = [11, 16], strides = [1, 1]} : vector<16x16xf32> to vector<11x16xf32>
    %137 = tpu.concatenate %136, %135 in 0 : vector<11x16xf32>, vector<5x16xf32> -> vector<16x16xf32>
    %138 = arith.addf %131, %137 : vector<16x16xf32>
    %c0_90 = arith.constant 0 : index
    %c0_91 = arith.constant 0 : index
    %139 = vector.load %arg8[%c0_90, %c0_91] : memref<1x16xf32, #tpu.memory_space<vmem>>, vector<1x16xf32>
    %140 = vector.broadcast %139 : vector<1x16xf32> to vector<16x16xf32>
    %141 = arith.mulf %138, %140 : vector<16x16xf32>
    %c0_92 = arith.constant 0 : index
    %c0_93 = arith.constant 0 : index
    %142 = vector.load %arg9[%c0_92, %c0_93] : memref<1x16xf32, #tpu.memory_space<vmem>>, vector<1x16xf32>
    %143 = vector.broadcast %142 : vector<1x16xf32> to vector<16x16xf32>
    %144 = arith.addf %141, %143 : vector<16x16xf32>
    %145 = arith.extf %1 : vector<16x16xbf16> to vector<16x16xf32>
    %146 = arith.addf %144, %145 : vector<16x16xf32>
    %cst_94 = arith.constant 0.000000e+00 : f32
    %147 = vector.broadcast %cst_94 : f32 to vector<16x16xf32>
    %148 = arith.maximumf %146, %147 : vector<16x16xf32>
    %149 = arith.truncf %148 : vector<16x16xf32> to vector<16x16xbf16>
    %c0_95 = arith.constant 0 : index
    %c0_96 = arith.constant 0 : index
    %c0_97 = arith.constant 0 : index
    %150 = vector.load %arg10[%c0_95, %c0_96, %c0_97] : memref<1x16x16xbf16, #tpu.memory_space<vmem>>, vector<1x16x16xbf16>
    %151 = vector.shape_cast %150 : vector<1x16x16xbf16> to vector<16x16xbf16>
    %152 = vector.shape_cast %149 : vector<16x16xbf16> to vector<1x16x16xbf16>
    tpu.vector_store %arg10[%c0_95, %c0_96, %c0_97], %152 {strides = array<i32>} : memref<1x16x16xbf16, #tpu.memory_space<vmem>>, vector<1x16x16xbf16>,
    return
  }
  func.func @transform_0(%arg0: i32) -> (i32, i32, i32) {
    %c0_i32 = arith.constant 0 : i32
    %c0_i32_0 = arith.constant 0 : i32
    %c0_i32_1 = arith.constant 0 : i32
    return %arg0, %c0_i32, %c0_i32_0 : i32, i32, i32
  }
  func.func @transform_1(%arg0: i32) -> (i32, i32) {
    %c0_i32 = arith.constant 0 : i32
    %c0_i32_0 = arith.constant 0 : i32
    %c0_i32_1 = arith.constant 0 : i32
    return %c0_i32, %c0_i32_0 : i32, i32
  }
  func.func @transform_2(%arg0: i32) -> (i32, i32) {
    %c0_i32 = arith.constant 0 : i32
    %c0_i32_0 = arith.constant 0 : i32
    %c0_i32_1 = arith.constant 0 : i32
    return %c0_i32, %c0_i32_0 : i32, i32
  }
  func.func @transform_3(%arg0: i32) -> (i32, i32, i32) {
    %c0_i32 = arith.constant 0 : i32
    %c0_i32_0 = arith.constant 0 : i32
    %c0_i32_1 = arith.constant 0 : i32
    %c0_i32_2 = arith.constant 0 : i32
    return %c0_i32, %c0_i32_0, %c0_i32_1 : i32, i32, i32
  }
  func.func @transform_4(%arg0: i32) -> (i32, i32) {
    %c0_i32 = arith.constant 0 : i32
    %c0_i32_0 = arith.constant 0 : i32
    %c0_i32_1 = arith.constant 0 : i32
    return %c0_i32, %c0_i32_0 : i32, i32
  }
  func.func @transform_5(%arg0: i32) -> (i32, i32) {
    %c0_i32 = arith.constant 0 : i32
    %c0_i32_0 = arith.constant 0 : i32
    %c0_i32_1 = arith.constant 0 : i32
    return %c0_i32, %c0_i32_0 : i32, i32
  }
  func.func @transform_6(%arg0: i32) -> (i32, i32, i32) {
    %c0_i32 = arith.constant 0 : i32
    %c0_i32_0 = arith.constant 0 : i32
    %c0_i32_1 = arith.constant 0 : i32
    %c0_i32_2 = arith.constant 0 : i32
    return %c0_i32, %c0_i32_0, %c0_i32_1 : i32, i32, i32
  }
  func.func @transform_7(%arg0: i32) -> (i32, i32) {
    %c0_i32 = arith.constant 0 : i32
    %c0_i32_0 = arith.constant 0 : i32
    %c0_i32_1 = arith.constant 0 : i32
    return %c0_i32, %c0_i32_0 : i32, i32
  }
  func.func @transform_8(%arg0: i32) -> (i32, i32) {
    %c0_i32 = arith.constant 0 : i32
    %c0_i32_0 = arith.constant 0 : i32
    %c0_i32_1 = arith.constant 0 : i32
    return %c0_i32, %c0_i32_0 : i32, i32
  }
  func.func @transform_9(%arg0: i32) -> (i32, i32, i32) {
    %c0_i32 = arith.constant 0 : i32
    %c0_i32_0 = arith.constant 0 : i32
    %c0_i32_1 = arith.constant 0 : i32
    return %arg0, %c0_i32, %c0_i32_0 : i32, i32, i32
  }
}

module attributes {stable_mosaic.version = 11 : i64} {
  func.func @_down_block_kernel(%arg0: i32, %arg1: memref<1x16x72xbf16, #tpu.memory_space<vmem>>, %arg2: memref<16x1xbf16, #tpu.memory_space<vmem>>, %arg3: memref<16x1xbf16, #tpu.memory_space<vmem>>, %arg4: memref<72x16xbf16, #tpu.memory_space<vmem>>, %arg5: memref<8x16xbf16, #tpu.memory_space<vmem>>, %arg6: memref<1x16xf32, #tpu.memory_space<vmem>>, %arg7: memref<1x16xf32, #tpu.memory_space<vmem>>, %arg8: memref<1x16xf32, #tpu.memory_space<vmem>>, %arg9: memref<1x16xf32, #tpu.memory_space<vmem>>, %arg10: memref<9x16x16xbf16, #tpu.memory_space<vmem>>, %arg11: memref<1x16xf32, #tpu.memory_space<vmem>>, %arg12: memref<1x16xf32, #tpu.memory_space<vmem>>, %arg13: memref<1x16x16xbf16, #tpu.memory_space<vmem>>) attributes {dimension_semantics = [#tpu.dimension_semantics<parallel>], iteration_bounds = array<i64: 2>, scalar_prefetch = 0 : i64, scratch_operands = 0 : i64, tpu.core_type = #tpu.core_type<tc>, window_params = [{transform_indices = @transform_0, window_bounds = array<i64: 1, 16, 72>}, {pipeline_mode = #tpu.pipeline_mode<synchronous>, transform_indices = @transform_1, window_bounds = array<i64: 16, 1>}, {pipeline_mode = #tpu.pipeline_mode<synchronous>, transform_indices = @transform_2, window_bounds = array<i64: 16, 1>}, {pipeline_mode = #tpu.pipeline_mode<synchronous>, transform_indices = @transform_3, window_bounds = array<i64: 72, 16>}, {pipeline_mode = #tpu.pipeline_mode<synchronous>, transform_indices = @transform_4, window_bounds = array<i64: 8, 16>}, {pipeline_mode = #tpu.pipeline_mode<synchronous>, transform_indices = @transform_5, window_bounds = array<i64: 1, 16>}, {pipeline_mode = #tpu.pipeline_mode<synchronous>, transform_indices = @transform_6, window_bounds = array<i64: 1, 16>}, {pipeline_mode = #tpu.pipeline_mode<synchronous>, transform_indices = @transform_7, window_bounds = array<i64: 1, 16>}, {pipeline_mode = #tpu.pipeline_mode<synchronous>, transform_indices = @transform_8, window_bounds = array<i64: 1, 16>}, {pipeline_mode = #tpu.pipeline_mode<synchronous>, transform_indices = @transform_9, window_bounds = array<i64: 9, 16, 16>}, {pipeline_mode = #tpu.pipeline_mode<synchronous>, transform_indices = @transform_10, window_bounds = array<i64: 1, 16>}, {pipeline_mode = #tpu.pipeline_mode<synchronous>, transform_indices = @transform_11, window_bounds = array<i64: 1, 16>}, {transform_indices = @transform_12, window_bounds = array<i64: 1, 16, 16>}]} {
    %c0 = arith.constant 0 : index
    %c0_0 = arith.constant 0 : index
    %c0_1 = arith.constant 0 : index
    %0 = vector.load %arg1[%c0, %c0_0, %c0_1] : memref<1x16x72xbf16, #tpu.memory_space<vmem>>, vector<1x16x72xbf16>
    %1 = vector.shape_cast %0 : vector<1x16x72xbf16> to vector<16x72xbf16>
    %c0_2 = arith.constant 0 : index
    %c0_3 = arith.constant 0 : index
    %2 = vector.load %arg4[%c0_2, %c0_3] : memref<72x16xbf16, #tpu.memory_space<vmem>>, vector<72x16xbf16>
    %cst = arith.constant dense<0.000000e+00> : vector<16x16xf32>
    %3 = tpu.matmul %1, %2, %cst {dimension_numbers = #tpu.dot_dimension_numbers<[1], [0], [0], [1], [0, 0, 1, 1], [], []>} : vector<16x72xbf16>, vector<72x16xbf16>, vector<16x16xf32> -> vector<16x16xf32>
    %c0_4 = arith.constant 0 : index
    %c0_5 = arith.constant 0 : index
    %4 = vector.load %arg6[%c0_4, %c0_5] : memref<1x16xf32, #tpu.memory_space<vmem>>, vector<1x16xf32>
    %5 = vector.broadcast %4 : vector<1x16xf32> to vector<16x16xf32>
    %6 = arith.mulf %3, %5 : vector<16x16xf32>
    %c0_6 = arith.constant 0 : index
    %c0_7 = arith.constant 0 : index
    %7 = vector.load %arg7[%c0_6, %c0_7] : memref<1x16xf32, #tpu.memory_space<vmem>>, vector<1x16xf32>
    %8 = vector.broadcast %7 : vector<1x16xf32> to vector<16x16xf32>
    %9 = arith.addf %6, %8 : vector<16x16xf32>
    %cst_8 = arith.constant 0.000000e+00 : f32
    %10 = vector.broadcast %cst_8 : f32 to vector<16x16xf32>
    %11 = arith.maximumf %9, %10 : vector<16x16xf32>
    %12 = vector.extract_strided_slice %1 {offsets = [0, 32], sizes = [16, 8], strides = [1, 1]} : vector<16x72xbf16> to vector<16x8xbf16>
    %c0_9 = arith.constant 0 : index
    %c0_10 = arith.constant 0 : index
    %13 = vector.load %arg5[%c0_9, %c0_10] : memref<8x16xbf16, #tpu.memory_space<vmem>>, vector<8x16xbf16>
    %cst_11 = arith.constant dense<0.000000e+00> : vector<16x16xf32>
    %14 = tpu.matmul %12, %13, %cst_11 {dimension_numbers = #tpu.dot_dimension_numbers<[1], [0], [0], [1], [0, 0, 1, 1], [], []>} : vector<16x8xbf16>, vector<8x16xbf16>, vector<16x16xf32> -> vector<16x16xf32>
    %c0_12 = arith.constant 0 : index
    %c0_13 = arith.constant 0 : index
    %15 = vector.load %arg8[%c0_12, %c0_13] : memref<1x16xf32, #tpu.memory_space<vmem>>, vector<1x16xf32>
    %16 = vector.broadcast %15 : vector<1x16xf32> to vector<16x16xf32>
    %17 = arith.mulf %14, %16 : vector<16x16xf32>
    %c0_14 = arith.constant 0 : index
    %c0_15 = arith.constant 0 : index
    %18 = vector.load %arg9[%c0_14, %c0_15] : memref<1x16xf32, #tpu.memory_space<vmem>>, vector<1x16xf32>
    %19 = vector.broadcast %18 : vector<1x16xf32> to vector<16x16xf32>
    %20 = arith.addf %17, %19 : vector<16x16xf32>
    %21 = arith.truncf %11 : vector<16x16xf32> to vector<16x16xbf16>
    %c0_16 = arith.constant 0 : index
    %c0_17 = arith.constant 0 : index
    %22 = vector.load %arg2[%c0_16, %c0_17] : memref<16x1xbf16, #tpu.memory_space<vmem>>, vector<16x1xbf16>
    %c0_18 = arith.constant 0 : index
    %c0_19 = arith.constant 0 : index
    %23 = vector.load %arg3[%c0_18, %c0_19] : memref<16x1xbf16, #tpu.memory_space<vmem>>, vector<16x1xbf16>
    %24 = vector.broadcast %22 : vector<16x1xbf16> to vector<16x16xbf16>
    %25 = arith.mulf %21, %24 : vector<16x16xbf16>
    %26 = vector.broadcast %23 : vector<16x1xbf16> to vector<16x16xbf16>
    %27 = arith.mulf %21, %26 : vector<16x16xbf16>
    %c0_20 = arith.constant 0 : index
    %c0_21 = arith.constant 0 : index
    %c0_22 = arith.constant 0 : index
    %28 = vector.load %arg10[%c0_20, %c0_21, %c0_22] : memref<9x16x16xbf16, #tpu.memory_space<vmem>>, vector<1x16x16xbf16>
    %29 = vector.shape_cast %28 : vector<1x16x16xbf16> to vector<16x16xbf16>
    %cst_23 = arith.constant dense<0.000000e+00> : vector<16x16xf32>
    %30 = tpu.matmul %25, %29, %cst_23 {dimension_numbers = #tpu.dot_dimension_numbers<[1], [0], [0], [1], [0, 0, 1, 1], [], []>} : vector<16x16xbf16>, vector<16x16xbf16>, vector<16x16xf32> -> vector<16x16xf32>
    %cst_24 = arith.constant 0.000000e+00 : f32
    %31 = vector.broadcast %cst_24 : f32 to vector<5x16xf32>
    %32 = vector.extract_strided_slice %30 {offsets = [0, 0], sizes = [11, 16], strides = [1, 1]} : vector<16x16xf32> to vector<11x16xf32>
    %33 = tpu.concatenate %31, %32 in 0 : vector<5x16xf32>, vector<11x16xf32> -> vector<16x16xf32>
    %c1 = arith.constant 1 : index
    %c0_25 = arith.constant 0 : index
    %c0_26 = arith.constant 0 : index
    %34 = vector.load %arg10[%c1, %c0_25, %c0_26] : memref<9x16x16xbf16, #tpu.memory_space<vmem>>, vector<1x16x16xbf16>
    %35 = vector.shape_cast %34 : vector<1x16x16xbf16> to vector<16x16xbf16>
    %cst_27 = arith.constant dense<0.000000e+00> : vector<16x16xf32>
    %36 = tpu.matmul %21, %35, %cst_27 {dimension_numbers = #tpu.dot_dimension_numbers<[1], [0], [0], [1], [0, 0, 1, 1], [], []>} : vector<16x16xbf16>, vector<16x16xbf16>, vector<16x16xf32> -> vector<16x16xf32>
    %cst_28 = arith.constant 0.000000e+00 : f32
    %37 = vector.broadcast %cst_28 : f32 to vector<4x16xf32>
    %38 = vector.extract_strided_slice %36 {offsets = [0, 0], sizes = [12, 16], strides = [1, 1]} : vector<16x16xf32> to vector<12x16xf32>
    %39 = tpu.concatenate %37, %38 in 0 : vector<4x16xf32>, vector<12x16xf32> -> vector<16x16xf32>
    %40 = arith.addf %33, %39 : vector<16x16xf32>
    %c2 = arith.constant 2 : index
    %c0_29 = arith.constant 0 : index
    %c0_30 = arith.constant 0 : index
    %41 = vector.load %arg10[%c2, %c0_29, %c0_30] : memref<9x16x16xbf16, #tpu.memory_space<vmem>>, vector<1x16x16xbf16>
    %42 = vector.shape_cast %41 : vector<1x16x16xbf16> to vector<16x16xbf16>
    %cst_31 = arith.constant dense<0.000000e+00> : vector<16x16xf32>
    %43 = tpu.matmul %27, %42, %cst_31 {dimension_numbers = #tpu.dot_dimension_numbers<[1], [0], [0], [1], [0, 0, 1, 1], [], []>} : vector<16x16xbf16>, vector<16x16xbf16>, vector<16x16xf32> -> vector<16x16xf32>
    %cst_32 = arith.constant 0.000000e+00 : f32
    %44 = vector.broadcast %cst_32 : f32 to vector<3x16xf32>
    %45 = vector.extract_strided_slice %43 {offsets = [0, 0], sizes = [13, 16], strides = [1, 1]} : vector<16x16xf32> to vector<13x16xf32>
    %46 = tpu.concatenate %44, %45 in 0 : vector<3x16xf32>, vector<13x16xf32> -> vector<16x16xf32>
    %47 = arith.addf %40, %46 : vector<16x16xf32>
    %c3 = arith.constant 3 : index
    %c0_33 = arith.constant 0 : index
    %c0_34 = arith.constant 0 : index
    %48 = vector.load %arg10[%c3, %c0_33, %c0_34] : memref<9x16x16xbf16, #tpu.memory_space<vmem>>, vector<1x16x16xbf16>
    %49 = vector.shape_cast %48 : vector<1x16x16xbf16> to vector<16x16xbf16>
    %cst_35 = arith.constant dense<0.000000e+00> : vector<16x16xf32>
    %50 = tpu.matmul %25, %49, %cst_35 {dimension_numbers = #tpu.dot_dimension_numbers<[1], [0], [0], [1], [0, 0, 1, 1], [], []>} : vector<16x16xbf16>, vector<16x16xbf16>, vector<16x16xf32> -> vector<16x16xf32>
    %cst_36 = arith.constant 0.000000e+00 : f32
    %51 = vector.broadcast %cst_36 : f32 to vector<1x16xf32>
    %52 = vector.extract_strided_slice %50 {offsets = [0, 0], sizes = [15, 16], strides = [1, 1]} : vector<16x16xf32> to vector<15x16xf32>
    %53 = tpu.concatenate %51, %52 in 0 : vector<1x16xf32>, vector<15x16xf32> -> vector<16x16xf32>
    %54 = arith.addf %47, %53 : vector<16x16xf32>
    %c4 = arith.constant 4 : index
    %c0_37 = arith.constant 0 : index
    %c0_38 = arith.constant 0 : index
    %55 = vector.load %arg10[%c4, %c0_37, %c0_38] : memref<9x16x16xbf16, #tpu.memory_space<vmem>>, vector<1x16x16xbf16>
    %56 = vector.shape_cast %55 : vector<1x16x16xbf16> to vector<16x16xbf16>
    %cst_39 = arith.constant dense<0.000000e+00> : vector<16x16xf32>
    %57 = tpu.matmul %21, %56, %cst_39 {dimension_numbers = #tpu.dot_dimension_numbers<[1], [0], [0], [1], [0, 0, 1, 1], [], []>} : vector<16x16xbf16>, vector<16x16xbf16>, vector<16x16xf32> -> vector<16x16xf32>
    %58 = arith.addf %54, %57 : vector<16x16xf32>
    %c5 = arith.constant 5 : index
    %c0_40 = arith.constant 0 : index
    %c0_41 = arith.constant 0 : index
    %59 = vector.load %arg10[%c5, %c0_40, %c0_41] : memref<9x16x16xbf16, #tpu.memory_space<vmem>>, vector<1x16x16xbf16>
    %60 = vector.shape_cast %59 : vector<1x16x16xbf16> to vector<16x16xbf16>
    %cst_42 = arith.constant dense<0.000000e+00> : vector<16x16xf32>
    %61 = tpu.matmul %27, %60, %cst_42 {dimension_numbers = #tpu.dot_dimension_numbers<[1], [0], [0], [1], [0, 0, 1, 1], [], []>} : vector<16x16xbf16>, vector<16x16xbf16>, vector<16x16xf32> -> vector<16x16xf32>
    %cst_43 = arith.constant 0.000000e+00 : f32
    %62 = vector.broadcast %cst_43 : f32 to vector<1x16xf32>
    %63 = vector.extract_strided_slice %61 {offsets = [1, 0], sizes = [15, 16], strides = [1, 1]} : vector<16x16xf32> to vector<15x16xf32>
    %64 = tpu.concatenate %63, %62 in 0 : vector<15x16xf32>, vector<1x16xf32> -> vector<16x16xf32>
    %65 = arith.addf %58, %64 : vector<16x16xf32>
    %c6 = arith.constant 6 : index
    %c0_44 = arith.constant 0 : index
    %c0_45 = arith.constant 0 : index
    %66 = vector.load %arg10[%c6, %c0_44, %c0_45] : memref<9x16x16xbf16, #tpu.memory_space<vmem>>, vector<1x16x16xbf16>
    %67 = vector.shape_cast %66 : vector<1x16x16xbf16> to vector<16x16xbf16>
    %cst_46 = arith.constant dense<0.000000e+00> : vector<16x16xf32>
    %68 = tpu.matmul %25, %67, %cst_46 {dimension_numbers = #tpu.dot_dimension_numbers<[1], [0], [0], [1], [0, 0, 1, 1], [], []>} : vector<16x16xbf16>, vector<16x16xbf16>, vector<16x16xf32> -> vector<16x16xf32>
    %cst_47 = arith.constant 0.000000e+00 : f32
    %69 = vector.broadcast %cst_47 : f32 to vector<3x16xf32>
    %70 = vector.extract_strided_slice %68 {offsets = [3, 0], sizes = [13, 16], strides = [1, 1]} : vector<16x16xf32> to vector<13x16xf32>
    %71 = tpu.concatenate %70, %69 in 0 : vector<13x16xf32>, vector<3x16xf32> -> vector<16x16xf32>
    %72 = arith.addf %65, %71 : vector<16x16xf32>
    %c7 = arith.constant 7 : index
    %c0_48 = arith.constant 0 : index
    %c0_49 = arith.constant 0 : index
    %73 = vector.load %arg10[%c7, %c0_48, %c0_49] : memref<9x16x16xbf16, #tpu.memory_space<vmem>>, vector<1x16x16xbf16>
    %74 = vector.shape_cast %73 : vector<1x16x16xbf16> to vector<16x16xbf16>
    %cst_50 = arith.constant dense<0.000000e+00> : vector<16x16xf32>
    %75 = tpu.matmul %21, %74, %cst_50 {dimension_numbers = #tpu.dot_dimension_numbers<[1], [0], [0], [1], [0, 0, 1, 1], [], []>} : vector<16x16xbf16>, vector<16x16xbf16>, vector<16x16xf32> -> vector<16x16xf32>
    %cst_51 = arith.constant 0.000000e+00 : f32
    %76 = vector.broadcast %cst_51 : f32 to vector<4x16xf32>
    %77 = vector.extract_strided_slice %75 {offsets = [4, 0], sizes = [12, 16], strides = [1, 1]} : vector<16x16xf32> to vector<12x16xf32>
    %78 = tpu.concatenate %77, %76 in 0 : vector<12x16xf32>, vector<4x16xf32> -> vector<16x16xf32>
    %79 = arith.addf %72, %78 : vector<16x16xf32>
    %c8 = arith.constant 8 : index
    %c0_52 = arith.constant 0 : index
    %c0_53 = arith.constant 0 : index
    %80 = vector.load %arg10[%c8, %c0_52, %c0_53] : memref<9x16x16xbf16, #tpu.memory_space<vmem>>, vector<1x16x16xbf16>
    %81 = vector.shape_cast %80 : vector<1x16x16xbf16> to vector<16x16xbf16>
    %cst_54 = arith.constant dense<0.000000e+00> : vector<16x16xf32>
    %82 = tpu.matmul %27, %81, %cst_54 {dimension_numbers = #tpu.dot_dimension_numbers<[1], [0], [0], [1], [0, 0, 1, 1], [], []>} : vector<16x16xbf16>, vector<16x16xbf16>, vector<16x16xf32> -> vector<16x16xf32>
    %cst_55 = arith.constant 0.000000e+00 : f32
    %83 = vector.broadcast %cst_55 : f32 to vector<5x16xf32>
    %84 = vector.extract_strided_slice %82 {offsets = [5, 0], sizes = [11, 16], strides = [1, 1]} : vector<16x16xf32> to vector<11x16xf32>
    %85 = tpu.concatenate %84, %83 in 0 : vector<11x16xf32>, vector<5x16xf32> -> vector<16x16xf32>
    %86 = arith.addf %79, %85 : vector<16x16xf32>
    %c0_56 = arith.constant 0 : index
    %c0_57 = arith.constant 0 : index
    %87 = vector.load %arg11[%c0_56, %c0_57] : memref<1x16xf32, #tpu.memory_space<vmem>>, vector<1x16xf32>
    %88 = vector.broadcast %87 : vector<1x16xf32> to vector<16x16xf32>
    %89 = arith.mulf %86, %88 : vector<16x16xf32>
    %c0_58 = arith.constant 0 : index
    %c0_59 = arith.constant 0 : index
    %90 = vector.load %arg12[%c0_58, %c0_59] : memref<1x16xf32, #tpu.memory_space<vmem>>, vector<1x16xf32>
    %91 = vector.broadcast %90 : vector<1x16xf32> to vector<16x16xf32>
    %92 = arith.addf %89, %91 : vector<16x16xf32>
    %93 = arith.addf %92, %20 : vector<16x16xf32>
    %cst_60 = arith.constant 0.000000e+00 : f32
    %94 = vector.broadcast %cst_60 : f32 to vector<16x16xf32>
    %95 = arith.maximumf %93, %94 : vector<16x16xf32>
    %96 = arith.truncf %95 : vector<16x16xf32> to vector<16x16xbf16>
    %c0_61 = arith.constant 0 : index
    %c0_62 = arith.constant 0 : index
    %c0_63 = arith.constant 0 : index
    %97 = vector.load %arg13[%c0_61, %c0_62, %c0_63] : memref<1x16x16xbf16, #tpu.memory_space<vmem>>, vector<1x16x16xbf16>
    %98 = vector.shape_cast %97 : vector<1x16x16xbf16> to vector<16x16xbf16>
    %99 = vector.shape_cast %96 : vector<16x16xbf16> to vector<1x16x16xbf16>
    tpu.vector_store %arg13[%c0_61, %c0_62, %c0_63], %99 {strides = array<i32>} : memref<1x16x16xbf16, #tpu.memory_space<vmem>>, vector<1x16x16xbf16>,
    return
  }
  func.func @transform_0(%arg0: i32) -> (i32, i32, i32) {
    %c0_i32 = arith.constant 0 : i32
    %c0_i32_0 = arith.constant 0 : i32
    %c0_i32_1 = arith.constant 0 : i32
    return %arg0, %c0_i32, %c0_i32_0 : i32, i32, i32
  }
  func.func @transform_1(%arg0: i32) -> (i32, i32) {
    %c0_i32 = arith.constant 0 : i32
    %c0_i32_0 = arith.constant 0 : i32
    %c0_i32_1 = arith.constant 0 : i32
    return %c0_i32, %c0_i32_0 : i32, i32
  }
  func.func @transform_2(%arg0: i32) -> (i32, i32) {
    %c0_i32 = arith.constant 0 : i32
    %c0_i32_0 = arith.constant 0 : i32
    %c0_i32_1 = arith.constant 0 : i32
    return %c0_i32, %c0_i32_0 : i32, i32
  }
  func.func @transform_3(%arg0: i32) -> (i32, i32) {
    %c0_i32 = arith.constant 0 : i32
    %c0_i32_0 = arith.constant 0 : i32
    %c0_i32_1 = arith.constant 0 : i32
    return %c0_i32, %c0_i32_0 : i32, i32
  }
  func.func @transform_4(%arg0: i32) -> (i32, i32) {
    %c0_i32 = arith.constant 0 : i32
    %c0_i32_0 = arith.constant 0 : i32
    %c0_i32_1 = arith.constant 0 : i32
    return %c0_i32, %c0_i32_0 : i32, i32
  }
  func.func @transform_5(%arg0: i32) -> (i32, i32) {
    %c0_i32 = arith.constant 0 : i32
    %c0_i32_0 = arith.constant 0 : i32
    %c0_i32_1 = arith.constant 0 : i32
    return %c0_i32, %c0_i32_0 : i32, i32
  }
  func.func @transform_6(%arg0: i32) -> (i32, i32) {
    %c0_i32 = arith.constant 0 : i32
    %c0_i32_0 = arith.constant 0 : i32
    %c0_i32_1 = arith.constant 0 : i32
    return %c0_i32, %c0_i32_0 : i32, i32
  }
  func.func @transform_7(%arg0: i32) -> (i32, i32) {
    %c0_i32 = arith.constant 0 : i32
    %c0_i32_0 = arith.constant 0 : i32
    %c0_i32_1 = arith.constant 0 : i32
    return %c0_i32, %c0_i32_0 : i32, i32
  }
  func.func @transform_8(%arg0: i32) -> (i32, i32) {
    %c0_i32 = arith.constant 0 : i32
    %c0_i32_0 = arith.constant 0 : i32
    %c0_i32_1 = arith.constant 0 : i32
    return %c0_i32, %c0_i32_0 : i32, i32
  }
  func.func @transform_9(%arg0: i32) -> (i32, i32, i32) {
    %c0_i32 = arith.constant 0 : i32
    %c0_i32_0 = arith.constant 0 : i32
    %c0_i32_1 = arith.constant 0 : i32
    %c0_i32_2 = arith.constant 0 : i32
    return %c0_i32, %c0_i32_0, %c0_i32_1 : i32, i32, i32
  }
  func.func @transform_10(%arg0: i32) -> (i32, i32) {
    %c0_i32 = arith.constant 0 : i32
    %c0_i32_0 = arith.constant 0 : i32
    %c0_i32_1 = arith.constant 0 : i32
    return %c0_i32, %c0_i32_0 : i32, i32
  }
  func.func @transform_11(%arg0: i32) -> (i32, i32) {
    %c0_i32 = arith.constant 0 : i32
    %c0_i32_0 = arith.constant 0 : i32
    %c0_i32_1 = arith.constant 0 : i32
    return %c0_i32, %c0_i32_0 : i32, i32
  }
  func.func @transform_12(%arg0: i32) -> (i32, i32, i32) {
    %c0_i32 = arith.constant 0 : i32
    %c0_i32_0 = arith.constant 0 : i32
    %c0_i32_1 = arith.constant 0 : i32
    return %arg0, %c0_i32, %c0_i32_0 : i32, i32, i32
  }
}

module attributes {stable_mosaic.version = 11 : i64} {
  func.func @_down_block_kernel(%arg0: i32, %arg1: memref<1x4x144xbf16, #tpu.memory_space<vmem>>, %arg2: memref<4x1xbf16, #tpu.memory_space<vmem>>, %arg3: memref<4x1xbf16, #tpu.memory_space<vmem>>, %arg4: memref<144x32xbf16, #tpu.memory_space<vmem>>, %arg5: memref<16x32xbf16, #tpu.memory_space<vmem>>, %arg6: memref<1x32xf32, #tpu.memory_space<vmem>>, %arg7: memref<1x32xf32, #tpu.memory_space<vmem>>, %arg8: memref<1x32xf32, #tpu.memory_space<vmem>>, %arg9: memref<1x32xf32, #tpu.memory_space<vmem>>, %arg10: memref<9x32x32xbf16, #tpu.memory_space<vmem>>, %arg11: memref<1x32xf32, #tpu.memory_space<vmem>>, %arg12: memref<1x32xf32, #tpu.memory_space<vmem>>, %arg13: memref<1x4x32xbf16, #tpu.memory_space<vmem>>) attributes {dimension_semantics = [#tpu.dimension_semantics<parallel>], iteration_bounds = array<i64: 2>, scalar_prefetch = 0 : i64, scratch_operands = 0 : i64, tpu.core_type = #tpu.core_type<tc>, window_params = [{transform_indices = @transform_0, window_bounds = array<i64: 1, 4, 144>}, {pipeline_mode = #tpu.pipeline_mode<synchronous>, transform_indices = @transform_1, window_bounds = array<i64: 4, 1>}, {pipeline_mode = #tpu.pipeline_mode<synchronous>, transform_indices = @transform_2, window_bounds = array<i64: 4, 1>}, {pipeline_mode = #tpu.pipeline_mode<synchronous>, transform_indices = @transform_3, window_bounds = array<i64: 144, 32>}, {pipeline_mode = #tpu.pipeline_mode<synchronous>, transform_indices = @transform_4, window_bounds = array<i64: 16, 32>}, {pipeline_mode = #tpu.pipeline_mode<synchronous>, transform_indices = @transform_5, window_bounds = array<i64: 1, 32>}, {pipeline_mode = #tpu.pipeline_mode<synchronous>, transform_indices = @transform_6, window_bounds = array<i64: 1, 32>}, {pipeline_mode = #tpu.pipeline_mode<synchronous>, transform_indices = @transform_7, window_bounds = array<i64: 1, 32>}, {pipeline_mode = #tpu.pipeline_mode<synchronous>, transform_indices = @transform_8, window_bounds = array<i64: 1, 32>}, {pipeline_mode = #tpu.pipeline_mode<synchronous>, transform_indices = @transform_9, window_bounds = array<i64: 9, 32, 32>}, {pipeline_mode = #tpu.pipeline_mode<synchronous>, transform_indices = @transform_10, window_bounds = array<i64: 1, 32>}, {pipeline_mode = #tpu.pipeline_mode<synchronous>, transform_indices = @transform_11, window_bounds = array<i64: 1, 32>}, {transform_indices = @transform_12, window_bounds = array<i64: 1, 4, 32>}]} {
    %c0 = arith.constant 0 : index
    %c0_0 = arith.constant 0 : index
    %c0_1 = arith.constant 0 : index
    %0 = vector.load %arg1[%c0, %c0_0, %c0_1] : memref<1x4x144xbf16, #tpu.memory_space<vmem>>, vector<1x4x144xbf16>
    %1 = vector.shape_cast %0 : vector<1x4x144xbf16> to vector<4x144xbf16>
    %c0_2 = arith.constant 0 : index
    %c0_3 = arith.constant 0 : index
    %2 = vector.load %arg4[%c0_2, %c0_3] : memref<144x32xbf16, #tpu.memory_space<vmem>>, vector<144x32xbf16>
    %cst = arith.constant dense<0.000000e+00> : vector<4x32xf32>
    %3 = tpu.matmul %1, %2, %cst {dimension_numbers = #tpu.dot_dimension_numbers<[1], [0], [0], [1], [0, 0, 1, 1], [], []>} : vector<4x144xbf16>, vector<144x32xbf16>, vector<4x32xf32> -> vector<4x32xf32>
    %c0_4 = arith.constant 0 : index
    %c0_5 = arith.constant 0 : index
    %4 = vector.load %arg6[%c0_4, %c0_5] : memref<1x32xf32, #tpu.memory_space<vmem>>, vector<1x32xf32>
    %5 = vector.broadcast %4 : vector<1x32xf32> to vector<4x32xf32>
    %6 = arith.mulf %3, %5 : vector<4x32xf32>
    %c0_6 = arith.constant 0 : index
    %c0_7 = arith.constant 0 : index
    %7 = vector.load %arg7[%c0_6, %c0_7] : memref<1x32xf32, #tpu.memory_space<vmem>>, vector<1x32xf32>
    %8 = vector.broadcast %7 : vector<1x32xf32> to vector<4x32xf32>
    %9 = arith.addf %6, %8 : vector<4x32xf32>
    %cst_8 = arith.constant 0.000000e+00 : f32
    %10 = vector.broadcast %cst_8 : f32 to vector<4x32xf32>
    %11 = arith.maximumf %9, %10 : vector<4x32xf32>
    %12 = vector.extract_strided_slice %1 {offsets = [0, 64], sizes = [4, 16], strides = [1, 1]} : vector<4x144xbf16> to vector<4x16xbf16>
    %c0_9 = arith.constant 0 : index
    %c0_10 = arith.constant 0 : index
    %13 = vector.load %arg5[%c0_9, %c0_10] : memref<16x32xbf16, #tpu.memory_space<vmem>>, vector<16x32xbf16>
    %cst_11 = arith.constant dense<0.000000e+00> : vector<4x32xf32>
    %14 = tpu.matmul %12, %13, %cst_11 {dimension_numbers = #tpu.dot_dimension_numbers<[1], [0], [0], [1], [0, 0, 1, 1], [], []>} : vector<4x16xbf16>, vector<16x32xbf16>, vector<4x32xf32> -> vector<4x32xf32>
    %c0_12 = arith.constant 0 : index
    %c0_13 = arith.constant 0 : index
    %15 = vector.load %arg8[%c0_12, %c0_13] : memref<1x32xf32, #tpu.memory_space<vmem>>, vector<1x32xf32>
    %16 = vector.broadcast %15 : vector<1x32xf32> to vector<4x32xf32>
    %17 = arith.mulf %14, %16 : vector<4x32xf32>
    %c0_14 = arith.constant 0 : index
    %c0_15 = arith.constant 0 : index
    %18 = vector.load %arg9[%c0_14, %c0_15] : memref<1x32xf32, #tpu.memory_space<vmem>>, vector<1x32xf32>
    %19 = vector.broadcast %18 : vector<1x32xf32> to vector<4x32xf32>
    %20 = arith.addf %17, %19 : vector<4x32xf32>
    %21 = arith.truncf %11 : vector<4x32xf32> to vector<4x32xbf16>
    %c0_16 = arith.constant 0 : index
    %c0_17 = arith.constant 0 : index
    %22 = vector.load %arg2[%c0_16, %c0_17] : memref<4x1xbf16, #tpu.memory_space<vmem>>, vector<4x1xbf16>
    %c0_18 = arith.constant 0 : index
    %c0_19 = arith.constant 0 : index
    %23 = vector.load %arg3[%c0_18, %c0_19] : memref<4x1xbf16, #tpu.memory_space<vmem>>, vector<4x1xbf16>
    %24 = vector.broadcast %22 : vector<4x1xbf16> to vector<4x32xbf16>
    %25 = arith.mulf %21, %24 : vector<4x32xbf16>
    %26 = vector.broadcast %23 : vector<4x1xbf16> to vector<4x32xbf16>
    %27 = arith.mulf %21, %26 : vector<4x32xbf16>
    %c0_20 = arith.constant 0 : index
    %c0_21 = arith.constant 0 : index
    %c0_22 = arith.constant 0 : index
    %28 = vector.load %arg10[%c0_20, %c0_21, %c0_22] : memref<9x32x32xbf16, #tpu.memory_space<vmem>>, vector<1x32x32xbf16>
    %29 = vector.shape_cast %28 : vector<1x32x32xbf16> to vector<32x32xbf16>
    %cst_23 = arith.constant dense<0.000000e+00> : vector<4x32xf32>
    %30 = tpu.matmul %25, %29, %cst_23 {dimension_numbers = #tpu.dot_dimension_numbers<[1], [0], [0], [1], [0, 0, 1, 1], [], []>} : vector<4x32xbf16>, vector<32x32xbf16>, vector<4x32xf32> -> vector<4x32xf32>
    %cst_24 = arith.constant 0.000000e+00 : f32
    %31 = vector.broadcast %cst_24 : f32 to vector<3x32xf32>
    %32 = vector.extract_strided_slice %30 {offsets = [0, 0], sizes = [1, 32], strides = [1, 1]} : vector<4x32xf32> to vector<1x32xf32>
    %33 = tpu.concatenate %31, %32 in 0 : vector<3x32xf32>, vector<1x32xf32> -> vector<4x32xf32>
    %c1 = arith.constant 1 : index
    %c0_25 = arith.constant 0 : index
    %c0_26 = arith.constant 0 : index
    %34 = vector.load %arg10[%c1, %c0_25, %c0_26] : memref<9x32x32xbf16, #tpu.memory_space<vmem>>, vector<1x32x32xbf16>
    %35 = vector.shape_cast %34 : vector<1x32x32xbf16> to vector<32x32xbf16>
    %cst_27 = arith.constant dense<0.000000e+00> : vector<4x32xf32>
    %36 = tpu.matmul %21, %35, %cst_27 {dimension_numbers = #tpu.dot_dimension_numbers<[1], [0], [0], [1], [0, 0, 1, 1], [], []>} : vector<4x32xbf16>, vector<32x32xbf16>, vector<4x32xf32> -> vector<4x32xf32>
    %cst_28 = arith.constant 0.000000e+00 : f32
    %37 = vector.broadcast %cst_28 : f32 to vector<2x32xf32>
    %38 = vector.extract_strided_slice %36 {offsets = [0, 0], sizes = [2, 32], strides = [1, 1]} : vector<4x32xf32> to vector<2x32xf32>
    %39 = tpu.concatenate %37, %38 in 0 : vector<2x32xf32>, vector<2x32xf32> -> vector<4x32xf32>
    %40 = arith.addf %33, %39 : vector<4x32xf32>
    %c2 = arith.constant 2 : index
    %c0_29 = arith.constant 0 : index
    %c0_30 = arith.constant 0 : index
    %41 = vector.load %arg10[%c2, %c0_29, %c0_30] : memref<9x32x32xbf16, #tpu.memory_space<vmem>>, vector<1x32x32xbf16>
    %42 = vector.shape_cast %41 : vector<1x32x32xbf16> to vector<32x32xbf16>
    %cst_31 = arith.constant dense<0.000000e+00> : vector<4x32xf32>
    %43 = tpu.matmul %27, %42, %cst_31 {dimension_numbers = #tpu.dot_dimension_numbers<[1], [0], [0], [1], [0, 0, 1, 1], [], []>} : vector<4x32xbf16>, vector<32x32xbf16>, vector<4x32xf32> -> vector<4x32xf32>
    %cst_32 = arith.constant 0.000000e+00 : f32
    %44 = vector.broadcast %cst_32 : f32 to vector<1x32xf32>
    %45 = vector.extract_strided_slice %43 {offsets = [0, 0], sizes = [3, 32], strides = [1, 1]} : vector<4x32xf32> to vector<3x32xf32>
    %46 = tpu.concatenate %44, %45 in 0 : vector<1x32xf32>, vector<3x32xf32> -> vector<4x32xf32>
    %47 = arith.addf %40, %46 : vector<4x32xf32>
    %c3 = arith.constant 3 : index
    %c0_33 = arith.constant 0 : index
    %c0_34 = arith.constant 0 : index
    %48 = vector.load %arg10[%c3, %c0_33, %c0_34] : memref<9x32x32xbf16, #tpu.memory_space<vmem>>, vector<1x32x32xbf16>
    %49 = vector.shape_cast %48 : vector<1x32x32xbf16> to vector<32x32xbf16>
    %cst_35 = arith.constant dense<0.000000e+00> : vector<4x32xf32>
    %50 = tpu.matmul %25, %49, %cst_35 {dimension_numbers = #tpu.dot_dimension_numbers<[1], [0], [0], [1], [0, 0, 1, 1], [], []>} : vector<4x32xbf16>, vector<32x32xbf16>, vector<4x32xf32> -> vector<4x32xf32>
    %cst_36 = arith.constant 0.000000e+00 : f32
    %51 = vector.broadcast %cst_36 : f32 to vector<1x32xf32>
    %52 = vector.extract_strided_slice %50 {offsets = [0, 0], sizes = [3, 32], strides = [1, 1]} : vector<4x32xf32> to vector<3x32xf32>
    %53 = tpu.concatenate %51, %52 in 0 : vector<1x32xf32>, vector<3x32xf32> -> vector<4x32xf32>
    %54 = arith.addf %47, %53 : vector<4x32xf32>
    %c4 = arith.constant 4 : index
    %c0_37 = arith.constant 0 : index
    %c0_38 = arith.constant 0 : index
    %55 = vector.load %arg10[%c4, %c0_37, %c0_38] : memref<9x32x32xbf16, #tpu.memory_space<vmem>>, vector<1x32x32xbf16>
    %56 = vector.shape_cast %55 : vector<1x32x32xbf16> to vector<32x32xbf16>
    %cst_39 = arith.constant dense<0.000000e+00> : vector<4x32xf32>
    %57 = tpu.matmul %21, %56, %cst_39 {dimension_numbers = #tpu.dot_dimension_numbers<[1], [0], [0], [1], [0, 0, 1, 1], [], []>} : vector<4x32xbf16>, vector<32x32xbf16>, vector<4x32xf32> -> vector<4x32xf32>
    %58 = arith.addf %54, %57 : vector<4x32xf32>
    %c5 = arith.constant 5 : index
    %c0_40 = arith.constant 0 : index
    %c0_41 = arith.constant 0 : index
    %59 = vector.load %arg10[%c5, %c0_40, %c0_41] : memref<9x32x32xbf16, #tpu.memory_space<vmem>>, vector<1x32x32xbf16>
    %60 = vector.shape_cast %59 : vector<1x32x32xbf16> to vector<32x32xbf16>
    %cst_42 = arith.constant dense<0.000000e+00> : vector<4x32xf32>
    %61 = tpu.matmul %27, %60, %cst_42 {dimension_numbers = #tpu.dot_dimension_numbers<[1], [0], [0], [1], [0, 0, 1, 1], [], []>} : vector<4x32xbf16>, vector<32x32xbf16>, vector<4x32xf32> -> vector<4x32xf32>
    %cst_43 = arith.constant 0.000000e+00 : f32
    %62 = vector.broadcast %cst_43 : f32 to vector<1x32xf32>
    %63 = vector.extract_strided_slice %61 {offsets = [1, 0], sizes = [3, 32], strides = [1, 1]} : vector<4x32xf32> to vector<3x32xf32>
    %64 = tpu.concatenate %63, %62 in 0 : vector<3x32xf32>, vector<1x32xf32> -> vector<4x32xf32>
    %65 = arith.addf %58, %64 : vector<4x32xf32>
    %c6 = arith.constant 6 : index
    %c0_44 = arith.constant 0 : index
    %c0_45 = arith.constant 0 : index
    %66 = vector.load %arg10[%c6, %c0_44, %c0_45] : memref<9x32x32xbf16, #tpu.memory_space<vmem>>, vector<1x32x32xbf16>
    %67 = vector.shape_cast %66 : vector<1x32x32xbf16> to vector<32x32xbf16>
    %cst_46 = arith.constant dense<0.000000e+00> : vector<4x32xf32>
    %68 = tpu.matmul %25, %67, %cst_46 {dimension_numbers = #tpu.dot_dimension_numbers<[1], [0], [0], [1], [0, 0, 1, 1], [], []>} : vector<4x32xbf16>, vector<32x32xbf16>, vector<4x32xf32> -> vector<4x32xf32>
    %cst_47 = arith.constant 0.000000e+00 : f32
    %69 = vector.broadcast %cst_47 : f32 to vector<1x32xf32>
    %70 = vector.extract_strided_slice %68 {offsets = [1, 0], sizes = [3, 32], strides = [1, 1]} : vector<4x32xf32> to vector<3x32xf32>
    %71 = tpu.concatenate %70, %69 in 0 : vector<3x32xf32>, vector<1x32xf32> -> vector<4x32xf32>
    %72 = arith.addf %65, %71 : vector<4x32xf32>
    %c7 = arith.constant 7 : index
    %c0_48 = arith.constant 0 : index
    %c0_49 = arith.constant 0 : index
    %73 = vector.load %arg10[%c7, %c0_48, %c0_49] : memref<9x32x32xbf16, #tpu.memory_space<vmem>>, vector<1x32x32xbf16>
    %74 = vector.shape_cast %73 : vector<1x32x32xbf16> to vector<32x32xbf16>
    %cst_50 = arith.constant dense<0.000000e+00> : vector<4x32xf32>
    %75 = tpu.matmul %21, %74, %cst_50 {dimension_numbers = #tpu.dot_dimension_numbers<[1], [0], [0], [1], [0, 0, 1, 1], [], []>} : vector<4x32xbf16>, vector<32x32xbf16>, vector<4x32xf32> -> vector<4x32xf32>
    %cst_51 = arith.constant 0.000000e+00 : f32
    %76 = vector.broadcast %cst_51 : f32 to vector<2x32xf32>
    %77 = vector.extract_strided_slice %75 {offsets = [2, 0], sizes = [2, 32], strides = [1, 1]} : vector<4x32xf32> to vector<2x32xf32>
    %78 = tpu.concatenate %77, %76 in 0 : vector<2x32xf32>, vector<2x32xf32> -> vector<4x32xf32>
    %79 = arith.addf %72, %78 : vector<4x32xf32>
    %c8 = arith.constant 8 : index
    %c0_52 = arith.constant 0 : index
    %c0_53 = arith.constant 0 : index
    %80 = vector.load %arg10[%c8, %c0_52, %c0_53] : memref<9x32x32xbf16, #tpu.memory_space<vmem>>, vector<1x32x32xbf16>
    %81 = vector.shape_cast %80 : vector<1x32x32xbf16> to vector<32x32xbf16>
    %cst_54 = arith.constant dense<0.000000e+00> : vector<4x32xf32>
    %82 = tpu.matmul %27, %81, %cst_54 {dimension_numbers = #tpu.dot_dimension_numbers<[1], [0], [0], [1], [0, 0, 1, 1], [], []>} : vector<4x32xbf16>, vector<32x32xbf16>, vector<4x32xf32> -> vector<4x32xf32>
    %cst_55 = arith.constant 0.000000e+00 : f32
    %83 = vector.broadcast %cst_55 : f32 to vector<3x32xf32>
    %84 = vector.extract_strided_slice %82 {offsets = [3, 0], sizes = [1, 32], strides = [1, 1]} : vector<4x32xf32> to vector<1x32xf32>
    %85 = tpu.concatenate %84, %83 in 0 : vector<1x32xf32>, vector<3x32xf32> -> vector<4x32xf32>
    %86 = arith.addf %79, %85 : vector<4x32xf32>
    %c0_56 = arith.constant 0 : index
    %c0_57 = arith.constant 0 : index
    %87 = vector.load %arg11[%c0_56, %c0_57] : memref<1x32xf32, #tpu.memory_space<vmem>>, vector<1x32xf32>
    %88 = vector.broadcast %87 : vector<1x32xf32> to vector<4x32xf32>
    %89 = arith.mulf %86, %88 : vector<4x32xf32>
    %c0_58 = arith.constant 0 : index
    %c0_59 = arith.constant 0 : index
    %90 = vector.load %arg12[%c0_58, %c0_59] : memref<1x32xf32, #tpu.memory_space<vmem>>, vector<1x32xf32>
    %91 = vector.broadcast %90 : vector<1x32xf32> to vector<4x32xf32>
    %92 = arith.addf %89, %91 : vector<4x32xf32>
    %93 = arith.addf %92, %20 : vector<4x32xf32>
    %cst_60 = arith.constant 0.000000e+00 : f32
    %94 = vector.broadcast %cst_60 : f32 to vector<4x32xf32>
    %95 = arith.maximumf %93, %94 : vector<4x32xf32>
    %96 = arith.truncf %95 : vector<4x32xf32> to vector<4x32xbf16>
    %c0_61 = arith.constant 0 : index
    %c0_62 = arith.constant 0 : index
    %c0_63 = arith.constant 0 : index
    %97 = vector.load %arg13[%c0_61, %c0_62, %c0_63] : memref<1x4x32xbf16, #tpu.memory_space<vmem>>, vector<1x4x32xbf16>
    %98 = vector.shape_cast %97 : vector<1x4x32xbf16> to vector<4x32xbf16>
    %99 = vector.shape_cast %96 : vector<4x32xbf16> to vector<1x4x32xbf16>
    tpu.vector_store %arg13[%c0_61, %c0_62, %c0_63], %99 {strides = array<i32>} : memref<1x4x32xbf16, #tpu.memory_space<vmem>>, vector<1x4x32xbf16>,
    return
  }
  func.func @transform_0(%arg0: i32) -> (i32, i32, i32) {
    %c0_i32 = arith.constant 0 : i32
    %c0_i32_0 = arith.constant 0 : i32
    %c0_i32_1 = arith.constant 0 : i32
    return %arg0, %c0_i32, %c0_i32_0 : i32, i32, i32
  }
  func.func @transform_1(%arg0: i32) -> (i32, i32) {
    %c0_i32 = arith.constant 0 : i32
    %c0_i32_0 = arith.constant 0 : i32
    %c0_i32_1 = arith.constant 0 : i32
    return %c0_i32, %c0_i32_0 : i32, i32
  }
  func.func @transform_2(%arg0: i32) -> (i32, i32) {
    %c0_i32 = arith.constant 0 : i32
    %c0_i32_0 = arith.constant 0 : i32
    %c0_i32_1 = arith.constant 0 : i32
    return %c0_i32, %c0_i32_0 : i32, i32
  }
  func.func @transform_3(%arg0: i32) -> (i32, i32) {
    %c0_i32 = arith.constant 0 : i32
    %c0_i32_0 = arith.constant 0 : i32
    %c0_i32_1 = arith.constant 0 : i32
    return %c0_i32, %c0_i32_0 : i32, i32
  }
  func.func @transform_4(%arg0: i32) -> (i32, i32) {
    %c0_i32 = arith.constant 0 : i32
    %c0_i32_0 = arith.constant 0 : i32
    %c0_i32_1 = arith.constant 0 : i32
    return %c0_i32, %c0_i32_0 : i32, i32
  }
  func.func @transform_5(%arg0: i32) -> (i32, i32) {
    %c0_i32 = arith.constant 0 : i32
    %c0_i32_0 = arith.constant 0 : i32
    %c0_i32_1 = arith.constant 0 : i32
    return %c0_i32, %c0_i32_0 : i32, i32
  }
  func.func @transform_6(%arg0: i32) -> (i32, i32) {
    %c0_i32 = arith.constant 0 : i32
    %c0_i32_0 = arith.constant 0 : i32
    %c0_i32_1 = arith.constant 0 : i32
    return %c0_i32, %c0_i32_0 : i32, i32
  }
  func.func @transform_7(%arg0: i32) -> (i32, i32) {
    %c0_i32 = arith.constant 0 : i32
    %c0_i32_0 = arith.constant 0 : i32
    %c0_i32_1 = arith.constant 0 : i32
    return %c0_i32, %c0_i32_0 : i32, i32
  }
  func.func @transform_8(%arg0: i32) -> (i32, i32) {
    %c0_i32 = arith.constant 0 : i32
    %c0_i32_0 = arith.constant 0 : i32
    %c0_i32_1 = arith.constant 0 : i32
    return %c0_i32, %c0_i32_0 : i32, i32
  }
  func.func @transform_9(%arg0: i32) -> (i32, i32, i32) {
    %c0_i32 = arith.constant 0 : i32
    %c0_i32_0 = arith.constant 0 : i32
    %c0_i32_1 = arith.constant 0 : i32
    %c0_i32_2 = arith.constant 0 : i32
    return %c0_i32, %c0_i32_0, %c0_i32_1 : i32, i32, i32
  }
  func.func @transform_10(%arg0: i32) -> (i32, i32) {
    %c0_i32 = arith.constant 0 : i32
    %c0_i32_0 = arith.constant 0 : i32
    %c0_i32_1 = arith.constant 0 : i32
    return %c0_i32, %c0_i32_0 : i32, i32
  }
  func.func @transform_11(%arg0: i32) -> (i32, i32) {
    %c0_i32 = arith.constant 0 : i32
    %c0_i32_0 = arith.constant 0 : i32
    %c0_i32_1 = arith.constant 0 : i32
    return %c0_i32, %c0_i32_0 : i32, i32
  }
  func.func @transform_12(%arg0: i32) -> (i32, i32, i32) {
    %c0_i32 = arith.constant 0 : i32
    %c0_i32_0 = arith.constant 0 : i32
    %c0_i32_1 = arith.constant 0 : i32
    return %arg0, %c0_i32, %c0_i32_0 : i32, i32, i32
  }
}

module attributes {stable_mosaic.version = 11 : i64} {
  func.func @_identity_block_kernel(%arg0: i32, %arg1: memref<1x4x32xbf16, #tpu.memory_space<vmem>>, %arg2: memref<4x1xbf16, #tpu.memory_space<vmem>>, %arg3: memref<4x1xbf16, #tpu.memory_space<vmem>>, %arg4: memref<9x32x32xbf16, #tpu.memory_space<vmem>>, %arg5: memref<1x32xf32, #tpu.memory_space<vmem>>, %arg6: memref<1x32xf32, #tpu.memory_space<vmem>>, %arg7: memref<9x32x32xbf16, #tpu.memory_space<vmem>>, %arg8: memref<1x32xf32, #tpu.memory_space<vmem>>, %arg9: memref<1x32xf32, #tpu.memory_space<vmem>>, %arg10: memref<1x4x32xbf16, #tpu.memory_space<vmem>>) attributes {dimension_semantics = [#tpu.dimension_semantics<parallel>], iteration_bounds = array<i64: 2>, scalar_prefetch = 0 : i64, scratch_operands = 0 : i64, tpu.core_type = #tpu.core_type<tc>, window_params = [{transform_indices = @transform_0, window_bounds = array<i64: 1, 4, 32>}, {pipeline_mode = #tpu.pipeline_mode<synchronous>, transform_indices = @transform_1, window_bounds = array<i64: 4, 1>}, {pipeline_mode = #tpu.pipeline_mode<synchronous>, transform_indices = @transform_2, window_bounds = array<i64: 4, 1>}, {pipeline_mode = #tpu.pipeline_mode<synchronous>, transform_indices = @transform_3, window_bounds = array<i64: 9, 32, 32>}, {pipeline_mode = #tpu.pipeline_mode<synchronous>, transform_indices = @transform_4, window_bounds = array<i64: 1, 32>}, {pipeline_mode = #tpu.pipeline_mode<synchronous>, transform_indices = @transform_5, window_bounds = array<i64: 1, 32>}, {pipeline_mode = #tpu.pipeline_mode<synchronous>, transform_indices = @transform_6, window_bounds = array<i64: 9, 32, 32>}, {pipeline_mode = #tpu.pipeline_mode<synchronous>, transform_indices = @transform_7, window_bounds = array<i64: 1, 32>}, {pipeline_mode = #tpu.pipeline_mode<synchronous>, transform_indices = @transform_8, window_bounds = array<i64: 1, 32>}, {transform_indices = @transform_9, window_bounds = array<i64: 1, 4, 32>}]} {
    %c0 = arith.constant 0 : index
    %c0_0 = arith.constant 0 : index
    %c0_1 = arith.constant 0 : index
    %0 = vector.load %arg1[%c0, %c0_0, %c0_1] : memref<1x4x32xbf16, #tpu.memory_space<vmem>>, vector<1x4x32xbf16>
    %1 = vector.shape_cast %0 : vector<1x4x32xbf16> to vector<4x32xbf16>
    %c0_2 = arith.constant 0 : index
    %c0_3 = arith.constant 0 : index
    %2 = vector.load %arg2[%c0_2, %c0_3] : memref<4x1xbf16, #tpu.memory_space<vmem>>, vector<4x1xbf16>
    %c0_4 = arith.constant 0 : index
    %c0_5 = arith.constant 0 : index
    %3 = vector.load %arg3[%c0_4, %c0_5] : memref<4x1xbf16, #tpu.memory_space<vmem>>, vector<4x1xbf16>
    %4 = vector.broadcast %2 : vector<4x1xbf16> to vector<4x32xbf16>
    %5 = arith.mulf %1, %4 : vector<4x32xbf16>
    %6 = vector.broadcast %3 : vector<4x1xbf16> to vector<4x32xbf16>
    %7 = arith.mulf %1, %6 : vector<4x32xbf16>
    %c0_6 = arith.constant 0 : index
    %c0_7 = arith.constant 0 : index
    %c0_8 = arith.constant 0 : index
    %8 = vector.load %arg4[%c0_6, %c0_7, %c0_8] : memref<9x32x32xbf16, #tpu.memory_space<vmem>>, vector<1x32x32xbf16>
    %9 = vector.shape_cast %8 : vector<1x32x32xbf16> to vector<32x32xbf16>
    %cst = arith.constant dense<0.000000e+00> : vector<4x32xf32>
    %10 = tpu.matmul %5, %9, %cst {dimension_numbers = #tpu.dot_dimension_numbers<[1], [0], [0], [1], [0, 0, 1, 1], [], []>} : vector<4x32xbf16>, vector<32x32xbf16>, vector<4x32xf32> -> vector<4x32xf32>
    %cst_9 = arith.constant 0.000000e+00 : f32
    %11 = vector.broadcast %cst_9 : f32 to vector<3x32xf32>
    %12 = vector.extract_strided_slice %10 {offsets = [0, 0], sizes = [1, 32], strides = [1, 1]} : vector<4x32xf32> to vector<1x32xf32>
    %13 = tpu.concatenate %11, %12 in 0 : vector<3x32xf32>, vector<1x32xf32> -> vector<4x32xf32>
    %c1 = arith.constant 1 : index
    %c0_10 = arith.constant 0 : index
    %c0_11 = arith.constant 0 : index
    %14 = vector.load %arg4[%c1, %c0_10, %c0_11] : memref<9x32x32xbf16, #tpu.memory_space<vmem>>, vector<1x32x32xbf16>
    %15 = vector.shape_cast %14 : vector<1x32x32xbf16> to vector<32x32xbf16>
    %cst_12 = arith.constant dense<0.000000e+00> : vector<4x32xf32>
    %16 = tpu.matmul %1, %15, %cst_12 {dimension_numbers = #tpu.dot_dimension_numbers<[1], [0], [0], [1], [0, 0, 1, 1], [], []>} : vector<4x32xbf16>, vector<32x32xbf16>, vector<4x32xf32> -> vector<4x32xf32>
    %cst_13 = arith.constant 0.000000e+00 : f32
    %17 = vector.broadcast %cst_13 : f32 to vector<2x32xf32>
    %18 = vector.extract_strided_slice %16 {offsets = [0, 0], sizes = [2, 32], strides = [1, 1]} : vector<4x32xf32> to vector<2x32xf32>
    %19 = tpu.concatenate %17, %18 in 0 : vector<2x32xf32>, vector<2x32xf32> -> vector<4x32xf32>
    %20 = arith.addf %13, %19 : vector<4x32xf32>
    %c2 = arith.constant 2 : index
    %c0_14 = arith.constant 0 : index
    %c0_15 = arith.constant 0 : index
    %21 = vector.load %arg4[%c2, %c0_14, %c0_15] : memref<9x32x32xbf16, #tpu.memory_space<vmem>>, vector<1x32x32xbf16>
    %22 = vector.shape_cast %21 : vector<1x32x32xbf16> to vector<32x32xbf16>
    %cst_16 = arith.constant dense<0.000000e+00> : vector<4x32xf32>
    %23 = tpu.matmul %7, %22, %cst_16 {dimension_numbers = #tpu.dot_dimension_numbers<[1], [0], [0], [1], [0, 0, 1, 1], [], []>} : vector<4x32xbf16>, vector<32x32xbf16>, vector<4x32xf32> -> vector<4x32xf32>
    %cst_17 = arith.constant 0.000000e+00 : f32
    %24 = vector.broadcast %cst_17 : f32 to vector<1x32xf32>
    %25 = vector.extract_strided_slice %23 {offsets = [0, 0], sizes = [3, 32], strides = [1, 1]} : vector<4x32xf32> to vector<3x32xf32>
    %26 = tpu.concatenate %24, %25 in 0 : vector<1x32xf32>, vector<3x32xf32> -> vector<4x32xf32>
    %27 = arith.addf %20, %26 : vector<4x32xf32>
    %c3 = arith.constant 3 : index
    %c0_18 = arith.constant 0 : index
    %c0_19 = arith.constant 0 : index
    %28 = vector.load %arg4[%c3, %c0_18, %c0_19] : memref<9x32x32xbf16, #tpu.memory_space<vmem>>, vector<1x32x32xbf16>
    %29 = vector.shape_cast %28 : vector<1x32x32xbf16> to vector<32x32xbf16>
    %cst_20 = arith.constant dense<0.000000e+00> : vector<4x32xf32>
    %30 = tpu.matmul %5, %29, %cst_20 {dimension_numbers = #tpu.dot_dimension_numbers<[1], [0], [0], [1], [0, 0, 1, 1], [], []>} : vector<4x32xbf16>, vector<32x32xbf16>, vector<4x32xf32> -> vector<4x32xf32>
    %cst_21 = arith.constant 0.000000e+00 : f32
    %31 = vector.broadcast %cst_21 : f32 to vector<1x32xf32>
    %32 = vector.extract_strided_slice %30 {offsets = [0, 0], sizes = [3, 32], strides = [1, 1]} : vector<4x32xf32> to vector<3x32xf32>
    %33 = tpu.concatenate %31, %32 in 0 : vector<1x32xf32>, vector<3x32xf32> -> vector<4x32xf32>
    %34 = arith.addf %27, %33 : vector<4x32xf32>
    %c4 = arith.constant 4 : index
    %c0_22 = arith.constant 0 : index
    %c0_23 = arith.constant 0 : index
    %35 = vector.load %arg4[%c4, %c0_22, %c0_23] : memref<9x32x32xbf16, #tpu.memory_space<vmem>>, vector<1x32x32xbf16>
    %36 = vector.shape_cast %35 : vector<1x32x32xbf16> to vector<32x32xbf16>
    %cst_24 = arith.constant dense<0.000000e+00> : vector<4x32xf32>
    %37 = tpu.matmul %1, %36, %cst_24 {dimension_numbers = #tpu.dot_dimension_numbers<[1], [0], [0], [1], [0, 0, 1, 1], [], []>} : vector<4x32xbf16>, vector<32x32xbf16>, vector<4x32xf32> -> vector<4x32xf32>
    %38 = arith.addf %34, %37 : vector<4x32xf32>
    %c5 = arith.constant 5 : index
    %c0_25 = arith.constant 0 : index
    %c0_26 = arith.constant 0 : index
    %39 = vector.load %arg4[%c5, %c0_25, %c0_26] : memref<9x32x32xbf16, #tpu.memory_space<vmem>>, vector<1x32x32xbf16>
    %40 = vector.shape_cast %39 : vector<1x32x32xbf16> to vector<32x32xbf16>
    %cst_27 = arith.constant dense<0.000000e+00> : vector<4x32xf32>
    %41 = tpu.matmul %7, %40, %cst_27 {dimension_numbers = #tpu.dot_dimension_numbers<[1], [0], [0], [1], [0, 0, 1, 1], [], []>} : vector<4x32xbf16>, vector<32x32xbf16>, vector<4x32xf32> -> vector<4x32xf32>
    %cst_28 = arith.constant 0.000000e+00 : f32
    %42 = vector.broadcast %cst_28 : f32 to vector<1x32xf32>
    %43 = vector.extract_strided_slice %41 {offsets = [1, 0], sizes = [3, 32], strides = [1, 1]} : vector<4x32xf32> to vector<3x32xf32>
    %44 = tpu.concatenate %43, %42 in 0 : vector<3x32xf32>, vector<1x32xf32> -> vector<4x32xf32>
    %45 = arith.addf %38, %44 : vector<4x32xf32>
    %c6 = arith.constant 6 : index
    %c0_29 = arith.constant 0 : index
    %c0_30 = arith.constant 0 : index
    %46 = vector.load %arg4[%c6, %c0_29, %c0_30] : memref<9x32x32xbf16, #tpu.memory_space<vmem>>, vector<1x32x32xbf16>
    %47 = vector.shape_cast %46 : vector<1x32x32xbf16> to vector<32x32xbf16>
    %cst_31 = arith.constant dense<0.000000e+00> : vector<4x32xf32>
    %48 = tpu.matmul %5, %47, %cst_31 {dimension_numbers = #tpu.dot_dimension_numbers<[1], [0], [0], [1], [0, 0, 1, 1], [], []>} : vector<4x32xbf16>, vector<32x32xbf16>, vector<4x32xf32> -> vector<4x32xf32>
    %cst_32 = arith.constant 0.000000e+00 : f32
    %49 = vector.broadcast %cst_32 : f32 to vector<1x32xf32>
    %50 = vector.extract_strided_slice %48 {offsets = [1, 0], sizes = [3, 32], strides = [1, 1]} : vector<4x32xf32> to vector<3x32xf32>
    %51 = tpu.concatenate %50, %49 in 0 : vector<3x32xf32>, vector<1x32xf32> -> vector<4x32xf32>
    %52 = arith.addf %45, %51 : vector<4x32xf32>
    %c7 = arith.constant 7 : index
    %c0_33 = arith.constant 0 : index
    %c0_34 = arith.constant 0 : index
    %53 = vector.load %arg4[%c7, %c0_33, %c0_34] : memref<9x32x32xbf16, #tpu.memory_space<vmem>>, vector<1x32x32xbf16>
    %54 = vector.shape_cast %53 : vector<1x32x32xbf16> to vector<32x32xbf16>
    %cst_35 = arith.constant dense<0.000000e+00> : vector<4x32xf32>
    %55 = tpu.matmul %1, %54, %cst_35 {dimension_numbers = #tpu.dot_dimension_numbers<[1], [0], [0], [1], [0, 0, 1, 1], [], []>} : vector<4x32xbf16>, vector<32x32xbf16>, vector<4x32xf32> -> vector<4x32xf32>
    %cst_36 = arith.constant 0.000000e+00 : f32
    %56 = vector.broadcast %cst_36 : f32 to vector<2x32xf32>
    %57 = vector.extract_strided_slice %55 {offsets = [2, 0], sizes = [2, 32], strides = [1, 1]} : vector<4x32xf32> to vector<2x32xf32>
    %58 = tpu.concatenate %57, %56 in 0 : vector<2x32xf32>, vector<2x32xf32> -> vector<4x32xf32>
    %59 = arith.addf %52, %58 : vector<4x32xf32>
    %c8 = arith.constant 8 : index
    %c0_37 = arith.constant 0 : index
    %c0_38 = arith.constant 0 : index
    %60 = vector.load %arg4[%c8, %c0_37, %c0_38] : memref<9x32x32xbf16, #tpu.memory_space<vmem>>, vector<1x32x32xbf16>
    %61 = vector.shape_cast %60 : vector<1x32x32xbf16> to vector<32x32xbf16>
    %cst_39 = arith.constant dense<0.000000e+00> : vector<4x32xf32>
    %62 = tpu.matmul %7, %61, %cst_39 {dimension_numbers = #tpu.dot_dimension_numbers<[1], [0], [0], [1], [0, 0, 1, 1], [], []>} : vector<4x32xbf16>, vector<32x32xbf16>, vector<4x32xf32> -> vector<4x32xf32>
    %cst_40 = arith.constant 0.000000e+00 : f32
    %63 = vector.broadcast %cst_40 : f32 to vector<3x32xf32>
    %64 = vector.extract_strided_slice %62 {offsets = [3, 0], sizes = [1, 32], strides = [1, 1]} : vector<4x32xf32> to vector<1x32xf32>
    %65 = tpu.concatenate %64, %63 in 0 : vector<1x32xf32>, vector<3x32xf32> -> vector<4x32xf32>
    %66 = arith.addf %59, %65 : vector<4x32xf32>
    %c0_41 = arith.constant 0 : index
    %c0_42 = arith.constant 0 : index
    %67 = vector.load %arg5[%c0_41, %c0_42] : memref<1x32xf32, #tpu.memory_space<vmem>>, vector<1x32xf32>
    %68 = vector.broadcast %67 : vector<1x32xf32> to vector<4x32xf32>
    %69 = arith.mulf %66, %68 : vector<4x32xf32>
    %c0_43 = arith.constant 0 : index
    %c0_44 = arith.constant 0 : index
    %70 = vector.load %arg6[%c0_43, %c0_44] : memref<1x32xf32, #tpu.memory_space<vmem>>, vector<1x32xf32>
    %71 = vector.broadcast %70 : vector<1x32xf32> to vector<4x32xf32>
    %72 = arith.addf %69, %71 : vector<4x32xf32>
    %cst_45 = arith.constant 0.000000e+00 : f32
    %73 = vector.broadcast %cst_45 : f32 to vector<4x32xf32>
    %74 = arith.maximumf %72, %73 : vector<4x32xf32>
    %75 = arith.truncf %74 : vector<4x32xf32> to vector<4x32xbf16>
    %76 = vector.broadcast %2 : vector<4x1xbf16> to vector<4x32xbf16>
    %77 = arith.mulf %75, %76 : vector<4x32xbf16>
    %78 = vector.broadcast %3 : vector<4x1xbf16> to vector<4x32xbf16>
    %79 = arith.mulf %75, %78 : vector<4x32xbf16>
    %c0_46 = arith.constant 0 : index
    %c0_47 = arith.constant 0 : index
    %c0_48 = arith.constant 0 : index
    %80 = vector.load %arg7[%c0_46, %c0_47, %c0_48] : memref<9x32x32xbf16, #tpu.memory_space<vmem>>, vector<1x32x32xbf16>
    %81 = vector.shape_cast %80 : vector<1x32x32xbf16> to vector<32x32xbf16>
    %cst_49 = arith.constant dense<0.000000e+00> : vector<4x32xf32>
    %82 = tpu.matmul %77, %81, %cst_49 {dimension_numbers = #tpu.dot_dimension_numbers<[1], [0], [0], [1], [0, 0, 1, 1], [], []>} : vector<4x32xbf16>, vector<32x32xbf16>, vector<4x32xf32> -> vector<4x32xf32>
    %cst_50 = arith.constant 0.000000e+00 : f32
    %83 = vector.broadcast %cst_50 : f32 to vector<3x32xf32>
    %84 = vector.extract_strided_slice %82 {offsets = [0, 0], sizes = [1, 32], strides = [1, 1]} : vector<4x32xf32> to vector<1x32xf32>
    %85 = tpu.concatenate %83, %84 in 0 : vector<3x32xf32>, vector<1x32xf32> -> vector<4x32xf32>
    %c1_51 = arith.constant 1 : index
    %c0_52 = arith.constant 0 : index
    %c0_53 = arith.constant 0 : index
    %86 = vector.load %arg7[%c1_51, %c0_52, %c0_53] : memref<9x32x32xbf16, #tpu.memory_space<vmem>>, vector<1x32x32xbf16>
    %87 = vector.shape_cast %86 : vector<1x32x32xbf16> to vector<32x32xbf16>
    %cst_54 = arith.constant dense<0.000000e+00> : vector<4x32xf32>
    %88 = tpu.matmul %75, %87, %cst_54 {dimension_numbers = #tpu.dot_dimension_numbers<[1], [0], [0], [1], [0, 0, 1, 1], [], []>} : vector<4x32xbf16>, vector<32x32xbf16>, vector<4x32xf32> -> vector<4x32xf32>
    %cst_55 = arith.constant 0.000000e+00 : f32
    %89 = vector.broadcast %cst_55 : f32 to vector<2x32xf32>
    %90 = vector.extract_strided_slice %88 {offsets = [0, 0], sizes = [2, 32], strides = [1, 1]} : vector<4x32xf32> to vector<2x32xf32>
    %91 = tpu.concatenate %89, %90 in 0 : vector<2x32xf32>, vector<2x32xf32> -> vector<4x32xf32>
    %92 = arith.addf %85, %91 : vector<4x32xf32>
    %c2_56 = arith.constant 2 : index
    %c0_57 = arith.constant 0 : index
    %c0_58 = arith.constant 0 : index
    %93 = vector.load %arg7[%c2_56, %c0_57, %c0_58] : memref<9x32x32xbf16, #tpu.memory_space<vmem>>, vector<1x32x32xbf16>
    %94 = vector.shape_cast %93 : vector<1x32x32xbf16> to vector<32x32xbf16>
    %cst_59 = arith.constant dense<0.000000e+00> : vector<4x32xf32>
    %95 = tpu.matmul %79, %94, %cst_59 {dimension_numbers = #tpu.dot_dimension_numbers<[1], [0], [0], [1], [0, 0, 1, 1], [], []>} : vector<4x32xbf16>, vector<32x32xbf16>, vector<4x32xf32> -> vector<4x32xf32>
    %cst_60 = arith.constant 0.000000e+00 : f32
    %96 = vector.broadcast %cst_60 : f32 to vector<1x32xf32>
    %97 = vector.extract_strided_slice %95 {offsets = [0, 0], sizes = [3, 32], strides = [1, 1]} : vector<4x32xf32> to vector<3x32xf32>
    %98 = tpu.concatenate %96, %97 in 0 : vector<1x32xf32>, vector<3x32xf32> -> vector<4x32xf32>
    %99 = arith.addf %92, %98 : vector<4x32xf32>
    %c3_61 = arith.constant 3 : index
    %c0_62 = arith.constant 0 : index
    %c0_63 = arith.constant 0 : index
    %100 = vector.load %arg7[%c3_61, %c0_62, %c0_63] : memref<9x32x32xbf16, #tpu.memory_space<vmem>>, vector<1x32x32xbf16>
    %101 = vector.shape_cast %100 : vector<1x32x32xbf16> to vector<32x32xbf16>
    %cst_64 = arith.constant dense<0.000000e+00> : vector<4x32xf32>
    %102 = tpu.matmul %77, %101, %cst_64 {dimension_numbers = #tpu.dot_dimension_numbers<[1], [0], [0], [1], [0, 0, 1, 1], [], []>} : vector<4x32xbf16>, vector<32x32xbf16>, vector<4x32xf32> -> vector<4x32xf32>
    %cst_65 = arith.constant 0.000000e+00 : f32
    %103 = vector.broadcast %cst_65 : f32 to vector<1x32xf32>
    %104 = vector.extract_strided_slice %102 {offsets = [0, 0], sizes = [3, 32], strides = [1, 1]} : vector<4x32xf32> to vector<3x32xf32>
    %105 = tpu.concatenate %103, %104 in 0 : vector<1x32xf32>, vector<3x32xf32> -> vector<4x32xf32>
    %106 = arith.addf %99, %105 : vector<4x32xf32>
    %c4_66 = arith.constant 4 : index
    %c0_67 = arith.constant 0 : index
    %c0_68 = arith.constant 0 : index
    %107 = vector.load %arg7[%c4_66, %c0_67, %c0_68] : memref<9x32x32xbf16, #tpu.memory_space<vmem>>, vector<1x32x32xbf16>
    %108 = vector.shape_cast %107 : vector<1x32x32xbf16> to vector<32x32xbf16>
    %cst_69 = arith.constant dense<0.000000e+00> : vector<4x32xf32>
    %109 = tpu.matmul %75, %108, %cst_69 {dimension_numbers = #tpu.dot_dimension_numbers<[1], [0], [0], [1], [0, 0, 1, 1], [], []>} : vector<4x32xbf16>, vector<32x32xbf16>, vector<4x32xf32> -> vector<4x32xf32>
    %110 = arith.addf %106, %109 : vector<4x32xf32>
    %c5_70 = arith.constant 5 : index
    %c0_71 = arith.constant 0 : index
    %c0_72 = arith.constant 0 : index
    %111 = vector.load %arg7[%c5_70, %c0_71, %c0_72] : memref<9x32x32xbf16, #tpu.memory_space<vmem>>, vector<1x32x32xbf16>
    %112 = vector.shape_cast %111 : vector<1x32x32xbf16> to vector<32x32xbf16>
    %cst_73 = arith.constant dense<0.000000e+00> : vector<4x32xf32>
    %113 = tpu.matmul %79, %112, %cst_73 {dimension_numbers = #tpu.dot_dimension_numbers<[1], [0], [0], [1], [0, 0, 1, 1], [], []>} : vector<4x32xbf16>, vector<32x32xbf16>, vector<4x32xf32> -> vector<4x32xf32>
    %cst_74 = arith.constant 0.000000e+00 : f32
    %114 = vector.broadcast %cst_74 : f32 to vector<1x32xf32>
    %115 = vector.extract_strided_slice %113 {offsets = [1, 0], sizes = [3, 32], strides = [1, 1]} : vector<4x32xf32> to vector<3x32xf32>
    %116 = tpu.concatenate %115, %114 in 0 : vector<3x32xf32>, vector<1x32xf32> -> vector<4x32xf32>
    %117 = arith.addf %110, %116 : vector<4x32xf32>
    %c6_75 = arith.constant 6 : index
    %c0_76 = arith.constant 0 : index
    %c0_77 = arith.constant 0 : index
    %118 = vector.load %arg7[%c6_75, %c0_76, %c0_77] : memref<9x32x32xbf16, #tpu.memory_space<vmem>>, vector<1x32x32xbf16>
    %119 = vector.shape_cast %118 : vector<1x32x32xbf16> to vector<32x32xbf16>
    %cst_78 = arith.constant dense<0.000000e+00> : vector<4x32xf32>
    %120 = tpu.matmul %77, %119, %cst_78 {dimension_numbers = #tpu.dot_dimension_numbers<[1], [0], [0], [1], [0, 0, 1, 1], [], []>} : vector<4x32xbf16>, vector<32x32xbf16>, vector<4x32xf32> -> vector<4x32xf32>
    %cst_79 = arith.constant 0.000000e+00 : f32
    %121 = vector.broadcast %cst_79 : f32 to vector<1x32xf32>
    %122 = vector.extract_strided_slice %120 {offsets = [1, 0], sizes = [3, 32], strides = [1, 1]} : vector<4x32xf32> to vector<3x32xf32>
    %123 = tpu.concatenate %122, %121 in 0 : vector<3x32xf32>, vector<1x32xf32> -> vector<4x32xf32>
    %124 = arith.addf %117, %123 : vector<4x32xf32>
    %c7_80 = arith.constant 7 : index
    %c0_81 = arith.constant 0 : index
    %c0_82 = arith.constant 0 : index
    %125 = vector.load %arg7[%c7_80, %c0_81, %c0_82] : memref<9x32x32xbf16, #tpu.memory_space<vmem>>, vector<1x32x32xbf16>
    %126 = vector.shape_cast %125 : vector<1x32x32xbf16> to vector<32x32xbf16>
    %cst_83 = arith.constant dense<0.000000e+00> : vector<4x32xf32>
    %127 = tpu.matmul %75, %126, %cst_83 {dimension_numbers = #tpu.dot_dimension_numbers<[1], [0], [0], [1], [0, 0, 1, 1], [], []>} : vector<4x32xbf16>, vector<32x32xbf16>, vector<4x32xf32> -> vector<4x32xf32>
    %cst_84 = arith.constant 0.000000e+00 : f32
    %128 = vector.broadcast %cst_84 : f32 to vector<2x32xf32>
    %129 = vector.extract_strided_slice %127 {offsets = [2, 0], sizes = [2, 32], strides = [1, 1]} : vector<4x32xf32> to vector<2x32xf32>
    %130 = tpu.concatenate %129, %128 in 0 : vector<2x32xf32>, vector<2x32xf32> -> vector<4x32xf32>
    %131 = arith.addf %124, %130 : vector<4x32xf32>
    %c8_85 = arith.constant 8 : index
    %c0_86 = arith.constant 0 : index
    %c0_87 = arith.constant 0 : index
    %132 = vector.load %arg7[%c8_85, %c0_86, %c0_87] : memref<9x32x32xbf16, #tpu.memory_space<vmem>>, vector<1x32x32xbf16>
    %133 = vector.shape_cast %132 : vector<1x32x32xbf16> to vector<32x32xbf16>
    %cst_88 = arith.constant dense<0.000000e+00> : vector<4x32xf32>
    %134 = tpu.matmul %79, %133, %cst_88 {dimension_numbers = #tpu.dot_dimension_numbers<[1], [0], [0], [1], [0, 0, 1, 1], [], []>} : vector<4x32xbf16>, vector<32x32xbf16>, vector<4x32xf32> -> vector<4x32xf32>
    %cst_89 = arith.constant 0.000000e+00 : f32
    %135 = vector.broadcast %cst_89 : f32 to vector<3x32xf32>
    %136 = vector.extract_strided_slice %134 {offsets = [3, 0], sizes = [1, 32], strides = [1, 1]} : vector<4x32xf32> to vector<1x32xf32>
    %137 = tpu.concatenate %136, %135 in 0 : vector<1x32xf32>, vector<3x32xf32> -> vector<4x32xf32>
    %138 = arith.addf %131, %137 : vector<4x32xf32>
    %c0_90 = arith.constant 0 : index
    %c0_91 = arith.constant 0 : index
    %139 = vector.load %arg8[%c0_90, %c0_91] : memref<1x32xf32, #tpu.memory_space<vmem>>, vector<1x32xf32>
    %140 = vector.broadcast %139 : vector<1x32xf32> to vector<4x32xf32>
    %141 = arith.mulf %138, %140 : vector<4x32xf32>
    %c0_92 = arith.constant 0 : index
    %c0_93 = arith.constant 0 : index
    %142 = vector.load %arg9[%c0_92, %c0_93] : memref<1x32xf32, #tpu.memory_space<vmem>>, vector<1x32xf32>
    %143 = vector.broadcast %142 : vector<1x32xf32> to vector<4x32xf32>
    %144 = arith.addf %141, %143 : vector<4x32xf32>
    %145 = arith.extf %1 : vector<4x32xbf16> to vector<4x32xf32>
    %146 = arith.addf %144, %145 : vector<4x32xf32>
    %cst_94 = arith.constant 0.000000e+00 : f32
    %147 = vector.broadcast %cst_94 : f32 to vector<4x32xf32>
    %148 = arith.maximumf %146, %147 : vector<4x32xf32>
    %149 = arith.truncf %148 : vector<4x32xf32> to vector<4x32xbf16>
    %c0_95 = arith.constant 0 : index
    %c0_96 = arith.constant 0 : index
    %c0_97 = arith.constant 0 : index
    %150 = vector.load %arg10[%c0_95, %c0_96, %c0_97] : memref<1x4x32xbf16, #tpu.memory_space<vmem>>, vector<1x4x32xbf16>
    %151 = vector.shape_cast %150 : vector<1x4x32xbf16> to vector<4x32xbf16>
    %152 = vector.shape_cast %149 : vector<4x32xbf16> to vector<1x4x32xbf16>
    tpu.vector_store %arg10[%c0_95, %c0_96, %c0_97], %152 {strides = array<i32>} : memref<1x4x32xbf16, #tpu.memory_space<vmem>>, vector<1x4x32xbf16>,
    return
  }
  func.func @transform_0(%arg0: i32) -> (i32, i32, i32) {
    %c0_i32 = arith.constant 0 : i32
    %c0_i32_0 = arith.constant 0 : i32
    %c0_i32_1 = arith.constant 0 : i32
    return %arg0, %c0_i32, %c0_i32_0 : i32, i32, i32
  }
  func.func @transform_1(%arg0: i32) -> (i32, i32) {
    %c0_i32 = arith.constant 0 : i32
    %c0_i32_0 = arith.constant 0 : i32
    %c0_i32_1 = arith.constant 0 : i32
    return %c0_i32, %c0_i32_0 : i32, i32
  }
  func.func @transform_2(%arg0: i32) -> (i32, i32) {
    %c0_i32 = arith.constant 0 : i32
    %c0_i32_0 = arith.constant 0 : i32
    %c0_i32_1 = arith.constant 0 : i32
    return %c0_i32, %c0_i32_0 : i32, i32
  }
  func.func @transform_3(%arg0: i32) -> (i32, i32, i32) {
    %c0_i32 = arith.constant 0 : i32
    %c0_i32_0 = arith.constant 0 : i32
    %c0_i32_1 = arith.constant 0 : i32
    %c0_i32_2 = arith.constant 0 : i32
    return %c0_i32, %c0_i32_0, %c0_i32_1 : i32, i32, i32
  }
  func.func @transform_4(%arg0: i32) -> (i32, i32) {
    %c0_i32 = arith.constant 0 : i32
    %c0_i32_0 = arith.constant 0 : i32
    %c0_i32_1 = arith.constant 0 : i32
    return %c0_i32, %c0_i32_0 : i32, i32
  }
  func.func @transform_5(%arg0: i32) -> (i32, i32) {
    %c0_i32 = arith.constant 0 : i32
    %c0_i32_0 = arith.constant 0 : i32
    %c0_i32_1 = arith.constant 0 : i32
    return %c0_i32, %c0_i32_0 : i32, i32
  }
  func.func @transform_6(%arg0: i32) -> (i32, i32, i32) {
    %c0_i32 = arith.constant 0 : i32
    %c0_i32_0 = arith.constant 0 : i32
    %c0_i32_1 = arith.constant 0 : i32
    %c0_i32_2 = arith.constant 0 : i32
    return %c0_i32, %c0_i32_0, %c0_i32_1 : i32, i32, i32
  }
  func.func @transform_7(%arg0: i32) -> (i32, i32) {
    %c0_i32 = arith.constant 0 : i32
    %c0_i32_0 = arith.constant 0 : i32
    %c0_i32_1 = arith.constant 0 : i32
    return %c0_i32, %c0_i32_0 : i32, i32
  }
  func.func @transform_8(%arg0: i32) -> (i32, i32) {
    %c0_i32 = arith.constant 0 : i32
    %c0_i32_0 = arith.constant 0 : i32
    %c0_i32_1 = arith.constant 0 : i32
    return %c0_i32, %c0_i32_0 : i32, i32
  }
  func.func @transform_9(%arg0: i32) -> (i32, i32, i32) {
    %c0_i32 = arith.constant 0 : i32
    %c0_i32_0 = arith.constant 0 : i32
    %c0_i32_1 = arith.constant 0 : i32
    return %arg0, %c0_i32, %c0_i32_0 : i32, i32, i32
  }
}

module attributes {stable_mosaic.version = 11 : i64} {
  func.func @_down_block_kernel(%arg0: i32, %arg1: memref<1x1x288xbf16, #tpu.memory_space<vmem>>, %arg2: memref<1x1xbf16, #tpu.memory_space<vmem>>, %arg3: memref<1x1xbf16, #tpu.memory_space<vmem>>, %arg4: memref<288x64xbf16, #tpu.memory_space<vmem>>, %arg5: memref<32x64xbf16, #tpu.memory_space<vmem>>, %arg6: memref<1x64xf32, #tpu.memory_space<vmem>>, %arg7: memref<1x64xf32, #tpu.memory_space<vmem>>, %arg8: memref<1x64xf32, #tpu.memory_space<vmem>>, %arg9: memref<1x64xf32, #tpu.memory_space<vmem>>, %arg10: memref<9x64x64xbf16, #tpu.memory_space<vmem>>, %arg11: memref<1x64xf32, #tpu.memory_space<vmem>>, %arg12: memref<1x64xf32, #tpu.memory_space<vmem>>, %arg13: memref<1x1x64xbf16, #tpu.memory_space<vmem>>) attributes {dimension_semantics = [#tpu.dimension_semantics<parallel>], iteration_bounds = array<i64: 2>, scalar_prefetch = 0 : i64, scratch_operands = 0 : i64, tpu.core_type = #tpu.core_type<tc>, window_params = [{transform_indices = @transform_0, window_bounds = array<i64: 1, 1, 288>}, {pipeline_mode = #tpu.pipeline_mode<synchronous>, transform_indices = @transform_1, window_bounds = array<i64: 1, 1>}, {pipeline_mode = #tpu.pipeline_mode<synchronous>, transform_indices = @transform_2, window_bounds = array<i64: 1, 1>}, {pipeline_mode = #tpu.pipeline_mode<synchronous>, transform_indices = @transform_3, window_bounds = array<i64: 288, 64>}, {pipeline_mode = #tpu.pipeline_mode<synchronous>, transform_indices = @transform_4, window_bounds = array<i64: 32, 64>}, {pipeline_mode = #tpu.pipeline_mode<synchronous>, transform_indices = @transform_5, window_bounds = array<i64: 1, 64>}, {pipeline_mode = #tpu.pipeline_mode<synchronous>, transform_indices = @transform_6, window_bounds = array<i64: 1, 64>}, {pipeline_mode = #tpu.pipeline_mode<synchronous>, transform_indices = @transform_7, window_bounds = array<i64: 1, 64>}, {pipeline_mode = #tpu.pipeline_mode<synchronous>, transform_indices = @transform_8, window_bounds = array<i64: 1, 64>}, {pipeline_mode = #tpu.pipeline_mode<synchronous>, transform_indices = @transform_9, window_bounds = array<i64: 9, 64, 64>}, {pipeline_mode = #tpu.pipeline_mode<synchronous>, transform_indices = @transform_10, window_bounds = array<i64: 1, 64>}, {pipeline_mode = #tpu.pipeline_mode<synchronous>, transform_indices = @transform_11, window_bounds = array<i64: 1, 64>}, {transform_indices = @transform_12, window_bounds = array<i64: 1, 1, 64>}]} {
    %c0 = arith.constant 0 : index
    %c0_0 = arith.constant 0 : index
    %c0_1 = arith.constant 0 : index
    %0 = vector.load %arg1[%c0, %c0_0, %c0_1] : memref<1x1x288xbf16, #tpu.memory_space<vmem>>, vector<1x1x288xbf16>
    %1 = vector.shape_cast %0 : vector<1x1x288xbf16> to vector<1x288xbf16>
    %c0_2 = arith.constant 0 : index
    %c0_3 = arith.constant 0 : index
    %2 = vector.load %arg4[%c0_2, %c0_3] : memref<288x64xbf16, #tpu.memory_space<vmem>>, vector<288x64xbf16>
    %cst = arith.constant dense<0.000000e+00> : vector<1x64xf32>
    %3 = tpu.matmul %1, %2, %cst {dimension_numbers = #tpu.dot_dimension_numbers<[1], [0], [0], [1], [0, 0, 1, 1], [], []>} : vector<1x288xbf16>, vector<288x64xbf16>, vector<1x64xf32> -> vector<1x64xf32>
    %c0_4 = arith.constant 0 : index
    %c0_5 = arith.constant 0 : index
    %4 = vector.load %arg6[%c0_4, %c0_5] : memref<1x64xf32, #tpu.memory_space<vmem>>, vector<1x64xf32>
    %5 = arith.mulf %3, %4 : vector<1x64xf32>
    %c0_6 = arith.constant 0 : index
    %c0_7 = arith.constant 0 : index
    %6 = vector.load %arg7[%c0_6, %c0_7] : memref<1x64xf32, #tpu.memory_space<vmem>>, vector<1x64xf32>
    %7 = arith.addf %5, %6 : vector<1x64xf32>
    %cst_8 = arith.constant 0.000000e+00 : f32
    %8 = vector.broadcast %cst_8 : f32 to vector<1x64xf32>
    %9 = arith.maximumf %7, %8 : vector<1x64xf32>
    %10 = vector.extract_strided_slice %1 {offsets = [0, 128], sizes = [1, 32], strides = [1, 1]} : vector<1x288xbf16> to vector<1x32xbf16>
    %c0_9 = arith.constant 0 : index
    %c0_10 = arith.constant 0 : index
    %11 = vector.load %arg5[%c0_9, %c0_10] : memref<32x64xbf16, #tpu.memory_space<vmem>>, vector<32x64xbf16>
    %cst_11 = arith.constant dense<0.000000e+00> : vector<1x64xf32>
    %12 = tpu.matmul %10, %11, %cst_11 {dimension_numbers = #tpu.dot_dimension_numbers<[1], [0], [0], [1], [0, 0, 1, 1], [], []>} : vector<1x32xbf16>, vector<32x64xbf16>, vector<1x64xf32> -> vector<1x64xf32>
    %c0_12 = arith.constant 0 : index
    %c0_13 = arith.constant 0 : index
    %13 = vector.load %arg8[%c0_12, %c0_13] : memref<1x64xf32, #tpu.memory_space<vmem>>, vector<1x64xf32>
    %14 = arith.mulf %12, %13 : vector<1x64xf32>
    %c0_14 = arith.constant 0 : index
    %c0_15 = arith.constant 0 : index
    %15 = vector.load %arg9[%c0_14, %c0_15] : memref<1x64xf32, #tpu.memory_space<vmem>>, vector<1x64xf32>
    %16 = arith.addf %14, %15 : vector<1x64xf32>
    %17 = arith.truncf %9 : vector<1x64xf32> to vector<1x64xbf16>
    %c0_16 = arith.constant 0 : index
    %c0_17 = arith.constant 0 : index
    %18 = vector.load %arg2[%c0_16, %c0_17] : memref<1x1xbf16, #tpu.memory_space<vmem>>, vector<1x1xbf16>
    %c0_18 = arith.constant 0 : index
    %c0_19 = arith.constant 0 : index
    %19 = vector.load %arg3[%c0_18, %c0_19] : memref<1x1xbf16, #tpu.memory_space<vmem>>, vector<1x1xbf16>
    %20 = vector.broadcast %18 : vector<1x1xbf16> to vector<1x64xbf16>
    %21 = arith.mulf %17, %20 : vector<1x64xbf16>
    %22 = vector.broadcast %19 : vector<1x1xbf16> to vector<1x64xbf16>
    %23 = arith.mulf %17, %22 : vector<1x64xbf16>
    %cst_20 = arith.constant 0.000000e+00 : f32
    %24 = vector.broadcast %cst_20 : f32 to vector<1x64xf32>
    %cst_21 = arith.constant 0.000000e+00 : f32
    %25 = vector.broadcast %cst_21 : f32 to vector<1x64xf32>
    %26 = arith.addf %24, %25 : vector<1x64xf32>
    %c2 = arith.constant 2 : index
    %c0_22 = arith.constant 0 : index
    %c0_23 = arith.constant 0 : index
    %27 = vector.load %arg10[%c2, %c0_22, %c0_23] : memref<9x64x64xbf16, #tpu.memory_space<vmem>>, vector<1x64x64xbf16>
    %28 = vector.shape_cast %27 : vector<1x64x64xbf16> to vector<64x64xbf16>
    %cst_24 = arith.constant dense<0.000000e+00> : vector<1x64xf32>
    %29 = tpu.matmul %23, %28, %cst_24 {dimension_numbers = #tpu.dot_dimension_numbers<[1], [0], [0], [1], [0, 0, 1, 1], [], []>} : vector<1x64xbf16>, vector<64x64xbf16>, vector<1x64xf32> -> vector<1x64xf32>
    %30 = arith.addf %26, %29 : vector<1x64xf32>
    %cst_25 = arith.constant 0.000000e+00 : f32
    %31 = vector.broadcast %cst_25 : f32 to vector<1x64xf32>
    %32 = arith.addf %30, %31 : vector<1x64xf32>
    %c4 = arith.constant 4 : index
    %c0_26 = arith.constant 0 : index
    %c0_27 = arith.constant 0 : index
    %33 = vector.load %arg10[%c4, %c0_26, %c0_27] : memref<9x64x64xbf16, #tpu.memory_space<vmem>>, vector<1x64x64xbf16>
    %34 = vector.shape_cast %33 : vector<1x64x64xbf16> to vector<64x64xbf16>
    %cst_28 = arith.constant dense<0.000000e+00> : vector<1x64xf32>
    %35 = tpu.matmul %17, %34, %cst_28 {dimension_numbers = #tpu.dot_dimension_numbers<[1], [0], [0], [1], [0, 0, 1, 1], [], []>} : vector<1x64xbf16>, vector<64x64xbf16>, vector<1x64xf32> -> vector<1x64xf32>
    %36 = arith.addf %32, %35 : vector<1x64xf32>
    %cst_29 = arith.constant 0.000000e+00 : f32
    %37 = vector.broadcast %cst_29 : f32 to vector<1x64xf32>
    %38 = arith.addf %36, %37 : vector<1x64xf32>
    %c6 = arith.constant 6 : index
    %c0_30 = arith.constant 0 : index
    %c0_31 = arith.constant 0 : index
    %39 = vector.load %arg10[%c6, %c0_30, %c0_31] : memref<9x64x64xbf16, #tpu.memory_space<vmem>>, vector<1x64x64xbf16>
    %40 = vector.shape_cast %39 : vector<1x64x64xbf16> to vector<64x64xbf16>
    %cst_32 = arith.constant dense<0.000000e+00> : vector<1x64xf32>
    %41 = tpu.matmul %21, %40, %cst_32 {dimension_numbers = #tpu.dot_dimension_numbers<[1], [0], [0], [1], [0, 0, 1, 1], [], []>} : vector<1x64xbf16>, vector<64x64xbf16>, vector<1x64xf32> -> vector<1x64xf32>
    %42 = arith.addf %38, %41 : vector<1x64xf32>
    %cst_33 = arith.constant 0.000000e+00 : f32
    %43 = vector.broadcast %cst_33 : f32 to vector<1x64xf32>
    %44 = arith.addf %42, %43 : vector<1x64xf32>
    %cst_34 = arith.constant 0.000000e+00 : f32
    %45 = vector.broadcast %cst_34 : f32 to vector<1x64xf32>
    %46 = arith.addf %44, %45 : vector<1x64xf32>
    %c0_35 = arith.constant 0 : index
    %c0_36 = arith.constant 0 : index
    %47 = vector.load %arg11[%c0_35, %c0_36] : memref<1x64xf32, #tpu.memory_space<vmem>>, vector<1x64xf32>
    %48 = arith.mulf %46, %47 : vector<1x64xf32>
    %c0_37 = arith.constant 0 : index
    %c0_38 = arith.constant 0 : index
    %49 = vector.load %arg12[%c0_37, %c0_38] : memref<1x64xf32, #tpu.memory_space<vmem>>, vector<1x64xf32>
    %50 = arith.addf %48, %49 : vector<1x64xf32>
    %51 = arith.addf %50, %16 : vector<1x64xf32>
    %cst_39 = arith.constant 0.000000e+00 : f32
    %52 = vector.broadcast %cst_39 : f32 to vector<1x64xf32>
    %53 = arith.maximumf %51, %52 : vector<1x64xf32>
    %54 = arith.truncf %53 : vector<1x64xf32> to vector<1x64xbf16>
    %c0_40 = arith.constant 0 : index
    %c0_41 = arith.constant 0 : index
    %c0_42 = arith.constant 0 : index
    %55 = vector.load %arg13[%c0_40, %c0_41, %c0_42] : memref<1x1x64xbf16, #tpu.memory_space<vmem>>, vector<1x1x64xbf16>
    %56 = vector.shape_cast %55 : vector<1x1x64xbf16> to vector<1x64xbf16>
    %57 = vector.shape_cast %54 : vector<1x64xbf16> to vector<1x1x64xbf16>
    tpu.vector_store %arg13[%c0_40, %c0_41, %c0_42], %57 {strides = array<i32>} : memref<1x1x64xbf16, #tpu.memory_space<vmem>>, vector<1x1x64xbf16>,
    return
  }
  func.func @transform_0(%arg0: i32) -> (i32, i32, i32) {
    %c0_i32 = arith.constant 0 : i32
    %c0_i32_0 = arith.constant 0 : i32
    %c0_i32_1 = arith.constant 0 : i32
    return %arg0, %c0_i32, %c0_i32_0 : i32, i32, i32
  }
  func.func @transform_1(%arg0: i32) -> (i32, i32) {
    %c0_i32 = arith.constant 0 : i32
    %c0_i32_0 = arith.constant 0 : i32
    %c0_i32_1 = arith.constant 0 : i32
    return %c0_i32, %c0_i32_0 : i32, i32
  }
  func.func @transform_2(%arg0: i32) -> (i32, i32) {
    %c0_i32 = arith.constant 0 : i32
    %c0_i32_0 = arith.constant 0 : i32
    %c0_i32_1 = arith.constant 0 : i32
    return %c0_i32, %c0_i32_0 : i32, i32
  }
  func.func @transform_3(%arg0: i32) -> (i32, i32) {
    %c0_i32 = arith.constant 0 : i32
    %c0_i32_0 = arith.constant 0 : i32
    %c0_i32_1 = arith.constant 0 : i32
    return %c0_i32, %c0_i32_0 : i32, i32
  }
  func.func @transform_4(%arg0: i32) -> (i32, i32) {
    %c0_i32 = arith.constant 0 : i32
    %c0_i32_0 = arith.constant 0 : i32
    %c0_i32_1 = arith.constant 0 : i32
    return %c0_i32, %c0_i32_0 : i32, i32
  }
  func.func @transform_5(%arg0: i32) -> (i32, i32) {
    %c0_i32 = arith.constant 0 : i32
    %c0_i32_0 = arith.constant 0 : i32
    %c0_i32_1 = arith.constant 0 : i32
    return %c0_i32, %c0_i32_0 : i32, i32
  }
  func.func @transform_6(%arg0: i32) -> (i32, i32) {
    %c0_i32 = arith.constant 0 : i32
    %c0_i32_0 = arith.constant 0 : i32
    %c0_i32_1 = arith.constant 0 : i32
    return %c0_i32, %c0_i32_0 : i32, i32
  }
  func.func @transform_7(%arg0: i32) -> (i32, i32) {
    %c0_i32 = arith.constant 0 : i32
    %c0_i32_0 = arith.constant 0 : i32
    %c0_i32_1 = arith.constant 0 : i32
    return %c0_i32, %c0_i32_0 : i32, i32
  }
  func.func @transform_8(%arg0: i32) -> (i32, i32) {
    %c0_i32 = arith.constant 0 : i32
    %c0_i32_0 = arith.constant 0 : i32
    %c0_i32_1 = arith.constant 0 : i32
    return %c0_i32, %c0_i32_0 : i32, i32
  }
  func.func @transform_9(%arg0: i32) -> (i32, i32, i32) {
    %c0_i32 = arith.constant 0 : i32
    %c0_i32_0 = arith.constant 0 : i32
    %c0_i32_1 = arith.constant 0 : i32
    %c0_i32_2 = arith.constant 0 : i32
    return %c0_i32, %c0_i32_0, %c0_i32_1 : i32, i32, i32
  }
  func.func @transform_10(%arg0: i32) -> (i32, i32) {
    %c0_i32 = arith.constant 0 : i32
    %c0_i32_0 = arith.constant 0 : i32
    %c0_i32_1 = arith.constant 0 : i32
    return %c0_i32, %c0_i32_0 : i32, i32
  }
  func.func @transform_11(%arg0: i32) -> (i32, i32) {
    %c0_i32 = arith.constant 0 : i32
    %c0_i32_0 = arith.constant 0 : i32
    %c0_i32_1 = arith.constant 0 : i32
    return %c0_i32, %c0_i32_0 : i32, i32
  }
  func.func @transform_12(%arg0: i32) -> (i32, i32, i32) {
    %c0_i32 = arith.constant 0 : i32
    %c0_i32_0 = arith.constant 0 : i32
    %c0_i32_1 = arith.constant 0 : i32
    return %arg0, %c0_i32, %c0_i32_0 : i32, i32, i32
  }
}

module attributes {stable_mosaic.version = 11 : i64} {
  func.func @_identity_block_kernel(%arg0: i32, %arg1: memref<1x1x64xbf16, #tpu.memory_space<vmem>>, %arg2: memref<1x1xbf16, #tpu.memory_space<vmem>>, %arg3: memref<1x1xbf16, #tpu.memory_space<vmem>>, %arg4: memref<9x64x64xbf16, #tpu.memory_space<vmem>>, %arg5: memref<1x64xf32, #tpu.memory_space<vmem>>, %arg6: memref<1x64xf32, #tpu.memory_space<vmem>>, %arg7: memref<9x64x64xbf16, #tpu.memory_space<vmem>>, %arg8: memref<1x64xf32, #tpu.memory_space<vmem>>, %arg9: memref<1x64xf32, #tpu.memory_space<vmem>>, %arg10: memref<1x1x64xbf16, #tpu.memory_space<vmem>>) attributes {dimension_semantics = [#tpu.dimension_semantics<parallel>], iteration_bounds = array<i64: 2>, scalar_prefetch = 0 : i64, scratch_operands = 0 : i64, tpu.core_type = #tpu.core_type<tc>, window_params = [{transform_indices = @transform_0, window_bounds = array<i64: 1, 1, 64>}, {pipeline_mode = #tpu.pipeline_mode<synchronous>, transform_indices = @transform_1, window_bounds = array<i64: 1, 1>}, {pipeline_mode = #tpu.pipeline_mode<synchronous>, transform_indices = @transform_2, window_bounds = array<i64: 1, 1>}, {pipeline_mode = #tpu.pipeline_mode<synchronous>, transform_indices = @transform_3, window_bounds = array<i64: 9, 64, 64>}, {pipeline_mode = #tpu.pipeline_mode<synchronous>, transform_indices = @transform_4, window_bounds = array<i64: 1, 64>}, {pipeline_mode = #tpu.pipeline_mode<synchronous>, transform_indices = @transform_5, window_bounds = array<i64: 1, 64>}, {pipeline_mode = #tpu.pipeline_mode<synchronous>, transform_indices = @transform_6, window_bounds = array<i64: 9, 64, 64>}, {pipeline_mode = #tpu.pipeline_mode<synchronous>, transform_indices = @transform_7, window_bounds = array<i64: 1, 64>}, {pipeline_mode = #tpu.pipeline_mode<synchronous>, transform_indices = @transform_8, window_bounds = array<i64: 1, 64>}, {transform_indices = @transform_9, window_bounds = array<i64: 1, 1, 64>}]} {
    %c0 = arith.constant 0 : index
    %c0_0 = arith.constant 0 : index
    %c0_1 = arith.constant 0 : index
    %0 = vector.load %arg1[%c0, %c0_0, %c0_1] : memref<1x1x64xbf16, #tpu.memory_space<vmem>>, vector<1x1x64xbf16>
    %1 = vector.shape_cast %0 : vector<1x1x64xbf16> to vector<1x64xbf16>
    %c0_2 = arith.constant 0 : index
    %c0_3 = arith.constant 0 : index
    %2 = vector.load %arg2[%c0_2, %c0_3] : memref<1x1xbf16, #tpu.memory_space<vmem>>, vector<1x1xbf16>
    %c0_4 = arith.constant 0 : index
    %c0_5 = arith.constant 0 : index
    %3 = vector.load %arg3[%c0_4, %c0_5] : memref<1x1xbf16, #tpu.memory_space<vmem>>, vector<1x1xbf16>
    %4 = vector.broadcast %2 : vector<1x1xbf16> to vector<1x64xbf16>
    %5 = arith.mulf %1, %4 : vector<1x64xbf16>
    %6 = vector.broadcast %3 : vector<1x1xbf16> to vector<1x64xbf16>
    %7 = arith.mulf %1, %6 : vector<1x64xbf16>
    %cst = arith.constant 0.000000e+00 : f32
    %8 = vector.broadcast %cst : f32 to vector<1x64xf32>
    %cst_6 = arith.constant 0.000000e+00 : f32
    %9 = vector.broadcast %cst_6 : f32 to vector<1x64xf32>
    %10 = arith.addf %8, %9 : vector<1x64xf32>
    %c2 = arith.constant 2 : index
    %c0_7 = arith.constant 0 : index
    %c0_8 = arith.constant 0 : index
    %11 = vector.load %arg4[%c2, %c0_7, %c0_8] : memref<9x64x64xbf16, #tpu.memory_space<vmem>>, vector<1x64x64xbf16>
    %12 = vector.shape_cast %11 : vector<1x64x64xbf16> to vector<64x64xbf16>
    %cst_9 = arith.constant dense<0.000000e+00> : vector<1x64xf32>
    %13 = tpu.matmul %7, %12, %cst_9 {dimension_numbers = #tpu.dot_dimension_numbers<[1], [0], [0], [1], [0, 0, 1, 1], [], []>} : vector<1x64xbf16>, vector<64x64xbf16>, vector<1x64xf32> -> vector<1x64xf32>
    %14 = arith.addf %10, %13 : vector<1x64xf32>
    %cst_10 = arith.constant 0.000000e+00 : f32
    %15 = vector.broadcast %cst_10 : f32 to vector<1x64xf32>
    %16 = arith.addf %14, %15 : vector<1x64xf32>
    %c4 = arith.constant 4 : index
    %c0_11 = arith.constant 0 : index
    %c0_12 = arith.constant 0 : index
    %17 = vector.load %arg4[%c4, %c0_11, %c0_12] : memref<9x64x64xbf16, #tpu.memory_space<vmem>>, vector<1x64x64xbf16>
    %18 = vector.shape_cast %17 : vector<1x64x64xbf16> to vector<64x64xbf16>
    %cst_13 = arith.constant dense<0.000000e+00> : vector<1x64xf32>
    %19 = tpu.matmul %1, %18, %cst_13 {dimension_numbers = #tpu.dot_dimension_numbers<[1], [0], [0], [1], [0, 0, 1, 1], [], []>} : vector<1x64xbf16>, vector<64x64xbf16>, vector<1x64xf32> -> vector<1x64xf32>
    %20 = arith.addf %16, %19 : vector<1x64xf32>
    %cst_14 = arith.constant 0.000000e+00 : f32
    %21 = vector.broadcast %cst_14 : f32 to vector<1x64xf32>
    %22 = arith.addf %20, %21 : vector<1x64xf32>
    %c6 = arith.constant 6 : index
    %c0_15 = arith.constant 0 : index
    %c0_16 = arith.constant 0 : index
    %23 = vector.load %arg4[%c6, %c0_15, %c0_16] : memref<9x64x64xbf16, #tpu.memory_space<vmem>>, vector<1x64x64xbf16>
    %24 = vector.shape_cast %23 : vector<1x64x64xbf16> to vector<64x64xbf16>
    %cst_17 = arith.constant dense<0.000000e+00> : vector<1x64xf32>
    %25 = tpu.matmul %5, %24, %cst_17 {dimension_numbers = #tpu.dot_dimension_numbers<[1], [0], [0], [1], [0, 0, 1, 1], [], []>} : vector<1x64xbf16>, vector<64x64xbf16>, vector<1x64xf32> -> vector<1x64xf32>
    %26 = arith.addf %22, %25 : vector<1x64xf32>
    %cst_18 = arith.constant 0.000000e+00 : f32
    %27 = vector.broadcast %cst_18 : f32 to vector<1x64xf32>
    %28 = arith.addf %26, %27 : vector<1x64xf32>
    %cst_19 = arith.constant 0.000000e+00 : f32
    %29 = vector.broadcast %cst_19 : f32 to vector<1x64xf32>
    %30 = arith.addf %28, %29 : vector<1x64xf32>
    %c0_20 = arith.constant 0 : index
    %c0_21 = arith.constant 0 : index
    %31 = vector.load %arg5[%c0_20, %c0_21] : memref<1x64xf32, #tpu.memory_space<vmem>>, vector<1x64xf32>
    %32 = arith.mulf %30, %31 : vector<1x64xf32>
    %c0_22 = arith.constant 0 : index
    %c0_23 = arith.constant 0 : index
    %33 = vector.load %arg6[%c0_22, %c0_23] : memref<1x64xf32, #tpu.memory_space<vmem>>, vector<1x64xf32>
    %34 = arith.addf %32, %33 : vector<1x64xf32>
    %cst_24 = arith.constant 0.000000e+00 : f32
    %35 = vector.broadcast %cst_24 : f32 to vector<1x64xf32>
    %36 = arith.maximumf %34, %35 : vector<1x64xf32>
    %37 = arith.truncf %36 : vector<1x64xf32> to vector<1x64xbf16>
    %38 = vector.broadcast %2 : vector<1x1xbf16> to vector<1x64xbf16>
    %39 = arith.mulf %37, %38 : vector<1x64xbf16>
    %40 = vector.broadcast %3 : vector<1x1xbf16> to vector<1x64xbf16>
    %41 = arith.mulf %37, %40 : vector<1x64xbf16>
    %cst_25 = arith.constant 0.000000e+00 : f32
    %42 = vector.broadcast %cst_25 : f32 to vector<1x64xf32>
    %cst_26 = arith.constant 0.000000e+00 : f32
    %43 = vector.broadcast %cst_26 : f32 to vector<1x64xf32>
    %44 = arith.addf %42, %43 : vector<1x64xf32>
    %c2_27 = arith.constant 2 : index
    %c0_28 = arith.constant 0 : index
    %c0_29 = arith.constant 0 : index
    %45 = vector.load %arg7[%c2_27, %c0_28, %c0_29] : memref<9x64x64xbf16, #tpu.memory_space<vmem>>, vector<1x64x64xbf16>
    %46 = vector.shape_cast %45 : vector<1x64x64xbf16> to vector<64x64xbf16>
    %cst_30 = arith.constant dense<0.000000e+00> : vector<1x64xf32>
    %47 = tpu.matmul %41, %46, %cst_30 {dimension_numbers = #tpu.dot_dimension_numbers<[1], [0], [0], [1], [0, 0, 1, 1], [], []>} : vector<1x64xbf16>, vector<64x64xbf16>, vector<1x64xf32> -> vector<1x64xf32>
    %48 = arith.addf %44, %47 : vector<1x64xf32>
    %cst_31 = arith.constant 0.000000e+00 : f32
    %49 = vector.broadcast %cst_31 : f32 to vector<1x64xf32>
    %50 = arith.addf %48, %49 : vector<1x64xf32>
    %c4_32 = arith.constant 4 : index
    %c0_33 = arith.constant 0 : index
    %c0_34 = arith.constant 0 : index
    %51 = vector.load %arg7[%c4_32, %c0_33, %c0_34] : memref<9x64x64xbf16, #tpu.memory_space<vmem>>, vector<1x64x64xbf16>
    %52 = vector.shape_cast %51 : vector<1x64x64xbf16> to vector<64x64xbf16>
    %cst_35 = arith.constant dense<0.000000e+00> : vector<1x64xf32>
    %53 = tpu.matmul %37, %52, %cst_35 {dimension_numbers = #tpu.dot_dimension_numbers<[1], [0], [0], [1], [0, 0, 1, 1], [], []>} : vector<1x64xbf16>, vector<64x64xbf16>, vector<1x64xf32> -> vector<1x64xf32>
    %54 = arith.addf %50, %53 : vector<1x64xf32>
    %cst_36 = arith.constant 0.000000e+00 : f32
    %55 = vector.broadcast %cst_36 : f32 to vector<1x64xf32>
    %56 = arith.addf %54, %55 : vector<1x64xf32>
    %c6_37 = arith.constant 6 : index
    %c0_38 = arith.constant 0 : index
    %c0_39 = arith.constant 0 : index
    %57 = vector.load %arg7[%c6_37, %c0_38, %c0_39] : memref<9x64x64xbf16, #tpu.memory_space<vmem>>, vector<1x64x64xbf16>
    %58 = vector.shape_cast %57 : vector<1x64x64xbf16> to vector<64x64xbf16>
    %cst_40 = arith.constant dense<0.000000e+00> : vector<1x64xf32>
    %59 = tpu.matmul %39, %58, %cst_40 {dimension_numbers = #tpu.dot_dimension_numbers<[1], [0], [0], [1], [0, 0, 1, 1], [], []>} : vector<1x64xbf16>, vector<64x64xbf16>, vector<1x64xf32> -> vector<1x64xf32>
    %60 = arith.addf %56, %59 : vector<1x64xf32>
    %cst_41 = arith.constant 0.000000e+00 : f32
    %61 = vector.broadcast %cst_41 : f32 to vector<1x64xf32>
    %62 = arith.addf %60, %61 : vector<1x64xf32>
    %cst_42 = arith.constant 0.000000e+00 : f32
    %63 = vector.broadcast %cst_42 : f32 to vector<1x64xf32>
    %64 = arith.addf %62, %63 : vector<1x64xf32>
    %c0_43 = arith.constant 0 : index
    %c0_44 = arith.constant 0 : index
    %65 = vector.load %arg8[%c0_43, %c0_44] : memref<1x64xf32, #tpu.memory_space<vmem>>, vector<1x64xf32>
    %66 = arith.mulf %64, %65 : vector<1x64xf32>
    %c0_45 = arith.constant 0 : index
    %c0_46 = arith.constant 0 : index
    %67 = vector.load %arg9[%c0_45, %c0_46] : memref<1x64xf32, #tpu.memory_space<vmem>>, vector<1x64xf32>
    %68 = arith.addf %66, %67 : vector<1x64xf32>
    %69 = arith.extf %1 : vector<1x64xbf16> to vector<1x64xf32>
    %70 = arith.addf %68, %69 : vector<1x64xf32>
    %cst_47 = arith.constant 0.000000e+00 : f32
    %71 = vector.broadcast %cst_47 : f32 to vector<1x64xf32>
    %72 = arith.maximumf %70, %71 : vector<1x64xf32>
    %73 = arith.truncf %72 : vector<1x64xf32> to vector<1x64xbf16>
    %c0_48 = arith.constant 0 : index
    %c0_49 = arith.constant 0 : index
    %c0_50 = arith.constant 0 : index
    %74 = vector.load %arg10[%c0_48, %c0_49, %c0_50] : memref<1x1x64xbf16, #tpu.memory_space<vmem>>, vector<1x1x64xbf16>
    %75 = vector.shape_cast %74 : vector<1x1x64xbf16> to vector<1x64xbf16>
    %76 = vector.shape_cast %73 : vector<1x64xbf16> to vector<1x1x64xbf16>
    tpu.vector_store %arg10[%c0_48, %c0_49, %c0_50], %76 {strides = array<i32>} : memref<1x1x64xbf16, #tpu.memory_space<vmem>>, vector<1x1x64xbf16>,
    return
  }
  func.func @transform_0(%arg0: i32) -> (i32, i32, i32) {
    %c0_i32 = arith.constant 0 : i32
    %c0_i32_0 = arith.constant 0 : i32
    %c0_i32_1 = arith.constant 0 : i32
    return %arg0, %c0_i32, %c0_i32_0 : i32, i32, i32
  }
  func.func @transform_1(%arg0: i32) -> (i32, i32) {
    %c0_i32 = arith.constant 0 : i32
    %c0_i32_0 = arith.constant 0 : i32
    %c0_i32_1 = arith.constant 0 : i32
    return %c0_i32, %c0_i32_0 : i32, i32
  }
  func.func @transform_2(%arg0: i32) -> (i32, i32) {
    %c0_i32 = arith.constant 0 : i32
    %c0_i32_0 = arith.constant 0 : i32
    %c0_i32_1 = arith.constant 0 : i32
    return %c0_i32, %c0_i32_0 : i32, i32
  }
  func.func @transform_3(%arg0: i32) -> (i32, i32, i32) {
    %c0_i32 = arith.constant 0 : i32
    %c0_i32_0 = arith.constant 0 : i32
    %c0_i32_1 = arith.constant 0 : i32
    %c0_i32_2 = arith.constant 0 : i32
    return %c0_i32, %c0_i32_0, %c0_i32_1 : i32, i32, i32
  }
  func.func @transform_4(%arg0: i32) -> (i32, i32) {
    %c0_i32 = arith.constant 0 : i32
    %c0_i32_0 = arith.constant 0 : i32
    %c0_i32_1 = arith.constant 0 : i32
    return %c0_i32, %c0_i32_0 : i32, i32
  }
  func.func @transform_5(%arg0: i32) -> (i32, i32) {
    %c0_i32 = arith.constant 0 : i32
    %c0_i32_0 = arith.constant 0 : i32
    %c0_i32_1 = arith.constant 0 : i32
    return %c0_i32, %c0_i32_0 : i32, i32
  }
  func.func @transform_6(%arg0: i32) -> (i32, i32, i32) {
    %c0_i32 = arith.constant 0 : i32
    %c0_i32_0 = arith.constant 0 : i32
    %c0_i32_1 = arith.constant 0 : i32
    %c0_i32_2 = arith.constant 0 : i32
    return %c0_i32, %c0_i32_0, %c0_i32_1 : i32, i32, i32
  }
  func.func @transform_7(%arg0: i32) -> (i32, i32) {
    %c0_i32 = arith.constant 0 : i32
    %c0_i32_0 = arith.constant 0 : i32
    %c0_i32_1 = arith.constant 0 : i32
    return %c0_i32, %c0_i32_0 : i32, i32
  }
  func.func @transform_8(%arg0: i32) -> (i32, i32) {
    %c0_i32 = arith.constant 0 : i32
    %c0_i32_0 = arith.constant 0 : i32
    %c0_i32_1 = arith.constant 0 : i32
    return %c0_i32, %c0_i32_0 : i32, i32
  }
  func.func @transform_9(%arg0: i32) -> (i32, i32, i32) {
    %c0_i32 = arith.constant 0 : i32
    %c0_i32_0 = arith.constant 0 : i32
    %c0_i32_1 = arith.constant 0 : i32
    return %arg0, %c0_i32, %c0_i32_0 : i32, i32, i32
  }
}

module attributes {stable_mosaic.version = 11 : i64} {
  func.func @_head_kernel(%arg0: memref<2x1x64xbf16, #tpu.memory_space<vmem>>, %arg1: memref<1x64xf32, #tpu.memory_space<vmem>>, %arg2: memref<1x64xf32, #tpu.memory_space<vmem>>, %arg3: memref<64x128xbf16, #tpu.memory_space<vmem>>, %arg4: memref<1x128xf32, #tpu.memory_space<vmem>>, %arg5: memref<2x128xf32, #tpu.memory_space<vmem>>) attributes {dimension_semantics = [], scalar_prefetch = 0 : i64, scratch_operands = 0 : i64, tpu.core_type = #tpu.core_type<tc>} {
    %c0 = arith.constant 0 : index
    %c0_0 = arith.constant 0 : index
    %c0_1 = arith.constant 0 : index
    %0 = vector.load %arg0[%c0, %c0_0, %c0_1] : memref<2x1x64xbf16, #tpu.memory_space<vmem>>, vector<2x1x64xbf16>
    %1 = arith.extf %0 : vector<2x1x64xbf16> to vector<2x1x64xf32>
    %cst = arith.constant dense<0.000000e+00> : vector<2x64xf32>
    %2 = vector.multi_reduction <add>, %1, %cst [1] : vector<2x1x64xf32> to vector<2x64xf32>
    %cst_2 = arith.constant 1.000000e+00 : f32
    %3 = vector.broadcast %cst_2 : f32 to vector<2x64xf32>
    %4 = arith.divf %2, %3 : vector<2x64xf32>
    %c0_3 = arith.constant 0 : index
    %c0_4 = arith.constant 0 : index
    %5 = vector.load %arg1[%c0_3, %c0_4] : memref<1x64xf32, #tpu.memory_space<vmem>>, vector<1x64xf32>
    %6 = vector.broadcast %5 : vector<1x64xf32> to vector<2x64xf32>
    %7 = arith.mulf %4, %6 : vector<2x64xf32>
    %c0_5 = arith.constant 0 : index
    %c0_6 = arith.constant 0 : index
    %8 = vector.load %arg2[%c0_5, %c0_6] : memref<1x64xf32, #tpu.memory_space<vmem>>, vector<1x64xf32>
    %9 = vector.broadcast %8 : vector<1x64xf32> to vector<2x64xf32>
    %10 = arith.addf %7, %9 : vector<2x64xf32>
    %cst_7 = arith.constant 0.000000e+00 : f32
    %11 = vector.broadcast %cst_7 : f32 to vector<2x64xf32>
    %12 = arith.maximumf %10, %11 : vector<2x64xf32>
    %13 = arith.truncf %12 : vector<2x64xf32> to vector<2x64xbf16>
    %c0_8 = arith.constant 0 : index
    %c0_9 = arith.constant 0 : index
    %14 = vector.load %arg3[%c0_8, %c0_9] : memref<64x128xbf16, #tpu.memory_space<vmem>>, vector<64x128xbf16>
    %cst_10 = arith.constant dense<0.000000e+00> : vector<2x128xf32>
    %15 = tpu.matmul %13, %14, %cst_10 {dimension_numbers = #tpu.dot_dimension_numbers<[1], [0], [0], [1], [0, 0, 1, 1], [], []>} : vector<2x64xbf16>, vector<64x128xbf16>, vector<2x128xf32> -> vector<2x128xf32>
    %c0_11 = arith.constant 0 : index
    %c0_12 = arith.constant 0 : index
    %16 = vector.load %arg4[%c0_11, %c0_12] : memref<1x128xf32, #tpu.memory_space<vmem>>, vector<1x128xf32>
    %17 = vector.broadcast %16 : vector<1x128xf32> to vector<2x128xf32>
    %18 = arith.addf %15, %17 : vector<2x128xf32>
    %c0_13 = arith.constant 0 : index
    %c0_14 = arith.constant 0 : index
    %19 = vector.load %arg5[%c0_13, %c0_14] : memref<2x128xf32, #tpu.memory_space<vmem>>, vector<2x128xf32>
    tpu.vector_store %arg5[%c0_13, %c0_14], %18 {strides = array<i32>} : memref<2x128xf32, #tpu.memory_space<vmem>>, vector<2x128xf32>,
    return
  }
}

</mosaic_0001>

<bundles_post_ra>
// kernel: audra_forward.10
= control target key start
LH: loop header
LB: loop body
LE: loop exit
PB: predicated region body
PF: predicated region fallthrough
CT: control target
= control target key end

     0   :  { %s1261_s15 = smov 0   ;;  %s1502_s0 = inlined_call_operand.vmem [shape: bf16[512,147], index: 0, kind: input, shape index: {}]   ;;  %s1503_s1 = inlined_call_operand.vmem [shape: bf16[147,8], index: 1, kind: input, shape index: {}]   ;;  %s1504_s2 = inlined_call_operand.vmem [shape: f32[1,8], index: 2, kind: input, shape index: {}]   ;;  %s1505_s3 = inlined_call_operand.vmem [shape: f32[1,8], index: 3, kind: input, shape index: {}]   ;;  %s1506_s4 = inlined_call_operand.vmem [shape: bf16[512,8], index: 4, kind: output, shape index: {}]  }
   0x1 LB: > { %s1001_s16 = sadd.s32 4294967295, %s1232_s15   ;;  %p1005_p0 = scmp.ge.s32.totalorder %s1232_s15, 1  ;;  %s1232_s15 = sphi %s1261_s15, %s14_s15  }
   0x2   : > { %p164_p1 = scmp.lt.s32.totalorder %s1232_s15, 3 }
   0x4   : > { %p165_p2 = pnand %p1005_p0, %p164_p1 }
   0x5   : > { %v1168_v0 = vld [vmem:[%s1503_s1] sm:$0xff] (!%p165_p2)   ;;  %v1234_v1 = vmov (!%p165_p2), 0   ;;  %v1169_v2 = vld [vmem:[%s1503_s1 + $0x8] sm:$0xff] (!%p165_p2)   ;;  %v1170_v3 = vld [vmem:[%s1503_s1 + $0x10] sm:$0xff] (!%p165_p2)   ;;  %s1006_s23 = sshll.u32 (!%p165_p2), %s1001_s16, 5  ;;  %vm457_vm0 = vcmask (!%p165_p2), 154624  }
   0x6   : > { %168 = sbr.rel (%p165_p2) target bundleno = 325 (0x145), region = 36  ;;  %513 = vmatprep.subr.bf16.mxu0 (!%p165_p2), %v1234_v1  ;;  %1138 = vmatprep.subr.bf16.mxu1 (!%p165_p2), %v1234_v1  ;;  %p192_p3 = scmp.lt.s32.totalorder (!%p165_p2), %s1006_s23, 63  ;;  %v1171_v4 = vld [vmem:[%s1503_s1 + $0x18] sm:$0xff] (!%p165_p2)   ;;  %v1172_v5 = vld [vmem:[%s1503_s1 + $0x20] sm:$0xff] (!%p165_p2)   ;;  %v1173_v8 = vld [vmem:[%s1503_s1 + $0x28] sm:$0xff] (!%p165_p2)   ;;  %vm506_vm1 = vcmask (!%p165_p2), 1040384  }
   0x7   : > { %514 = vmatpush1.bf16.msra.mxu0 (!%p165_p2), %v1168_v0  ;;  %1148 = vmatpush1.bf16.msra.mxu1 (!%p165_p2), %v1168_v0  ;;  %v1174_v9 = vld [vmem:[%s1503_s1 + $0x30] sm:$0xff] (!%p165_p2)   ;;  %v1175_v10 = vld [vmem:[%s1503_s1 + $0x38] sm:$0xff] (!%p165_p2)   ;;  %vm507_vm2 = vcmask (!%p165_p2), 1041408   ;;  %v1235_v11 = vmov (!%p165_p2), 65535   ;;  %v1176_v13 = vld [vmem:[%s1503_s1 + $0x40] sm:$0xff] (!%p165_p2)   ;;  %vm912_vm3 = vcmask (!%p165_p2), 60416  }
   0x8   : > { %515 = vmatprep.subr.bf16.mxu0 (!%p165_p2), %v1234_v1  ;;  %1139 = vmatprep.subr.bf16.mxu1 (!%p165_p2), %v1234_v1  ;;  %v508_v12 = vsel (!%p165_p2), %vm506_vm1, 4294967295, %v1235_v11  ;;  %v1177_v14 = vld [vmem:[%s1503_s1 + $0x48] ss:$0 sps:$4 sm:$0x33] (!%p165_p2)   ;;  %v1358_v47 = vld [vmem:[%s1504_s2] ss:$0 sm:$0xff] (!%p165_p2) }
   0x9   : > { %v509_v15 = vsel (!%p165_p2), %vm507_vm2, %v508_v12, 0  ;;  %v1363_v49 = vld [vmem:[%s1505_s3] ss:$0 sm:$0xff] (!%p165_p2) }
   0xa   : > { %v511_v16 = vand.u32 (!%p165_p2), %v1177_v14, %v509_v15 }
   0xb   : > { %516 = vmatpush1.bf16.msra.mxu0 (!%p165_p2), %v1169_v2  ;;  %1149 = vmatpush1.bf16.msra.mxu1 (!%p165_p2), %v1169_v2 }
   0xc   : > { %517 = vmatprep.subr.bf16.mxu0 (!%p165_p2), %v1234_v1  ;;  %1140 = vmatprep.subr.bf16.mxu1 (!%p165_p2), %v1234_v1 }
   0xd   : > { %s1508_s23 = smov (!%p192_p3, %s1006_s23), 63 }
   0xe   : > { %s1105_s26 = sshll.u32 %s1508_s23, 3  ;;  %s1010_s21 = sshll.u32 %s1508_s23, 2 }
   0xf   : > { %518 = vmatpush1.bf16.msra.mxu0 %v1170_v3  ;;  %1150 = vmatpush1.bf16.msra.mxu1 %v1170_v3  ;;  %s1287_s29 = scalar_lea.vmem %s1502_s0, %s1105_s26  ;;  %s1377_s23 = scalar_lea.vmem %s1506_s4, %s1010_s21 }
  0x10   : > { %519 = vmatprep.subr.bf16.mxu0 %v1234_v1  ;;  %1141 = vmatprep.subr.bf16.mxu1 %v1234_v1  ;;  %v1180_v6 = vld [vmem:[%s1287_s29 + $0x4] ss:$8 sps:$4 sm:$0xff]   ;;  %v1178_v17 = vld [vmem:[%s1287_s29] ss:$8 sps:$4 sm:$0xff]   ;;  %v1184_v19 = vld [vmem:[%s1287_s29 + $0x14] ss:$8 sps:$4 sm:$0xff]  }
  0x11   : > { %v1183_v7 = vld [vmem:[%s1287_s29 + $0x84] ss:$8 sps:$4 sm:$0xff]   ;;  %1053 = vmatprep.mubr.msk.bf16.mxu0 %vm457_vm0, %v1180_v6  ;;  %v1181_v18 = vld [vmem:[%s1287_s29 + $0x80] ss:$8 sps:$4 sm:$0xff]   ;;  %v1186_v20 = vld [vmem:[%s1287_s29 + $0x94] ss:$8 sps:$4 sm:$0xff]  }
  0x12   : > { %1061 = vmatprep.mubr.msk.bf16.mxu1 %vm457_vm0, %v1183_v7  ;;  %v1188_v21 = vld [vmem:[%s1287_s29 + $0x10] ss:$8 sps:$4 sm:$0xff]   ;;  %v1190_v23 = vld [vmem:[%s1287_s29 + $0x24] ss:$8 sps:$4 sm:$0xff]   ;;  %v1194_v25 = vld [vmem:[%s1287_s29 + $0x20] ss:$8 sps:$4 sm:$0xff]  }
  0x13   : > { %520 = vmatpush1.bf16.msra.mxu0 %v1171_v4  ;;  %1151 = vmatpush1.bf16.msra.mxu1 %v1171_v4  ;;  %v1189_v22 = vld [vmem:[%s1287_s29 + $0x90] ss:$8 sps:$4 sm:$0xff]   ;;  %v1192_v24 = vld [vmem:[%s1287_s29 + $0xa4] ss:$8 sps:$4 sm:$0xff]   ;;  %v1195_v26 = vld [vmem:[%s1287_s29 + $0xa0] ss:$8 sps:$4 sm:$0xff]  }
  0x14   : > { %521 = vmatprep.subr.bf16.mxu0 %v1234_v1  ;;  %1142 = vmatprep.subr.bf16.mxu1 %v1234_v1  ;;  %v1196_v27 = vld [vmem:[%s1287_s29 + $0x34] ss:$8 sps:$4 sm:$0xff]   ;;  %v1200_v29 = vld [vmem:[%s1287_s29 + $0x30] ss:$8 sps:$4 sm:$0xff]   ;;  %v1202_v31 = vld [vmem:[%s1287_s29 + $0x44] ss:$8 sps:$4 sm:$0xff]  }
  0x15   : > { %v1198_v28 = vld [vmem:[%s1287_s29 + $0xb4] ss:$8 sps:$4 sm:$0xff]   ;;  %v1201_v30 = vld [vmem:[%s1287_s29 + $0xb0] ss:$8 sps:$4 sm:$0xff]   ;;  %v1204_v32 = vld [vmem:[%s1287_s29 + $0xc4] ss:$8 sps:$4 sm:$0xff]  }
  0x16   : > { %v1206_v33 = vld [vmem:[%s1287_s29 + $0x40] ss:$8 sps:$4 sm:$0xff]   ;;  %v1208_v35 = vld [vmem:[%s1287_s29 + $0x54] ss:$8 sps:$4 sm:$0xff]   ;;  %v1212_v37 = vld [vmem:[%s1287_s29 + $0x50] ss:$8 sps:$4 sm:$0xff]  }
  0x17   : > { %522 = vmatpush1.bf16.msra.mxu0 %v1172_v5  ;;  %1152 = vmatpush1.bf16.msra.mxu1 %v1172_v5  ;;  %v1207_v34 = vld [vmem:[%s1287_s29 + $0xc0] ss:$8 sps:$4 sm:$0xff]   ;;  %v1210_v36 = vld [vmem:[%s1287_s29 + $0xd4] ss:$8 sps:$4 sm:$0xff]   ;;  %v1213_v38 = vld [vmem:[%s1287_s29 + $0xd0] ss:$8 sps:$4 sm:$0xff]  }
  0x18   : > { %523 = vmatprep.subr.bf16.mxu0 %v1234_v1  ;;  %1143 = vmatprep.subr.bf16.mxu1 %v1234_v1  ;;  %v1214_v39 = vld [vmem:[%s1287_s29 + $0x64] ss:$8 sps:$4 sm:$0xff]   ;;  %v1218_v41 = vld [vmem:[%s1287_s29 + $0x60] ss:$8 sps:$4 sm:$0xff]   ;;  %v1220_v43 = vld [vmem:[%s1287_s29 + $0x74] ss:$8 sps:$4 sm:$0xff]  }
  0x19   : > { %v1216_v40 = vld [vmem:[%s1287_s29 + $0xe4] ss:$8 sps:$4 sm:$0xff]   ;;  %v1219_v42 = vld [vmem:[%s1287_s29 + $0xe0] ss:$8 sps:$4 sm:$0xff]   ;;  %v1222_v44 = vld [vmem:[%s1287_s29 + $0xf4] ss:$8 sps:$4 sm:$0xff]  }
  0x1a   : > { %v1224_v45 = vld [vmem:[%s1287_s29 + $0x70] ss:$8 sps:$4 sm:$0xff]  }
  0x1b   : > { %524 = vmatpush1.bf16.msra.mxu0 %v1173_v8  ;;  %1153 = vmatpush1.bf16.msra.mxu1 %v1173_v8  ;;  %v1225_v46 = vld [vmem:[%s1287_s29 + $0xf0] ss:$8 sps:$4 sm:$0xff]  }
  0x1c   : > { %525 = vmatprep.subr.bf16.mxu0 %v1234_v1  ;;  %1144 = vmatprep.subr.bf16.mxu1 %v1234_v1 }
  0x1f   : > { %526 = vmatpush1.bf16.msra.mxu0 %v1174_v9  ;;  %1154 = vmatpush1.bf16.msra.mxu1 %v1174_v9 }
  0x20   : > { %527 = vmatprep.subr.bf16.mxu0 %v1234_v1  ;;  %1145 = vmatprep.subr.bf16.mxu1 %v1234_v1 }
  0x23   : > { %528 = vmatpush1.bf16.msra.mxu0 %v1175_v10  ;;  %1155 = vmatpush1.bf16.msra.mxu1 %v1175_v10 }
  0x24   : > { %529 = vmatprep.subr.bf16.mxu0 %v1234_v1  ;;  %1146 = vmatprep.subr.bf16.mxu1 %v1234_v1 }
  0x27   : > { %530 = vmatpush1.bf16.msra.mxu0 %v1176_v13  ;;  %1156 = vmatpush1.bf16.msra.mxu1 %v1176_v13 }
  0x28   : > { %531 = vmatprep.subr.bf16.mxu0 %v1234_v1  ;;  %1147 = vmatprep.subr.bf16.mxu1 %v1234_v1 }
  0x2b   : > { %532 = vmatpush1.bf16.msra.mxu0 %v511_v16  ;;  %1157 = vmatpush1.bf16.msra.mxu1 %v511_v16 }
  0x2e   : > { %546 = vmatmul.mubr.bf16.vlgmr.msra.gmra.mrb[0].mxu0 %v1178_v17  ;;  %610 = vmatmul.mubr.bf16.vlgmr.msra.gmra.mrb[0].mxu1 %v1181_v18 }
  0x2f   : > { %1054 = vmatprep.mubr.msk.bf16.mxu0 %vm457_vm0, %v1184_v19  ;;  %1062 = vmatprep.mubr.msk.bf16.mxu1 %vm457_vm0, %v1186_v20 }
  0x36   : > { %554 = vmatmul.mubr.bf16.gmra.mrb[4].mxu0 %v1188_v21  ;;  %618 = vmatmul.mubr.bf16.gmra.mrb[4].mxu1 %v1189_v22 }
  0x37   : > { %1055 = vmatprep.mubr.msk.bf16.mxu0 %vm457_vm0, %v1190_v23  ;;  %1063 = vmatprep.mubr.msk.bf16.mxu1 %vm457_vm0, %v1192_v24 }
  0x3e   : > { %562 = vmatmul.mubr.bf16.gmra.mrb[8].mxu0 %v1194_v25  ;;  %626 = vmatmul.mubr.bf16.gmra.mrb[8].mxu1 %v1195_v26 }
  0x3f   : > { %1056 = vmatprep.mubr.msk.bf16.mxu0 %vm457_vm0, %v1196_v27  ;;  %1064 = vmatprep.mubr.msk.bf16.mxu1 %vm457_vm0, %v1198_v28 }
  0x46   : > { %570 = vmatmul.mubr.bf16.gmra.mrb[12].mxu0 %v1200_v29  ;;  %634 = vmatmul.mubr.bf16.gmra.mrb[12].mxu1 %v1201_v30 }
  0x47   : > { %1057 = vmatprep.mubr.msk.bf16.mxu0 %vm457_vm0, %v1202_v31  ;;  %1065 = vmatprep.mubr.msk.bf16.mxu1 %vm457_vm0, %v1204_v32 }
  0x4e   : > { %578 = vmatmul.mubr.bf16.gmra.mrb[16].mxu0 %v1206_v33  ;;  %642 = vmatmul.mubr.bf16.gmra.mrb[16].mxu1 %v1207_v34 }
  0x4f   : > { %1058 = vmatprep.mubr.msk.bf16.mxu0 %vm457_vm0, %v1208_v35  ;;  %1066 = vmatprep.mubr.msk.bf16.mxu1 %vm457_vm0, %v1210_v36 }
  0x56   : > { %586 = vmatmul.mubr.bf16.gmra.mrb[20].mxu0 %v1212_v37  ;;  %650 = vmatmul.mubr.bf16.gmra.mrb[20].mxu1 %v1213_v38 }
  0x57   : > { %1059 = vmatprep.mubr.msk.bf16.mxu0 %vm457_vm0, %v1214_v39  ;;  %1067 = vmatprep.mubr.msk.bf16.mxu1 %vm457_vm0, %v1216_v40 }
  0x5e   : > { %594 = vmatmul.mubr.bf16.gmra.mrb[24].mxu0 %v1218_v41  ;;  %658 = vmatmul.mubr.bf16.gmra.mrb[24].mxu1 %v1219_v42 }
  0x5f   : > { %1060 = vmatprep.mubr.msk.bf16.mxu0 %vm457_vm0, %v1220_v43  ;;  %1068 = vmatprep.mubr.msk.bf16.mxu1 %vm457_vm0, %v1222_v44 }
  0x66   : > { %602 = vmatmul.mubr.bf16.gmra.mrb[28].mxu0 %v1224_v45  ;;  %666 = vmatmul.mubr.bf16.gmra.mrb[28].mxu1 %v1225_v46 }
 0x101   : > { %v547_v48 = vpop.f32.mrb[0].mxu0  ;;  %v611_v50 = vpop.f32.mrb[0].mxu1 }
 0x102   : > { %v681_v51 = vmul.f32 %v1358_v47, %v547_v48  ;;  %v697_v52 = vmul.f32 %v1358_v47, %v611_v50  ;;  %v549_v53 = vpop.f32.mrb[1].mxu0  ;;  %v613_v54 = vpop.f32.mrb[1].mxu1 }
 0x103   : > { %v550_v55 = vpop.f32.mrb[2].mxu0  ;;  %v614_v56 = vpop.f32.mrb[2].mxu1 }
 0x104   : > { %v720_v57 = vadd.f32 %v1363_v49, %v681_v51  ;;  %v736_v58 = vadd.f32 %v1363_v49, %v697_v52  ;;  %v682_v59 = vmul.f32 %v1358_v47, %v550_v55  ;;  %v698_v60 = vmul.f32 %v1358_v47, %v614_v56  ;;  %v552_v61 = vpop.f32.mrb[3].mxu0  ;;  %v616_v62 = vpop.f32.mrb[3].mxu1 }
 0x106   : > { %v752_v63 = vmax.f32 %v720_v57, 0.0  ;;  %v768_v0 = vmax.f32 %v736_v58, 0.0  ;;  %v721_v1 = vadd.f32 %v1363_v49, %v682_v59  ;;  %v737_v2 = vadd.f32 %v1363_v49, %v698_v60 }
 0x108   : > { %v1106_v3 = vpack.c.bf16 %v752_v63, %v752_v63  ;;  %v1122_v4 = vpack.c.bf16 %v768_v0, %v768_v0  ;;  %v753_v5 = vmax.f32 %v721_v1, 0.0  ;;  %v769_v6 = vmax.f32 %v737_v2, 0.0 }
 0x109   : > { %v555_v7 = vpop.f32.mrb[4].mxu0  ;;  %v619_v8 = vpop.f32.mrb[4].mxu1 }
 0x10a   : > { %913 = vst.msk [vmem:[%s1377_s23] sm:$0xf] %vm912_vm3, %v1106_v3  ;;  %929 = vst.msk [vmem:[%s1377_s23 + $0x40] sm:$0xf] %vm912_vm3, %v1122_v4  ;;  %v1107_v9 = vpack.c.bf16 %v753_v5, %v753_v5  ;;  %v1123_v10 = vpack.c.bf16 %v769_v6, %v769_v6  ;;  %v683_v11 = vmul.f32 %v1358_v47, %v555_v7  ;;  %v557_v13 = vpop.f32.mrb[5].mxu0  ;;  %v621_v14 = vpop.f32.mrb[5].mxu1 }
 0x10b   : > { %v699_v12 = vmul.f32 %v1358_v47, %v619_v8  ;;  %v558_v15 = vpop.f32.mrb[6].mxu0  ;;  %v622_v16 = vpop.f32.mrb[6].mxu1 }
 0x10c   : > { %914 = vst.msk [vmem:[%s1377_s23 + $0x4] sm:$0xf] %vm912_vm3, %v1107_v9  ;;  %930 = vst.msk [vmem:[%s1377_s23 + $0x44] sm:$0xf] %vm912_vm3, %v1123_v10  ;;  %v722_v17 = vadd.f32 %v1363_v49, %v683_v11  ;;  %v684_v19 = vmul.f32 %v1358_v47, %v558_v15  ;;  %v700_v20 = vmul.f32 %v1358_v47, %v622_v16  ;;  %v560_v21 = vpop.f32.mrb[7].mxu0  ;;  %v624_v22 = vpop.f32.mrb[7].mxu1 }
 0x10d   : > { %v738_v18 = vadd.f32 %v1363_v49, %v699_v12 }
 0x10e   : > { %v754_v23 = vmax.f32 %v722_v17, 0.0  ;;  %v723_v25 = vadd.f32 %v1363_v49, %v684_v19  ;;  %v739_v26 = vadd.f32 %v1363_v49, %v700_v20 }
 0x10f   : > { %v770_v24 = vmax.f32 %v738_v18, 0.0 }
 0x110   : > { %v1108_v27 = vpack.c.bf16 %v754_v23, %v754_v23  ;;  %v755_v29 = vmax.f32 %v723_v25, 0.0  ;;  %v771_v30 = vmax.f32 %v739_v26, 0.0 }
 0x111   : > { %v1124_v28 = vpack.c.bf16 %v770_v24, %v770_v24  ;;  %v563_v31 = vpop.f32.mrb[8].mxu0  ;;  %v627_v32 = vpop.f32.mrb[8].mxu1 }
 0x112   : > { %915 = vst.msk [vmem:[%s1377_s23 + $0x8] sm:$0xf] %vm912_vm3, %v1108_v27  ;;  %v1109_v33 = vpack.c.bf16 %v755_v29, %v755_v29  ;;  %v1125_v34 = vpack.c.bf16 %v771_v30, %v771_v30  ;;  %v685_v35 = vmul.f32 %v1358_v47, %v563_v31  ;;  %v701_v36 = vmul.f32 %v1358_v47, %v627_v32  ;;  %v565_v37 = vpop.f32.mrb[9].mxu0  ;;  %v629_v38 = vpop.f32.mrb[9].mxu1 }
 0x113   : > { %931 = vst.msk [vmem:[%s1377_s23 + $0x48] sm:$0xf] %vm912_vm3, %v1124_v28  ;;  %v566_v39 = vpop.f32.mrb[10].mxu0  ;;  %v630_v40 = vpop.f32.mrb[10].mxu1 }
 0x114   : > { %916 = vst.msk [vmem:[%s1377_s23 + $0xc] sm:$0xf] %vm912_vm3, %v1109_v33  ;;  %932 = vst.msk [vmem:[%s1377_s23 + $0x4c] sm:$0xf] %vm912_vm3, %v1125_v34  ;;  %v724_v41 = vadd.f32 %v1363_v49, %v685_v35  ;;  %v740_v42 = vadd.f32 %v1363_v49, %v701_v36  ;;  %v686_v43 = vmul.f32 %v1358_v47, %v566_v39  ;;  %v568_v45 = vpop.f32.mrb[11].mxu0  ;;  %v632_v46 = vpop.f32.mrb[11].mxu1 }
 0x115   : > { %v702_v44 = vmul.f32 %v1358_v47, %v630_v40 }
 0x116   : > { %v756_v48 = vmax.f32 %v724_v41, 0.0  ;;  %v772_v50 = vmax.f32 %v740_v42, 0.0  ;;  %v725_v51 = vadd.f32 %v1363_v49, %v686_v43 }
 0x117   : > { %v741_v52 = vadd.f32 %v1363_v49, %v702_v44 }
 0x118   : > { %v1110_v53 = vpack.c.bf16 %v756_v48, %v756_v48  ;;  %v1126_v54 = vpack.c.bf16 %v772_v50, %v772_v50  ;;  %v757_v55 = vmax.f32 %v725_v51, 0.0 }
 0x119   : > { %v773_v56 = vmax.f32 %v741_v52, 0.0  ;;  %v571_v57 = vpop.f32.mrb[12].mxu0  ;;  %v635_v58 = vpop.f32.mrb[12].mxu1 }
 0x11a   : > { %917 = vst.msk [vmem:[%s1377_s23 + $0x10] sm:$0xf] %vm912_vm3, %v1110_v53  ;;  %933 = vst.msk [vmem:[%s1377_s23 + $0x50] sm:$0xf] %vm912_vm3, %v1126_v54  ;;  %v1111_v59 = vpack.c.bf16 %v757_v55, %v757_v55  ;;  %v687_v61 = vmul.f32 %v1358_v47, %v571_v57  ;;  %v703_v62 = vmul.f32 %v1358_v47, %v635_v58  ;;  %v573_v63 = vpop.f32.mrb[13].mxu0  ;;  %v637_v0 = vpop.f32.mrb[13].mxu1 }
 0x11b   : > { %v1127_v60 = vpack.c.bf16 %v773_v56, %v773_v56  ;;  %v574_v1 = vpop.f32.mrb[14].mxu0  ;;  %v638_v2 = vpop.f32.mrb[14].mxu1 }
 0x11c   : > { %918 = vst.msk [vmem:[%s1377_s23 + $0x14] sm:$0xf] %vm912_vm3, %v1111_v59  ;;  %v726_v3 = vadd.f32 %v1363_v49, %v687_v61  ;;  %v742_v4 = vadd.f32 %v1363_v49, %v703_v62  ;;  %v688_v5 = vmul.f32 %v1358_v47, %v574_v1  ;;  %v704_v6 = vmul.f32 %v1358_v47, %v638_v2  ;;  %v576_v7 = vpop.f32.mrb[15].mxu0  ;;  %v640_v8 = vpop.f32.mrb[15].mxu1 }
 0x11d   : > { %934 = vst.msk [vmem:[%s1377_s23 + $0x54] sm:$0xf] %vm912_vm3, %v1127_v60 }
 0x11e   : > { %v758_v9 = vmax.f32 %v726_v3, 0.0  ;;  %v774_v10 = vmax.f32 %v742_v4, 0.0  ;;  %v727_v11 = vadd.f32 %v1363_v49, %v688_v5  ;;  %v743_v12 = vadd.f32 %v1363_v49, %v704_v6 }
 0x120   : > { %v1112_v13 = vpack.c.bf16 %v758_v9, %v758_v9  ;;  %v1128_v14 = vpack.c.bf16 %v774_v10, %v774_v10  ;;  %v759_v15 = vmax.f32 %v727_v11, 0.0  ;;  %v775_v16 = vmax.f32 %v743_v12, 0.0 }
 0x121   : > { %v579_v17 = vpop.f32.mrb[16].mxu0  ;;  %v643_v18 = vpop.f32.mrb[16].mxu1 }
 0x122   : > { %919 = vst.msk [vmem:[%s1377_s23 + $0x18] sm:$0xf] %vm912_vm3, %v1112_v13  ;;  %935 = vst.msk [vmem:[%s1377_s23 + $0x58] sm:$0xf] %vm912_vm3, %v1128_v14  ;;  %v1113_v19 = vpack.c.bf16 %v759_v15, %v759_v15  ;;  %v1129_v20 = vpack.c.bf16 %v775_v16, %v775_v16  ;;  %v689_v21 = vmul.f32 %v1358_v47, %v579_v17  ;;  %v581_v23 = vpop.f32.mrb[17].mxu0  ;;  %v645_v24 = vpop.f32.mrb[17].mxu1 }
 0x123   : > { %v705_v22 = vmul.f32 %v1358_v47, %v643_v18  ;;  %v582_v25 = vpop.f32.mrb[18].mxu0  ;;  %v646_v26 = vpop.f32.mrb[18].mxu1 }
 0x124   : > { %920 = vst.msk [vmem:[%s1377_s23 + $0x1c] sm:$0xf] %vm912_vm3, %v1113_v19  ;;  %936 = vst.msk [vmem:[%s1377_s23 + $0x5c] sm:$0xf] %vm912_vm3, %v1129_v20  ;;  %v728_v27 = vadd.f32 %v1363_v49, %v689_v21  ;;  %v690_v29 = vmul.f32 %v1358_v47, %v582_v25  ;;  %v706_v30 = vmul.f32 %v1358_v47, %v646_v26  ;;  %v584_v31 = vpop.f32.mrb[19].mxu0  ;;  %v648_v32 = vpop.f32.mrb[19].mxu1 }
 0x125   : > { %v744_v28 = vadd.f32 %v1363_v49, %v705_v22 }
 0x126   : > { %v760_v33 = vmax.f32 %v728_v27, 0.0  ;;  %v729_v35 = vadd.f32 %v1363_v49, %v690_v29  ;;  %v745_v36 = vadd.f32 %v1363_v49, %v706_v30 }
 0x127   : > { %v776_v34 = vmax.f32 %v744_v28, 0.0 }
 0x128   : > { %v1114_v37 = vpack.c.bf16 %v760_v33, %v760_v33  ;;  %v761_v39 = vmax.f32 %v729_v35, 0.0  ;;  %v777_v40 = vmax.f32 %v745_v36, 0.0 }
 0x129   : > { %v1130_v38 = vpack.c.bf16 %v776_v34, %v776_v34  ;;  %v587_v41 = vpop.f32.mrb[20].mxu0  ;;  %v651_v42 = vpop.f32.mrb[20].mxu1 }
 0x12a   : > { %921 = vst.msk [vmem:[%s1377_s23 + $0x20] sm:$0xf] %vm912_vm3, %v1114_v37  ;;  %v1115_v43 = vpack.c.bf16 %v761_v39, %v761_v39  ;;  %v1131_v44 = vpack.c.bf16 %v777_v40, %v777_v40  ;;  %v691_v45 = vmul.f32 %v1358_v47, %v587_v41  ;;  %v707_v46 = vmul.f32 %v1358_v47, %v651_v42  ;;  %v589_v48 = vpop.f32.mrb[21].mxu0  ;;  %v653_v50 = vpop.f32.mrb[21].mxu1 }
 0x12b   : > { %937 = vst.msk [vmem:[%s1377_s23 + $0x60] sm:$0xf] %vm912_vm3, %v1130_v38  ;;  %v590_v51 = vpop.f32.mrb[22].mxu0  ;;  %v654_v52 = vpop.f32.mrb[22].mxu1 }
 0x12c   : > { %922 = vst.msk [vmem:[%s1377_s23 + $0x24] sm:$0xf] %vm912_vm3, %v1115_v43  ;;  %938 = vst.msk [vmem:[%s1377_s23 + $0x64] sm:$0xf] %vm912_vm3, %v1131_v44  ;;  %v730_v53 = vadd.f32 %v1363_v49, %v691_v45  ;;  %v746_v54 = vadd.f32 %v1363_v49, %v707_v46  ;;  %v692_v55 = vmul.f32 %v1358_v47, %v590_v51  ;;  %v592_v57 = vpop.f32.mrb[23].mxu0  ;;  %v656_v58 = vpop.f32.mrb[23].mxu1 }
 0x12d   : > { %v708_v56 = vmul.f32 %v1358_v47, %v654_v52 }
 0x12e   : > { %v762_v59 = vmax.f32 %v730_v53, 0.0  ;;  %v778_v60 = vmax.f32 %v746_v54, 0.0  ;;  %v731_v61 = vadd.f32 %v1363_v49, %v692_v55 }
 0x12f   : > { %v747_v62 = vadd.f32 %v1363_v49, %v708_v56 }
 0x130   : > { %v1116_v63 = vpack.c.bf16 %v762_v59, %v762_v59  ;;  %v1132_v0 = vpack.c.bf16 %v778_v60, %v778_v60  ;;  %v763_v1 = vmax.f32 %v731_v61, 0.0 }
 0x131   : > { %v779_v2 = vmax.f32 %v747_v62, 0.0  ;;  %v595_v3 = vpop.f32.mrb[24].mxu0  ;;  %v659_v4 = vpop.f32.mrb[24].mxu1 }
 0x132   : > { %923 = vst.msk [vmem:[%s1377_s23 + $0x28] sm:$0xf] %vm912_vm3, %v1116_v63  ;;  %939 = vst.msk [vmem:[%s1377_s23 + $0x68] sm:$0xf] %vm912_vm3, %v1132_v0  ;;  %v1117_v5 = vpack.c.bf16 %v763_v1, %v763_v1  ;;  %v693_v7 = vmul.f32 %v1358_v47, %v595_v3  ;;  %v709_v8 = vmul.f32 %v1358_v47, %v659_v4  ;;  %v597_v9 = vpop.f32.mrb[25].mxu0  ;;  %v661_v10 = vpop.f32.mrb[25].mxu1 }
 0x133   : > { %v1133_v6 = vpack.c.bf16 %v779_v2, %v779_v2  ;;  %v598_v11 = vpop.f32.mrb[26].mxu0  ;;  %v662_v12 = vpop.f32.mrb[26].mxu1 }
 0x134   : > { %924 = vst.msk [vmem:[%s1377_s23 + $0x2c] sm:$0xf] %vm912_vm3, %v1117_v5  ;;  %v732_v13 = vadd.f32 %v1363_v49, %v693_v7  ;;  %v748_v14 = vadd.f32 %v1363_v49, %v709_v8  ;;  %v694_v15 = vmul.f32 %v1358_v47, %v598_v11  ;;  %v710_v16 = vmul.f32 %v1358_v47, %v662_v12  ;;  %v600_v17 = vpop.f32.mrb[27].mxu0  ;;  %v664_v18 = vpop.f32.mrb[27].mxu1 }
 0x135   : > { %940 = vst.msk [vmem:[%s1377_s23 + $0x6c] sm:$0xf] %vm912_vm3, %v1133_v6 }
 0x136   : > { %v764_v19 = vmax.f32 %v732_v13, 0.0  ;;  %v780_v20 = vmax.f32 %v748_v14, 0.0  ;;  %v733_v21 = vadd.f32 %v1363_v49, %v694_v15  ;;  %v749_v22 = vadd.f32 %v1363_v49, %v710_v16 }
 0x138   : > { %v1118_v23 = vpack.c.bf16 %v764_v19, %v764_v19  ;;  %v1134_v24 = vpack.c.bf16 %v780_v20, %v780_v20  ;;  %v765_v25 = vmax.f32 %v733_v21, 0.0  ;;  %v781_v26 = vmax.f32 %v749_v22, 0.0 }
 0x139   : > { %v603_v27 = vpop.f32.mrb[28].mxu0  ;;  %v667_v28 = vpop.f32.mrb[28].mxu1 }
 0x13a   : > { %925 = vst.msk [vmem:[%s1377_s23 + $0x30] sm:$0xf] %vm912_vm3, %v1118_v23  ;;  %941 = vst.msk [vmem:[%s1377_s23 + $0x70] sm:$0xf] %vm912_vm3, %v1134_v24  ;;  %v1119_v29 = vpack.c.bf16 %v765_v25, %v765_v25  ;;  %v1135_v30 = vpack.c.bf16 %v781_v26, %v781_v26  ;;  %v695_v31 = vmul.f32 %v1358_v47, %v603_v27  ;;  %v605_v33 = vpop.f32.mrb[29].mxu0  ;;  %v669_v34 = vpop.f32.mrb[29].mxu1 }
 0x13b   : > { %v711_v32 = vmul.f32 %v1358_v47, %v667_v28  ;;  %v606_v35 = vpop.f32.mrb[30].mxu0  ;;  %v670_v36 = vpop.f32.mrb[30].mxu1 }
 0x13c   : > { %926 = vst.msk [vmem:[%s1377_s23 + $0x34] sm:$0xf] %vm912_vm3, %v1119_v29  ;;  %942 = vst.msk [vmem:[%s1377_s23 + $0x74] sm:$0xf] %vm912_vm3, %v1135_v30  ;;  %v734_v37 = vadd.f32 %v1363_v49, %v695_v31  ;;  %v696_v39 = vmul.f32 %v1358_v47, %v606_v35  ;;  %v712_v40 = vmul.f32 %v1358_v47, %v670_v36  ;;  %v608_v41 = vpop.f32.mrb[31].mxu0  ;;  %v672_v42 = vpop.f32.mrb[31].mxu1 }
 0x13d   : > { %v750_v38 = vadd.f32 %v1363_v49, %v711_v32 }
 0x13e   : > { %v766_v43 = vmax.f32 %v734_v37, 0.0  ;;  %v735_v45 = vadd.f32 %v1363_v49, %v696_v39  ;;  %v751_v46 = vadd.f32 %v1363_v49, %v712_v40 }
 0x13f   : > { %v782_v44 = vmax.f32 %v750_v38, 0.0 }
 0x140   : > { %v1120_v48 = vpack.c.bf16 %v766_v43, %v766_v43  ;;  %v767_v51 = vmax.f32 %v735_v45, 0.0  ;;  %v783_v52 = vmax.f32 %v751_v46, 0.0 }
 0x141   : > { %v1136_v50 = vpack.c.bf16 %v782_v44, %v782_v44 }
 0x142   : > { %927 = vst.msk [vmem:[%s1377_s23 + $0x38] sm:$0xf] %vm912_vm3, %v1120_v48  ;;  %v1121_v53 = vpack.c.bf16 %v767_v51, %v767_v51  ;;  %v1137_v54 = vpack.c.bf16 %v783_v52, %v783_v52 }
 0x143   : > { %943 = vst.msk [vmem:[%s1377_s23 + $0x78] sm:$0xf] %vm912_vm3, %v1136_v50 }
 0x144   : > { %928 = vst.msk [vmem:[%s1377_s23 + $0x3c] sm:$0xf] %vm912_vm3, %v1121_v53  ;;  %944 = vst.msk [vmem:[%s1377_s23 + $0x7c] sm:$0xf] %vm912_vm3, %v1137_v54 }
 0x145 PF: > { %s14_s15 = sadd.s32 1, %s1232_s15  }
 0x146   : > { %p11_p4 = scmp.ge.s32.totalorder %s14_s15, 4  }
 0x148   :  { %13 = sbr.rel (!%p11_p4) target bundleno = 1 (0x1), region = 66 }

// kernel: audra_forward.11
= control target key start
LH: loop header
LB: loop body
LE: loop exit
PB: predicated region body
PF: predicated region fallthrough
CT: control target
= control target key end

     0   :  { %s3207_s30 = smov 0   ;;  %s3854_s0 = inlined_call_operand.vmem [shape: bf16[2,64,8], index: 0, kind: input, shape index: {}]   ;;  %s3855_s1 = inlined_call_operand.vmem [shape: bf16[64,1], index: 1, kind: input, shape index: {}]   ;;  %s3856_s2 = inlined_call_operand.vmem [shape: bf16[64,1], index: 2, kind: input, shape index: {}]   ;;  %s3857_s3 = inlined_call_operand.vmem [shape: bf16[9,8,8], index: 3, kind: input, shape index: {}]   ;;  %s3858_s4 = inlined_call_operand.vmem [shape: f32[1,8], index: 4, kind: input, shape index: {}]   ;;  %s3859_s5 = inlined_call_operand.vmem [shape: f32[1,8], index: 5, kind: input, shape index: {}]   ;;  %s3860_s6 = inlined_call_operand.vmem [shape: bf16[9,8,8], index: 6, kind: input, shape index: {}]   ;;  %s3861_s7 = inlined_call_operand.vmem [shape: f32[1,8], index: 7, kind: input, shape index: {}]   ;;  %s3862_s8 = inlined_call_operand.vmem [shape: f32[1,8], index: 8, kind: input, shape index: {}]   ;;  %s3863_s9 = inlined_call_operand.vmem [shape: bf16[2,64,8], index: 9, kind: output, shape index: {}]  }
   0x1 LB: > { %s2694_s10 = sadd.s32 4294967295, %s3153_s30   ;;  %p2698_p0 = scmp.ge.s32.totalorder %s3153_s30, 1  ;;  %s3153_s30 = sphi %s3207_s30, %s19_s30  }
   0x2   : > { %p287_p1 = scmp.lt.s32.totalorder %s3153_s30, 3 }
   0x4   : > { %p288_p2 = pnand %p2698_p0, %p287_p1 }
   0x5   : > { %v344_v0 = vld [vmem:[%s3855_s1 + $0x8] sm:$0xf] (!%p288_p2)  ;;  %v342_v1 = vld [vmem:[%s3855_s1] sm:$0xf] (!%p288_p2)  ;;  %v3155_v2 = vmov (!%p288_p2), 0   ;;  %vm600_vm0 = vcmask (!%p288_p2), 1043456   ;;  %v366_v39 = vlaneseq (!%p288_p2) }
   0x6   : > { %291 = sbr.rel (%p288_p2) target bundleno = 752 (0x2f0), region = 56  ;;  %3134 = vset.pattern.permute.xlu1 (!%p288_p2), %v3155_v2  ;;  %3133 = vset.pattern.permute.xlu0 (!%p288_p2), %v3155_v2  ;;  %v345_v3 = vld [vmem:[%s3855_s1 + $0xc] sm:$0xf] (!%p288_p2)  ;;  %v343_v4 = vld [vmem:[%s3855_s1 + $0x4] sm:$0xf] (!%p288_p2)  ;;  %p323_p3 = scmp.lt.s32.totalorder (!%p288_p2), %s2694_s10, 1 }
   0x7   : > { %384 = vperm.xlu1 (!%p288_p2), %3134, %v344_v0   ;;  %360 = vperm.xlu0 (!%p288_p2), %3133, %v342_v1   ;;  %v2711_v5 = vld [vmem:[%s3857_s3 + $0x4] sm:$0xf] (!%p288_p2)  ;;  %v347_v7 = vld [vmem:[%s3855_s1 + $0x14] sm:$0xf] (!%p288_p2)  ;;  %v346_v8 = vld [vmem:[%s3855_s1 + $0x10] sm:$0xf] (!%p288_p2) }
   0x8   : > { %v732_v6 = vsel (!%p288_p2), %vm600_vm0, %v2711_v5, 0  ;;  %3106 = vmatprep.subr.msk.bf16.mxu1 (!%p288_p2), %vm600_vm0, %v2711_v5  ;;  %v566_v9 = vld [vmem:[%s3857_s3] sm:$0xf] (!%p288_p2)  ;;  %v2729_v10 = vld [vmem:[%s3857_s3 + $0xc] sm:$0xf] (!%p288_p2)  ;;  %vm587_vm1 = vcmask (!%p288_p2), 64512  }
   0x9   : > { %2936 = vmatpush3.bf16.msra.mxu1 (!%p288_p2), %v732_v6  ;;  %3105 = vmatprep.subr.msk.bf16.mxu0 (!%p288_p2), %vm600_vm0, %v566_v9  ;;  %v602_v11 = vsel (!%p288_p2), %vm600_vm0, %v566_v9, 0  ;;  %v349_v12 = vld [vmem:[%s3855_s1 + $0x1c] sm:$0xf] (!%p288_p2)  ;;  %v348_v13 = vld [vmem:[%s3855_s1 + $0x18] sm:$0xf] (!%p288_p2)  ;;  %v951_v23 = vsel (!%p288_p2), %vm600_vm0, %v2729_v10, 0 }
   0xa   : > { %3108 = vmatprep.subr.msk.bf16.mxu1 (!%p288_p2), %vm600_vm0, %v2729_v10  ;;  %2926 = vmatpush3.bf16.msra.mxu0 (!%p288_p2), %v602_v11  ;;  %v2720_v24 = vld [vmem:[%s3857_s3 + $0x8] sm:$0xf] (!%p288_p2)  ;;  %v351_v25 = vld [vmem:[%s3856_s2 + $0x4] sm:$0xf] (!%p288_p2)  ;;  %v350_v26 = vld [vmem:[%s3856_s2] sm:$0xf] (!%p288_p2) }
   0xb   : > { %396 = vperm.xlu1 (!%p288_p2), %3134, %v345_v3   ;;  %372 = vperm.xlu0 (!%p288_p2), %3133, %v343_v4   ;;  %v353_v29 = vld [vmem:[%s3856_s2 + $0xc] sm:$0xf] (!%p288_p2)  ;;  %v352_v30 = vld [vmem:[%s3856_s2 + $0x8] sm:$0xf] (!%p288_p2)  ;;  %v355_v32 = vld [vmem:[%s3856_s2 + $0x14] sm:$0xf] (!%p288_p2) }
   0xc   : > { %3107 = vmatprep.subr.msk.bf16.mxu0 (!%p288_p2), %vm600_vm0, %v2720_v24  ;;  %v354_v33 = vld [vmem:[%s3856_s2 + $0x10] sm:$0xf] (!%p288_p2)  ;;  %v2739_v34 = vld [vmem:[%s3857_s3 + $0x14] sm:$0xf] (!%p288_p2)  ;;  %v357_v35 = vld [vmem:[%s3856_s2 + $0x1c] sm:$0xf] (!%p288_p2) }
   0xd   : > { %s3867_s10 = smov (!%p323_p3, %s2694_s10), 1  ;;  %v356_v36 = vld [vmem:[%s3856_s2 + $0x18] sm:$0xf]  ;;  %v3156_v37 = vmov 839922192   ;;  %v367_v41 = vshrl.u32 %v366_v39, 7 }
   0xe   : > { %s2825_s29 = sshll.u32 %s3867_s10, 5  ;;  %v364_v38 = vunpack.c.l.s4 %v3156_v37  ;;  %v840_v63 = vsel %vm600_vm0, %v2720_v24, 0  ;;  %v1139_v0 = vsel %vm600_vm0, %v2739_v34, 0  ;;  %v2734_v4 = vld [vmem:[%s3857_s3 + $0x10] sm:$0xf]  ;;  %vm675_vm2 = vcmask 1040384  }
   0xf   : > { %420 = vperm.xlu1 %3134, %v347_v7   ;;  %408 = vperm.xlu0 %3133, %v346_v8   ;;  %s3261_s17 = scalar_lea.vmem %s3854_s0, %s2825_s29  ;;  %v2749_v5 = vld [vmem:[%s3857_s3 + $0x1c] sm:$0xf]  ;;  %vm915_vm3 = vcmask 1046528   ;;  %s3806_s23 = scalar_lea.vmem %s3863_s9, %s2825_s29  ;;  %vm2630_vm4 = vcmask 60416  }
  0x10   : > { %v3264_v14 = vld [vmem:[%s3261_s17] sm:$0xf]  ;;  %v3267_v15 = vld [vmem:[%s3261_s17 + $0x4] sm:$0xf]  ;;  %v3270_v16 = vld [vmem:[%s3261_s17 + $0x8] sm:$0xf]  ;;  %v365_v40 = vunpack.c.0.s8 %v364_v38 }
  0x11   : > { %v3274_v17 = vcombine.low %v3264_v14, %v3267_v15  ;;  %v3277_v18 = vld [vmem:[%s3261_s17 + $0xc] sm:$0xf]  ;;  %v3280_v19 = vld [vmem:[%s3261_s17 + $0x10] sm:$0xf]  ;;  %v3283_v20 = vld [vmem:[%s3261_s17 + $0x14] sm:$0xf] }
  0x12   : > { %v3287_v21 = vcombine.low %v3270_v16, %v3277_v18  ;;  %v3291_v22 = vcombine.low %v3280_v19, %v3283_v20  ;;  %v3311_v27 = vld [vmem:[%s3261_s17 + $0x18] sm:$0xf]  ;;  %v3314_v28 = vld [vmem:[%s3261_s17 + $0x1c] sm:$0xf]  ;;  %v3344_v42 = vsub.s32 %v365_v40, %v367_v41 }
  0x13   : > { %444 = vperm.xlu1 %3134, %v349_v12   ;;  %432 = vperm.xlu0 %3133, %v348_v13   ;;  %v3324_v31 = vcombine.low %v3311_v27, %v3314_v28 }
  0x14   : > { %2937 = vmatprep.mubr.msk.bf16.mxu1 %vm587_vm1, %v3274_v17 }
  0x15   : > { %2938 = vmatmul.mubr.msk.bf16.vlgmr.msra.gmra.mrb[0].mxu1 %vm587_vm1, %v3287_v21 }
  0x16   : > { %2941 = vmatprep.mubr.msk.bf16.mxu1 %vm587_vm1, %v3291_v22  ;;  %2956 = vmatpush3.bf16.msra.mxu1 %v951_v23 }
  0x17   : > { %476 = vperm.xlu1 %3134, %v351_v25   ;;  %464 = vperm.xlu0 %3133, %v350_v26  }
  0x18   : > { %3110 = vmatprep.subr.msk.bf16.mxu1 %vm600_vm0, %v2739_v34 }
  0x1b   : > { %500 = vperm.xlu1 %3134, %v353_v29   ;;  %488 = vperm.xlu0 %3133, %v352_v30  }
  0x1d   : > { %2942 = vmatmul.mubr.msk.bf16.gmra.mrb[4].mxu1 %vm587_vm1, %v3324_v31 }
  0x1f   : > { %524 = vperm.xlu1 %3134, %v355_v32   ;;  %512 = vperm.xlu0 %3133, %v354_v33  }
  0x23   : > { %548 = vperm.xlu1 %3134, %v357_v35   ;;  %536 = vperm.xlu0 %3133, %v356_v36  }
  0x86   : > { %v385_v43 = vpop.permute.xlu1 %384  ;;  %v361_v44 = vpop.permute.xlu0 %360 }
  0x87   : > { %v3347_v45 = vrot.slane %v385_v43, %v3344_v42  ;;  %v3350_v46 = vrot.slane %v361_v44, %v3344_v42 }
  0x89   : > { %v456_v51 = vmul.bf16 %v3347_v45, %v3270_v16  ;;  %v454_v52 = vmul.bf16 %v3350_v46, %v3264_v14 }
  0x8a   : > { %v397_v47 = vpop.permute.xlu1 %396  ;;  %v373_v48 = vpop.permute.xlu0 %372 }
  0x8b   : > { %v3353_v49 = vrot.slane %v397_v47, %v3344_v42  ;;  %v3356_v50 = vrot.slane %v373_v48, %v3344_v42 }
  0x8d   : > { %v457_v53 = vmul.bf16 %v3353_v49, %v3277_v18  ;;  %v2762_v54 = vcombine.low %v3347_v45, %v3353_v49  ;;  %v455_v55 = vmul.bf16 %v3356_v50, %v3267_v15  ;;  %v2761_v56 = vcombine.low %v3350_v46, %v3356_v50  ;;  %v2788_v45 = vld [vmem:[%s3860_s6 + $0x10] sm:$0xf] }
  0x8e   : > { %v421_v57 = vpop.permute.xlu1 %420  ;;  %v409_v58 = vpop.permute.xlu0 %408 }
  0x8f   : > { %v3370_v59 = vcombine.low %v456_v51, %v457_v53  ;;  %v3373_v60 = vrot.slane %v421_v57, %v3344_v42  ;;  %v3376_v61 = vrot.slane %v409_v58, %v3344_v42  ;;  %v3378_v62 = vcombine.low %v454_v52, %v455_v55  ;;  %v2744_v53 = vld [vmem:[%s3857_s3 + $0x18] sm:$0xf] }
  0x91   : > { %v459_v1 = vmul.bf16 %v3373_v60, %v3283_v20  ;;  %v458_v2 = vmul.bf16 %v3376_v61, %v3280_v19  ;;  %v2763_v3 = vcombine.low %v3376_v61, %v3373_v60  ;;  %2927 = vmatprep.mubr.msk.bf16.mxu0 %vm587_vm1, %v3378_v62  ;;  %2957 = vmatprep.mubr.msk.bf16.mxu1 %vm587_vm1, %v3378_v62  ;;  %v2067_v60 = vsel %vm600_vm0, %v2788_v45, 0  ;;  %v2798_v61 = vld [vmem:[%s3860_s6 + $0x18] sm:$0xf] }
  0x92   : > { %v445_v6 = vpop.permute.xlu1 %444  ;;  %v433_v7 = vpop.permute.xlu0 %432  ;;  %2928 = vmatmul.mubr.msk.bf16.vlgmr.msra.gmra.mrb[0].mxu0 %vm587_vm1, %v3370_v59  ;;  %2958 = vmatmul.mubr.msk.bf16.vlgmr.msra.gmra.mrb[8].mxu1 %vm587_vm1, %v3370_v59 }
  0x93   : > { %v3402_v8 = vcombine.low %v458_v2, %v459_v1  ;;  %v3405_v9 = vrot.slane %v445_v6, %v3344_v42  ;;  %v3408_v10 = vrot.slane %v433_v7, %v3344_v42  ;;  %2946 = vmatpush3.bf16.msra.mxu0 %v840_v63  ;;  %2976 = vmatpush3.bf16.msra.mxu1 %v1139_v0  ;;  %v2773_v6 = vld [vmem:[%s3860_s6 + $0x4] sm:$0xf]  ;;  %v1636_v7 = vld [vmem:[%s3860_s6] sm:$0xf] }
  0x94   : > { %3109 = vmatprep.subr.msk.bf16.mxu0 %vm600_vm0, %v2734_v4  ;;  %3112 = vmatprep.subr.msk.bf16.mxu1 %vm600_vm0, %v2749_v5 }
  0x95   : > { %v461_v11 = vmul.bf16 %v3405_v9, %v3314_v28  ;;  %v460_v12 = vmul.bf16 %v3408_v10, %v3311_v27  ;;  %v2764_v13 = vcombine.low %v3408_v10, %v3405_v9  ;;  %2931 = vmatprep.mubr.msk.bf16.mxu0 %vm587_vm1, %v3402_v8  ;;  %2961 = vmatprep.mubr.msk.bf16.mxu1 %vm587_vm1, %v3402_v8 }
  0x96   : > { %v477_v23 = vpop.permute.xlu1 %476  ;;  %v465_v24 = vpop.permute.xlu0 %464 }
  0x97   : > { %v3422_v25 = vcombine.low %v460_v12, %v461_v11  ;;  %v3425_v26 = vrot.slane %v477_v23, %v3344_v42  ;;  %v3428_v29 = vrot.slane %v465_v24, %v3344_v42  ;;  %v1650_v11 = vsel %vm600_vm0, %v1636_v7, 0  ;;  %v3541_v12 = vld [vmem:[%s3860_s6 + $0x8] sm:$0xf]  ;;  %v3548_v23 = vld [vmem:[%s3860_s6 + $0xc] sm:$0xf] }
  0x99   : > { %v559_v30 = vmul.bf16 %v3425_v26, %v3267_v15  ;;  %v558_v32 = vmul.bf16 %v3428_v29, %v3264_v14  ;;  %v2765_v33 = vcombine.low %v3428_v29, %v3425_v26  ;;  %v1847_v26 = vsel %vm600_vm0, %v3541_v12, 0 }
  0x9a   : > { %v501_v34 = vpop.permute.xlu1 %500  ;;  %v489_v35 = vpop.permute.xlu0 %488  ;;  %2932 = vmatmul.mubr.msk.bf16.gmra.mrb[4].mxu0 %vm587_vm1, %v3422_v25  ;;  %2962 = vmatmul.mubr.msk.bf16.gmra.mrb[12].mxu1 %vm587_vm1, %v3422_v25 }
  0x9b   : > { %v2721_v36 = vcombine.low %v558_v32, %v559_v30  ;;  %v3441_v37 = vrot.slane %v501_v34, %v3344_v42  ;;  %v3444_v15 = vrot.slane %v489_v35, %v3344_v42 }
  0x9d   : > { %v561_v14 = vmul.bf16 %v3441_v37, %v3277_v18  ;;  %v560_v38 = vmul.bf16 %v3444_v15, %v3270_v16  ;;  %2947 = vmatprep.mubr.msk.bf16.mxu0 %vm587_vm1, %v2721_v36  ;;  %2977 = vmatprep.mubr.msk.bf16.mxu1 %vm587_vm1, %v2721_v36  ;;  %v1061_v18 = vsel %vm600_vm0, %v2734_v4, 0  ;;  %v1359_v16 = vsel %vm600_vm0, %v2749_v5, 0 }
  0x9e   : > { %v525_v40 = vpop.permute.xlu1 %524  ;;  %v513_v41 = vpop.permute.xlu0 %512  ;;  %v3864_v9 = vcombine.low %v3444_v15, %v3441_v37  ;;  %v2255_v37 = vsel %vm600_vm0, %v2798_v61, 0  ;;  %v2808_v15 = vld [vmem:[%s3860_s6 + $0x20] sm:$0xf] }
  0x9f   : > { %v2722_v43 = vcombine.low %v560_v38, %v561_v14  ;;  %v3455_v44 = vrot.slane %v525_v40, %v3344_v42  ;;  %v3458_v47 = vrot.slane %v513_v41, %v3344_v42 }
  0xa1   : > { %v563_v48 = vmul.bf16 %v3455_v44, %v3283_v20  ;;  %v562_v51 = vmul.bf16 %v3458_v47, %v3280_v19 }
  0xa2   : > { %v549_v55 = vpop.permute.xlu1 %548  ;;  %v537_v57 = vpop.permute.xlu0 %536  ;;  %2948 = vmatmul.mubr.msk.bf16.vlgmr.msra.gmra.mrb[8].mxu0 %vm587_vm1, %v2722_v43  ;;  %2978 = vmatmul.mubr.msk.bf16.vlgmr.msra.gmra.mrb[16].mxu1 %vm587_vm1, %v2722_v43 }
  0xa3   : > { %v2723_v58 = vcombine.low %v562_v51, %v563_v48  ;;  %v3474_v63 = vrot.slane %v549_v55, %v3344_v42  ;;  %v3477_v20 = vrot.slane %v537_v57, %v3344_v42  ;;  %2966 = vmatpush3.bf16.msra.mxu0 %v1061_v18  ;;  %2996 = vmatpush3.bf16.msra.mxu1 %v1359_v16 }
  0xa4   : > { %3111 = vmatprep.subr.msk.bf16.mxu0 %vm600_vm0, %v2744_v53  ;;  %3114 = vmatprep.subr.msk.bf16.mxu1 %vm600_vm0, %v1636_v7 }
  0xa5   : > { %v565_v19 = vmul.bf16 %v3474_v63, %v3314_v28  ;;  %v564_v0 = vmul.bf16 %v3477_v20, %v3311_v27  ;;  %v2768_v1 = vcombine.low %v3477_v20, %v3474_v63  ;;  %2951 = vmatprep.mubr.msk.bf16.mxu0 %vm587_vm1, %v2723_v58  ;;  %2981 = vmatprep.mubr.msk.bf16.mxu1 %vm587_vm1, %v2723_v58  ;;  %v1249_v27 = vsel %vm600_vm0, %v2744_v53, 0  ;;  %v2754_v28 = vld [vmem:[%s3857_s3 + $0x20] sm:$0xf] }
  0xa7   : > { %v2724_v2 = vcombine.low %v564_v0, %v565_v19 }
  0xaa   : > { %2952 = vmatmul.mubr.msk.bf16.gmra.mrb[12].mxu0 %vm587_vm1, %v2724_v2  ;;  %2982 = vmatmul.mubr.msk.bf16.gmra.mrb[20].mxu1 %vm587_vm1, %v2724_v2 }
  0xab   : > { %2967 = vmatprep.mubr.msk.bf16.mxu0 %vm587_vm1, %v3274_v17  ;;  %2997 = vmatprep.mubr.msk.bf16.mxu1 %vm587_vm1, %v3274_v17  ;;  %v1436_v17 = vsel %vm600_vm0, %v2754_v28, 0 }
  0xb2   : > { %2968 = vmatmul.mubr.msk.bf16.vlgmr.msra.gmra.mrb[16].mxu0 %vm587_vm1, %v3287_v21  ;;  %2998 = vmatmul.mubr.msk.bf16.vlgmr.msra.gmra.mrb[24].mxu1 %vm587_vm1, %v3287_v21 }
  0xb3   : > { %2986 = vmatpush3.bf16.msra.mxu0 %v1249_v27  ;;  %2971 = vmatprep.mubr.msk.bf16.mxu0 %vm587_vm1, %v3291_v22 }
  0xb4   : > { %3113 = vmatprep.subr.msk.bf16.mxu0 %vm600_vm0, %v2754_v28  ;;  %3001 = vmatprep.mubr.msk.bf16.mxu1 %vm587_vm1, %v3291_v22 }
  0xb5   : > { %3016 = vmatpush3.bf16.msra.mxu1 %v1650_v11 }
  0xb6   : > { %3116 = vmatprep.subr.msk.bf16.mxu1 %vm600_vm0, %v3541_v12 }
  0xba   : > { %2972 = vmatmul.mubr.msk.bf16.gmra.mrb[20].mxu0 %vm587_vm1, %v3324_v31  ;;  %3002 = vmatmul.mubr.msk.bf16.gmra.mrb[28].mxu1 %vm587_vm1, %v3324_v31 }
  0xbb   : > { %2987 = vmatprep.mubr.msk.bf16.mxu0 %vm587_vm1, %v3378_v62 }
  0xc2   : > { %2988 = vmatmul.mubr.msk.bf16.vlgmr.msra.gmra.mrb[24].mxu0 %vm587_vm1, %v3370_v59 }
  0xc3   : > { %3006 = vmatpush3.bf16.msra.mxu0 %v1436_v17  ;;  %2991 = vmatprep.mubr.msk.bf16.mxu0 %vm587_vm1, %v3402_v8  ;;  %v1759_v8 = vsel %vm600_vm0, %v2773_v6, 0 }
  0xc4   : > { %3115 = vmatprep.subr.msk.bf16.mxu0 %vm600_vm0, %v2773_v6 }
  0xca   : > { %2992 = vmatmul.mubr.msk.bf16.gmra.mrb[28].mxu0 %vm587_vm1, %v3422_v25 }
  0xcb   : > { %3007 = vmatprep.mubr.msk.bf16.mxu0 %vm587_vm1, %v2721_v36 }
  0xd2   : > { %3008 = vmatmul.mubr.msk.bf16.vlgmr.msra.gmra.mrb[32].mxu0 %vm587_vm1, %v2722_v43 }
  0xd3   : > { %3011 = vmatprep.mubr.msk.bf16.mxu0 %vm587_vm1, %v2723_v58  ;;  %3026 = vmatpush3.bf16.msra.mxu0 %v1759_v8 }
  0xd4   : > { %3117 = vmatprep.subr.msk.bf16.mxu0 %vm600_vm0, %v3548_v23 }
  0xda   : > { %3012 = vmatmul.mubr.msk.bf16.gmra.mrb[36].mxu0 %vm587_vm1, %v2724_v2 }
  0xe8   : > { %v2939_v21 = vpop.f32.mrb[0].mxu1 }
  0xe9   : > { %v768_v22 = vpop.f32.mrb[1].mxu1 }
  0xea   : > { %v2940_v31 = vpop.f32.mrb[2].mxu1 }
  0xeb   : > { %v771_v42 = vpop.f32.mrb[3].mxu1 }
  0xf0   : > { %v3524_v59 = vpop.f32.mrb[4].mxu1 }
  0xf1   : > { %v784_v62 = vpop.f32.mrb[5].mxu1 }
  0xf2   : > { %v2944_v4 = vpop.f32.mrb[6].mxu1 }
  0xf3   : > { %v3526_v5 = vpop.f32.mrb[7].mxu1 }
 0x165   : > { %v2929_v24 = vpop.f32.mrb[0].mxu0  ;;  %v2959_v25 = vpop.f32.mrb[8].mxu1 }
 0x166   : > { %v638_v30 = vpop.f32.mrb[1].mxu0  ;;  %v987_v32 = vpop.f32.mrb[9].mxu1  ;;  %v679_v14 = vrot.slane %v2929_v24, 7  ;;  %v1029_v38 = vrot.slane %v2959_v25, 7 }
 0x167   : > { %v676_v34 = vrot.slane %v638_v30, 7  ;;  %v2930_v35 = vpop.f32.mrb[2].mxu0  ;;  %v2960_v36 = vpop.f32.mrb[10].mxu1  ;;  %v1026_v55 = vrot.slane %v987_v32, 7 }
 0x168   : > { %v681_v40 = vrot.slane %v2930_v35, 7  ;;  %v1031_v41 = vrot.slane %v2960_v36, 7  ;;  %v641_v43 = vpop.f32.mrb[3].mxu0  ;;  %v990_v18 = vpop.f32.mrb[11].mxu1 }
 0x169   : > { %v696_v16 = vsel %vm675_vm2, 0.0, %v676_v34  ;;  %v677_v48 = vrot.slane %v641_v43, 7  ;;  %v1027_v51 = vrot.slane %v990_v18, 7 }
 0x16a   : > { %v3553_v53 = vadd.f32 %v768_v22, %v696_v16  ;;  %v682_v57 = vsel %vm675_vm2, %v679_v14, %v681_v40  ;;  %v3557_v58 = vsel %vm675_vm2, %v1029_v38, %v1031_v41 }
 0x16b   : > { %v3559_v19 = vadd.f32 %v2940_v31, %v682_v57  ;;  %v678_v0 = vsel %vm675_vm2, %v676_v34, %v677_v48  ;;  %v680_v2 = vsel %vm675_vm2, %v677_v48, %v679_v14  ;;  %v3564_v27 = vsel %vm675_vm2, %v1027_v51, %v1029_v38 }
 0x16c   : > { %v799_v28 = vadd.f32 %v771_v42, %v678_v0  ;;  %v800_v17 = vadd.f32 %v2939_v21, %v680_v2  ;;  %v1028_v22 = vsel %vm675_vm2, %v1026_v55, %v1027_v51 }
 0x16d   : > { %v2933_v4 = vpop.f32.mrb[4].mxu0  ;;  %v2963_v6 = vpop.f32.mrb[12].mxu1 }
 0x16e   : > { %v654_v7 = vpop.f32.mrb[5].mxu0  ;;  %v1003_v8 = vpop.f32.mrb[13].mxu1  ;;  %v687_v30 = vrot.slane %v2933_v4, 7  ;;  %v1037_v32 = vrot.slane %v2963_v6, 7  ;;  %v1049_v6 = vsel %vm675_vm2, 0.0, %v1026_v55 }
 0x16f   : > { %v683_v11 = vrot.slane %v654_v7, 7  ;;  %v1033_v24 = vrot.slane %v1003_v8, 7  ;;  %v2934_v25 = vpop.f32.mrb[6].mxu0  ;;  %v2964_v31 = vpop.f32.mrb[14].mxu1 }
 0x170   : > { %v1039_v34 = vrot.slane %v2964_v31, 7  ;;  %v657_v35 = vpop.f32.mrb[7].mxu0  ;;  %v1006_v36 = vpop.f32.mrb[15].mxu1 }
 0x171   : > { %v684_v14 = vsel %vm675_vm2, %v681_v40, %v683_v11  ;;  %v685_v38 = vrot.slane %v657_v35, 7  ;;  %v1035_v42 = vrot.slane %v1006_v36, 7  ;;  %v3569_v21 = vsel %vm675_vm2, %v1031_v41, %v1033_v24 }
 0x172   : > { %v3571_v43 = vadd.f32 %v784_v62, %v684_v14  ;;  %v3574_v18 = vsel %vm675_vm2, %v1037_v32, %v1039_v34 }
 0x173   : > { %v686_v16 = vsel %vm675_vm2, %v683_v11, %v685_v38  ;;  %v688_v48 = vsel %vm675_vm2, %v685_v38, %v687_v30  ;;  %v3579_v51 = vsel %vm675_vm2, %v1035_v42, %v1037_v32  ;;  %v3582_v57 = vsel %vm675_vm2, %v1033_v24, %v1035_v42 }
 0x174   : > { %v803_v40 = vadd.f32 %v3526_v5, %v686_v16  ;;  %v804_v41 = vadd.f32 %v3524_v59, %v688_v48 }
 0x175   : > { %v2949_v0 = vpop.f32.mrb[8].mxu0  ;;  %v2979_v62 = vpop.f32.mrb[16].mxu1 }
 0x176   : > { %v876_v2 = vpop.f32.mrb[9].mxu0  ;;  %v1175_v4 = vpop.f32.mrb[17].mxu1  ;;  %v919_v25 = vrot.slane %v2949_v0, 1  ;;  %v1217_v31 = vrot.slane %v2979_v62, 1 }
 0x177   : > { %v916_v7 = vrot.slane %v876_v2, 1  ;;  %v2950_v8 = vpop.f32.mrb[10].mxu0  ;;  %v2980_v11 = vpop.f32.mrb[18].mxu1  ;;  %v1214_v35 = vrot.slane %v1175_v4, 1 }
 0x178   : > { %v921_v30 = vrot.slane %v2950_v8, 1  ;;  %v1219_v32 = vrot.slane %v2980_v11, 1  ;;  %v879_v24 = vpop.f32.mrb[11].mxu0  ;;  %v1178_v34 = vpop.f32.mrb[19].mxu1 }
 0x179   : > { %v939_v5 = vsel %vm915_vm3, 0.0, %v916_v7  ;;  %v917_v59 = vrot.slane %v879_v24, 1  ;;  %v1215_v36 = vrot.slane %v1178_v34, 1 }
 0x17a   : > { %v922_v14 = vsel %vm915_vm3, %v919_v25, %v921_v30  ;;  %v1220_v38 = vsel %vm915_vm3, %v1217_v31, %v1219_v32  ;;  %v1050_v42 = vadd.f32 %v1049_v6, %v939_v5 }
 0x17b   : > { %v918_v55 = vsel %vm915_vm3, %v916_v7, %v917_v59  ;;  %v920_v16 = vsel %vm915_vm3, %v917_v59, %v919_v25  ;;  %v1216_v48 = vsel %vm915_vm3, %v1214_v35, %v1215_v36  ;;  %v943_v0 = vadd.f32 %v922_v14, %v800_v17 }
 0x17c   : > { %v942_v62 = vadd.f32 %v920_v16, %v799_v28  ;;  %v941_v2 = vadd.f32 %v918_v55, %v3553_v53  ;;  %v1218_v8 = vsel %vm915_vm3, %v1215_v36, %v1217_v31 }
 0x17d   : > { %v2953_v4 = vpop.f32.mrb[12].mxu0  ;;  %v2983_v11 = vpop.f32.mrb[20].mxu1  ;;  %v1053_v24 = vadd.f32 %v3557_v58, %v943_v0 }
 0x17e   : > { %v892_v34 = vpop.f32.mrb[13].mxu0  ;;  %v1191_v52 = vpop.f32.mrb[21].mxu1  ;;  %v1052_v6 = vadd.f32 %v3564_v27, %v942_v62  ;;  %v1051_v5 = vadd.f32 %v1028_v22, %v941_v2  ;;  %v927_v35 = vrot.slane %v2953_v4, 1  ;;  %v1225_v17 = vrot.slane %v2983_v11, 1 }
 0x17f   : > { %v923_v7 = vrot.slane %v892_v34, 1  ;;  %v1221_v39 = vrot.slane %v1191_v52, 1  ;;  %v2954_v25 = vpop.f32.mrb[14].mxu0  ;;  %v2984_v59 = vpop.f32.mrb[22].mxu1 }
 0x180   : > { %v929_v28 = vrot.slane %v2954_v25, 1  ;;  %v1227_v14 = vrot.slane %v2984_v59, 1  ;;  %v895_v53 = vpop.f32.mrb[15].mxu0  ;;  %v1194_v55 = vpop.f32.mrb[23].mxu1 }
 0x181   : > { %v924_v31 = vsel %vm915_vm3, %v921_v30, %v923_v7  ;;  %v925_v36 = vrot.slane %v895_v53, 1  ;;  %v1223_v16 = vrot.slane %v1194_v55, 1  ;;  %v1222_v58 = vsel %vm915_vm3, %v1219_v32, %v1221_v39 }
 0x182   : > { %v930_v0 = vsel %vm915_vm3, %v927_v35, %v929_v28  ;;  %v1228_v27 = vsel %vm915_vm3, %v1225_v17, %v1227_v14  ;;  %v944_v52 = vadd.f32 %v924_v31, %v3559_v19 }
 0x183   : > { %v926_v22 = vsel %vm915_vm3, %v923_v7, %v925_v36  ;;  %v928_v62 = vsel %vm915_vm3, %v925_v36, %v927_v35  ;;  %v1224_v2 = vsel %vm915_vm3, %v1221_v39, %v1223_v16  ;;  %v947_v4 = vadd.f32 %v930_v0, %v804_v41 }
 0x184   : > { %v946_v11 = vadd.f32 %v928_v62, %v803_v40  ;;  %v1054_v30 = vadd.f32 %v3569_v21, %v944_v52  ;;  %v945_v34 = vadd.f32 %v926_v22, %v3571_v43  ;;  %v1226_v32 = vsel %vm915_vm3, %v1223_v16, %v1225_v17 }
 0x185   : > { %v2969_v25 = vpop.f32.mrb[16].mxu0  ;;  %v1057_v59 = vadd.f32 %v3574_v18, %v947_v4  ;;  %v2999_v28 = vpop.f32.mrb[24].mxu1 }
 0x186   : > { %v1130_v53 = vadd.f32 %v2969_v25, %v1052_v6  ;;  %v1097_v19 = vpop.f32.mrb[17].mxu0  ;;  %v1056_v7 = vadd.f32 %v3579_v51, %v946_v11  ;;  %v1055_v35 = vadd.f32 %v3582_v57, %v945_v34  ;;  %v1395_v55 = vpop.f32.mrb[25].mxu1 }
 0x187   : > { %v1128_v39 = vadd.f32 %v1097_v19, %v1050_v42  ;;  %v2970_v41 = vpop.f32.mrb[18].mxu0  ;;  %v3000_v40 = vpop.f32.mrb[26].mxu1 }
 0x188   : > { %v1240_v31 = vadd.f32 %v1220_v38, %v1130_v53  ;;  %v1131_v21 = vadd.f32 %v2970_v41, %v1053_v24  ;;  %v1100_v36 = vpop.f32.mrb[19].mxu0  ;;  %v1397_v43 = vpop.f32.mrb[27].mxu1  ;;  %v1237_v38 = vsel %vm915_vm3, %v1227_v14, 0.0 }
 0x189   : > { %v1238_v0 = vadd.f32 %v1216_v48, %v1128_v39  ;;  %v1129_v17 = vadd.f32 %v1100_v36, %v1051_v5 }
 0x18a   : > { %v1241_v16 = vadd.f32 %v1222_v58, %v1131_v21 }
 0x18b   : > { %v1239_v52 = vadd.f32 %v1218_v8, %v1129_v17 }
 0x18d   : > { %v2973_v18 = vpop.f32.mrb[20].mxu0  ;;  %v3003_v22 = vpop.f32.mrb[28].mxu1 }
 0x18e   : > { %v1134_v6 = vadd.f32 %v2973_v18, %v1056_v7  ;;  %v1113_v62 = vpop.f32.mrb[21].mxu0  ;;  %v1410_v4 = vpop.f32.mrb[29].mxu1 }
 0x18f   : > { %v1132_v51 = vadd.f32 %v1113_v62, %v1054_v30  ;;  %v2974_v11 = vpop.f32.mrb[22].mxu0  ;;  %v3004_v57 = vpop.f32.mrb[30].mxu1 }
 0x190   : > { %v1244_v34 = vadd.f32 %v1228_v27, %v1134_v6  ;;  %v1135_v42 = vadd.f32 %v2974_v11, %v1057_v59  ;;  %v1116_v25 = vpop.f32.mrb[23].mxu0  ;;  %v1413_v19 = vpop.f32.mrb[31].mxu1 }
 0x191   : > { %v1242_v24 = vadd.f32 %v1224_v2, %v1132_v51  ;;  %v1133_v53 = vadd.f32 %v1116_v25, %v1055_v35 }
 0x192   : > { %v1245_v48 = vadd.f32 %v1237_v38, %v1135_v42 }
 0x193   : > { %v1243_v5 = vadd.f32 %v1226_v32, %v1133_v53 }
 0x195   : > { %v2989_v58 = vpop.f32.mrb[24].mxu0 }
 0x196   : > { %v1285_v8 = vpop.f32.mrb[25].mxu0  ;;  %v1327_v39 = vrot.slane %v2989_v58, 7 }
 0x197   : > { %v2990_v55 = vpop.f32.mrb[26].mxu0  ;;  %v1324_v21 = vrot.slane %v1285_v8, 7 }
 0x198   : > { %v1329_v7 = vrot.slane %v2990_v55, 7  ;;  %v1288_v41 = vpop.f32.mrb[27].mxu0 }
 0x199   : > { %v1325_v30 = vrot.slane %v1288_v41, 7 }
 0x19a   : > { %v1330_v36 = vsel %vm675_vm2, %v1327_v39, %v1329_v7 }
 0x19b   : > { %v1328_v27 = vsel %vm675_vm2, %v1325_v30, %v1327_v39  ;;  %v1350_v59 = vadd.f32 %v1330_v36, %v1240_v31  ;;  %v1326_v17 = vsel %vm675_vm2, %v1324_v21, %v1325_v30 }
 0x19c   : > { %v1349_v14 = vadd.f32 %v1328_v27, %v1239_v52  ;;  %v1348_v2 = vadd.f32 %v1326_v17, %v1238_v0 }
 0x19d   : > { %v1427_v35 = vadd.f32 %v3000_v40, %v1350_v59  ;;  %v2993_v18 = vpop.f32.mrb[28].mxu0 }
 0x19e   : > { %v1426_v32 = vadd.f32 %v2999_v28, %v1349_v14  ;;  %v1425_v6 = vadd.f32 %v1397_v43, %v1348_v2  ;;  %v1301_v62 = vpop.f32.mrb[29].mxu0  ;;  %v1335_v42 = vrot.slane %v2993_v18, 7 }
 0x19f   : > { %v1331_v51 = vrot.slane %v1301_v62, 7  ;;  %v2994_v11 = vpop.f32.mrb[30].mxu0 }
 0x1a0   : > { %v1337_v25 = vrot.slane %v2994_v11, 7  ;;  %v1304_v38 = vpop.f32.mrb[31].mxu0 }
 0x1a1   : > { %v1333_v53 = vrot.slane %v1304_v38, 7  ;;  %v1332_v58 = vsel %vm675_vm2, %v1329_v7, %v1331_v51 }
 0x1a2   : > { %v1347_v8 = vsel %vm675_vm2, %v1337_v25, 0.0  ;;  %v1351_v31 = vadd.f32 %v1332_v58, %v1241_v16  ;;  %v1338_v55 = vsel %vm675_vm2, %v1335_v42, %v1337_v25 }
 0x1a3   : > { %v1355_v52 = vadd.f32 %v1347_v8, %v1245_v48  ;;  %v1336_v40 = vsel %vm675_vm2, %v1333_v53, %v1335_v42  ;;  %v1354_v0 = vadd.f32 %v1338_v55, %v1244_v34  ;;  %v1334_v28 = vsel %vm675_vm2, %v1331_v51, %v1333_v53 }
 0x1a4   : > { %v1353_v43 = vadd.f32 %v1336_v40, %v1243_v5  ;;  %v1428_v39 = vadd.f32 %v1410_v4, %v1351_v31  ;;  %v1352_v41 = vadd.f32 %v1334_v28, %v1242_v24  ;;  %v2759_v4 = vld [vmem:[%s3858_s4] ss:$0 sm:$0xff] }
 0x1a5   : > { %v1431_v21 = vadd.f32 %v3004_v57, %v1354_v0  ;;  %v3009_v30 = vpop.f32.mrb[32].mxu0  ;;  %v1552_v58 = vmul.f32 %v2759_v4, %v1355_v52 }
 0x1a6   : > { %v1430_v36 = vadd.f32 %v3003_v22, %v1353_v43  ;;  %v1429_v27 = vadd.f32 %v1413_v19, %v1352_v41  ;;  %v1472_v59 = vpop.f32.mrb[33].mxu0  ;;  %v1510_v17 = vrot.slane %v3009_v30, 1  ;;  %v2760_v22 = vld [vmem:[%s3859_s5] ss:$0 sm:$0xff] }
 0x1a7   : > { %v3010_v7 = vpop.f32.mrb[34].mxu0 }
 0x1a8   : > { %v1512_v14 = vrot.slane %v3010_v7, 1  ;;  %v1474_v16 = vpop.f32.mrb[35].mxu0 }
 0x1a9   : > { %v1509_v2 = vrot.slane %v1474_v16, 1 }
 0x1aa   : > { %v1513_v48 = vsel %vm915_vm3, %v1510_v17, %v1512_v14 }
 0x1ab   : > { %v1531_v18 = vadd.f32 %v1513_v48, %v1426_v32  ;;  %v1511_v34 = vsel %vm915_vm3, %v1509_v2, %v1510_v17  ;;  %v1567_v2 = vadd.f32 %v2760_v22, %v1552_v58 }
 0x1ac   : > { %v1530_v24 = vadd.f32 %v1511_v34, %v1425_v6 }
 0x1ad   : > { %v1546_v57 = vmul.f32 %v2759_v4, %v1531_v18  ;;  %v3013_v5 = vpop.f32.mrb[36].mxu0 }
 0x1ae   : > { %v1545_v19 = vmul.f32 %v2759_v4, %v1530_v24  ;;  %v1487_v62 = vpop.f32.mrb[37].mxu0  ;;  %v1518_v32 = vrot.slane %v3013_v5, 1 }
 0x1af   : > { %v1561_v51 = vadd.f32 %v2760_v22, %v1546_v57  ;;  %v1514_v11 = vrot.slane %v1487_v62, 1  ;;  %v3014_v42 = vpop.f32.mrb[38].mxu0 }
 0x1b0   : > { %v1560_v25 = vadd.f32 %v2760_v22, %v1545_v19  ;;  %v1520_v38 = vrot.slane %v3014_v42, 1  ;;  %v1490_v53 = vpop.f32.mrb[39].mxu0  ;;  %v1957_v42 = vsel %vm600_vm0, %v3548_v23, 0 }
 0x1b1   : > { %v1569_v8 = vmax.f32 %v1561_v51, 0.0  ;;  %v1515_v31 = vsel %vm915_vm3, %v1512_v14, %v1514_v11  ;;  %v1516_v6 = vrot.slane %v1490_v53, 1 }
 0x1b2   : > { %v1568_v55 = vmax.f32 %v1560_v25, 0.0  ;;  %v1532_v40 = vadd.f32 %v1515_v31, %v1427_v35  ;;  %v1521_v0 = vsel %vm915_vm3, %v1518_v32, %v1520_v38  ;;  %v1529_v28 = vsel %vm915_vm3, %v1520_v38, 0.0 }
 0x1b3   : > { %v1535_v43 = vadd.f32 %v1521_v0, %v1430_v36  ;;  %v1536_v41 = vadd.f32 %v1529_v28, %v1431_v21  ;;  %v1517_v30 = vsel %vm915_vm3, %v1514_v11, %v1516_v6  ;;  %v1519_v59 = vsel %vm915_vm3, %v1516_v6, %v1518_v32 }
 0x1b4   : > { %v1547_v7 = vmul.f32 %v2759_v4, %v1532_v40  ;;  %v1533_v17 = vadd.f32 %v1517_v30, %v1428_v39  ;;  %v1534_v16 = vadd.f32 %v1519_v59, %v1429_v27  ;;  %v3633_v52 = vpack.c.bf16 %v1569_v8, %v1568_v55 }
 0x1b5   : > { %v1550_v14 = vmul.f32 %v2759_v4, %v1535_v43  ;;  %v1551_v48 = vmul.f32 %v2759_v4, %v1536_v41 }
 0x1b6   : > { %v1562_v18 = vadd.f32 %v2760_v22, %v1547_v7  ;;  %v1548_v35 = vmul.f32 %v2759_v4, %v1533_v17  ;;  %v1549_v34 = vmul.f32 %v2759_v4, %v1534_v16  ;;  %3027 = vmatprep.mubr.msk.bf16.mxu0 %vm587_vm1, %v3633_v52  ;;  %v3641_v21 = vmul.bf16 %v2761_v56, %v3633_v52 }
 0x1b7   : > { %v1565_v36 = vadd.f32 %v2760_v22, %v1550_v14  ;;  %v1566_v39 = vadd.f32 %v2760_v22, %v1551_v48  ;;  %v3647_v27 = vmul.bf16 %v2765_v33, %v3633_v52  ;;  %v1575_v4 = vmax.f32 %v1567_v2, 0.0 }
 0x1b8   : > { %v1563_v24 = vadd.f32 %v2760_v22, %v1548_v35  ;;  %v1564_v57 = vadd.f32 %v2760_v22, %v1549_v34  ;;  %3017 = vmatprep.mubr.msk.bf16.mxu1 %vm587_vm1, %v3641_v21  ;;  %v1570_v62 = vmax.f32 %v1562_v18, 0.0  ;;  %v2793_v22 = vld [vmem:[%s3860_s6 + $0x14] sm:$0xf] }
 0x1b9   : > { %v1573_v5 = vmax.f32 %v1565_v36, 0.0  ;;  %v1574_v19 = vmax.f32 %v1566_v39, 0.0  ;;  %v2145_v49 = vsel %vm600_vm0, %v2793_v22, 0 }
 0x1ba   : > { %v1571_v46 = vmax.f32 %v1563_v24, 0.0  ;;  %v1572_v50 = vmax.f32 %v1564_v57, 0.0 }
 0x1bb   : > { %v1579_v56 = vpack.c.bf16 %v1575_v4, %v1574_v19 }
 0x1bc   : > { %v1577_v51 = vpack.c.bf16 %v1571_v46, %v1570_v62  ;;  %v1578_v11 = vpack.c.bf16 %v1573_v5, %v1572_v50 }
 0x1bd   : > { %v1607_v29 = vmul.bf16 %v2764_v13, %v1579_v56  ;;  %v1635_v33 = vmul.bf16 %v2768_v1, %v1579_v56  ;;  %v3865_v13 = vcombine.low %v3458_v47, %v3455_v44  ;;  %v2442_v44 = vsel %vm600_vm0, %v2808_v15, 0 }
 0x1be   : > { %3028 = vmatmul.mubr.msk.bf16.vlgmr.msra.gmra.mrb[40].mxu0 %vm587_vm1, %v1577_v51  ;;  %v1605_v23 = vmul.bf16 %v2762_v54, %v1577_v51  ;;  %v1606_v12 = vmul.bf16 %v2763_v3, %v1578_v11  ;;  %v1633_v10 = vmul.bf16 %v3864_v9, %v1577_v51  ;;  %v2803_v54 = vld [vmem:[%s3860_s6 + $0x1c] sm:$0xf] }
 0x1bf   : > { %v1634_v63 = vmul.bf16 %v3865_v13, %v1578_v11  ;;  %3031 = vmatprep.mubr.msk.bf16.mxu0 %vm587_vm1, %v1578_v11  ;;  %3046 = vmatpush3.bf16.msra.mxu0 %v1957_v42  ;;  %v2365_v3 = vsel %vm600_vm0, %v2803_v54, 0 }
 0x1c0   : > { %3018 = vmatmul.mubr.msk.bf16.vlgmr.msra.gmra.mrb[32].mxu1 %vm587_vm1, %v1605_v23  ;;  %3119 = vmatprep.subr.msk.bf16.mxu0 %vm600_vm0, %v2793_v22 }
 0x1c1   : > { %3036 = vmatpush3.bf16.msra.mxu1 %v1847_v26  ;;  %3021 = vmatprep.mubr.msk.bf16.mxu1 %vm587_vm1, %v1606_v12 }
 0x1c2   : > { %3118 = vmatprep.subr.msk.bf16.mxu1 %vm600_vm0, %v2788_v45 }
 0x1c6   : > { %3032 = vmatmul.mubr.msk.bf16.gmra.mrb[44].mxu0 %vm587_vm1, %v1579_v56 }
 0x1c7   : > { %3047 = vmatprep.mubr.msk.bf16.mxu0 %vm587_vm1, %v3641_v21 }
 0x1c8   : > { %3022 = vmatmul.mubr.msk.bf16.gmra.mrb[36].mxu1 %vm587_vm1, %v1607_v29 }
 0x1c9   : > { %3037 = vmatprep.mubr.msk.bf16.mxu1 %vm587_vm1, %v3647_v27 }
 0x1ce   : > { %3048 = vmatmul.mubr.msk.bf16.vlgmr.msra.gmra.mrb[48].mxu0 %vm587_vm1, %v1605_v23 }
 0x1cf   : > { %3051 = vmatprep.mubr.msk.bf16.mxu0 %vm587_vm1, %v1606_v12  ;;  %3066 = vmatpush3.bf16.msra.mxu0 %v2145_v49 }
 0x1d0   : > { %3038 = vmatmul.mubr.msk.bf16.vlgmr.msra.gmra.mrb[40].mxu1 %vm587_vm1, %v1633_v10  ;;  %3121 = vmatprep.subr.msk.bf16.mxu0 %vm600_vm0, %v2803_v54 }
 0x1d1   : > { %3056 = vmatpush3.bf16.msra.mxu1 %v2067_v60  ;;  %3041 = vmatprep.mubr.msk.bf16.mxu1 %vm587_vm1, %v1634_v63 }
 0x1d2   : > { %3120 = vmatprep.subr.msk.bf16.mxu1 %vm600_vm0, %v2798_v61 }
 0x1d6   : > { %3052 = vmatmul.mubr.msk.bf16.gmra.mrb[52].mxu0 %vm587_vm1, %v1607_v29 }
 0x1d7   : > { %3067 = vmatprep.mubr.msk.bf16.mxu0 %vm587_vm1, %v3647_v27 }
 0x1d8   : > { %3042 = vmatmul.mubr.msk.bf16.gmra.mrb[44].mxu1 %vm587_vm1, %v1635_v33 }
 0x1d9   : > { %3057 = vmatprep.mubr.msk.bf16.mxu1 %vm587_vm1, %v3633_v52 }
 0x1de   : > { %3068 = vmatmul.mubr.msk.bf16.vlgmr.msra.gmra.mrb[56].mxu0 %vm587_vm1, %v1633_v10 }
 0x1df   : > { %3071 = vmatprep.mubr.msk.bf16.mxu0 %vm587_vm1, %v1634_v63  ;;  %3086 = vmatpush3.bf16.msra.mxu0 %v2365_v3 }
 0x1e0   : > { %3058 = vmatmul.mubr.msk.bf16.vlgmr.msra.gmra.mrb[48].mxu1 %vm587_vm1, %v1577_v51 }
 0x1e1   : > { %3076 = vmatpush3.bf16.msra.mxu1 %v2255_v37  ;;  %3061 = vmatprep.mubr.msk.bf16.mxu1 %vm587_vm1, %v1578_v11 }
 0x1e2   : > { %3122 = vmatprep.subr.msk.bf16.mxu1 %vm600_vm0, %v2808_v15 }
 0x1e6   : > { %3072 = vmatmul.mubr.msk.bf16.gmra.mrb[60].mxu0 %vm587_vm1, %v1635_v33 }
 0x1e7   : > { %3087 = vmatprep.mubr.msk.bf16.mxu0 %vm587_vm1, %v3633_v52 }
 0x1e8   : > { %3062 = vmatmul.mubr.msk.bf16.gmra.mrb[52].mxu1 %vm587_vm1, %v1579_v56 }
 0x1e9   : > { %3077 = vmatprep.mubr.msk.bf16.mxu1 %vm587_vm1, %v3641_v21 }
 0x1ee   : > { %3088 = vmatmul.mubr.msk.bf16.vlgmr.msra.gmra.mrb[64].mxu0 %vm587_vm1, %v1577_v51 }
 0x1ef   : > { %3091 = vmatprep.mubr.msk.bf16.mxu0 %vm587_vm1, %v1578_v11 }
 0x1f0   : > { %3078 = vmatmul.mubr.msk.bf16.vlgmr.msra.gmra.mrb[56].mxu1 %vm587_vm1, %v1605_v23 }
 0x1f1   : > { %3096 = vmatpush3.bf16.msra.mxu1 %v2442_v44  ;;  %3081 = vmatprep.mubr.msk.bf16.mxu1 %vm587_vm1, %v1606_v12 }
 0x1f6   : > { %3092 = vmatmul.mubr.msk.bf16.gmra.mrb[68].mxu0 %vm587_vm1, %v1579_v56 }
 0x1f8   : > { %3082 = vmatmul.mubr.msk.bf16.gmra.mrb[60].mxu1 %vm587_vm1, %v1607_v29 }
 0x1f9   : > { %3097 = vmatprep.mubr.msk.bf16.mxu1 %vm587_vm1, %v3647_v27 }
 0x200   : > { %3098 = vmatmul.mubr.msk.bf16.vlgmr.msra.gmra.mrb[64].mxu1 %vm587_vm1, %v1633_v10 }
 0x201   : > { %3101 = vmatprep.mubr.msk.bf16.mxu1 %vm587_vm1, %v1634_v63 }
 0x208   : > { %3102 = vmatmul.mubr.msk.bf16.gmra.mrb[68].mxu1 %vm587_vm1, %v1635_v33 }
 0x291   : > { %v3029_v47 = vpop.f32.mrb[40].mxu0 }
 0x292   : > { %v1795_v20 = vpop.f32.mrb[41].mxu0 }
 0x293   : > { %v3019_v1 = vpop.f32.mrb[32].mxu1  ;;  %v3030_v25 = vpop.f32.mrb[42].mxu0 }
 0x294   : > { %v1686_v32 = vpop.f32.mrb[33].mxu1  ;;  %v1798_v38 = vpop.f32.mrb[43].mxu0  ;;  %v1726_v8 = vrot.slane %v3019_v1, 7 }
 0x295   : > { %v1723_v53 = vrot.slane %v1686_v32, 7  ;;  %v3020_v58 = vpop.f32.mrb[34].mxu1 }
 0x296   : > { %v1728_v31 = vrot.slane %v3020_v58, 7  ;;  %v1689_v6 = vpop.f32.mrb[35].mxu1 }
 0x297   : > { %v1743_v55 = vsel %vm675_vm2, 0.0, %v1723_v53  ;;  %v1724_v40 = vrot.slane %v1689_v6, 7 }
 0x298   : > { %v1825_v0 = vadd.f32 %v1795_v20, %v1743_v55  ;;  %v1729_v28 = vsel %vm675_vm2, %v1726_v8, %v1728_v31 }
 0x299   : > { %v3741_v43 = vadd.f32 %v3030_v25, %v1729_v28  ;;  %v1725_v41 = vsel %vm675_vm2, %v1723_v53, %v1724_v40  ;;  %v1727_v30 = vsel %vm675_vm2, %v1724_v40, %v1726_v8  ;;  %v3033_v59 = vpop.f32.mrb[44].mxu0 }
 0x29a   : > { %v1826_v7 = vadd.f32 %v1798_v38, %v1725_v41  ;;  %v1827_v17 = vadd.f32 %v3029_v47, %v1727_v30  ;;  %v1811_v16 = vpop.f32.mrb[45].mxu0 }
 0x29b   : > { %v3023_v52 = vpop.f32.mrb[36].mxu1  ;;  %v3034_v2 = vpop.f32.mrb[46].mxu0 }
 0x29c   : > { %v1702_v14 = vpop.f32.mrb[37].mxu1  ;;  %v1814_v48 = vpop.f32.mrb[47].mxu0  ;;  %v1734_v21 = vrot.slane %v3023_v52, 7 }
 0x29d   : > { %v1730_v18 = vrot.slane %v1702_v14, 7  ;;  %v3024_v35 = vpop.f32.mrb[38].mxu1 }
 0x29e   : > { %v1705_v34 = vpop.f32.mrb[39].mxu1 }
 0x29f   : > { %v1731_v36 = vsel %vm675_vm2, %v1728_v31, %v1730_v18  ;;  %v1732_v39 = vrot.slane %v1705_v34, 7 }
 0x2a0   : > { %v3746_v27 = vadd.f32 %v1811_v16, %v1731_v36 }
 0x2a1   : > { %v1733_v24 = vsel %vm675_vm2, %v1730_v18, %v1732_v39  ;;  %v1735_v57 = vsel %vm675_vm2, %v1732_v39, %v1734_v21  ;;  %v3049_v4 = vpop.f32.mrb[48].mxu0 }
 0x2a2   : > { %v1830_v5 = vadd.f32 %v1814_v48, %v1733_v24  ;;  %v1831_v19 = vadd.f32 %v3033_v59, %v1735_v57  ;;  %v1993_v62 = vpop.f32.mrb[49].mxu0  ;;  %v2035_v51 = vrot.slane %v3049_v4, 7 }
 0x2a3   : > { %v2032_v46 = vrot.slane %v1993_v62, 7  ;;  %v3039_v50 = vpop.f32.mrb[40].mxu1  ;;  %v3050_v56 = vpop.f32.mrb[50].mxu0 }
 0x2a4   : > { %v2037_v11 = vrot.slane %v3050_v56, 7  ;;  %v1883_v42 = vpop.f32.mrb[41].mxu1  ;;  %v1996_v26 = vpop.f32.mrb[51].mxu0  ;;  %v1925_v12 = vrot.slane %v3039_v50, 1 }
 0x2a5   : > { %v1922_v29 = vrot.slane %v1883_v42, 1  ;;  %v2033_v33 = vrot.slane %v1996_v26, 7  ;;  %v3040_v22 = vpop.f32.mrb[42].mxu1  ;;  %v2055_v23 = vsel %vm675_vm2, 0.0, %v2032_v46 }
 0x2a6   : > { %v1927_v9 = vrot.slane %v3040_v22, 1  ;;  %v1886_v10 = vpop.f32.mrb[43].mxu1  ;;  %v2038_v13 = vsel %vm675_vm2, %v2035_v51, %v2037_v11 }
 0x2a7   : > { %v1945_v63 = vsel %vm915_vm3, 0.0, %v1922_v29  ;;  %v1923_v45 = vrot.slane %v1886_v10, 1  ;;  %v2036_v49 = vsel %vm675_vm2, %v2033_v33, %v2035_v51  ;;  %v2034_v54 = vsel %vm675_vm2, %v2032_v46, %v2033_v33 }
 0x2a8   : > { %v1928_v60 = vsel %vm915_vm3, %v1925_v12, %v1927_v9  ;;  %v2056_v61 = vadd.f32 %v2055_v23, %v1945_v63 }
 0x2a9   : > { %v1924_v3 = vsel %vm915_vm3, %v1922_v29, %v1923_v45  ;;  %v1926_v37 = vsel %vm915_vm3, %v1923_v45, %v1925_v12  ;;  %v3053_v15 = vpop.f32.mrb[52].mxu0  ;;  %v1949_v44 = vadd.f32 %v1928_v60, %v1827_v17 }
 0x2aa   : > { %v2009_v47 = vpop.f32.mrb[53].mxu0  ;;  %v1948_v20 = vadd.f32 %v1926_v37, %v1826_v7  ;;  %v1947_v1 = vadd.f32 %v1924_v3, %v1825_v0  ;;  %v2043_v58 = vrot.slane %v3053_v15, 7 }
 0x2ab   : > { %v2039_v25 = vrot.slane %v2009_v47, 7  ;;  %v3043_v32 = vpop.f32.mrb[44].mxu1  ;;  %v3054_v38 = vpop.f32.mrb[54].mxu0  ;;  %v2059_v53 = vadd.f32 %v2038_v13, %v1949_v44 }
 0x2ac   : > { %v2045_v8 = vrot.slane %v3054_v38, 7  ;;  %v1899_v31 = vpop.f32.mrb[45].mxu1  ;;  %v2012_v6 = vpop.f32.mrb[55].mxu0  ;;  %v2058_v55 = vadd.f32 %v2036_v49, %v1948_v20  ;;  %v2057_v40 = vadd.f32 %v2034_v54, %v1947_v1  ;;  %v1933_v16 = vrot.slane %v3043_v32, 1 }
 0x2ad   : > { %v1929_v28 = vrot.slane %v1899_v31, 1  ;;  %v2041_v41 = vrot.slane %v2012_v6, 7  ;;  %v3044_v30 = vpop.f32.mrb[46].mxu1  ;;  %v2040_v59 = vsel %vm675_vm2, %v2037_v11, %v2039_v25 }
 0x2ae   : > { %v1935_v17 = vrot.slane %v3044_v30, 1  ;;  %v1902_v52 = vpop.f32.mrb[47].mxu1  ;;  %v2046_v0 = vsel %vm675_vm2, %v2043_v58, %v2045_v8 }
 0x2af   : > { %v1930_v7 = vsel %vm915_vm3, %v1927_v9, %v1929_v28  ;;  %v1931_v2 = vrot.slane %v1902_v52, 1  ;;  %v2044_v14 = vsel %vm675_vm2, %v2041_v41, %v2043_v58  ;;  %v2042_v48 = vsel %vm675_vm2, %v2039_v25, %v2041_v41 }
 0x2b0   : > { %v1936_v18 = vsel %vm915_vm3, %v1933_v16, %v1935_v17  ;;  %v1950_v35 = vadd.f32 %v1930_v7, %v3741_v43 }
 0x2b1   : > { %v1932_v34 = vsel %vm915_vm3, %v1929_v28, %v1931_v2  ;;  %v1934_v21 = vsel %vm915_vm3, %v1931_v2, %v1933_v16  ;;  %v3069_v36 = vpop.f32.mrb[56].mxu0  ;;  %v1953_v39 = vadd.f32 %v1936_v18, %v1831_v19 }
 0x2b2   : > { %v2181_v24 = vpop.f32.mrb[57].mxu0  ;;  %v1952_v57 = vadd.f32 %v1934_v21, %v1830_v5  ;;  %v2060_v4 = vadd.f32 %v2040_v59, %v1950_v35  ;;  %v1951_v62 = vadd.f32 %v1932_v34, %v3746_v27  ;;  %v2223_v46 = vrot.slane %v3069_v36, 1 }
 0x2b3   : > { %v3059_v50 = vpop.f32.mrb[48].mxu1  ;;  %v3070_v56 = vpop.f32.mrb[58].mxu0  ;;  %v2063_v51 = vadd.f32 %v2046_v0, %v1953_v39  ;;  %v2220_v22 = vrot.slane %v2181_v24, 1 }
 0x2b4   : > { %v2136_v11 = vadd.f32 %v3059_v50, %v2058_v55  ;;  %v2225_v42 = vrot.slane %v3070_v56, 1  ;;  %v2103_v26 = vpop.f32.mrb[49].mxu1  ;;  %v2184_v29 = vpop.f32.mrb[59].mxu0  ;;  %v2062_v43 = vadd.f32 %v2044_v14, %v1952_v57  ;;  %v2061_v33 = vadd.f32 %v2042_v48, %v1951_v62 }
 0x2b5   : > { %v2134_v23 = vadd.f32 %v2103_v26, %v2056_v61  ;;  %v2221_v12 = vrot.slane %v2184_v29, 1  ;;  %v3060_v9 = vpop.f32.mrb[50].mxu1 }
 0x2b6   : > { %v2226_v19 = vsel %vm915_vm3, %v2223_v46, %v2225_v42  ;;  %v2137_v5 = vadd.f32 %v3060_v9, %v2059_v53  ;;  %v2106_v10 = vpop.f32.mrb[51].mxu1 }
 0x2b7   : > { %v2246_v13 = vadd.f32 %v2226_v19, %v2136_v11  ;;  %v2222_v27 = vsel %vm915_vm3, %v2220_v22, %v2221_v12  ;;  %v2135_v63 = vadd.f32 %v2106_v10, %v2057_v40  ;;  %v2224_v45 = vsel %vm915_vm3, %v2221_v12, %v2223_v46 }
 0x2b8   : > { %v2244_v49 = vadd.f32 %v2222_v27, %v2134_v23 }
 0x2b9   : > { %v2245_v54 = vadd.f32 %v2224_v45, %v2135_v63  ;;  %v3073_v60 = vpop.f32.mrb[60].mxu0 }
 0x2ba   : > { %v2197_v3 = vpop.f32.mrb[61].mxu0  ;;  %v2231_v61 = vrot.slane %v3073_v60, 1 }
 0x2bb   : > { %v2227_v37 = vrot.slane %v2197_v3, 1  ;;  %v3063_v15 = vpop.f32.mrb[52].mxu1  ;;  %v3074_v44 = vpop.f32.mrb[62].mxu0 }
 0x2bc   : > { %v2140_v47 = vadd.f32 %v3063_v15, %v2062_v43  ;;  %v2233_v20 = vrot.slane %v3074_v44, 1  ;;  %v2119_v1 = vpop.f32.mrb[53].mxu1  ;;  %v2200_v25 = vpop.f32.mrb[63].mxu0  ;;  %v3794_v44 = vld [vmem:[%s3862_s8] ss:$0 sm:$0xff] }
 0x2bd   : > { %v2228_v32 = vsel %vm915_vm3, %v2225_v42, %v2227_v37  ;;  %v2138_v38 = vadd.f32 %v2119_v1, %v2060_v4  ;;  %v2229_v53 = vrot.slane %v2200_v25, 1  ;;  %v3064_v58 = vpop.f32.mrb[54].mxu1  ;;  %v3139_v25 = vld [vmem:[%s3261_s17 + $0x1c] sm:$0xf] }
 0x2be   : > { %v2247_v8 = vadd.f32 %v2228_v32, %v2137_v5  ;;  %v2234_v31 = vsel %vm915_vm3, %v2231_v61, %v2233_v20  ;;  %v2243_v6 = vsel %vm915_vm3, %v2233_v20, 0.0  ;;  %v2141_v55 = vadd.f32 %v3064_v58, %v2063_v51  ;;  %v2122_v40 = vpop.f32.mrb[55].mxu1 }
 0x2bf   : > { %v2250_v28 = vadd.f32 %v2234_v31, %v2140_v47  ;;  %v2230_v41 = vsel %vm915_vm3, %v2227_v37, %v2229_v53  ;;  %v2139_v30 = vadd.f32 %v2122_v40, %v2061_v33  ;;  %v2232_v59 = vsel %vm915_vm3, %v2229_v53, %v2231_v61 }
 0x2c0   : > { %v2248_v16 = vadd.f32 %v2230_v41, %v2138_v38  ;;  %v2251_v17 = vadd.f32 %v2243_v6, %v2141_v55  ;;  %v2581_v32 = vunpack.c.l.bf16 %v3139_v25 }
 0x2c1   : > { %v2249_v52 = vadd.f32 %v2232_v59, %v2139_v30  ;;  %v3089_v0 = vpop.f32.mrb[64].mxu0 }
 0x2c2   : > { %v2401_v7 = vpop.f32.mrb[65].mxu0 }
 0x2c3   : > { %v3079_v2 = vpop.f32.mrb[56].mxu1  ;;  %v3090_v14 = vpop.f32.mrb[66].mxu0 }
 0x2c4   : > { %v2291_v48 = vpop.f32.mrb[57].mxu1  ;;  %v2403_v18 = vpop.f32.mrb[67].mxu0  ;;  %v2333_v34 = vrot.slane %v3079_v2, 7  ;;  %v3140_v2 = vld [vmem:[%s3261_s17 + $0x4] sm:$0xf] }
 0x2c5   : > { %v3080_v35 = vpop.f32.mrb[58].mxu1  ;;  %v2330_v39 = vrot.slane %v2291_v48, 7 }
 0x2c6   : > { %v2335_v21 = vrot.slane %v3080_v35, 7  ;;  %v2294_v36 = vpop.f32.mrb[59].mxu1 }
 0x2c7   : > { %v2331_v24 = vrot.slane %v2294_v36, 7 }
 0x2c8   : > { %v2336_v57 = vsel %vm675_vm2, %v2333_v34, %v2335_v21 }
 0x2c9   : > { %v2356_v4 = vadd.f32 %v2336_v57, %v2246_v13  ;;  %v2332_v62 = vsel %vm675_vm2, %v2330_v39, %v2331_v24  ;;  %v2334_v46 = vsel %vm675_vm2, %v2331_v24, %v2333_v34  ;;  %v3093_v50 = vpop.f32.mrb[68].mxu0  ;;  %v3141_v34 = vld [vmem:[%s3261_s17] sm:$0xf] }
 0x2ca   : > { %v2354_v56 = vadd.f32 %v2332_v62, %v2244_v49  ;;  %v2355_v51 = vadd.f32 %v2334_v46, %v2245_v54  ;;  %v2416_v11 = vpop.f32.mrb[69].mxu0  ;;  %v3787_v54 = vld [vmem:[%s3861_s7] ss:$0 sm:$0xff] }
 0x2cb   : > { %v3083_v42 = vpop.f32.mrb[60].mxu1  ;;  %v3094_v26 = vpop.f32.mrb[70].mxu0  ;;  %v3779_v29 = vadd.f32 %v3090_v14, %v2356_v4  ;;  %v2575_v14 = vunpack.c.l.bf16 %v3140_v2  ;;  %v3142_v4 = vld [vmem:[%s3261_s17 + $0x8] sm:$0xf] }
 0x2cc   : > { %v2307_v43 = vpop.f32.mrb[61].mxu1  ;;  %v2419_v33 = vpop.f32.mrb[71].mxu0  ;;  %v2432_v22 = vadd.f32 %v3089_v0, %v2355_v51  ;;  %v2431_v23 = vadd.f32 %v2403_v18, %v2354_v56  ;;  %v2341_v19 = vrot.slane %v3083_v42, 7  ;;  %v2576_v62 = vunpack.c.l.bf16 %v3142_v4 }
 0x2cd   : > { %v2337_v12 = vrot.slane %v2307_v43, 7  ;;  %v3084_v9 = vpop.f32.mrb[62].mxu1 }
 0x2ce   : > { %v2343_v5 = vrot.slane %v3084_v9, 7  ;;  %v2310_v10 = vpop.f32.mrb[63].mxu1 }
 0x2cf   : > { %v2338_v13 = vsel %vm675_vm2, %v2335_v21, %v2337_v12  ;;  %v2339_v27 = vrot.slane %v2310_v10, 7  ;;  %v2574_v21 = vunpack.c.l.bf16 %v3141_v34 }
 0x2d0   : > { %v2357_v63 = vadd.f32 %v2338_v13, %v2247_v8  ;;  %v2344_v45 = vsel %vm675_vm2, %v2341_v19, %v2343_v5  ;;  %v2353_v49 = vsel %vm675_vm2, %v2343_v5, 0.0 }
 0x2d1   : > { %v2360_v60 = vadd.f32 %v2344_v45, %v2250_v28  ;;  %v2361_v3 = vadd.f32 %v2353_v49, %v2251_v17  ;;  %v2340_v37 = vsel %vm675_vm2, %v2337_v12, %v2339_v27  ;;  %v2342_v15 = vsel %vm675_vm2, %v2339_v27, %v2341_v19 }
 0x2d2   : > { %v2358_v61 = vadd.f32 %v2340_v37, %v2248_v16  ;;  %v2359_v47 = vadd.f32 %v2342_v15, %v2249_v52  ;;  %v2434_v20 = vadd.f32 %v2416_v11, %v2357_v63  ;;  %v3143_v11 = vld [vmem:[%s3261_s17 + $0x14] sm:$0xf] }
 0x2d3   : > { %v2558_v1 = vmul.f32 %v3787_v54, %v2361_v3  ;;  %v3099_v38 = vpop.f32.mrb[64].mxu1  ;;  %v2437_v53 = vadd.f32 %v3094_v26, %v2360_v60  ;;  %v2579_v42 = vunpack.c.l.bf16 %v3143_v11 }
 0x2d4   : > { %v2478_v58 = vpop.f32.mrb[65].mxu1  ;;  %v2436_v8 = vadd.f32 %v3093_v50, %v2359_v47  ;;  %v2435_v31 = vadd.f32 %v2419_v33, %v2358_v61  ;;  %v2516_v40 = vrot.slane %v3099_v38, 1  ;;  %v3145_v38 = vld [vmem:[%s3261_s17 + $0xc] sm:$0xf] }
 0x2d5   : > { %v2573_v6 = vadd.f32 %v3794_v44, %v2558_v1  ;;  %v3100_v55 = vpop.f32.mrb[66].mxu1 }
 0x2d6   : > { %v2518_v28 = vrot.slane %v3100_v55, 1  ;;  %v2480_v41 = vpop.f32.mrb[67].mxu1 }
 0x2d7   : > { %v2589_v30 = vadd.f32 %v2581_v32, %v2573_v6  ;;  %v2515_v59 = vrot.slane %v2480_v41, 1  ;;  %v3146_v6 = vld [vmem:[%s3261_s17 + $0x10] sm:$0xf] }
 0x2d8   : > { %v2519_v16 = vsel %vm915_vm3, %v2516_v40, %v2518_v28  ;;  %v2578_v55 = vunpack.c.l.bf16 %v3146_v6 }
 0x2d9   : > { %v2597_v17 = vmax.f32 %v2589_v30, 0.0  ;;  %v2537_v52 = vadd.f32 %v2519_v16, %v2432_v22  ;;  %v2517_v0 = vsel %vm915_vm3, %v2515_v59, %v2516_v40  ;;  %v3144_v22 = vld [vmem:[%s3261_s17 + $0x18] sm:$0xf] }
 0x2da   : > { %v2536_v7 = vadd.f32 %v2517_v0, %v2431_v23  ;;  %v2580_v23 = vunpack.c.l.bf16 %v3144_v22 }
 0x2db   : > { %v2834_v48 = vpack.c.bf16 %v2597_v17, %v2597_v17  ;;  %v2552_v18 = vmul.f32 %v3787_v54, %v2537_v52  ;;  %v3103_v35 = vpop.f32.mrb[68].mxu1 }
 0x2dc   : > { %v2551_v36 = vmul.f32 %v3787_v54, %v2536_v7  ;;  %v2493_v39 = vpop.f32.mrb[69].mxu1  ;;  %v2524_v56 = vrot.slane %v3103_v35, 1 }
 0x2dd   : > { %2638 = vst.msk [vmem:[%s3806_s23 + $0x1c] sm:$0xf] %vm2630_vm4, %v2834_v48  ;;  %v2567_v24 = vadd.f32 %v3794_v44, %v2552_v18  ;;  %v2520_v57 = vrot.slane %v2493_v39, 1  ;;  %v3104_v46 = vpop.f32.mrb[70].mxu1 }
 0x2de   : > { %v2566_v50 = vadd.f32 %v3794_v44, %v2551_v36  ;;  %v2526_v51 = vrot.slane %v3104_v46, 1  ;;  %v2496_v26 = vpop.f32.mrb[71].mxu1 }
 0x2df   : > { %v2583_v43 = vadd.f32 %v2575_v14, %v2567_v24  ;;  %v2521_v33 = vsel %vm915_vm3, %v2518_v28, %v2520_v57  ;;  %v2522_v12 = vrot.slane %v2496_v26, 1 }
 0x2e0   : > { %v2582_v9 = vadd.f32 %v2574_v21, %v2566_v50  ;;  %v2538_v19 = vadd.f32 %v2521_v33, %v3779_v29  ;;  %v2527_v5 = vsel %vm915_vm3, %v2524_v56, %v2526_v51  ;;  %v2535_v10 = vsel %vm915_vm3, %v2526_v51, 0.0 }
 0x2e1   : > { %v2591_v13 = vmax.f32 %v2583_v43, 0.0  ;;  %v2541_v27 = vadd.f32 %v2527_v5, %v2436_v8  ;;  %v2542_v63 = vadd.f32 %v2535_v10, %v2437_v53  ;;  %v2523_v45 = vsel %vm915_vm3, %v2520_v57, %v2522_v12 }
 0x2e2   : > { %v2590_v49 = vmax.f32 %v2582_v9, 0.0  ;;  %v2553_v60 = vmul.f32 %v3787_v54, %v2538_v19  ;;  %v2525_v3 = vsel %vm915_vm3, %v2522_v12, %v2524_v56  ;;  %v2539_v37 = vadd.f32 %v2523_v45, %v2434_v20 }
 0x2e3   : > { %v2828_v29 = vpack.c.bf16 %v2591_v13, %v2591_v13  ;;  %v2556_v15 = vmul.f32 %v3787_v54, %v2541_v27  ;;  %v2557_v61 = vmul.f32 %v3787_v54, %v2542_v63  ;;  %v2540_v47 = vadd.f32 %v2525_v3, %v2435_v31 }
 0x2e4   : > { %v2827_v1 = vpack.c.bf16 %v2590_v49, %v2590_v49  ;;  %v2568_v25 = vadd.f32 %v3794_v44, %v2553_v60  ;;  %v2554_v32 = vmul.f32 %v3787_v54, %v2539_v37  ;;  %v2577_v53 = vunpack.c.l.bf16 %v3145_v38 }
 0x2e5   : > { %2632 = vst.msk [vmem:[%s3806_s23 + $0x4] sm:$0xf] %vm2630_vm4, %v2828_v29  ;;  %v2571_v58 = vadd.f32 %v3794_v44, %v2556_v15  ;;  %v2572_v20 = vadd.f32 %v3794_v44, %v2557_v61  ;;  %v2555_v8 = vmul.f32 %v3787_v54, %v2540_v47 }
 0x2e6   : > { %2631 = vst.msk [vmem:[%s3806_s23] sm:$0xf] %vm2630_vm4, %v2827_v1  ;;  %v2584_v31 = vadd.f32 %v2576_v62, %v2568_v25  ;;  %v2569_v40 = vadd.f32 %v3794_v44, %v2554_v32 }
 0x2e7   : > { %v2587_v28 = vadd.f32 %v2579_v42, %v2571_v58  ;;  %v2588_v41 = vadd.f32 %v2580_v23, %v2572_v20  ;;  %v2570_v30 = vadd.f32 %v3794_v44, %v2555_v8 }
 0x2e8   : > { %v2592_v59 = vmax.f32 %v2584_v31, 0.0  ;;  %v2585_v16 = vadd.f32 %v2577_v53, %v2569_v40 }
 0x2e9   : > { %v2595_v17 = vmax.f32 %v2587_v28, 0.0  ;;  %v2596_v54 = vmax.f32 %v2588_v41, 0.0  ;;  %v2586_v52 = vadd.f32 %v2578_v55, %v2570_v30 }
 0x2ea   : > { %v2829_v0 = vpack.c.bf16 %v2592_v59, %v2592_v59  ;;  %v2593_v7 = vmax.f32 %v2585_v16, 0.0 }
 0x2eb   : > { %v2832_v2 = vpack.c.bf16 %v2595_v17, %v2595_v17  ;;  %v2833_v14 = vpack.c.bf16 %v2596_v54, %v2596_v54  ;;  %v2594_v48 = vmax.f32 %v2586_v52, 0.0 }
 0x2ec   : > { %2633 = vst.msk [vmem:[%s3806_s23 + $0x8] sm:$0xf] %vm2630_vm4, %v2829_v0  ;;  %v2830_v18 = vpack.c.bf16 %v2593_v7, %v2593_v7 }
 0x2ed   : > { %2636 = vst.msk [vmem:[%s3806_s23 + $0x14] sm:$0xf] %vm2630_vm4, %v2832_v2  ;;  %2637 = vst.msk [vmem:[%s3806_s23 + $0x18] sm:$0xf] %vm2630_vm4, %v2833_v14  ;;  %v2831_v44 = vpack.c.bf16 %v2594_v48, %v2594_v48 }
 0x2ee   : > { %2634 = vst.msk [vmem:[%s3806_s23 + $0xc] sm:$0xf] %vm2630_vm4, %v2830_v18 }
 0x2ef   : > { %2635 = vst.msk [vmem:[%s3806_s23 + $0x10] sm:$0xf] %vm2630_vm4, %v2831_v44 }
 0x2f0 PF: > { %s19_s30 = sadd.s32 1, %s3153_s30  }
 0x2f1   : > { %p16_p4 = scmp.ge.s32.totalorder %s19_s30, 4  }
 0x2f3   :  { %18 = sbr.rel (!%p16_p4) target bundleno = 1 (0x1), region = 102 }

// kernel: audra_forward.13
= control target key start
LH: loop header
LB: loop body
LE: loop exit
PB: predicated region body
PF: predicated region fallthrough
CT: control target
= control target key end

     0   :  { %s1569_s21 = smov 0   ;;  %s1734_s0 = inlined_call_operand.vmem [shape: bf16[2,16,72], index: 0, kind: input, shape index: {}]   ;;  %s1735_s1 = inlined_call_operand.vmem [shape: bf16[16,1], index: 1, kind: input, shape index: {}]   ;;  %s1736_s2 = inlined_call_operand.vmem [shape: bf16[16,1], index: 2, kind: input, shape index: {}]   ;;  %s1737_s3 = inlined_call_operand.vmem [shape: bf16[72,16], index: 3, kind: input, shape index: {}]   ;;  %s1738_s4 = inlined_call_operand.vmem [shape: bf16[8,16], index: 4, kind: input, shape index: {}]   ;;  %s1739_s5 = inlined_call_operand.vmem [shape: f32[1,16], index: 5, kind: input, shape index: {}]   ;;  %s1740_s6 = inlined_call_operand.vmem [shape: f32[1,16], index: 6, kind: input, shape index: {}]   ;;  %s1741_s7 = inlined_call_operand.vmem [shape: f32[1,16], index: 7, kind: input, shape index: {}]   ;;  %s1742_s8 = inlined_call_operand.vmem [shape: f32[1,16], index: 8, kind: input, shape index: {}]   ;;  %s1743_s9 = inlined_call_operand.vmem [shape: bf16[9,16,16], index: 9, kind: input, shape index: {}]   ;;  %s1744_s10 = inlined_call_operand.vmem [shape: f32[1,16], index: 10, kind: input, shape index: {}]   ;;  %s1745_s11 = inlined_call_operand.vmem [shape: f32[1,16], index: 11, kind: input, shape index: {}]   ;;  %s1746_s12 = inlined_call_operand.vmem [shape: bf16[2,16,16], index: 12, kind: output, shape index: {}]  }
   0x1 LB: > { %s1294_s22 = sadd.s32 4294967295, %s1497_s21   ;;  %p1298_p0 = scmp.ge.s32.totalorder %s1497_s21, 1  ;;  %s1497_s21 = sphi %s1569_s21, %s22_s21  }
   0x2   : > { %p362_p1 = scmp.lt.s32.totalorder %s1497_s21, 3 }
   0x4   : > { %p363_p2 = pnand %p1298_p0, %p362_p1 }
   0x5   : > { %v1476_v0 = vld [vmem:[%s1737_s3] sm:$0xff] (!%p363_p2)   ;;  %v1499_v1 = vmov (!%p363_p2), 0.0   ;;  %v1477_v2 = vld [vmem:[%s1737_s3 + $0x8] sm:$0xff] (!%p363_p2)   ;;  %vm1500_vm0 = vmmov (!%p363_p2), 0   ;;  %p404_p3 = scmp.lt.s32.totalorder (!%p363_p2), %s1294_s22, 1  ;;  %v1501_v3 = vmov (!%p363_p2), 0   ;;  %v609_v21 = vlaneseq (!%p363_p2) }
   0x6   : > { %366 = sbr.rel (%p363_p2) target bundleno = 514 (0x202), region = 68  ;;  %1387 = vmatprep.subr.bf16.mxu0 (!%p363_p2), %v1499_v1  ;;  %1401 = vmatprep.subr.bf16.mxu1 (!%p363_p2), %v1499_v1  ;;  %v597_v4 = vld [vmem:[%s1735_s1] sm:$0xf] (!%p363_p2)  ;;  %v1478_v5 = vld [vmem:[%s1737_s3 + $0x10] sm:$0xff] (!%p363_p2)   ;;  %vm462_vm1 = vcmask (!%p363_p2), 1043456   ;;  %v1479_v8 = vld [vmem:[%s1737_s3 + $0x18] sm:$0xff] (!%p363_p2)  }
   0x7   : > { %1388 = vmatpush3.bf16.msra.mxu0 (!%p363_p2), %v1476_v0  ;;  %1397 = vmatprep.mubr.msk.bf16.mxu0 (!%p363_p2), %vm1500_vm0, %v1499_v1  ;;  %v598_v6 = vld [vmem:[%s1735_s1 + $0x4] sm:$0xf] (!%p363_p2)  ;;  %v527_v7 = vld [vmem:[%s1738_s4] sm:$0xf] (!%p363_p2)  ;;  %s1502_s14 = smov (!%p363_p2), 96   ;;  %vm458_vm2 = vcmask (!%p363_p2), 588800  }
   0x8   : > { %1389 = vmatprep.subr.bf16.mxu0 (!%p363_p2), %v1499_v1  ;;  %1403 = vmatprep.mubr.msk.bf16.mxu1 (!%p363_p2), %vm1500_vm0, %v1499_v1  ;;  %v535_v9 = vsel (!%p363_p2), %vm462_vm1, %v527_v7, 0  ;;  %v1480_v10 = vld [vmem:[%s1737_s3 + $0x20] ss:$0 sps:$4 sm:$0xff] (!%p363_p2)   ;;  %v600_v12 = vld [vmem:[%s1736_s2 + $0x4] sm:$0xf] (!%p363_p2)  ;;  %v1483_v15 = vld [vmem:[%s1743_s9 + $0x10] sm:$0xff] (!%p363_p2)  }
   0x9   : > { %1474 = vset.pattern.permute.xlu0 (!%p363_p2), %v1501_v3  ;;  %1475 = vset.pattern.permute.xlu1 (!%p363_p2), %v1501_v3  ;;  %v599_v13 = vld [vmem:[%s1736_s2] sm:$0xf] (!%p363_p2)  ;;  %v464_v14 = vsel (!%p363_p2), %vm462_vm1, %v1480_v10, 0  ;;  %vm530_vm3 = vcmask (!%p363_p2), 64512   ;;  %v1503_v19 = vmov (!%p363_p2), 839922192  }
   0xa   : > { %603 = vperm.xlu0 (!%p363_p2), %1474, %v597_v4   ;;  %1402 = vmatpush3.bf16.msra.mxu1 (!%p363_p2), %v535_v9  ;;  %v1482_v16 = vld [vmem:[%s1743_s9] sm:$0xff] (!%p363_p2)   ;;  %v607_v20 = vunpack.c.l.s4 (!%p363_p2), %v1503_v19  ;;  %v610_v24 = vshrl.u32 (!%p363_p2), %v609_v21, 7  ;;  %vm671_vm4 = vcmask (!%p363_p2), 130048   ;;  %v1484_v47 = vld [vmem:[%s1743_s9 + $0x8] sm:$0xff] (!%p363_p2)   ;;  %v1486_v51 = vld [vmem:[%s1743_s9 + $0x18] sm:$0xff] (!%p363_p2)   ;;  %vm718_vm5 = vcmask (!%p363_p2), 1044480  }
   0xb   : > { %1390 = vmatpush3.bf16.msra.mxu0 (!%p363_p2), %v1477_v2  ;;  %1407 = vmatprep.subr.bf16.mxu1 (!%p363_p2), %v1499_v1  ;;  %v1310_v25 = vld [vmem:[%s1739_s5] ss:$0 sm:$0xff] (!%p363_p2)  ;;  %v1487_v52 = vld [vmem:[%s1743_s9 + $0x30] sm:$0xff] (!%p363_p2)   ;;  %v1488_v53 = vld [vmem:[%s1743_s9 + $0x28] sm:$0xff] (!%p363_p2)   ;;  %vm843_vm6 = vcmask (!%p363_p2), 1042432   ;;  %vm904_vm7 = vcmask (!%p363_p2), 1040384  }
   0xc   : > { %1391 = vmatprep.subr.bf16.mxu0 (!%p363_p2), %v1499_v1  ;;  %v608_v23 = vunpack.c.0.s8 (!%p363_p2), %v607_v20  ;;  %v1311_v28 = vld [vmem:[%s1740_s6] ss:$0 sm:$0xff] (!%p363_p2)  ;;  %v1490_v55 = vld [vmem:[%s1743_s9 + $0x38] sm:$0xff] (!%p363_p2)   ;;  %vm1017_vm8 = vcmask (!%p363_p2), 1046528   ;;  %vm1236_vm9 = vcmask (!%p363_p2), 125952  }
   0xd   : > { %s1748_s22 = smov (!%p404_p3, %s1294_s22), 1  ;;  %v1485_v48 = vld [vmem:[%s1743_s9 + $0x20] sm:$0xff]  }
   0xe   : > { %s1357_s13 = sshll.u32 %s1748_s22, 3  ;;  %615 = vperm.xlu0 %1474, %v598_v6   ;;  %v611_v26 = vsub.s32 %v608_v23, %v610_v24  ;;  %v1489_v54 = vld [vmem:[%s1743_s9 + $0x40] sm:$0xff]  }
   0xf   : > { %s408_s24 = scalar_lea.vmem %s1734_s0, %s1357_s13  ;;  %1392 = vmatpush3.bf16.msra.mxu0 %v1478_v5  ;;  %s413_s17 = scalar_lea.vmem %s1746_s12, %s1357_s13 }
  0x10   : > { %v1481_v11 = vld [vmem:[%s408_s24] sm:$0xff]   ;;  %1393 = vmatprep.subr.bf16.mxu0 %v1499_v1 }
  0x11   : > { %528 = vrot.lane.b32.xlu1 %v1481_v11, %s1502_s14 }
  0x12   : > { %646 = vperm.xlu0 %1474, %v600_v12  }
  0x13   : > { %1394 = vmatpush3.bf16.msra.mxu0 %v1479_v8 }
  0x14   : > { %1395 = vmatprep.subr.bf16.mxu0 %v1499_v1 }
  0x15   : > { %634 = vperm.xlu1 %1475, %v599_v13  }
  0x17   : > { %1396 = vmatpush3.bf16.msra.mxu0 %v464_v14 }
  0x18   : > { %1419 = vmatprep.subr.bf16.mxu0 %v1499_v1 }
  0x1a   : > { %1398 = vmatmul.mubr.msk.bf16.vlgmr.msra.gmra.mrb[0].mxu0 %vm458_vm2, %v1481_v11 }
  0x1b   : > { %1421 = vmatprep.mubr.msk.bf16.mxu0 %vm1500_vm0, %v1499_v1  ;;  %1420 = vmatpush3.bf16.msra.mxu0 %v1483_v15 }
  0x1c   : > { %1431 = vmatprep.subr.bf16.mxu0 %v1499_v1 }
  0x83   : > { %v529_v17 = vpop.permute.xlu1 %528 }
  0x84   : > { %1404 = vmatmul.mubr.msk.bf16.vlgmr.msra.gmra.mrb[0].mxu1 %vm530_vm3, %v529_v17 }
  0x85   : > { %1408 = vmatpush3.bf16.msra.mxu1 %v1482_v16  ;;  %1409 = vmatprep.mubr.msk.bf16.mxu1 %vm1500_vm0, %v1499_v1 }
  0x86   : > { %1413 = vmatprep.subr.bf16.mxu1 %v1499_v1 }
  0x89   : > { %v604_v18 = vpop.permute.xlu0 %603 }
  0x8a   : > { %v612_v37 = vrot.slane %v604_v18, %v611_v26 }
  0x8d   : > { %v616_v22 = vpop.permute.xlu0 %615 }
  0x8e   : > { %v624_v38 = vrot.slane %v616_v22, %v611_v26 }
  0x90   : > { %v1315_v44 = vcombine.low %v612_v37, %v624_v38 }
  0x91   : > { %v647_v31 = vpop.permute.xlu0 %646 }
  0x92   : > { %v655_v39 = vrot.slane %v647_v31, %v611_v26 }
  0x94   : > { %v635_v32 = vpop.permute.xlu1 %634 }
  0x95   : > { %v643_v40 = vrot.slane %v635_v32, %v611_v26 }
  0x97   : > { %v1316_v45 = vcombine.low %v643_v40, %v655_v39 }
  0xed   : > { %v500_v27 = vpop.f32.mrb[0].mxu0 }
  0xee   : > { %v514_v29 = vmul.f32 %v1310_v25, %v500_v27  ;;  %v1399_v30 = vpop.f32.mrb[1].mxu0 }
  0xef   : > { %v503_v33 = vpop.f32.mrb[2].mxu0 }
  0xf0   : > { %v523_v34 = vadd.f32 %v1311_v28, %v514_v29  ;;  %v515_v35 = vmul.f32 %v1310_v25, %v503_v33  ;;  %v1400_v36 = vpop.f32.mrb[3].mxu0 }
  0xf2   : > { %v524_v41 = vadd.f32 %v1311_v28, %v515_v35  ;;  %v525_v42 = vmax.f32 %v523_v34, 0.0 }
  0xf4   : > { %v526_v43 = vmax.f32 %v524_v41, 0.0 }
  0xf6   : > { %v596_v46 = vpack.c.bf16 %v526_v43, %v525_v42 }
  0xf8   : > { %v631_v49 = vmul.bf16 %v1315_v44, %v596_v46  ;;  %v662_v50 = vmul.bf16 %v1316_v45, %v596_v46 }
  0xfa   : > { %1410 = vmatmul.mubr.msk.bf16.vlgmr.msra.gmra.mrb[4].mxu1 %vm671_vm4, %v631_v49  ;;  %1422 = vmatmul.mubr.msk.bf16.vlgmr.msra.gmra.mrb[4].mxu0 %vm671_vm4, %v662_v50 }
  0xfb   : > { %1414 = vmatpush3.bf16.msra.mxu1 %v1484_v47  ;;  %1432 = vmatpush3.bf16.msra.mxu0 %v1485_v48 }
  0xfc   : > { %1415 = vmatprep.mubr.msk.bf16.mxu1 %vm1500_vm0, %v1499_v1  ;;  %1425 = vmatprep.subr.bf16.mxu1 %v1499_v1 }
  0xfd   : > { %1433 = vmatprep.mubr.msk.bf16.mxu0 %vm1500_vm0, %v1499_v1  ;;  %1443 = vmatprep.subr.bf16.mxu0 %v1499_v1 }
 0x102   : > { %1416 = vmatmul.mubr.msk.bf16.vlgmr.msra.gmra.mrb[8].mxu1 %vm671_vm4, %v596_v46  ;;  %1434 = vmatmul.mubr.msk.bf16.vlgmr.msra.gmra.mrb[8].mxu0 %vm671_vm4, %v596_v46 }
 0x103   : > { %1426 = vmatpush3.bf16.msra.mxu1 %v1486_v51  ;;  %1444 = vmatpush3.bf16.msra.mxu0 %v1487_v52 }
 0x104   : > { %1427 = vmatprep.mubr.msk.bf16.mxu1 %vm1500_vm0, %v1499_v1  ;;  %1437 = vmatprep.subr.bf16.mxu1 %v1499_v1 }
 0x105   : > { %1445 = vmatprep.mubr.msk.bf16.mxu0 %vm1500_vm0, %v1499_v1  ;;  %1455 = vmatprep.subr.bf16.mxu0 %v1499_v1 }
 0x10a   : > { %1428 = vmatmul.mubr.msk.bf16.vlgmr.msra.gmra.mrb[12].mxu1 %vm671_vm4, %v631_v49  ;;  %1446 = vmatmul.mubr.msk.bf16.vlgmr.msra.gmra.mrb[12].mxu0 %vm671_vm4, %v631_v49 }
 0x10b   : > { %1438 = vmatpush3.bf16.msra.mxu1 %v1488_v53  ;;  %1456 = vmatpush3.bf16.msra.mxu0 %v1489_v54 }
 0x10c   : > { %1439 = vmatprep.mubr.msk.bf16.mxu1 %vm1500_vm0, %v1499_v1  ;;  %1449 = vmatprep.subr.bf16.mxu1 %v1499_v1 }
 0x10d   : > { %1457 = vmatprep.mubr.msk.bf16.mxu0 %vm1500_vm0, %v1499_v1 }
 0x112   : > { %1440 = vmatmul.mubr.msk.bf16.vlgmr.msra.gmra.mrb[16].mxu1 %vm671_vm4, %v662_v50  ;;  %1458 = vmatmul.mubr.msk.bf16.vlgmr.msra.gmra.mrb[16].mxu0 %vm671_vm4, %v662_v50 }
 0x113   : > { %1450 = vmatpush3.bf16.msra.mxu1 %v1490_v55  ;;  %1451 = vmatprep.mubr.msk.bf16.mxu1 %vm1500_vm0, %v1499_v1 }
 0x11a   : > { %1452 = vmatmul.mubr.msk.bf16.vlgmr.msra.gmra.mrb[20].mxu1 %vm671_vm4, %v596_v46 }
 0x157   : > { %v1696_v56 = vpop.f32.mrb[0].mxu1 }
 0x158   : > { %v1405_v57 = vpop.f32.mrb[1].mxu1 }
 0x159   : > { %v1698_v58 = vpop.f32.mrb[2].mxu1 }
 0x15a   : > { %v1406_v59 = vpop.f32.mrb[3].mxu1 }
 0x1cd   : > { %v709_v60 = vpop.f32.mrb[4].mxu1  ;;  %v834_v61 = vpop.f32.mrb[4].mxu0 }
 0x1ce   : > { %v1411_v62 = vpop.f32.mrb[5].mxu1  ;;  %v1423_v63 = vpop.f32.mrb[5].mxu0  ;;  %v719_v3 = vrot.slane %v709_v60, 3  ;;  %v844_v4 = vrot.slane %v834_v61, 5 }
 0x1cf   : > { %v712_v0 = vpop.f32.mrb[6].mxu1  ;;  %v837_v2 = vpop.f32.mrb[6].mxu0 }
 0x1d0   : > { %v720_v5 = vrot.slane %v712_v0, 3  ;;  %v845_v6 = vrot.slane %v837_v2, 5  ;;  %v1412_v7 = vpop.f32.mrb[7].mxu1  ;;  %v1424_v1 = vpop.f32.mrb[7].mxu0  ;;  %v724_v17 = vsel %vm718_vm5, 0.0, %v719_v3  ;;  %v849_v23 = vsel %vm843_vm6, 0.0, %v844_v4 }
 0x1d2   : > { %v721_v8 = vsel %vm718_vm5, %v719_v3, %v720_v5  ;;  %v846_v9 = vsel %vm843_vm6, %v844_v4, %v845_v6 }
 0x1d5   : > { %v771_v10 = vpop.f32.mrb[8].mxu1  ;;  %v956_v11 = vpop.f32.mrb[8].mxu0 }
 0x1d6   : > { %v780_v12 = vrot.slane %v771_v10, 4  ;;  %v1417_v13 = vpop.f32.mrb[9].mxu1  ;;  %v1435_v14 = vpop.f32.mrb[9].mxu0 }
 0x1d7   : > { %v774_v15 = vpop.f32.mrb[10].mxu1  ;;  %v959_v16 = vpop.f32.mrb[10].mxu0 }
 0x1d8   : > { %v785_v18 = vsel %vm462_vm1, 0.0, %v780_v12  ;;  %v781_v19 = vrot.slane %v774_v15, 4  ;;  %v1418_v20 = vpop.f32.mrb[11].mxu1  ;;  %v1436_v21 = vpop.f32.mrb[11].mxu0 }
 0x1d9   : > { %v786_v22 = vadd.f32 %v785_v18, %v724_v17  ;;  %v1351_v17 = vld [vmem:[%s1744_s10] ss:$0 sm:$0xff] }
 0x1da   : > { %v782_v24 = vsel %vm462_vm1, %v780_v12, %v781_v19 }
 0x1db   : > { %v787_v25 = vadd.f32 %v782_v24, %v721_v8  ;;  %v850_v26 = vadd.f32 %v849_v23, %v786_v22  ;;  %v1314_v22 = vld [vmem:[%s1742_s8] ss:$0 sm:$0xff] }
 0x1dc   : > { %v1352_v23 = vld [vmem:[%s1745_s11] ss:$0 sm:$0xff] }
 0x1dd   : > { %v895_v27 = vpop.f32.mrb[12].mxu1  ;;  %v1069_v28 = vpop.f32.mrb[12].mxu0  ;;  %v851_v29 = vadd.f32 %v846_v9, %v787_v25 }
 0x1de   : > { %v905_v30 = vrot.slane %v895_v27, 7  ;;  %v1429_v31 = vpop.f32.mrb[13].mxu1  ;;  %v1447_v32 = vpop.f32.mrb[13].mxu0  ;;  %v1078_v36 = vrot.slane %v1069_v28, 3 }
 0x1df   : > { %v898_v33 = vpop.f32.mrb[14].mxu1  ;;  %v1072_v34 = vpop.f32.mrb[14].mxu0 }
 0x1e0   : > { %v910_v35 = vsel %vm904_vm7, 0.0, %v905_v30  ;;  %v906_v37 = vrot.slane %v898_v33, 7  ;;  %v1079_v38 = vrot.slane %v1072_v34, 3  ;;  %v1430_v39 = vpop.f32.mrb[15].mxu1  ;;  %v1448_v40 = vpop.f32.mrb[15].mxu0 }
 0x1e1   : > { %v911_v41 = vadd.f32 %v910_v35, %v850_v26 }
 0x1e2   : > { %v907_v42 = vsel %vm904_vm7, %v905_v30, %v906_v37  ;;  %v1080_v43 = vsel %vm718_vm5, %v1078_v36, %v1079_v38  ;;  %v1083_v3 = vsel %vm718_vm5, %v1079_v38, 0.0 }
 0x1e3   : > { %v963_v44 = vadd.f32 %v956_v11, %v911_v41  ;;  %v912_v45 = vadd.f32 %v907_v42, %v851_v29  ;;  %v1313_v11 = vld [vmem:[%s1741_s7] ss:$0 sm:$0xff] }
 0x1e4   : > { %v585_v18 = vmul.f32 %v1313_v11, %v1696_v56  ;;  %v586_v19 = vmul.f32 %v1313_v11, %v1698_v58 }
 0x1e5   : > { %v1008_v46 = vpop.f32.mrb[16].mxu1  ;;  %v1189_v47 = vpop.f32.mrb[16].mxu0  ;;  %v964_v48 = vadd.f32 %v959_v16, %v912_v45 }
 0x1e6   : > { %v1441_v49 = vpop.f32.mrb[17].mxu1  ;;  %v1459_v50 = vpop.f32.mrb[17].mxu0  ;;  %v1018_v53 = vrot.slane %v1008_v46, 1  ;;  %v1198_v54 = vrot.slane %v1189_v47, 5  ;;  %v594_v26 = vadd.f32 %v1314_v22, %v585_v18  ;;  %v595_v27 = vadd.f32 %v1314_v22, %v586_v19 }
 0x1e7   : > { %v1011_v51 = vpop.f32.mrb[18].mxu1  ;;  %v1192_v52 = vpop.f32.mrb[18].mxu0 }
 0x1e8   : > { %v1019_v55 = vrot.slane %v1011_v51, 1  ;;  %v1199_v57 = vrot.slane %v1192_v52, 5  ;;  %v1442_v59 = vpop.f32.mrb[19].mxu1  ;;  %v1460_v60 = vpop.f32.mrb[19].mxu0 }
 0x1ea   : > { %v1020_v61 = vsel %vm1017_vm8, %v1018_v53, %v1019_v55  ;;  %v1023_v62 = vsel %vm1017_vm8, %v1019_v55, 0.0  ;;  %v1200_v63 = vsel %vm843_vm6, %v1198_v54, %v1199_v57  ;;  %v1203_v16 = vsel %vm843_vm6, %v1199_v57, 0.0 }
 0x1eb   : > { %v1024_v0 = vadd.f32 %v1020_v61, %v963_v44  ;;  %v1025_v2 = vadd.f32 %v1023_v62, %v964_v48 }
 0x1ed   : > { %v1129_v4 = vpop.f32.mrb[20].mxu1  ;;  %v1084_v5 = vadd.f32 %v1080_v43, %v1024_v0  ;;  %v1085_v6 = vadd.f32 %v1083_v3, %v1025_v2 }
 0x1ee   : > { %v1453_v7 = vpop.f32.mrb[21].mxu1  ;;  %v1138_v8 = vrot.slane %v1129_v4, 4 }
 0x1ef   : > { %v1132_v1 = vpop.f32.mrb[22].mxu1 }
 0x1f0   : > { %v1139_v9 = vrot.slane %v1132_v1, 4  ;;  %v1454_v10 = vpop.f32.mrb[23].mxu1 }
 0x1f2   : > { %v1140_v12 = vsel %vm462_vm1, %v1138_v8, %v1139_v9  ;;  %v1143_v13 = vsel %vm462_vm1, %v1139_v9, 0.0 }
 0x1f3   : > { %v1144_v14 = vadd.f32 %v1140_v12, %v1084_v5  ;;  %v1145_v15 = vadd.f32 %v1143_v13, %v1085_v6 }
 0x1f5   : > { %v1204_v20 = vadd.f32 %v1200_v63, %v1144_v14  ;;  %v1205_v21 = vadd.f32 %v1203_v16, %v1145_v15 }
 0x1f7   : > { %v1213_v24 = vmul.f32 %v1351_v17, %v1204_v20  ;;  %v1214_v25 = vmul.f32 %v1351_v17, %v1205_v21 }
 0x1f9   : > { %v1222_v28 = vadd.f32 %v1352_v23, %v1213_v24  ;;  %v1223_v29 = vadd.f32 %v1352_v23, %v1214_v25 }
 0x1fb   : > { %v1224_v56 = vadd.f32 %v1222_v28, %v594_v26  ;;  %v1225_v30 = vadd.f32 %v1223_v29, %v595_v27 }
 0x1fd   : > { %v1226_v31 = vmax.f32 %v1224_v56, 0.0  ;;  %v1227_v58 = vmax.f32 %v1225_v30, 0.0 }
 0x1ff   : > { %v1359_v32 = vpack.c.bf16 %v1226_v31, %v1226_v31  ;;  %v1360_v33 = vpack.c.bf16 %v1227_v58, %v1227_v58 }
 0x201   : > { %1237 = vst.msk [vmem:[%s413_s17] sm:$0xf] %vm1236_vm9, %v1359_v32  ;;  %1238 = vst.msk [vmem:[%s413_s17 + $0x4] sm:$0xf] %vm1236_vm9, %v1360_v33 }
 0x202 PF: > { %s22_s21 = sadd.s32 1, %s1497_s21  }
 0x203   : > { %p19_p4 = scmp.ge.s32.totalorder %s22_s21, 4  }
 0x205   :  { %21 = sbr.rel (!%p19_p4) target bundleno = 1 (0x1), region = 106 }

// kernel: audra_forward.14
= control target key start
LH: loop header
LB: loop body
LE: loop exit
PB: predicated region body
PF: predicated region fallthrough
CT: control target
= control target key end

     0   :  { %s1947_s30 = smov 0   ;;  %s2187_s0 = inlined_call_operand.vmem [shape: bf16[2,16,16], index: 0, kind: input, shape index: {}]   ;;  %s2188_s1 = inlined_call_operand.vmem [shape: bf16[16,1], index: 1, kind: input, shape index: {}]   ;;  %s2189_s2 = inlined_call_operand.vmem [shape: bf16[16,1], index: 2, kind: input, shape index: {}]   ;;  %s2190_s3 = inlined_call_operand.vmem [shape: bf16[9,16,16], index: 3, kind: input, shape index: {}]   ;;  %s2191_s4 = inlined_call_operand.vmem [shape: f32[1,16], index: 4, kind: input, shape index: {}]   ;;  %s2192_s5 = inlined_call_operand.vmem [shape: f32[1,16], index: 5, kind: input, shape index: {}]   ;;  %s2193_s6 = inlined_call_operand.vmem [shape: bf16[9,16,16], index: 6, kind: input, shape index: {}]   ;;  %s2194_s7 = inlined_call_operand.vmem [shape: f32[1,16], index: 7, kind: input, shape index: {}]   ;;  %s2195_s8 = inlined_call_operand.vmem [shape: f32[1,16], index: 8, kind: input, shape index: {}]   ;;  %s2196_s9 = inlined_call_operand.vmem [shape: bf16[2,16,16], index: 9, kind: output, shape index: {}]  }
   0x1 LB: > { %s1614_s10 = sadd.s32 4294967295, %s1891_s30   ;;  %p1618_p0 = scmp.ge.s32.totalorder %s1891_s30, 1  ;;  %s1891_s30 = sphi %s1947_s30, %s19_s30  }
   0x2   : > { %p287_p1 = scmp.lt.s32.totalorder %s1891_s30, 3 }
   0x4   : > { %p288_p2 = pnand %p1618_p0, %p287_p1 }
   0x5   : > { %v336_v0 = vld [vmem:[%s2188_s1] sm:$0xf] (!%p288_p2)  ;;  %v1893_v2 = vmov (!%p288_p2), 0   ;;  %v337_v3 = vld [vmem:[%s2188_s1 + $0x4] sm:$0xf] (!%p288_p2)  ;;  %v1866_v4 = vld [vmem:[%s2190_s3 + $0x8] sm:$0xff] (!%p288_p2)   ;;  %v348_v14 = vlaneseq (!%p288_p2) }
   0x6   : > { %291 = sbr.rel (%p288_p2) target bundleno = 668 (0x29c), region = 56  ;;  %v338_v1 = vld [vmem:[%s2189_s2] sm:$0xf] (!%p288_p2)  ;;  %1864 = vset.pattern.permute.xlu0 (!%p288_p2), %v1893_v2  ;;  %1865 = vset.pattern.permute.xlu1 (!%p288_p2), %v1893_v2  ;;  %v339_v5 = vld [vmem:[%s2189_s2 + $0x4] sm:$0xf] (!%p288_p2)  ;;  %v1894_v6 = vmov (!%p288_p2), 0.0  }
   0x7   : > { %342 = vperm.xlu0 (!%p288_p2), %1864, %v336_v0   ;;  %368 = vperm.xlu1 (!%p288_p2), %1865, %v338_v1   ;;  %p323_p3 = scmp.lt.s32.totalorder (!%p288_p2), %s1614_s10, 1  ;;  %vm1895_vm0 = vmmov (!%p288_p2), 0   ;;  %vm405_vm1 = vcmask (!%p288_p2), 130048   ;;  %v1868_v7 = vld [vmem:[%s2190_s3] sm:$0xff] (!%p288_p2)   ;;  %v1869_v8 = vld [vmem:[%s2190_s3 + $0x18] sm:$0xff] (!%p288_p2)   ;;  %v349_v16 = vshrl.u32 (!%p288_p2), %v348_v14, 7 }
   0x8   : > { %1750 = vmatprep.subr.bf16.mxu1 (!%p288_p2), %v1894_v6  ;;  %1744 = vmatprep.subr.bf16.mxu0 (!%p288_p2), %v1894_v6  ;;  %v1896_v12 = vmov (!%p288_p2), 839922192   ;;  %v1870_v30 = vld [vmem:[%s2190_s3 + $0x10] sm:$0xff] (!%p288_p2)   ;;  %v1871_v31 = vld [vmem:[%s2190_s3 + $0x28] sm:$0xff] (!%p288_p2)   ;;  %v1872_v35 = vld [vmem:[%s2190_s3 + $0x20] sm:$0xff] (!%p288_p2)   ;;  %vm519_vm2 = vcmask (!%p288_p2), 1043456  }
   0x9   : > { %1751 = vmatpush3.bf16.msra.mxu1 (!%p288_p2), %v1866_v4  ;;  %1752 = vmatprep.mubr.msk.bf16.mxu1 (!%p288_p2), %vm1895_vm0, %v1894_v6  ;;  %v346_v13 = vunpack.c.l.s4 (!%p288_p2), %v1896_v12  ;;  %v1874_v37 = vld [vmem:[%s2190_s3 + $0x38] sm:$0xff] (!%p288_p2)   ;;  %v1873_v38 = vld [vmem:[%s2190_s3 + $0x30] sm:$0xff] (!%p288_p2)   ;;  %v1875_v39 = vld [vmem:[%s2190_s3 + $0x40] sm:$0xff] (!%p288_p2)   ;;  %vm452_vm3 = vcmask (!%p288_p2), 1044480   ;;  %vm649_vm4 = vcmask (!%p288_p2), 1040384   ;;  %vm588_vm5 = vcmask (!%p288_p2), 1042432  }
   0xa   : > { %1762 = vmatprep.subr.bf16.mxu1 (!%p288_p2), %v1894_v6  ;;  %1746 = vmatprep.mubr.msk.bf16.mxu0 (!%p288_p2), %vm1895_vm0, %v1894_v6  ;;  %v1877_v47 = vld [vmem:[%s2193_s6 + $0x8] sm:$0xff] (!%p288_p2)   ;;  %v1876_v48 = vld [vmem:[%s2193_s6] sm:$0xff] (!%p288_p2)   ;;  %vm762_vm6 = vcmask (!%p288_p2), 1046528   ;;  %vm1556_vm7 = vcmask (!%p288_p2), 125952  }
   0xb   : > { %354 = vperm.xlu0 (!%p288_p2), %1864, %v337_v3   ;;  %380 = vperm.xlu1 (!%p288_p2), %1865, %v339_v5   ;;  %v347_v15 = vunpack.c.0.s8 (!%p288_p2), %v346_v13 }
   0xc   : > { %1745 = vmatpush3.bf16.msra.mxu0 (!%p288_p2), %v1868_v7 }
   0xd   : > { %s2198_s10 = smov (!%p323_p3, %s1614_s10), 1  ;;  %1756 = vmatprep.subr.bf16.mxu0 %v1894_v6  ;;  %v350_v17 = vsub.s32 %v347_v15, %v349_v16 }
   0xe   : > { %s1704_s21 = sshll.u32 %s2198_s10, 3 }
   0xf   : > { %s327_s28 = scalar_lea.vmem %s2187_s0, %s1704_s21  ;;  %s332_s14 = scalar_lea.vmem %s2196_s9, %s1704_s21 }
  0x10   : > { %v1991_v9 = vld [vmem:[%s327_s28] sm:$0xf]  ;;  %v1993_v10 = vld [vmem:[%s327_s28 + $0x4] sm:$0xf] }
  0x11   : > { %v1628_v11 = vcombine.low %v1991_v9, %v1993_v10 }
  0x13   : > { %1753 = vmatmul.mubr.msk.bf16.vlgmr.msra.gmra.mrb[0].mxu1 %vm405_vm1, %v1628_v11 }
  0x14   : > { %1763 = vmatpush3.bf16.msra.mxu1 %v1869_v8  ;;  %1764 = vmatprep.mubr.msk.bf16.mxu1 %vm1895_vm0, %v1894_v6 }
  0x15   : > { %1774 = vmatprep.subr.bf16.mxu1 %v1894_v6 }
  0x86   : > { %v343_v18 = vpop.permute.xlu0 %342  ;;  %v369_v19 = vpop.permute.xlu1 %368 }
  0x87   : > { %v2002_v20 = vrot.slane %v343_v18, %v350_v17  ;;  %v2004_v21 = vrot.slane %v369_v19, %v350_v17 }
  0x89   : > { %v364_v26 = vmul.bf16 %v2002_v20, %v1991_v9  ;;  %v390_v33 = vmul.bf16 %v2004_v21, %v1991_v9 }
  0x8a   : > { %v355_v22 = vpop.permute.xlu0 %354  ;;  %v381_v23 = vpop.permute.xlu1 %380 }
  0x8b   : > { %v2006_v24 = vrot.slane %v355_v22, %v350_v17  ;;  %v2008_v25 = vrot.slane %v381_v23, %v350_v17 }
  0x8d   : > { %v365_v27 = vmul.bf16 %v2006_v24, %v1993_v10  ;;  %v1662_v28 = vcombine.low %v2002_v20, %v2006_v24  ;;  %v1663_v29 = vcombine.low %v2004_v21, %v2008_v25  ;;  %v391_v34 = vmul.bf16 %v2008_v25, %v1993_v10  ;;  %v1881_v20 = vld [vmem:[%s2193_s6 + $0x28] sm:$0xff]   ;;  %v1880_v21 = vld [vmem:[%s2193_s6 + $0x20] sm:$0xff]   ;;  %v1883_v24 = vld [vmem:[%s2193_s6 + $0x38] sm:$0xff]  }
  0x8e   : > { %v1882_v25 = vld [vmem:[%s2193_s6 + $0x30] sm:$0xff]  }
  0x8f   : > { %v1623_v32 = vcombine.low %v364_v26, %v365_v27  ;;  %v1633_v36 = vcombine.low %v390_v33, %v391_v34 }
  0x91   : > { %1747 = vmatmul.mubr.msk.bf16.vlgmr.msra.gmra.mrb[0].mxu0 %vm405_vm1, %v1623_v32  ;;  %1765 = vmatmul.mubr.msk.bf16.vlgmr.msra.gmra.mrb[4].mxu1 %vm405_vm1, %v1623_v32 }
  0x92   : > { %1757 = vmatpush3.bf16.msra.mxu0 %v1870_v30  ;;  %1775 = vmatpush3.bf16.msra.mxu1 %v1871_v31 }
  0x93   : > { %1758 = vmatprep.mubr.msk.bf16.mxu0 %vm1895_vm0, %v1894_v6  ;;  %1768 = vmatprep.subr.bf16.mxu0 %v1894_v6 }
  0x94   : > { %1776 = vmatprep.mubr.msk.bf16.mxu1 %vm1895_vm0, %v1894_v6  ;;  %1786 = vmatprep.subr.bf16.mxu1 %v1894_v6 }
  0x99   : > { %1759 = vmatmul.mubr.msk.bf16.vlgmr.msra.gmra.mrb[4].mxu0 %vm405_vm1, %v1633_v36  ;;  %1777 = vmatmul.mubr.msk.bf16.vlgmr.msra.gmra.mrb[8].mxu1 %vm405_vm1, %v1633_v36 }
  0x9a   : > { %1769 = vmatpush3.bf16.msra.mxu0 %v1872_v35  ;;  %1770 = vmatprep.mubr.msk.bf16.mxu0 %vm1895_vm0, %v1894_v6 }
  0x9b   : > { %1780 = vmatprep.subr.bf16.mxu0 %v1894_v6  ;;  %1787 = vmatpush3.bf16.msra.mxu1 %v1874_v37 }
  0x9c   : > { %1788 = vmatprep.mubr.msk.bf16.mxu1 %vm1895_vm0, %v1894_v6  ;;  %1798 = vmatprep.subr.bf16.mxu1 %v1894_v6 }
  0xa1   : > { %1771 = vmatmul.mubr.msk.bf16.vlgmr.msra.gmra.mrb[8].mxu0 %vm405_vm1, %v1628_v11  ;;  %1789 = vmatmul.mubr.msk.bf16.vlgmr.msra.gmra.mrb[12].mxu1 %vm405_vm1, %v1628_v11 }
  0xa2   : > { %1781 = vmatpush3.bf16.msra.mxu0 %v1873_v38  ;;  %1782 = vmatprep.mubr.msk.bf16.mxu0 %vm1895_vm0, %v1894_v6 }
  0xa3   : > { %1792 = vmatprep.subr.bf16.mxu0 %v1894_v6  ;;  %1800 = vmatprep.mubr.msk.bf16.mxu1 %vm1895_vm0, %v1894_v6 }
  0xa4   : > { %1799 = vmatpush3.bf16.msra.mxu1 %v1876_v48 }
  0xa5   : > { %1810 = vmatprep.subr.bf16.mxu1 %v1894_v6 }
  0xa9   : > { %1783 = vmatmul.mubr.msk.bf16.vlgmr.msra.gmra.mrb[12].mxu0 %vm405_vm1, %v1623_v32 }
  0xaa   : > { %1793 = vmatpush3.bf16.msra.mxu0 %v1875_v39  ;;  %1794 = vmatprep.mubr.msk.bf16.mxu0 %vm1895_vm0, %v1894_v6 }
  0xab   : > { %1804 = vmatprep.subr.bf16.mxu0 %v1894_v6 }
  0xb1   : > { %1795 = vmatmul.mubr.msk.bf16.vlgmr.msra.gmra.mrb[16].mxu0 %vm405_vm1, %v1633_v36 }
  0xb2   : > { %1806 = vmatprep.mubr.msk.bf16.mxu0 %vm1895_vm0, %v1894_v6  ;;  %1805 = vmatpush3.bf16.msra.mxu0 %v1877_v47 }
  0xb3   : > { %1816 = vmatprep.subr.bf16.mxu0 %v1894_v6 }
  0xe6   : > { %v510_v40 = vpop.f32.mrb[0].mxu1 }
  0xe7   : > { %v1754_v41 = vpop.f32.mrb[1].mxu1  ;;  %v520_v43 = vrot.slane %v510_v40, 4 }
  0xe8   : > { %v513_v42 = vpop.f32.mrb[2].mxu1 }
  0xe9   : > { %v521_v44 = vrot.slane %v513_v42, 4  ;;  %v1755_v45 = vpop.f32.mrb[3].mxu1  ;;  %v525_v51 = vsel %vm519_vm2, 0.0, %v520_v43 }
  0xeb   : > { %v522_v46 = vsel %vm519_vm2, %v520_v43, %v521_v44 }
 0x164   : > { %v443_v49 = vpop.f32.mrb[0].mxu0  ;;  %v640_v50 = vpop.f32.mrb[4].mxu1 }
 0x165   : > { %v453_v52 = vrot.slane %v443_v49, 3  ;;  %v1748_v53 = vpop.f32.mrb[1].mxu0  ;;  %v1766_v54 = vpop.f32.mrb[5].mxu1  ;;  %v650_v58 = vrot.slane %v640_v50, 7 }
 0x166   : > { %v446_v55 = vpop.f32.mrb[2].mxu0  ;;  %v643_v56 = vpop.f32.mrb[6].mxu1 }
 0x167   : > { %v458_v57 = vsel %vm452_vm3, 0.0, %v453_v52  ;;  %v454_v59 = vrot.slane %v446_v55, 3  ;;  %v651_v60 = vrot.slane %v643_v56, 7  ;;  %v1749_v61 = vpop.f32.mrb[3].mxu0  ;;  %v1767_v62 = vpop.f32.mrb[7].mxu1  ;;  %v655_v22 = vsel %vm649_vm4, 0.0, %v650_v58 }
 0x168   : > { %v526_v63 = vadd.f32 %v525_v51, %v458_v57 }
 0x169   : > { %v455_v0 = vsel %vm452_vm3, %v453_v52, %v454_v59  ;;  %v652_v1 = vsel %vm649_vm4, %v650_v58, %v651_v60 }
 0x16a   : > { %v527_v2 = vadd.f32 %v522_v46, %v455_v0 }
 0x16c   : > { %v579_v3 = vpop.f32.mrb[4].mxu0  ;;  %v753_v4 = vpop.f32.mrb[8].mxu1 }
 0x16d   : > { %v589_v5 = vrot.slane %v579_v3, 5  ;;  %v1760_v7 = vpop.f32.mrb[5].mxu0  ;;  %v1778_v8 = vpop.f32.mrb[9].mxu1  ;;  %v763_v14 = vrot.slane %v753_v4, 1 }
 0x16e   : > { %v582_v11 = vpop.f32.mrb[6].mxu0  ;;  %v756_v12 = vpop.f32.mrb[10].mxu1 }
 0x16f   : > { %v594_v13 = vsel %vm588_vm5, 0.0, %v589_v5  ;;  %v590_v15 = vrot.slane %v582_v11, 5  ;;  %v764_v16 = vrot.slane %v756_v12, 1  ;;  %v1761_v17 = vpop.f32.mrb[7].mxu0  ;;  %v1779_v18 = vpop.f32.mrb[11].mxu1 }
 0x170   : > { %v595_v19 = vadd.f32 %v594_v13, %v526_v63  ;;  %v1661_v11 = vld [vmem:[%s2192_s5] ss:$0 sm:$0xff]  ;;  %v1879_v18 = vld [vmem:[%s2193_s6 + $0x18] sm:$0xff]  }
 0x171   : > { %v591_v23 = vsel %vm588_vm5, %v589_v5, %v590_v15  ;;  %v765_v26 = vsel %vm762_vm6, %v763_v14, %v764_v16  ;;  %v768_v45 = vsel %vm762_vm6, %v764_v16, 0.0  ;;  %v1660_v5 = vld [vmem:[%s2191_s4] ss:$0 sm:$0xff] }
 0x172   : > { %v656_v27 = vadd.f32 %v655_v22, %v595_v19  ;;  %v596_v30 = vadd.f32 %v591_v23, %v527_v2  ;;  %v1878_v22 = vld [vmem:[%s2193_s6 + $0x10] sm:$0xff]  }
 0x174   : > { %v701_v31 = vpop.f32.mrb[8].mxu0  ;;  %v657_v32 = vadd.f32 %v652_v1, %v596_v30  ;;  %v874_v33 = vpop.f32.mrb[12].mxu1 }
 0x175   : > { %v708_v34 = vadd.f32 %v701_v31, %v656_v27  ;;  %v1772_v35 = vpop.f32.mrb[9].mxu0  ;;  %v883_v36 = vrot.slane %v874_v33, 4  ;;  %v1790_v37 = vpop.f32.mrb[13].mxu1 }
 0x176   : > { %v704_v38 = vpop.f32.mrb[10].mxu0  ;;  %v877_v39 = vpop.f32.mrb[14].mxu1 }
 0x177   : > { %v769_v40 = vadd.f32 %v765_v26, %v708_v34  ;;  %v709_v41 = vadd.f32 %v704_v38, %v657_v32  ;;  %v1773_v42 = vpop.f32.mrb[11].mxu0  ;;  %v884_v43 = vrot.slane %v877_v39, 4  ;;  %v1791_v44 = vpop.f32.mrb[15].mxu1 }
 0x179   : > { %v770_v46 = vadd.f32 %v768_v45, %v709_v41  ;;  %v885_v47 = vsel %vm519_vm2, %v883_v36, %v884_v43  ;;  %v888_v56 = vsel %vm519_vm2, %v884_v43, 0.0 }
 0x17c   : > { %v814_v48 = vpop.f32.mrb[12].mxu0 }
 0x17d   : > { %v1784_v49 = vpop.f32.mrb[13].mxu0  ;;  %v823_v51 = vrot.slane %v814_v48, 3 }
 0x17e   : > { %v817_v50 = vpop.f32.mrb[14].mxu0 }
 0x17f   : > { %v824_v52 = vrot.slane %v817_v50, 3  ;;  %v1785_v53 = vpop.f32.mrb[15].mxu0 }
 0x181   : > { %v825_v54 = vsel %vm452_vm3, %v823_v51, %v824_v52  ;;  %v828_v55 = vsel %vm452_vm3, %v824_v52, 0.0 }
 0x182   : > { %v829_v57 = vadd.f32 %v825_v54, %v769_v40  ;;  %v830_v58 = vadd.f32 %v828_v55, %v770_v46 }
 0x184   : > { %v889_v59 = vadd.f32 %v885_v47, %v829_v57  ;;  %v890_v60 = vadd.f32 %v888_v56, %v830_v58  ;;  %v934_v61 = vpop.f32.mrb[16].mxu0 }
 0x185   : > { %v1796_v62 = vpop.f32.mrb[17].mxu0  ;;  %v943_v0 = vrot.slane %v934_v61, 5 }
 0x186   : > { %v937_v63 = vpop.f32.mrb[18].mxu0 }
 0x187   : > { %v944_v1 = vrot.slane %v937_v63, 5  ;;  %v1797_v2 = vpop.f32.mrb[19].mxu0 }
 0x189   : > { %v945_v3 = vsel %vm588_vm5, %v943_v0, %v944_v1  ;;  %v948_v4 = vsel %vm588_vm5, %v944_v1, 0.0 }
 0x18a   : > { %v949_v7 = vadd.f32 %v945_v3, %v889_v59  ;;  %v950_v8 = vadd.f32 %v948_v4, %v890_v60 }
 0x18c   : > { %v958_v12 = vmul.f32 %v1660_v5, %v949_v7  ;;  %v959_v13 = vmul.f32 %v1660_v5, %v950_v8 }
 0x18e   : > { %v967_v14 = vadd.f32 %v1661_v11, %v958_v12  ;;  %v968_v15 = vadd.f32 %v1661_v11, %v959_v13 }
 0x190   : > { %v969_v16 = vmax.f32 %v967_v14, 0.0  ;;  %v970_v17 = vmax.f32 %v968_v15, 0.0 }
 0x192   : > { %v971_v19 = vpack.c.bf16 %v970_v17, %v969_v16 }
 0x194   : > { %1807 = vmatmul.mubr.msk.bf16.vlgmr.msra.gmra.mrb[20].mxu0 %vm405_vm1, %v971_v19  ;;  %v978_v23 = vmul.bf16 %v1662_v28, %v971_v19  ;;  %v985_v26 = vmul.bf16 %v1663_v29, %v971_v19  ;;  %v1884_v28 = vld [vmem:[%s2193_s6 + $0x40] sm:$0xff]  }
 0x195   : > { %1817 = vmatpush3.bf16.msra.mxu0 %v1879_v18  ;;  %1818 = vmatprep.mubr.msk.bf16.mxu0 %vm1895_vm0, %v1894_v6 }
 0x196   : > { %1801 = vmatmul.mubr.msk.bf16.vlgmr.msra.gmra.mrb[16].mxu1 %vm405_vm1, %v978_v23  ;;  %1828 = vmatprep.subr.bf16.mxu0 %v1894_v6 }
 0x197   : > { %1811 = vmatpush3.bf16.msra.mxu1 %v1878_v22  ;;  %1812 = vmatprep.mubr.msk.bf16.mxu1 %vm1895_vm0, %v1894_v6 }
 0x198   : > { %1822 = vmatprep.subr.bf16.mxu1 %v1894_v6 }
 0x19c   : > { %1819 = vmatmul.mubr.msk.bf16.vlgmr.msra.gmra.mrb[24].mxu0 %vm405_vm1, %v978_v23 }
 0x19d   : > { %1829 = vmatpush3.bf16.msra.mxu0 %v1881_v20  ;;  %1830 = vmatprep.mubr.msk.bf16.mxu0 %vm1895_vm0, %v1894_v6 }
 0x19e   : > { %1813 = vmatmul.mubr.msk.bf16.vlgmr.msra.gmra.mrb[20].mxu1 %vm405_vm1, %v985_v26  ;;  %1840 = vmatprep.subr.bf16.mxu0 %v1894_v6 }
 0x19f   : > { %1823 = vmatpush3.bf16.msra.mxu1 %v1880_v21  ;;  %1824 = vmatprep.mubr.msk.bf16.mxu1 %vm1895_vm0, %v1894_v6 }
 0x1a0   : > { %1834 = vmatprep.subr.bf16.mxu1 %v1894_v6 }
 0x1a4   : > { %1831 = vmatmul.mubr.msk.bf16.vlgmr.msra.gmra.mrb[28].mxu0 %vm405_vm1, %v985_v26 }
 0x1a5   : > { %1841 = vmatpush3.bf16.msra.mxu0 %v1883_v24  ;;  %1842 = vmatprep.mubr.msk.bf16.mxu0 %vm1895_vm0, %v1894_v6 }
 0x1a6   : > { %1825 = vmatmul.mubr.msk.bf16.vlgmr.msra.gmra.mrb[24].mxu1 %vm405_vm1, %v971_v19 }
 0x1a7   : > { %1835 = vmatpush3.bf16.msra.mxu1 %v1882_v25  ;;  %1836 = vmatprep.mubr.msk.bf16.mxu1 %vm1895_vm0, %v1894_v6 }
 0x1a8   : > { %1846 = vmatprep.subr.bf16.mxu1 %v1894_v6 }
 0x1ac   : > { %1843 = vmatmul.mubr.msk.bf16.vlgmr.msra.gmra.mrb[32].mxu0 %vm405_vm1, %v971_v19 }
 0x1ae   : > { %1837 = vmatmul.mubr.msk.bf16.vlgmr.msra.gmra.mrb[28].mxu1 %vm405_vm1, %v978_v23 }
 0x1af   : > { %1847 = vmatpush3.bf16.msra.mxu1 %v1884_v28  ;;  %1848 = vmatprep.mubr.msk.bf16.mxu1 %vm1895_vm0, %v1894_v6 }
 0x1b6   : > { %1849 = vmatmul.mubr.msk.bf16.vlgmr.msra.gmra.mrb[32].mxu1 %vm405_vm1, %v985_v26 }
 0x267   : > { %v1092_v29 = vpop.f32.mrb[20].mxu0 }
 0x268   : > { %v1101_v27 = vrot.slane %v1092_v29, 4  ;;  %v1808_v30 = vpop.f32.mrb[21].mxu0 }
 0x269   : > { %v1031_v31 = vpop.f32.mrb[16].mxu1  ;;  %v1095_v32 = vpop.f32.mrb[22].mxu0 }
 0x26a   : > { %v1040_v33 = vrot.slane %v1031_v31, 3  ;;  %v1102_v34 = vrot.slane %v1095_v32, 4  ;;  %v1802_v35 = vpop.f32.mrb[17].mxu1  ;;  %v1809_v36 = vpop.f32.mrb[23].mxu0  ;;  %v1106_v38 = vsel %vm519_vm2, 0.0, %v1101_v27 }
 0x26b   : > { %v1034_v37 = vpop.f32.mrb[18].mxu1 }
 0x26c   : > { %v1045_v39 = vsel %vm452_vm3, 0.0, %v1040_v33  ;;  %v1103_v40 = vsel %vm519_vm2, %v1101_v27, %v1102_v34  ;;  %v1041_v41 = vrot.slane %v1034_v37, 3  ;;  %v1803_v6 = vpop.f32.mrb[19].mxu1 }
 0x26d   : > { %v1107_v42 = vadd.f32 %v1106_v38, %v1045_v39 }
 0x26e   : > { %v1042_v43 = vsel %vm452_vm3, %v1040_v33, %v1041_v41 }
 0x26f   : > { %v1108_v44 = vadd.f32 %v1103_v40, %v1042_v43  ;;  %v1215_v45 = vpop.f32.mrb[24].mxu0 }
 0x270   : > { %v1820_v46 = vpop.f32.mrb[25].mxu0  ;;  %v1224_v49 = vrot.slane %v1215_v45, 7 }
 0x271   : > { %v1155_v47 = vpop.f32.mrb[20].mxu1  ;;  %v1218_v48 = vpop.f32.mrb[26].mxu0 }
 0x272   : > { %v1164_v50 = vrot.slane %v1155_v47, 5  ;;  %v1225_v51 = vrot.slane %v1218_v48, 7  ;;  %v1814_v52 = vpop.f32.mrb[21].mxu1  ;;  %v1821_v53 = vpop.f32.mrb[27].mxu0  ;;  %v1229_v60 = vsel %vm649_vm4, 0.0, %v1224_v49 }
 0x273   : > { %v1158_v54 = vpop.f32.mrb[22].mxu1  ;;  %v1698_v47 = vld [vmem:[%s2194_s7] ss:$0 sm:$0xff] }
 0x274   : > { %v1169_v55 = vsel %vm588_vm5, 0.0, %v1164_v50  ;;  %v1165_v56 = vrot.slane %v1158_v54, 5  ;;  %v1815_v57 = vpop.f32.mrb[23].mxu1  ;;  %v1226_v58 = vsel %vm649_vm4, %v1224_v49, %v1225_v51  ;;  %v1542_v51 = vunpack.c.l.bf16 %v1991_v9 }
 0x275   : > { %v1170_v59 = vadd.f32 %v1169_v55, %v1107_v42  ;;  %v1543_v54 = vunpack.c.l.bf16 %v1993_v10 }
 0x276   : > { %v1166_v61 = vsel %vm588_vm5, %v1164_v50, %v1165_v56  ;;  %v1699_v50 = vld [vmem:[%s2195_s8] ss:$0 sm:$0xff] }
 0x277   : > { %v1327_v62 = vpop.f32.mrb[28].mxu0  ;;  %v1230_v63 = vadd.f32 %v1229_v60, %v1170_v59  ;;  %v1171_v0 = vadd.f32 %v1166_v61, %v1108_v44 }
 0x278   : > { %v1832_v1 = vpop.f32.mrb[29].mxu0  ;;  %v1336_v5 = vrot.slane %v1327_v62, 1 }
 0x279   : > { %v1275_v2 = vpop.f32.mrb[24].mxu1  ;;  %v1330_v3 = vpop.f32.mrb[30].mxu0  ;;  %v1231_v4 = vadd.f32 %v1226_v58, %v1171_v0 }
 0x27a   : > { %v1282_v7 = vadd.f32 %v1275_v2, %v1230_v63  ;;  %v1337_v8 = vrot.slane %v1330_v3, 1  ;;  %v1826_v11 = vpop.f32.mrb[25].mxu1  ;;  %v1833_v12 = vpop.f32.mrb[31].mxu0 }
 0x27b   : > { %v1278_v13 = vpop.f32.mrb[26].mxu1 }
 0x27c   : > { %v1338_v14 = vsel %vm762_vm6, %v1336_v5, %v1337_v8  ;;  %v1341_v15 = vsel %vm762_vm6, %v1337_v8, 0.0  ;;  %v1283_v16 = vadd.f32 %v1278_v13, %v1231_v4  ;;  %v1827_v17 = vpop.f32.mrb[27].mxu1 }
 0x27d   : > { %v1342_v18 = vadd.f32 %v1338_v14, %v1282_v7 }
 0x27e   : > { %v1343_v19 = vadd.f32 %v1341_v15, %v1283_v16 }
 0x27f   : > { %v1447_v22 = vpop.f32.mrb[32].mxu0 }
 0x280   : > { %v1844_v23 = vpop.f32.mrb[33].mxu0  ;;  %v1456_v21 = vrot.slane %v1447_v22, 4 }
 0x281   : > { %v1387_v26 = vpop.f32.mrb[28].mxu1  ;;  %v1450_v20 = vpop.f32.mrb[34].mxu0 }
 0x282   : > { %v1457_v24 = vrot.slane %v1450_v20, 4  ;;  %v1838_v25 = vpop.f32.mrb[29].mxu1  ;;  %v1845_v28 = vpop.f32.mrb[35].mxu0  ;;  %v1396_v27 = vrot.slane %v1387_v26, 3 }
 0x283   : > { %v1390_v29 = vpop.f32.mrb[30].mxu1 }
 0x284   : > { %v1458_v30 = vsel %vm519_vm2, %v1456_v21, %v1457_v24  ;;  %v1397_v31 = vrot.slane %v1390_v29, 3  ;;  %v1839_v32 = vpop.f32.mrb[31].mxu1  ;;  %v1461_v37 = vsel %vm519_vm2, %v1457_v24, 0.0 }
 0x286   : > { %v1398_v33 = vsel %vm452_vm3, %v1396_v27, %v1397_v31  ;;  %v1401_v34 = vsel %vm452_vm3, %v1397_v31, 0.0 }
 0x287   : > { %v1402_v35 = vadd.f32 %v1398_v33, %v1342_v18  ;;  %v1403_v36 = vadd.f32 %v1401_v34, %v1343_v19 }
 0x289   : > { %v1507_v38 = vpop.f32.mrb[32].mxu1  ;;  %v1462_v39 = vadd.f32 %v1458_v30, %v1402_v35  ;;  %v1463_v40 = vadd.f32 %v1461_v37, %v1403_v36 }
 0x28a   : > { %v1850_v41 = vpop.f32.mrb[33].mxu1  ;;  %v1516_v42 = vrot.slane %v1507_v38, 5 }
 0x28b   : > { %v1510_v6 = vpop.f32.mrb[34].mxu1 }
 0x28c   : > { %v1517_v43 = vrot.slane %v1510_v6, 5  ;;  %v1851_v44 = vpop.f32.mrb[35].mxu1 }
 0x28e   : > { %v1518_v45 = vsel %vm588_vm5, %v1516_v42, %v1517_v43  ;;  %v1521_v46 = vsel %vm588_vm5, %v1517_v43, 0.0 }
 0x28f   : > { %v1522_v48 = vadd.f32 %v1518_v45, %v1462_v39  ;;  %v1523_v49 = vadd.f32 %v1521_v46, %v1463_v40 }
 0x291   : > { %v1531_v52 = vmul.f32 %v1698_v47, %v1522_v48  ;;  %v1532_v53 = vmul.f32 %v1698_v47, %v1523_v49 }
 0x293   : > { %v1540_v55 = vadd.f32 %v1699_v50, %v1531_v52  ;;  %v1541_v56 = vadd.f32 %v1699_v50, %v1532_v53 }
 0x295   : > { %v1544_v57 = vadd.f32 %v1542_v51, %v1540_v55  ;;  %v1545_v58 = vadd.f32 %v1543_v54, %v1541_v56 }
 0x297   : > { %v1546_v59 = vmax.f32 %v1544_v57, 0.0  ;;  %v1547_v60 = vmax.f32 %v1545_v58, 0.0 }
 0x299   : > { %v1706_v61 = vpack.c.bf16 %v1546_v59, %v1546_v59  ;;  %v1707_v62 = vpack.c.bf16 %v1547_v60, %v1547_v60 }
 0x29b   : > { %1557 = vst.msk [vmem:[%s332_s14] sm:$0xf] %vm1556_vm7, %v1706_v61  ;;  %1558 = vst.msk [vmem:[%s332_s14 + $0x4] sm:$0xf] %vm1556_vm7, %v1707_v62 }
 0x29c PF: > { %s19_s30 = sadd.s32 1, %s1891_s30  }
 0x29d   : > { %p16_p4 = scmp.ge.s32.totalorder %s19_s30, 4  }
 0x29f   :  { %18 = sbr.rel (!%p16_p4) target bundleno = 1 (0x1), region = 102 }

// kernel: audra_forward.15
= control target key start
LH: loop header
LB: loop body
LE: loop exit
PB: predicated region body
PF: predicated region fallthrough
CT: control target
= control target key end

     0   :  { %s1611_s21 = smov 0   ;;  %s1801_s0 = inlined_call_operand.vmem [shape: bf16[2,4,144], index: 0, kind: input, shape index: {}]   ;;  %s1802_s1 = inlined_call_operand.vmem [shape: bf16[4,1], index: 1, kind: input, shape index: {}]   ;;  %s1803_s2 = inlined_call_operand.vmem [shape: bf16[4,1], index: 2, kind: input, shape index: {}]   ;;  %s1804_s3 = inlined_call_operand.vmem [shape: bf16[144,32], index: 3, kind: input, shape index: {}]   ;;  %s1805_s4 = inlined_call_operand.vmem [shape: bf16[16,32], index: 4, kind: input, shape index: {}]   ;;  %s1806_s5 = inlined_call_operand.vmem [shape: f32[1,32], index: 5, kind: input, shape index: {}]   ;;  %s1807_s6 = inlined_call_operand.vmem [shape: f32[1,32], index: 6, kind: input, shape index: {}]   ;;  %s1808_s7 = inlined_call_operand.vmem [shape: f32[1,32], index: 7, kind: input, shape index: {}]   ;;  %s1809_s8 = inlined_call_operand.vmem [shape: f32[1,32], index: 8, kind: input, shape index: {}]   ;;  %s1810_s9 = inlined_call_operand.vmem [shape: bf16[9,32,32], index: 9, kind: input, shape index: {}]   ;;  %s1811_s10 = inlined_call_operand.vmem [shape: f32[1,32], index: 10, kind: input, shape index: {}]   ;;  %s1812_s11 = inlined_call_operand.vmem [shape: f32[1,32], index: 11, kind: input, shape index: {}]   ;;  %s1813_s12 = inlined_call_operand.vmem [shape: bf16[2,4,32], index: 12, kind: output, shape index: {}]  }
   0x1 LB: > { %s1294_s22 = sadd.s32 4294967295, %s1539_s21   ;;  %p1298_p0 = scmp.ge.s32.totalorder %s1539_s21, 1  ;;  %s1539_s21 = sphi %s1611_s21, %s22_s21  }
   0x2   : > { %p362_p1 = scmp.lt.s32.totalorder %s1539_s21, 3 }
   0x4   : > { %p363_p2 = pnand %p1298_p0, %p362_p1 }
   0x5   : > { %v1505_v0 = vld [vmem:[%s1804_s3] sm:$0xff] (!%p363_p2)   ;;  %v1541_v1 = vmov (!%p363_p2), 0   ;;  %p403_p3 = scmp.lt.s32.totalorder (!%p363_p2), %s1294_s22, 1  ;;  %v1506_v2 = vld [vmem:[%s1804_s3 + $0x8] sm:$0xff] (!%p363_p2)   ;;  %v1507_v3 = vld [vmem:[%s1804_s3 + $0x10] sm:$0xff] (!%p363_p2)   ;;  %vm496_vm0 = vcmask (!%p363_p2), 130048   ;;  %v637_v24 = vlaneseq (!%p363_p2) }
   0x6   : > { %366 = sbr.rel (%p363_p2) target bundleno = 534 (0x216), region = 68  ;;  %500 = vmatprep.subr.bf16.mxu0 (!%p363_p2), %v1541_v1  ;;  %1503 = vset.pattern.permute.xlu0 (!%p363_p2), %v1541_v1  ;;  %v627_v5 = vld [vmem:[%s1802_s1] sm:$0x3] (!%p363_p2)  ;;  %v1508_v6 = vld [vmem:[%s1804_s3 + $0x18] sm:$0xff] (!%p363_p2)   ;;  %v1542_v11 = vmov (!%p363_p2), 0.0   ;;  %vm1543_vm1 = vmmov (!%p363_p2), 0  }
   0x7   : > { %501 = vmatpush1.bf16.msra.mxu0 (!%p363_p2), %v1505_v0  ;;  %1504 = vset.pattern.permute.xlu1 (!%p363_p2), %v1541_v1  ;;  %v628_v8 = vld [vmem:[%s1803_s2] sm:$0x3] (!%p363_p2)  ;;  %v1510_v12 = vld [vmem:[%s1804_s3 + $0x28] sm:$0xff] (!%p363_p2)   ;;  %v1511_v13 = vld [vmem:[%s1804_s3 + $0x30] sm:$0xff] (!%p363_p2)   ;;  %v1545_v22 = vmov (!%p363_p2), 269488144  }
   0x8   : > { %502 = vmatprep.subr.bf16.mxu0 (!%p363_p2), %v1541_v1  ;;  %631 = vperm.xlu0 (!%p363_p2), %1503, %v627_v5   ;;  %v1514_v9 = vld [vmem:[%s1805_s4] sm:$0xff] (!%p363_p2)   ;;  %v1512_v14 = vld [vmem:[%s1804_s3 + $0x38] sm:$0xff] (!%p363_p2)   ;;  %v1517_v17 = vld [vmem:[%s1810_s9 + $0x48] sm:$0xff] (!%p363_p2)   ;;  %v635_v23 = vunpack.c.l.s4 (!%p363_p2), %v1545_v22  ;;  %v638_v27 = vshrl.u32 (!%p363_p2), %v637_v24, 7  ;;  %vm671_vm2 = vcmask (!%p363_p2), 261120   ;;  %vm718_vm3 = vcmask (!%p363_p2), 1042432  }
   0x9   : > { %644 = vperm.xlu1 (!%p363_p2), %1504, %v628_v8   ;;  %v1509_v10 = vld [vmem:[%s1804_s3 + $0x20] sm:$0xff] (!%p363_p2)   ;;  %1412 = vmatprep.subr.bf16.mxu1 (!%p363_p2), %v1542_v11  ;;  %v1518_v21 = vld [vmem:[%s1810_s9 + $0x8] sm:$0xff] (!%p363_p2)   ;;  %v1520_v40 = vld [vmem:[%s1810_s9 + $0x10] sm:$0xff] (!%p363_p2)   ;;  %vm783_vm4 = vcmask (!%p363_p2), 1041408   ;;  %vm849_vm5 = vcmask (!%p363_p2), 1040384   ;;  %vm1239_vm6 = vcmask (!%p363_p2), 254976  }
   0xa   : > { %1413 = vmatpush3.bf16.msra.mxu1 (!%p363_p2), %v1514_v9  ;;  %1414 = vmatprep.mubr.msk.bf16.mxu1 (!%p363_p2), %vm1543_vm1, %v1542_v11  ;;  %v1513_v15 = vld [vmem:[%s1804_s3 + $0x40] sm:$0xff] (!%p363_p2)   ;;  %v636_v26 = vunpack.c.0.s8 (!%p363_p2), %v635_v23  ;;  %v1521_v42 = vld [vmem:[%s1810_s9 + $0x68] sm:$0xff] (!%p363_p2)   ;;  %v1522_v43 = vld [vmem:[%s1810_s9 + $0x18] sm:$0xff] (!%p363_p2)  }
   0xb   : > { %503 = vmatpush1.bf16.msra.mxu0 (!%p363_p2), %v1506_v2  ;;  %1418 = vmatprep.subr.bf16.mxu1 (!%p363_p2), %v1542_v11  ;;  %v1515_v16 = vld [vmem:[%s1810_s9 + $0x40] sm:$0xff] (!%p363_p2)   ;;  %v1525_v47 = vld [vmem:[%s1810_s9 + $0x88] sm:$0xff] (!%p363_p2)   ;;  %v1527_v51 = vld [vmem:[%s1810_s9 + $0x30] sm:$0xff] (!%p363_p2)  }
   0xc   : > { %504 = vmatprep.subr.bf16.mxu0 (!%p363_p2), %v1541_v1  ;;  %v1516_v19 = vld [vmem:[%s1810_s9] sm:$0xff] (!%p363_p2)   ;;  %v639_v33 = vsub.s32 (!%p363_p2), %v636_v26, %v638_v27  ;;  %v1526_v49 = vld [vmem:[%s1810_s9 + $0x28] sm:$0xff] (!%p363_p2)   ;;  %v1528_v52 = vld [vmem:[%s1810_s9 + $0x38] sm:$0xff] (!%p363_p2)  }
   0xd   : > { %s1815_s22 = smov (!%p403_p3, %s1294_s22), 1  ;;  %v1313_v25 = vld [vmem:[%s1806_s5] ss:$0 sm:$0xff]  ;;  %v1529_v53 = vld [vmem:[%s1810_s9 + $0x50] sm:$0xff]   ;;  %v1530_v54 = vld [vmem:[%s1810_s9 + $0x58] sm:$0xff]  }
   0xe   : > { %s1382_s27 = sshll.u32 %s1815_s22, 2  ;;  %v1314_v29 = vld [vmem:[%s1807_s6] ss:$0 sm:$0xff]  ;;  %v1531_v55 = vld [vmem:[%s1810_s9 + $0x70] sm:$0xff]   ;;  %v1532_v56 = vld [vmem:[%s1810_s9 + $0x78] sm:$0xff]   ;;  %s1301_s18 = sshll.u32 %s1815_s22, 1 }
   0xf   : > { %s407_s14 = scalar_lea.vmem %s1801_s0, %s1382_s27  ;;  %505 = vmatpush1.bf16.msra.mxu0 %v1507_v3  ;;  %s1544_s27 = smov 64   ;;  %v1519_v37 = vld [vmem:[%s1810_s9 + $0x60] sm:$0xff]  }
  0x10   : > { %v1302_v4 = vld.sshfl [vmem:[%s407_s14] sm:$0x33 pattern:$0x76325410]  ;;  %506 = vmatprep.subr.bf16.mxu0 %v1541_v1  ;;  %s411_s23 = scalar_lea.vmem %s1813_s12, %s1301_s18 }
  0x11   : > { %v440_v7 = vcombine.high %v1302_v4, %v1302_v4  ;;  %559 = vrot.lane.b32.xlu0 %v1302_v4, %s1544_s27  ;;  %v1523_v44 = vld [vmem:[%s1810_s9 + $0x80] sm:$0xff]  }
  0x12   : > { %v1524_v46 = vld [vmem:[%s1810_s9 + $0x20] sm:$0xff]  }
  0x13   : > { %1312 = vmatprep.mubr.msk.bf16.mxu0 %vm496_vm0, %v440_v7  ;;  %507 = vmatpush1.bf16.msra.mxu0 %v1508_v6 }
  0x14   : > { %508 = vmatprep.subr.bf16.mxu0 %v1541_v1 }
  0x17   : > { %509 = vmatpush1.bf16.msra.mxu0 %v1509_v10 }
  0x18   : > { %510 = vmatprep.subr.bf16.mxu0 %v1541_v1 }
  0x1b   : > { %511 = vmatpush1.bf16.msra.mxu0 %v1510_v12 }
  0x1c   : > { %512 = vmatprep.subr.bf16.mxu0 %v1541_v1 }
  0x1f   : > { %513 = vmatpush1.bf16.msra.mxu0 %v1511_v13 }
  0x20   : > { %514 = vmatprep.subr.bf16.mxu0 %v1541_v1 }
  0x23   : > { %515 = vmatpush1.bf16.msra.mxu0 %v1512_v14 }
  0x24   : > { %516 = vmatprep.subr.bf16.mxu0 %v1541_v1 }
  0x27   : > { %517 = vmatpush1.bf16.msra.mxu0 %v1513_v15 }
  0x28   : > { %1450 = vmatprep.subr.bf16.mxu0 %v1542_v11 }
  0x2a   : > { %533 = vmatmul.mubr.bf16.vlgmr.msra.gmra.mrb[0].mxu0 %v1302_v4 }
  0x2b   : > { %1454 = vmatprep.mubr.msk.bf16.mxu0 %vm1543_vm1, %v1542_v11  ;;  %1451 = vmatpush3.bf16.msra.mxu0 %v1515_v16 }
  0x2c   : > { %1452 = vmatprep.subr.bf16.mxu0 %v1542_v11 }
  0x2f   : > { %1453 = vmatpush3.bf16.msra.mxu0 %v1517_v17 }
  0x30   : > { %1466 = vmatprep.subr.bf16.mxu0 %v1542_v11 }
  0x87   : > { %v632_v18 = vpop.permute.xlu0 %631 }
  0x88   : > { %v640_v38 = vrot.slane %v632_v18, %v639_v33  ;;  %v645_v45 = vpop.permute.xlu1 %644 }
  0x89   : > { %v653_v48 = vrot.slane %v645_v45, %v639_v33 }
  0x8b   : > { %v560_v20 = vpop.permute.xlu0 %559 }
  0x8c   : > { %1415 = vmatmul.mubr.msk.bf16.vlgmr.msra.gmra.mrb[0].mxu1 %vm496_vm0, %v560_v20 }
  0x8d   : > { %1419 = vmatpush3.bf16.msra.mxu1 %v1516_v19  ;;  %1422 = vmatprep.mubr.msk.bf16.mxu1 %vm1543_vm1, %v1542_v11 }
  0x8e   : > { %1420 = vmatprep.subr.bf16.mxu1 %v1542_v11 }
  0x91   : > { %1421 = vmatpush3.bf16.msra.mxu1 %v1518_v21 }
  0x92   : > { %1426 = vmatprep.subr.bf16.mxu1 %v1542_v11 }
  0xfd   : > { %v534_v28 = vpop.f32.mrb[0].mxu0 }
  0xfe   : > { %v547_v30 = vmul.f32 %v1313_v25, %v534_v28  ;;  %v536_v31 = vpop.f32.mrb[1].mxu0 }
  0xff   : > { %v537_v32 = vpop.f32.mrb[2].mxu0 }
 0x100   : > { %v555_v34 = vadd.f32 %v1314_v29, %v547_v30  ;;  %v538_v35 = vpop.f32.mrb[3].mxu0 }
 0x102   : > { %v556_v36 = vmax.f32 %v555_v34, 0.0 }
 0x104   : > { %v626_v39 = vpack.c.bf16 %v556_v36, %v556_v36 }
 0x106   : > { %1455 = vmatmul.mubr.msk.bf16.vlgmr.msra.gmra.mrb[4].mxu0 %vm671_vm2, %v626_v39  ;;  %v641_v41 = vmul.bf16 %v640_v38, %v626_v39  ;;  %v654_v50 = vmul.bf16 %v653_v48, %v626_v39 }
 0x107   : > { %1467 = vmatpush3.bf16.msra.mxu0 %v1519_v37  ;;  %1470 = vmatprep.mubr.msk.bf16.mxu0 %vm1543_vm1, %v1542_v11 }
 0x108   : > { %1423 = vmatmul.mubr.msk.bf16.vlgmr.msra.gmra.mrb[4].mxu1 %vm671_vm2, %v641_v41  ;;  %1468 = vmatprep.subr.bf16.mxu0 %v1542_v11 }
 0x109   : > { %1427 = vmatpush3.bf16.msra.mxu1 %v1520_v40  ;;  %1430 = vmatprep.mubr.msk.bf16.mxu1 %vm1543_vm1, %v1542_v11 }
 0x10a   : > { %1428 = vmatprep.subr.bf16.mxu1 %v1542_v11 }
 0x10b   : > { %1469 = vmatpush3.bf16.msra.mxu0 %v1521_v42 }
 0x10c   : > { %1482 = vmatprep.subr.bf16.mxu0 %v1542_v11 }
 0x10d   : > { %1429 = vmatpush3.bf16.msra.mxu1 %v1522_v43 }
 0x10e   : > { %1471 = vmatmul.mubr.msk.bf16.vlgmr.msra.gmra.mrb[8].mxu0 %vm671_vm2, %v641_v41  ;;  %1434 = vmatprep.subr.bf16.mxu1 %v1542_v11 }
 0x10f   : > { %1483 = vmatpush3.bf16.msra.mxu0 %v1523_v44  ;;  %1486 = vmatprep.mubr.msk.bf16.mxu0 %vm1543_vm1, %v1542_v11 }
 0x110   : > { %1431 = vmatmul.mubr.msk.bf16.vlgmr.msra.gmra.mrb[8].mxu1 %vm671_vm2, %v626_v39  ;;  %1484 = vmatprep.subr.bf16.mxu0 %v1542_v11 }
 0x111   : > { %1435 = vmatpush3.bf16.msra.mxu1 %v1524_v46  ;;  %1438 = vmatprep.mubr.msk.bf16.mxu1 %vm1543_vm1, %v1542_v11 }
 0x112   : > { %1436 = vmatprep.subr.bf16.mxu1 %v1542_v11 }
 0x113   : > { %1485 = vmatpush3.bf16.msra.mxu0 %v1525_v47 }
 0x115   : > { %1437 = vmatpush3.bf16.msra.mxu1 %v1526_v49 }
 0x116   : > { %1487 = vmatmul.mubr.msk.bf16.vlgmr.msra.gmra.mrb[12].mxu0 %vm671_vm2, %v654_v50  ;;  %1442 = vmatprep.subr.bf16.mxu1 %v1542_v11 }
 0x118   : > { %1439 = vmatmul.mubr.msk.bf16.vlgmr.msra.gmra.mrb[12].mxu1 %vm671_vm2, %v654_v50 }
 0x119   : > { %1443 = vmatpush3.bf16.msra.mxu1 %v1527_v51  ;;  %1446 = vmatprep.mubr.msk.bf16.mxu1 %vm1543_vm1, %v1542_v11 }
 0x11a   : > { %1444 = vmatprep.subr.bf16.mxu1 %v1542_v11 }
 0x11d   : > { %1445 = vmatpush3.bf16.msra.mxu1 %v1528_v52  ;;  %v1317_v52 = vld [vmem:[%s1808_s7] ss:$0 sm:$0xff] }
 0x11e   : > { %1458 = vmatprep.subr.bf16.mxu1 %v1542_v11 }
 0x120   : > { %1447 = vmatmul.mubr.msk.bf16.vlgmr.msra.gmra.mrb[16].mxu1 %vm671_vm2, %v641_v41 }
 0x121   : > { %1459 = vmatpush3.bf16.msra.mxu1 %v1529_v53  ;;  %1462 = vmatprep.mubr.msk.bf16.mxu1 %vm1543_vm1, %v1542_v11 }
 0x122   : > { %1460 = vmatprep.subr.bf16.mxu1 %v1542_v11 }
 0x125   : > { %1461 = vmatpush3.bf16.msra.mxu1 %v1530_v54 }
 0x126   : > { %1474 = vmatprep.subr.bf16.mxu1 %v1542_v11 }
 0x128   : > { %1463 = vmatmul.mubr.msk.bf16.vlgmr.msra.gmra.mrb[20].mxu1 %vm671_vm2, %v654_v50 }
 0x129   : > { %1475 = vmatpush3.bf16.msra.mxu1 %v1531_v55  ;;  %1478 = vmatprep.mubr.msk.bf16.mxu1 %vm1543_vm1, %v1542_v11 }
 0x12a   : > { %1476 = vmatprep.subr.bf16.mxu1 %v1542_v11 }
 0x12d   : > { %1477 = vmatpush3.bf16.msra.mxu1 %v1532_v56 }
 0x130   : > { %1479 = vmatmul.mubr.msk.bf16.vlgmr.msra.gmra.mrb[24].mxu1 %vm671_vm2, %v626_v39 }
 0x15f   : > { %v1771_v57 = vpop.f32.mrb[0].mxu1 }
 0x160   : > { %v1416_v58 = vpop.f32.mrb[1].mxu1 }
 0x161   : > { %v607_v59 = vpop.f32.mrb[2].mxu1  ;;  %v1378_v58 = vld [vmem:[%s1811_s10] ss:$0 sm:$0xff] }
 0x162   : > { %v1417_v60 = vpop.f32.mrb[3].mxu1  ;;  %v617_v59 = vmul.f32 %v1317_v52, %v1771_v57 }
 0x1d9   : > { %v965_v61 = vpop.f32.mrb[4].mxu0 }
 0x1da   : > { %v1456_v62 = vpop.f32.mrb[5].mxu0 }
 0x1db   : > { %v709_v63 = vpop.f32.mrb[4].mxu1  ;;  %v968_v0 = vpop.f32.mrb[6].mxu0  ;;  %v1379_v62 = vld [vmem:[%s1812_s11] ss:$0 sm:$0xff] }
 0x1dc   : > { %v1424_v1 = vpop.f32.mrb[5].mxu1  ;;  %v1457_v2 = vpop.f32.mrb[7].mxu0  ;;  %v716_v6 = vrot.slane %v709_v63, 5 }
 0x1dd   : > { %v712_v3 = vpop.f32.mrb[6].mxu1 }
 0x1de   : > { %v1425_v4 = vpop.f32.mrb[7].mxu1  ;;  %v719_v14 = vsel %vm718_vm3, 0.0, %v716_v6 }
 0x1e1   : > { %v1085_v5 = vpop.f32.mrb[8].mxu0 }
 0x1e2   : > { %v1472_v7 = vpop.f32.mrb[9].mxu0  ;;  %v1092_v38 = vrot.slane %v1085_v5, 1 }
 0x1e3   : > { %v774_v8 = vpop.f32.mrb[8].mxu1  ;;  %v1088_v9 = vpop.f32.mrb[10].mxu0 }
 0x1e4   : > { %v781_v10 = vrot.slane %v774_v8, 6  ;;  %v1432_v11 = vpop.f32.mrb[9].mxu1  ;;  %v1473_v12 = vpop.f32.mrb[11].mxu0  ;;  %v1094_v45 = vsel %vm718_vm3, %v1092_v38, 0.0 }
 0x1e5   : > { %v777_v13 = vpop.f32.mrb[10].mxu1 }
 0x1e6   : > { %v784_v15 = vsel %vm783_vm4, 0.0, %v781_v10  ;;  %v1433_v16 = vpop.f32.mrb[11].mxu1 }
 0x1e7   : > { %v785_v17 = vadd.f32 %v784_v15, %v719_v14 }
 0x1e9   : > { %v1209_v18 = vpop.f32.mrb[12].mxu0 }
 0x1ea   : > { %v1488_v19 = vpop.f32.mrb[13].mxu0  ;;  %v1216_v48 = vrot.slane %v1209_v18, 3 }
 0x1eb   : > { %v840_v20 = vpop.f32.mrb[12].mxu1  ;;  %v1212_v21 = vpop.f32.mrb[14].mxu0 }
 0x1ec   : > { %v847_v22 = vrot.slane %v840_v20, 7  ;;  %v1440_v23 = vpop.f32.mrb[13].mxu1  ;;  %v1489_v24 = vpop.f32.mrb[15].mxu0  ;;  %v1218_v56 = vsel %vm849_vm5, %v1216_v48, 0.0 }
 0x1ed   : > { %v843_v25 = vpop.f32.mrb[14].mxu1 }
 0x1ee   : > { %v850_v26 = vsel %vm849_vm5, 0.0, %v847_v22  ;;  %v1441_v27 = vpop.f32.mrb[15].mxu1 }
 0x1ef   : > { %v851_v28 = vadd.f32 %v850_v26, %v785_v17 }
 0x1f3   : > { %v903_v29 = vpop.f32.mrb[16].mxu1 }
 0x1f4   : > { %v910_v30 = vrot.slane %v903_v29, 7  ;;  %v1448_v31 = vpop.f32.mrb[17].mxu1 }
 0x1f5   : > { %v906_v32 = vpop.f32.mrb[18].mxu1 }
 0x1f6   : > { %v912_v33 = vsel %vm849_vm5, 0.0, %v910_v30  ;;  %v1449_v34 = vpop.f32.mrb[19].mxu1 }
 0x1f7   : > { %v913_v35 = vadd.f32 %v912_v33, %v851_v28 }
 0x1f9   : > { %v971_v36 = vadd.f32 %v965_v61, %v913_v35  ;;  %v1318_v61 = vld [vmem:[%s1809_s8] ss:$0 sm:$0xff] }
 0x1fa   : > { %v625_v0 = vadd.f32 %v1318_v61, %v617_v59 }
 0x1fb   : > { %v1023_v37 = vpop.f32.mrb[20].mxu1 }
 0x1fc   : > { %v1030_v39 = vrot.slane %v1023_v37, 1  ;;  %v1464_v40 = vpop.f32.mrb[21].mxu1 }
 0x1fd   : > { %v1026_v41 = vpop.f32.mrb[22].mxu1 }
 0x1fe   : > { %v1032_v42 = vsel %vm718_vm3, %v1030_v39, 0.0  ;;  %v1465_v43 = vpop.f32.mrb[23].mxu1 }
 0x1ff   : > { %v1033_v44 = vadd.f32 %v1032_v42, %v971_v36 }
 0x201   : > { %v1095_v46 = vadd.f32 %v1094_v45, %v1033_v44 }
 0x203   : > { %v1147_v47 = vpop.f32.mrb[24].mxu1 }
 0x204   : > { %v1154_v49 = vrot.slane %v1147_v47, 2  ;;  %v1480_v50 = vpop.f32.mrb[25].mxu1 }
 0x205   : > { %v1150_v51 = vpop.f32.mrb[26].mxu1 }
 0x206   : > { %v1156_v53 = vsel %vm783_vm4, %v1154_v49, 0.0  ;;  %v1481_v54 = vpop.f32.mrb[27].mxu1 }
 0x207   : > { %v1157_v55 = vadd.f32 %v1156_v53, %v1095_v46 }
 0x209   : > { %v1219_v60 = vadd.f32 %v1218_v56, %v1157_v55 }
 0x20b   : > { %v1227_v63 = vmul.f32 %v1378_v58, %v1219_v60 }
 0x20d   : > { %v1235_v1 = vadd.f32 %v1379_v62, %v1227_v63 }
 0x20f   : > { %v1236_v2 = vadd.f32 %v1235_v1, %v625_v0 }
 0x211   : > { %v1237_v3 = vmax.f32 %v1236_v2, 0.0 }
 0x213   : > { %v1238_v57 = vpack.c.bf16 %v1237_v3, %v1237_v3 }
 0x215   : > { %1240 = vst.msk [vmem:[%s411_s23] sm:$0x3] %vm1239_vm6, %v1238_v57 }
 0x216 PF: > { %s22_s21 = sadd.s32 1, %s1539_s21  }
 0x217   : > { %p19_p4 = scmp.ge.s32.totalorder %s22_s21, 4  }
 0x219   :  { %21 = sbr.rel (!%p19_p4) target bundleno = 1 (0x1), region = 106 }

// kernel: audra_forward.17
= control target key start
LH: loop header
LB: loop body
LE: loop exit
PB: predicated region body
PF: predicated region fallthrough
CT: control target
= control target key end

     0   :  { %s1349_s25 = smov 0   ;;  %s1519_s0 = inlined_call_operand.vmem [shape: bf16[2,1,288], index: 0, kind: input, shape index: {}]   ;;  %s1520_s1 = inlined_call_operand.<no memory space> [shape: bf16[1,1], index: 1, kind: input, shape index: {}, may-alias: {1,2}]   ;;  %s1521_s3 = inlined_call_operand.vmem [shape: bf16[288,64], index: 3, kind: input, shape index: {}]   ;;  %s1522_s4 = inlined_call_operand.vmem [shape: bf16[32,64], index: 4, kind: input, shape index: {}]   ;;  %s1523_s5 = inlined_call_operand.vmem [shape: f32[1,64], index: 5, kind: input, shape index: {}]   ;;  %s1524_s6 = inlined_call_operand.vmem [shape: f32[1,64], index: 6, kind: input, shape index: {}]   ;;  %s1525_s7 = inlined_call_operand.vmem [shape: f32[1,64], index: 7, kind: input, shape index: {}]   ;;  %s1526_s8 = inlined_call_operand.vmem [shape: f32[1,64], index: 8, kind: input, shape index: {}]   ;;  %s1527_s9 = inlined_call_operand.vmem [shape: bf16[9,64,64], index: 9, kind: input, shape index: {}]   ;;  %s1528_s10 = inlined_call_operand.vmem [shape: f32[1,64], index: 10, kind: input, shape index: {}]   ;;  %s1529_s11 = inlined_call_operand.vmem [shape: f32[1,64], index: 11, kind: input, shape index: {}]   ;;  %s1530_s12 = inlined_call_operand.vmem [shape: bf16[2,1,64], index: 12, kind: output, shape index: {}]   ;;  %s1531_s2 = inlined_call_operand.<no memory space> [shape: bf16[1,1], index: 2, kind: input, shape index: {}, may-alias: {1,2}]  }
   0x1   :  { %v17_v0 = vstv %s1520_s1  ;;  %v19_v1 = vstv %s1531_s2 }
   0x2   :  { %18 = vst [vmem:[#allocation2] sm:$0x1] %v17_v0  ;;  %20 = vst [vmem:[#allocation3] sm:$0x1] %v19_v1 }
   0x3 LB: > { %s1051_s26 = sadd.s32 4294967295, %s1272_s25   ;;  %p1055_p0 = scmp.ge.s32.totalorder %s1272_s25, 1  ;;  %s1272_s25 = sphi %s1349_s25, %s26_s25  }
   0x4   : > { %p365_p1 = scmp.lt.s32.totalorder %s1272_s25, 3 }
   0x6   : > { %p366_p2 = pnand %p1055_p0, %p365_p1 }
   0x7   : > { %v1234_v2 = vld [vmem:[%s1521_s3 + $0x40] sm:$0xff] (!%p366_p2)   ;;  %v1274_v4 = vmov (!%p366_p2), 0.0   ;;  %v1236_v5 = vld [vmem:[%s1521_s3 + $0x48] sm:$0xff] (!%p366_p2)   ;;  %p404_p3 = scmp.lt.s32.totalorder (!%p366_p2), %s1051_s26, 1  ;;  %v1238_v7 = vld [vmem:[%s1521_s3 + $0x50] sm:$0xff] (!%p366_p2)   ;;  %vm1275_vm0 = vmmov (!%p366_p2), 0   ;;  %v461_v15 = vlaneseq (!%p366_p2) }
   0x8   : > { %369 = sbr.rel (%p366_p2) target bundleno = 509 (0x1fd), region = 68  ;;  %v1235_v3 = vld [vmem:[%s1521_s3] sm:$0xff] (!%p366_p2)   ;;  %1163 = vmatprep.subr.bf16.mxu1 (!%p366_p2), %v1274_v4  ;;  %1120 = vmatprep.subr.bf16.mxu0 (!%p366_p2), %v1234_v2  ;;  %v1237_v6 = vld [vmem:[%s1521_s3 + $0x8] sm:$0xff] (!%p366_p2)   ;;  %v1239_v8 = vld [vmem:[%s1521_s3 + $0x10] sm:$0xff] (!%p366_p2)   ;;  %v1276_v10 = vmov (!%p366_p2), 0   ;;  %vm583_vm1 = vcmask (!%p366_p2), 261120  }
   0x9   : > { %1121 = vmatpush3.bf16.msra.mxu0 (!%p366_p2), %v1235_v3  ;;  %1167 = vmatprep.mubr.msk.bf16.mxu1 (!%p366_p2), %vm1275_vm0, %v1274_v4  ;;  %v1240_v9 = vld [vmem:[%s1521_s3 + $0x58] sm:$0xff] (!%p366_p2)   ;;  %v1242_v12 = vld [vmem:[%s1521_s3 + $0x60] sm:$0xff] (!%p366_p2)   ;;  %v1244_v16 = vld [vmem:[%s1521_s3 + $0x68] sm:$0xff] (!%p366_p2)   ;;  %v1277_v20 = vmov (!%p366_p2), 1966171168   ;;  %v1409_v22 = vshrl.u32 (!%p366_p2), %v461_v15, 7 }
   0xa   : > { %1122 = vmatprep.subr.bf16.mxu0 (!%p366_p2), %v1236_v5  ;;  %1233 = vset.pattern.permute.xlu0 (!%p366_p2), %v1276_v10  ;;  %v1241_v11 = vld [vmem:[%s1521_s3 + $0x18] sm:$0xff] (!%p366_p2)   ;;  %v1248_v13 = vld [vmem:[%s1521_s3 + $0x80] sm:$0xff] (!%p366_p2)   ;;  %v1251_v17 = vld [vmem:[%s1521_s3 + $0x88] sm:$0xff] (!%p366_p2)   ;;  %v459_v21 = vunpack.c.l.s4 (!%p366_p2), %v1277_v20  ;;  %vm800_vm2 = vcmask (!%p366_p2), 523264   ;;  %vm998_vm3 = vcmask (!%p366_p2), 516096  }
   0xb   : > { %v1243_v14 = vld [vmem:[%s1521_s3 + $0x20] sm:$0xff] (!%p366_p2)   ;;  %1164 = vmatpush3.bf16.msra.mxu1 (!%p366_p2), %v1248_v13  ;;  %v1245_v19 = vld [vmem:[%s1521_s3 + $0x28] sm:$0xff] (!%p366_p2)   ;;  %v1246_v24 = vld [vmem:[%s1521_s3 + $0x70] sm:$0xff] (!%p366_p2)   ;;  %v745_v61 = vsub.s32 (!%p366_p2), 0, %v1409_v22  ;;  %vm999_vm4 = vsmask.f32 (!%p366_p2), 256 }
   0xc   : > { %1165 = vmatprep.subr.bf16.mxu1 (!%p366_p2), %v1274_v4  ;;  %v737_v23 = vld [vmem:[#allocation3] sm:$0x1] (!%p366_p2)  ;;  %v1247_v25 = vld [vmem:[%s1521_s3 + $0x30] sm:$0xff] (!%p366_p2)   ;;  %v460_v27 = vunpack.c.0.s8 (!%p366_p2), %v459_v21  ;;  %v1249_v28 = vld [vmem:[%s1521_s3 + $0x78] sm:$0xff] (!%p366_p2)  }
   0xd   : > { %1123 = vmatpush3.bf16.msra.mxu0 (!%p366_p2), %v1237_v6  ;;  %750 = vperm.xlu0 (!%p366_p2), %1233, %v737_v23   ;;  %v736_v29 = vld [vmem:[#allocation2] sm:$0x1] (!%p366_p2)  ;;  %v1250_v32 = vld [vmem:[%s1521_s3 + $0x38] sm:$0xff] (!%p366_p2)   ;;  %v1253_v36 = vld [vmem:[%s1522_s4 + $0x8] sm:$0xff] (!%p366_p2)  }
   0xe   : > { %1124 = vmatprep.subr.bf16.mxu0 (!%p366_p2), %v1238_v7  ;;  %v463_v30 = vsub.s32 (!%p366_p2), %v460_v27, %v1409_v22  ;;  %v1252_v31 = vld [vmem:[%s1522_s4] sm:$0xff] (!%p366_p2)   ;;  %v1256_v39 = vld [vmem:[%s1527_s9 + $0x88] sm:$0xff] (!%p366_p2)   ;;  %v1258_v41 = vld [vmem:[%s1527_s9 + $0x90] sm:$0xff] (!%p366_p2)  }
   0xf   : > { %s1533_s26 = smov (!%p404_p3, %s1051_s26), 1  ;;  %1166 = vmatpush3.bf16.msra.mxu1 %v1251_v17  ;;  %v1254_v37 = vld [vmem:[%s1527_s9 + $0x80] sm:$0xff]   ;;  %v1257_v40 = vld [vmem:[%s1527_s9 + $0x48] sm:$0xff]   ;;  %v1259_v42 = vld [vmem:[%s1527_s9 + $0x50] sm:$0xff]  }
  0x10   : > { %s1220_s23 = smul.u32 3, %s1533_s26  ;;  %1171 = vmatprep.subr.bf16.mxu1 %v1274_v4  ;;  %v1255_v38 = vld [vmem:[%s1527_s9 + $0x40] sm:$0xff]   ;;  %v1260_v43 = vld [vmem:[%s1527_s9 + $0x98] sm:$0xff]   ;;  %v1263_v7 = vld [vmem:[%s1527_s9 + $0xc8] sm:$0xff]   ;;  %s410_s17 = scalar_lea.vmem %s1530_s12, %s1533_s26 }
  0x11   : > { %1125 = vmatpush3.bf16.msra.mxu0 %v1239_v8  ;;  %740 = vperm.xlu0 %1233, %v736_v29   ;;  %v1261_v44 = vld [vmem:[%s1527_s9 + $0x58] sm:$0xff]   ;;  %v667_v53 = vld [vmem:[%s1523_s5] sm:$0x1]  ;;  %v1264_v8 = vld [vmem:[%s1527_s9 + $0xd0] sm:$0xff]  }
  0x12   : > { %1126 = vmatprep.subr.bf16.mxu0 %v1240_v9  ;;  %s407_s14 = scalar_lea.vmem %s1519_s0, %s1220_s23  ;;  %v669_v58 = vld [vmem:[%s1524_s6] sm:$0x1]  ;;  %v1265_v10 = vld [vmem:[%s1527_s9 + $0xd8] sm:$0xff]   ;;  %vm1000_vm5 = vmand %vm998_vm3, %vm999_vm4 }
  0x13   : > { %v1056_v18 = vld.sshfl [vmem:[%s407_s14] sm:$0x13 pattern:$0x75316420] }
  0x14   : > { %v457_v26 = vcombine.high %v1056_v18, %v1056_v18  ;;  %v464_v34 = vrot.slane %v1056_v18, %v463_v30  ;;  %v1262_v5 = vld [vmem:[%s1527_s9 + $0xc0] sm:$0xff]  }
  0x15   : > { %1127 = vmatpush3.bf16.msra.mxu0 %v1241_v11  ;;  %v731_v17 = vld [vmem:[%s1525_s7] sm:$0x1] }
  0x16   : > { %1128 = vmatprep.subr.bf16.mxu0 %v1242_v12  ;;  %v471_v33 = vrot.slane %v457_v26, %v463_v30  ;;  %v472_v35 = vcombine.high %v464_v34, %v464_v34  ;;  %v733_v22 = vld [vmem:[%s1526_s8] sm:$0x1] }
  0x17   : > { %v993_v23 = vld [vmem:[%s1529_s11] sm:$0x1] }
  0x18   : > { %619 = vmatprep.mubr.bf16.mxu0 %v471_v33  ;;  %1168 = vmatmul.mubr.msk.bf16.vlgmr.msra.gmra.mrb[0].mxu1 %vm583_vm1, %v472_v35 }
  0x19   : > { %1129 = vmatpush3.bf16.msra.mxu0 %v1243_v14  ;;  %1172 = vmatpush3.bf16.msra.mxu1 %v1252_v31  ;;  %v1001_v31 = vld [vmem:[%s410_s17] sm:$0x1] }
  0x1a   : > { %1130 = vmatprep.subr.bf16.mxu0 %v1244_v16  ;;  %1175 = vmatprep.mubr.msk.bf16.mxu1 %vm1275_vm0, %v1274_v4 }
  0x1b   : > { %1173 = vmatprep.subr.bf16.mxu1 %v1274_v4 }
  0x1d   : > { %1131 = vmatpush3.bf16.msra.mxu0 %v1245_v19  ;;  %1174 = vmatpush3.bf16.msra.mxu1 %v1253_v36  ;;  %v991_v19 = vld [vmem:[%s1528_s10] sm:$0x1] }
  0x1e   : > { %1132 = vmatprep.subr.bf16.mxu0 %v1246_v24  ;;  %1191 = vmatprep.subr.bf16.mxu1 %v1274_v4 }
  0x20   : > { %1176 = vmatmul.mubr.msk.bf16.vlgmr.msra.gmra.mrb[4].mxu1 %vm583_vm1, %v471_v33 }
  0x21   : > { %1133 = vmatpush3.bf16.msra.mxu0 %v1247_v25  ;;  %1199 = vmatprep.mubr.msk.bf16.mxu1 %vm1275_vm0, %v1274_v4 }
  0x22   : > { %1134 = vmatprep.subr.bf16.mxu0 %v1249_v28  ;;  %1192 = vmatpush3.bf16.msra.mxu1 %v1255_v38 }
  0x23   : > { %1193 = vmatprep.subr.bf16.mxu1 %v1274_v4 }
  0x25   : > { %1135 = vmatpush3.bf16.msra.mxu0 %v1250_v32 }
  0x26   : > { %1179 = vmatprep.subr.bf16.mxu0 %v1274_v4  ;;  %1194 = vmatpush3.bf16.msra.mxu1 %v1257_v40 }
  0x27   : > { %1195 = vmatprep.subr.bf16.mxu1 %v1274_v4 }
  0x28   : > { %620 = vmatmul.mubr.bf16.vlgmr.msra.gmra.mrb[0].mxu0 %v464_v34 }
  0x29   : > { %1180 = vmatpush3.bf16.msra.mxu0 %v1254_v37  ;;  %1187 = vmatprep.mubr.msk.bf16.mxu0 %vm1275_vm0, %v1274_v4 }
  0x2a   : > { %1181 = vmatprep.subr.bf16.mxu0 %v1274_v4  ;;  %1196 = vmatpush3.bf16.msra.mxu1 %v1259_v42 }
  0x2b   : > { %1197 = vmatprep.subr.bf16.mxu1 %v1274_v4 }
  0x2d   : > { %1182 = vmatpush3.bf16.msra.mxu0 %v1256_v39 }
  0x2e   : > { %1183 = vmatprep.subr.bf16.mxu0 %v1274_v4  ;;  %1198 = vmatpush3.bf16.msra.mxu1 %v1261_v44 }
  0x2f   : > { %1203 = vmatprep.subr.bf16.mxu1 %v1274_v4 }
  0x31   : > { %1184 = vmatpush3.bf16.msra.mxu0 %v1258_v41 }
  0x32   : > { %1185 = vmatprep.subr.bf16.mxu0 %v1274_v4 }
  0x35   : > { %1186 = vmatpush3.bf16.msra.mxu0 %v1260_v43 }
  0x8c   : > { %v751_v0 = vpop.permute.xlu0 %750 }
  0x8d   : > { %v756_v2 = vrot.slane %v751_v0, %v745_v61 }
  0x90   : > { %v741_v9 = vpop.permute.xlu0 %740 }
  0x91   : > { %v746_v11 = vrot.slane %v741_v9, %v745_v61 }
  0xeb   : > { %v661_v45 = vpop.f32.mrb[0].mxu1 }
  0xec   : > { %v1169_v46 = vpop.f32.mrb[1].mxu1 }
  0xed   : > { %v664_v47 = vpop.f32.mrb[2].mxu1 }
  0xee   : > { %v1170_v48 = vpop.f32.mrb[3].mxu1 }
  0xf3   : > { %v725_v55 = vpop.f32.mrb[4].mxu1 }
  0xf4   : > { %v1177_v57 = vpop.f32.mrb[5].mxu1  ;;  %v732_v20 = vmul.f32 %v731_v17, %v725_v55 }
  0xf5   : > { %v728_v59 = vpop.f32.mrb[6].mxu1 }
  0xf6   : > { %v1178_v62 = vpop.f32.mrb[7].mxu1  ;;  %v734_v27 = vadd.f32 %v733_v22, %v732_v20 }
  0xfb   : > { %v1136_v49 = vpop.f32.mrb[0].mxu0 }
  0xfc   : > { %v1137_v50 = vpop.f32.mrb[1].mxu0 }
  0xfd   : > { %v1138_v51 = vadd.f32 %v1137_v50, %v1136_v49  ;;  %v1139_v52 = vpop.f32.mrb[2].mxu0 }
  0xfe   : > { %v1140_v54 = vpop.f32.mrb[3].mxu0 }
  0xff   : > { %v662_v56 = vadd.f32 %v1138_v51, %v661_v45 }
 0x101   : > { %v668_v60 = vmul.f32 %v667_v53, %v662_v56 }
 0x103   : > { %v670_v63 = vadd.f32 %v669_v58, %v668_v60 }
 0x105   : > { %v671_v1 = vmax.f32 %v670_v63, 0.0 }
 0x107   : > { %v735_v3 = vpack.c.bf16 %v671_v1, %v671_v1 }
 0x109   : > { %v757_v6 = vmul.bf16 %v756_v2, %v735_v3  ;;  %1188 = vmatmul.mubr.msk.bf16.vlgmr.msra.gmra.mrb[4].mxu0 %vm800_vm2, %v735_v3  ;;  %v747_v12 = vmul.bf16 %v746_v11, %v735_v3 }
 0x10b   : > { %1200 = vmatmul.mubr.msk.bf16.vlgmr.msra.gmra.mrb[8].mxu1 %vm800_vm2, %v757_v6 }
 0x10c   : > { %1204 = vmatpush3.bf16.msra.mxu1 %v1262_v5  ;;  %1211 = vmatprep.mubr.msk.bf16.mxu1 %vm1275_vm0, %v1274_v4 }
 0x10d   : > { %1205 = vmatprep.subr.bf16.mxu1 %v1274_v4 }
 0x110   : > { %1206 = vmatpush3.bf16.msra.mxu1 %v1263_v7 }
 0x111   : > { %1207 = vmatprep.subr.bf16.mxu1 %v1274_v4 }
 0x114   : > { %1208 = vmatpush3.bf16.msra.mxu1 %v1264_v8 }
 0x115   : > { %1209 = vmatprep.subr.bf16.mxu1 %v1274_v4 }
 0x118   : > { %1210 = vmatpush3.bf16.msra.mxu1 %v1265_v10 }
 0x11b   : > { %1212 = vmatmul.mubr.msk.bf16.vlgmr.msra.gmra.mrb[8].mxu1 %vm800_vm2, %v747_v12 }
 0x1dc   : > { %v838_v13 = vpop.f32.mrb[4].mxu0 }
 0x1dd   : > { %v1189_v14 = vpop.f32.mrb[5].mxu0 }
 0x1de   : > { %v841_v15 = vpop.f32.mrb[6].mxu0 }
 0x1df   : > { %v1190_v16 = vpop.f32.mrb[7].mxu0 }
 0x1ee   : > { %v982_v18 = vpop.f32.mrb[8].mxu1 }
 0x1ef   : > { %v1215_v4 = vadd.f32 %v982_v18, %v838_v13  ;;  %v1213_v21 = vpop.f32.mrb[9].mxu1 }
 0x1f0   : > { %v985_v24 = vpop.f32.mrb[10].mxu1 }
 0x1f1   : > { %v992_v25 = vmul.f32 %v1215_v4, %v991_v19  ;;  %v1214_v26 = vpop.f32.mrb[11].mxu1 }
 0x1f3   : > { %v994_v28 = vadd.f32 %v993_v23, %v992_v25 }
 0x1f5   : > { %v995_v29 = vadd.f32 %v994_v28, %v734_v27 }
 0x1f7   : > { %v996_v30 = vmax.f32 %v995_v29, 0.0 }
 0x1f9   : > { %v997_v32 = vpack.c.bf16 %v996_v30, %v996_v30 }
 0x1fb   : > { %v1002_v33 = vsel %vm1000_vm5, %v997_v32, %v1001_v31 }
 0x1fc   : > { %1003 = vst [vmem:[%s410_s17] sm:$0x1] %v1002_v33 }
 0x1fd PF: > { %s26_s25 = sadd.s32 1, %s1272_s25  }
 0x1fe   : > { %p23_p4 = scmp.ge.s32.totalorder %s26_s25, 4  }
 0x200   :  { %25 = sbr.rel (!%p23_p4) target bundleno = 3 (0x3), region = 101 }

// kernel: audra_forward.18
= control target key start
LH: loop header
LB: loop body
LE: loop exit
PB: predicated region body
PF: predicated region fallthrough
CT: control target
= control target key end

     0   :  { %s1188_s13 = smov 0   ;;  %s1341_s0 = inlined_call_operand.vmem [shape: bf16[2,1,64], index: 0, kind: input, shape index: {}]   ;;  %s1342_s1 = inlined_call_operand.<no memory space> [shape: bf16[1,1], index: 1, kind: input, shape index: {}, may-alias: {1,2}]   ;;  %s1343_s3 = inlined_call_operand.vmem [shape: bf16[9,64,64], index: 3, kind: input, shape index: {}]   ;;  %s1344_s4 = inlined_call_operand.vmem [shape: f32[1,64], index: 4, kind: input, shape index: {}]   ;;  %s1345_s5 = inlined_call_operand.vmem [shape: f32[1,64], index: 5, kind: input, shape index: {}]   ;;  %s1346_s6 = inlined_call_operand.vmem [shape: bf16[9,64,64], index: 6, kind: input, shape index: {}]   ;;  %s1347_s7 = inlined_call_operand.vmem [shape: f32[1,64], index: 7, kind: input, shape index: {}]   ;;  %s1348_s8 = inlined_call_operand.vmem [shape: f32[1,64], index: 8, kind: input, shape index: {}]   ;;  %s1349_s9 = inlined_call_operand.vmem [shape: bf16[2,1,64], index: 9, kind: output, shape index: {}]   ;;  %s1350_s2 = inlined_call_operand.<no memory space> [shape: bf16[1,1], index: 2, kind: input, shape index: {}, may-alias: {1,2}]  }
   0x1   :  { %v14_v0 = vstv %s1342_s1  ;;  %v16_v1 = vstv %s1350_s2 }
   0x2   :  { %15 = vst [vmem:[#allocation2] sm:$0x1] %v14_v0  ;;  %17 = vst [vmem:[#allocation3] sm:$0x1] %v16_v1 }
   0x3 LB: > { %s882_s14 = sadd.s32 4294967295, %s1127_s13   ;;  %p886_p0 = scmp.ge.s32.totalorder %s1127_s13, 1  ;;  %s1127_s13 = sphi %s1188_s13, %s23_s13  }
   0x4   : > { %p289_p1 = scmp.lt.s32.totalorder %s1127_s13, 3 }
   0x6   : > { %p290_p2 = pnand %p886_p0, %p289_p1 }
   0x7   : > { %v1129_v3 = vmov (!%p290_p2), 0   ;;  %v1130_v5 = vmov (!%p290_p2), 0.0   ;;  %v1097_v6 = vld [vmem:[%s1343_s3 + $0x80] sm:$0xff] (!%p290_p2)   ;;  %vm1131_vm0 = vmmov (!%p290_p2), 0   ;;  %p321_p3 = scmp.lt.s32.totalorder (!%p290_p2), %s882_s14, 1  ;;  %v1098_v7 = vld [vmem:[%s1343_s3 + $0x88] sm:$0xff] (!%p290_p2)   ;;  %v336_v17 = vlaneseq (!%p290_p2) }
   0x8   : > { %293 = sbr.rel (%p290_p2) target bundleno = 634 (0x27a), region = 56  ;;  %1096 = vset.pattern.permute.xlu0 (!%p290_p2), %v1129_v3  ;;  %997 = vmatprep.subr.bf16.mxu0 (!%p290_p2), %v1130_v5  ;;  %v1099_v8 = vld [vmem:[%s1343_s3 + $0x90] sm:$0xff] (!%p290_p2)   ;;  %v1100_v9 = vld [vmem:[%s1343_s3 + $0x98] sm:$0xff] (!%p290_p2)   ;;  %vm393_vm1 = vcmask (!%p290_p2), 523264   ;;  %v1101_v11 = vld [vmem:[%s1343_s3 + $0x40] sm:$0xff] (!%p290_p2)   ;;  %vm832_vm2 = vcmask (!%p290_p2), 516096  }
   0x9   : > { %v330_v2 = vld [vmem:[#allocation3] sm:$0x1] (!%p290_p2)  ;;  %v329_v4 = vld [vmem:[#allocation2] sm:$0x1] (!%p290_p2)  ;;  %1005 = vmatprep.mubr.msk.bf16.mxu0 (!%p290_p2), %vm1131_vm0, %v1130_v5  ;;  %998 = vmatpush3.bf16.msra.mxu0 (!%p290_p2), %v1097_v6  ;;  %v1102_v12 = vld [vmem:[%s1343_s3 + $0x48] sm:$0xff] (!%p290_p2)   ;;  %v337_v18 = vshrl.u32 (!%p290_p2), %v336_v17, 7 }
   0xa   : > { %343 = vperm.xlu0 (!%p290_p2), %1096, %v330_v2   ;;  %1033 = vmatprep.subr.bf16.mxu1 (!%p290_p2), %v1130_v5  ;;  %v1109_v13 = vld [vmem:[%s1346_s6 + $0x80] sm:$0xff] (!%p290_p2)   ;;  %v1103_v14 = vld [vmem:[%s1343_s3 + $0x50] sm:$0xff] (!%p290_p2)   ;;  %v1110_v15 = vld [vmem:[%s1346_s6 + $0x88] sm:$0xff] (!%p290_p2)   ;;  %vm833_vm3 = vsmask.f32 (!%p290_p2), 256 }
   0xb   : > { %999 = vmatprep.subr.bf16.mxu0 (!%p290_p2), %v1130_v5  ;;  %1041 = vmatprep.mubr.msk.bf16.mxu1 (!%p290_p2), %vm1131_vm0, %v1130_v5  ;;  %v1104_v16 = vld [vmem:[%s1343_s3 + $0x58] sm:$0xff] (!%p290_p2)   ;;  %v338_v19 = vsub.s32 (!%p290_p2), 0, %v337_v18  ;;  %v1105_v22 = vld [vmem:[%s1343_s3 + $0xc0] sm:$0xff] (!%p290_p2)   ;;  %v1106_v24 = vld [vmem:[%s1343_s3 + $0xc8] sm:$0xff] (!%p290_p2)  }
   0xc   : > { %1034 = vmatpush3.bf16.msra.mxu1 (!%p290_p2), %v1109_v13  ;;  %v1107_v25 = vld [vmem:[%s1343_s3 + $0xd0] sm:$0xff] (!%p290_p2)   ;;  %v1108_v27 = vld [vmem:[%s1343_s3 + $0xd8] sm:$0xff] (!%p290_p2)   ;;  %v584_v32 = vld [vmem:[%s1344_s4] sm:$0x1] (!%p290_p2) }
   0xd   : > { %1000 = vmatpush3.bf16.msra.mxu0 (!%p290_p2), %v1098_v7  ;;  %1035 = vmatprep.subr.bf16.mxu1 (!%p290_p2), %v1130_v5  ;;  %v1111_v30 = vld [vmem:[%s1346_s6 + $0x90] sm:$0xff] (!%p290_p2)   ;;  %v1112_v31 = vld [vmem:[%s1346_s6 + $0x98] sm:$0xff] (!%p290_p2)   ;;  %v586_v34 = vld [vmem:[%s1345_s5] sm:$0x1] (!%p290_p2) }
   0xe   : > { %333 = vperm.xlu0 (!%p290_p2), %1096, %v329_v4   ;;  %1001 = vmatprep.subr.bf16.mxu0 (!%p290_p2), %v1130_v5  ;;  %v1113_v41 = vld [vmem:[%s1346_s6 + $0x40] sm:$0xff] (!%p290_p2)   ;;  %v1114_v43 = vld [vmem:[%s1346_s6 + $0x48] sm:$0xff] (!%p290_p2)   ;;  %v1115_v44 = vld [vmem:[%s1346_s6 + $0x50] sm:$0xff] (!%p290_p2)  }
   0xf   : > { %s1352_s14 = smov (!%p321_p3, %s882_s14), 1  ;;  %v1116_v45 = vld [vmem:[%s1346_s6 + $0x58] sm:$0xff]   ;;  %v1117_v46 = vld [vmem:[%s1346_s6 + $0xc0] sm:$0xff]   ;;  %v1118_v48 = vld [vmem:[%s1346_s6 + $0xc8] sm:$0xff]  }
  0x10   : > { %s323_s21 = scalar_lea.vmem %s1341_s0, %s1352_s14  ;;  %1036 = vmatpush3.bf16.msra.mxu1 %v1110_v15  ;;  %v1119_v49 = vld [vmem:[%s1346_s6 + $0xd0] sm:$0xff]   ;;  %v1120_v50 = vld [vmem:[%s1346_s6 + $0xd8] sm:$0xff]   ;;  %v824_v52 = vld [vmem:[%s1347_s7] sm:$0x1]  ;;  %s326_s11 = scalar_lea.vmem %s1349_s9, %s1352_s14 }
  0x11   : > { %1002 = vmatpush3.bf16.msra.mxu0 %v1099_v8  ;;  %v1223_v10 = vld [vmem:[%s323_s21] sm:$0x1]  ;;  %1037 = vmatprep.subr.bf16.mxu1 %v1130_v5  ;;  %vm834_vm4 = vmand %vm832_vm2, %vm833_vm3 }
  0x12   : > { %1003 = vmatprep.subr.bf16.mxu0 %v1130_v5  ;;  %v826_v54 = vld [vmem:[%s1348_s8] sm:$0x1]  ;;  %v828_v56 = vunpack.c.l.bf16 %v1223_v10 }
  0x13   : > { %v835_v63 = vld [vmem:[%s326_s11] sm:$0x1] }
  0x14   : > { %1038 = vmatpush3.bf16.msra.mxu1 %v1111_v30 }
  0x15   : > { %1004 = vmatpush3.bf16.msra.mxu0 %v1100_v9  ;;  %1039 = vmatprep.subr.bf16.mxu1 %v1130_v5 }
  0x16   : > { %1009 = vmatprep.subr.bf16.mxu0 %v1130_v5 }
  0x18   : > { %1006 = vmatmul.mubr.msk.bf16.vlgmr.msra.gmra.mrb[0].mxu0 %vm393_vm1, %v1223_v10  ;;  %1040 = vmatpush3.bf16.msra.mxu1 %v1112_v31 }
  0x19   : > { %1010 = vmatpush3.bf16.msra.mxu0 %v1101_v11  ;;  %1017 = vmatprep.mubr.msk.bf16.mxu0 %vm1131_vm0, %v1130_v5 }
  0x1a   : > { %1011 = vmatprep.subr.bf16.mxu0 %v1130_v5  ;;  %1045 = vmatprep.subr.bf16.mxu1 %v1130_v5 }
  0x1d   : > { %1012 = vmatpush3.bf16.msra.mxu0 %v1102_v12 }
  0x1e   : > { %1013 = vmatprep.subr.bf16.mxu0 %v1130_v5 }
  0x21   : > { %1014 = vmatpush3.bf16.msra.mxu0 %v1103_v14 }
  0x22   : > { %1015 = vmatprep.subr.bf16.mxu0 %v1130_v5 }
  0x25   : > { %1016 = vmatpush3.bf16.msra.mxu0 %v1104_v16 }
  0x26   : > { %1021 = vmatprep.subr.bf16.mxu0 %v1130_v5 }
  0x89   : > { %v344_v20 = vpop.permute.xlu0 %343 }
  0x8a   : > { %v349_v21 = vrot.slane %v344_v20, %v338_v19 }
  0x8c   : > { %v350_v23 = vmul.bf16 %v349_v21, %v1223_v10 }
  0x8d   : > { %v334_v26 = vpop.permute.xlu0 %333 }
  0x8e   : > { %1018 = vmatmul.mubr.msk.bf16.vlgmr.msra.gmra.mrb[0].mxu0 %vm393_vm1, %v350_v23  ;;  %v339_v28 = vrot.slane %v334_v26, %v338_v19 }
  0x8f   : > { %1022 = vmatpush3.bf16.msra.mxu0 %v1105_v22  ;;  %1029 = vmatprep.mubr.msk.bf16.mxu0 %vm1131_vm0, %v1130_v5 }
  0x90   : > { %1023 = vmatprep.subr.bf16.mxu0 %v1130_v5  ;;  %v340_v29 = vmul.bf16 %v339_v28, %v1223_v10 }
  0x93   : > { %1024 = vmatpush3.bf16.msra.mxu0 %v1106_v24 }
  0x94   : > { %1025 = vmatprep.subr.bf16.mxu0 %v1130_v5 }
  0x97   : > { %1026 = vmatpush3.bf16.msra.mxu0 %v1107_v25 }
  0x98   : > { %1027 = vmatprep.subr.bf16.mxu0 %v1130_v5 }
  0x9b   : > { %1028 = vmatpush3.bf16.msra.mxu0 %v1108_v27 }
  0x9e   : > { %1030 = vmatmul.mubr.msk.bf16.vlgmr.msra.gmra.mrb[0].mxu0 %vm393_vm1, %v340_v29 }
 0x171   : > { %v575_v33 = vpop.f32.mrb[0].mxu0 }
 0x172   : > { %v585_v35 = vmul.f32 %v584_v32, %v575_v33  ;;  %v1031_v36 = vpop.f32.mrb[1].mxu0 }
 0x173   : > { %v578_v37 = vpop.f32.mrb[2].mxu0 }
 0x174   : > { %v587_v38 = vadd.f32 %v586_v34, %v585_v35  ;;  %v1032_v39 = vpop.f32.mrb[3].mxu0 }
 0x176   : > { %v588_v40 = vmax.f32 %v587_v38, 0.0 }
 0x178   : > { %v589_v42 = vpack.c.bf16 %v588_v40, %v588_v40 }
 0x17a   : > { %1042 = vmatmul.mubr.msk.bf16.vlgmr.msra.gmra.mrb[0].mxu1 %vm393_vm1, %v589_v42  ;;  %v591_v47 = vmul.bf16 %v589_v42, %v349_v21  ;;  %v590_v51 = vmul.bf16 %v589_v42, %v339_v28 }
 0x17b   : > { %1046 = vmatpush3.bf16.msra.mxu1 %v1113_v41  ;;  %1053 = vmatprep.mubr.msk.bf16.mxu1 %vm1131_vm0, %v1130_v5 }
 0x17c   : > { %1047 = vmatprep.subr.bf16.mxu1 %v1130_v5 }
 0x17f   : > { %1048 = vmatpush3.bf16.msra.mxu1 %v1114_v43 }
 0x180   : > { %1049 = vmatprep.subr.bf16.mxu1 %v1130_v5 }
 0x183   : > { %1050 = vmatpush3.bf16.msra.mxu1 %v1115_v44 }
 0x184   : > { %1051 = vmatprep.subr.bf16.mxu1 %v1130_v5 }
 0x187   : > { %1052 = vmatpush3.bf16.msra.mxu1 %v1116_v45 }
 0x188   : > { %1057 = vmatprep.subr.bf16.mxu1 %v1130_v5 }
 0x18a   : > { %1054 = vmatmul.mubr.msk.bf16.vlgmr.msra.gmra.mrb[0].mxu1 %vm393_vm1, %v591_v47 }
 0x18b   : > { %1058 = vmatpush3.bf16.msra.mxu1 %v1117_v46  ;;  %1065 = vmatprep.mubr.msk.bf16.mxu1 %vm1131_vm0, %v1130_v5 }
 0x18c   : > { %1059 = vmatprep.subr.bf16.mxu1 %v1130_v5 }
 0x18f   : > { %1060 = vmatpush3.bf16.msra.mxu1 %v1118_v48 }
 0x190   : > { %1061 = vmatprep.subr.bf16.mxu1 %v1130_v5 }
 0x193   : > { %1062 = vmatpush3.bf16.msra.mxu1 %v1119_v49 }
 0x194   : > { %1063 = vmatprep.subr.bf16.mxu1 %v1130_v5 }
 0x197   : > { %1064 = vmatpush3.bf16.msra.mxu1 %v1120_v50 }
 0x19a   : > { %1066 = vmatmul.mubr.msk.bf16.vlgmr.msra.gmra.mrb[0].mxu1 %vm393_vm1, %v590_v51 }
 0x26d   : > { %v815_v53 = vpop.f32.mrb[0].mxu1 }
 0x26e   : > { %v825_v55 = vmul.f32 %v824_v52, %v815_v53  ;;  %v1067_v57 = vpop.f32.mrb[1].mxu1 }
 0x26f   : > { %v818_v58 = vpop.f32.mrb[2].mxu1 }
 0x270   : > { %v827_v59 = vadd.f32 %v826_v54, %v825_v55  ;;  %v1068_v60 = vpop.f32.mrb[3].mxu1 }
 0x272   : > { %v829_v61 = vadd.f32 %v828_v56, %v827_v59 }
 0x274   : > { %v830_v62 = vmax.f32 %v829_v61, 0.0 }
 0x276   : > { %v831_v0 = vpack.c.bf16 %v830_v62, %v830_v62 }
 0x278   : > { %v836_v1 = vsel %vm834_vm4, %v831_v0, %v835_v63 }
 0x279   : > { %837 = vst [vmem:[%s326_s11] sm:$0x1] %v836_v1 }
 0x27a PF: > { %s23_s13 = sadd.s32 1, %s1127_s13  }
 0x27b   : > { %p20_p4 = scmp.ge.s32.totalorder %s23_s13, 4  }
 0x27d   :  { %22 = sbr.rel (!%p20_p4) target bundleno = 3 (0x3), region = 92 }

// kernel: audra_forward.16
= control target key start
LH: loop header
LB: loop body
LE: loop exit
PB: predicated region body
PF: predicated region fallthrough
CT: control target
= control target key end

     0   :  { %s2019_s30 = smov 0   ;;  %s2291_s0 = inlined_call_operand.vmem [shape: bf16[2,4,32], index: 0, kind: input, shape index: {}]   ;;  %s2292_s1 = inlined_call_operand.vmem [shape: bf16[4,1], index: 1, kind: input, shape index: {}]   ;;  %s2293_s2 = inlined_call_operand.vmem [shape: bf16[4,1], index: 2, kind: input, shape index: {}]   ;;  %s2294_s3 = inlined_call_operand.vmem [shape: bf16[9,32,32], index: 3, kind: input, shape index: {}]   ;;  %s2295_s4 = inlined_call_operand.vmem [shape: f32[1,32], index: 4, kind: input, shape index: {}]   ;;  %s2296_s5 = inlined_call_operand.vmem [shape: f32[1,32], index: 5, kind: input, shape index: {}]   ;;  %s2297_s6 = inlined_call_operand.vmem [shape: bf16[9,32,32], index: 6, kind: input, shape index: {}]   ;;  %s2298_s7 = inlined_call_operand.vmem [shape: f32[1,32], index: 7, kind: input, shape index: {}]   ;;  %s2299_s8 = inlined_call_operand.vmem [shape: f32[1,32], index: 8, kind: input, shape index: {}]   ;;  %s2300_s9 = inlined_call_operand.vmem [shape: bf16[2,4,32], index: 9, kind: output, shape index: {}]  }
   0x1 LB: > { %s1579_s10 = sadd.s32 4294967295, %s1963_s30   ;;  %p1583_p0 = scmp.ge.s32.totalorder %s1963_s30, 1  ;;  %s1963_s30 = sphi %s2019_s30, %s19_s30  }
   0x2   : > { %p286_p1 = scmp.lt.s32.totalorder %s1963_s30, 3 }
   0x4   : > { %p287_p2 = pnand %p1583_p0, %p286_p1 }
   0x5   : > { %v330_v0 = vld [vmem:[%s2292_s1] sm:$0x3] (!%p287_p2)  ;;  %v1965_v1 = vmov (!%p287_p2), 0   ;;  %v1966_v3 = vmov (!%p287_p2), 0.0   ;;  %v1921_v4 = vld [vmem:[%s2294_s3 + $0x10] sm:$0xff] (!%p287_p2)   ;;  %v1922_v5 = vld [vmem:[%s2294_s3 + $0x18] sm:$0xff] (!%p287_p2)   ;;  %v340_v13 = vlaneseq (!%p287_p2) }
   0x6   : > { %290 = sbr.rel (%p287_p2) target bundleno = 658 (0x292), region = 56  ;;  %1920 = vset.pattern.permute.xlu0 (!%p287_p2), %v1965_v1  ;;  %v331_v2 = vld [vmem:[%s2293_s2] sm:$0x3] (!%p287_p2)  ;;  %1772 = vmatprep.subr.bf16.mxu1 (!%p287_p2), %v1966_v3  ;;  %p320_p3 = scmp.lt.s32.totalorder (!%p287_p2), %s1579_s10, 1  ;;  %vm1967_vm0 = vmmov (!%p287_p2), 0   ;;  %vm374_vm1 = vcmask (!%p287_p2), 261120  }
   0x7   : > { %334 = vperm.xlu0 (!%p287_p2), %1920, %v330_v0   ;;  %1764 = vmatprep.subr.bf16.mxu0 (!%p287_p2), %v1966_v3  ;;  %v1923_v6 = vld [vmem:[%s2294_s3] sm:$0xff] (!%p287_p2)   ;;  %v1925_v7 = vld [vmem:[%s2294_s3 + $0x8] sm:$0xff] (!%p287_p2)   ;;  %v1924_v8 = vld [vmem:[%s2294_s3 + $0x30] sm:$0xff] (!%p287_p2)   ;;  %v1968_v11 = vmov (!%p287_p2), 269488144   ;;  %v341_v15 = vshrl.u32 (!%p287_p2), %v340_v13, 7 }
   0x8   : > { %1773 = vmatpush3.bf16.msra.mxu1 (!%p287_p2), %v1921_v4  ;;  %1776 = vmatprep.mubr.msk.bf16.mxu1 (!%p287_p2), %vm1967_vm0, %v1966_v3  ;;  %v1926_v10 = vld [vmem:[%s2294_s3 + $0x38] sm:$0xff] (!%p287_p2)   ;;  %v338_v12 = vunpack.c.l.s4 (!%p287_p2), %v1968_v11  ;;  %v1927_v19 = vld [vmem:[%s2294_s3 + $0x20] sm:$0xff] (!%p287_p2)   ;;  %v1928_v20 = vld [vmem:[%s2294_s3 + $0x50] sm:$0xff] (!%p287_p2)   ;;  %vm486_vm2 = vcmask (!%p287_p2), 1041408   ;;  %vm421_vm3 = vcmask (!%p287_p2), 1042432   ;;  %vm552_vm4 = vcmask (!%p287_p2), 1040384  }
   0x9   : > { %1774 = vmatprep.subr.bf16.mxu1 (!%p287_p2), %v1966_v3  ;;  %1768 = vmatprep.mubr.msk.bf16.mxu0 (!%p287_p2), %vm1967_vm0, %v1966_v3  ;;  %v1929_v23 = vld [vmem:[%s2294_s3 + $0x28] sm:$0xff] (!%p287_p2)   ;;  %v1930_v24 = vld [vmem:[%s2294_s3 + $0x58] sm:$0xff] (!%p287_p2)   ;;  %v1931_v26 = vld [vmem:[%s2294_s3 + $0x40] sm:$0xff] (!%p287_p2)   ;;  %vm1524_vm5 = vcmask (!%p287_p2), 254976  }
   0xa   : > { %1765 = vmatpush3.bf16.msra.mxu0 (!%p287_p2), %v1923_v6  ;;  %v339_v14 = vunpack.c.0.s8 (!%p287_p2), %v338_v12  ;;  %v1934_v28 = vld [vmem:[%s2294_s3 + $0x70] sm:$0xff] (!%p287_p2)   ;;  %v1932_v29 = vld [vmem:[%s2294_s3 + $0x48] sm:$0xff] (!%p287_p2)   ;;  %v1936_v30 = vld [vmem:[%s2294_s3 + $0x78] sm:$0xff] (!%p287_p2)  }
   0xb   : > { %347 = vperm.xlu0 (!%p287_p2), %1920, %v331_v2   ;;  %1766 = vmatprep.subr.bf16.mxu0 (!%p287_p2), %v1966_v3  ;;  %v1933_v31 = vld [vmem:[%s2294_s3 + $0x60] sm:$0xff] (!%p287_p2)   ;;  %v1935_v32 = vld [vmem:[%s2294_s3 + $0x68] sm:$0xff] (!%p287_p2)   ;;  %v1939_v39 = vld [vmem:[%s2297_s6 + $0x10] sm:$0xff] (!%p287_p2)  }
   0xc   : > { %1775 = vmatpush3.bf16.msra.mxu1 (!%p287_p2), %v1922_v5  ;;  %v342_v16 = vsub.s32 (!%p287_p2), %v339_v14, %v341_v15  ;;  %v1937_v33 = vld [vmem:[%s2294_s3 + $0x80] sm:$0xff] (!%p287_p2)   ;;  %v1938_v34 = vld [vmem:[%s2294_s3 + $0x88] sm:$0xff] (!%p287_p2)   ;;  %v1941_v41 = vld [vmem:[%s2297_s6 + $0x18] sm:$0xff] (!%p287_p2)  }
   0xd   : > { %s2302_s10 = smov (!%p320_p3, %s1579_s10), 1  ;;  %1788 = vmatprep.subr.bf16.mxu1 %v1966_v3  ;;  %v1940_v40 = vld [vmem:[%s2297_s6] sm:$0xff]   ;;  %v1942_v42 = vld [vmem:[%s2297_s6 + $0x8] sm:$0xff]  }
   0xe   : > { %s1584_s23 = sshll.u32 %s2302_s10, 1  ;;  %1767 = vmatpush3.bf16.msra.mxu0 %v1925_v7 }
   0xf   : > { %s323_s28 = scalar_lea.vmem %s2291_s0, %s1584_s23  ;;  %1780 = vmatprep.subr.bf16.mxu0 %v1966_v3  ;;  %s327_s29 = scalar_lea.vmem %s2300_s9, %s1584_s23 }
  0x10   : > { %v2064_v9 = vld [vmem:[%s323_s28] sm:$0x3] }
  0x11   : > { %1777 = vmatmul.mubr.msk.bf16.vlgmr.msra.gmra.mrb[0].mxu1 %vm374_vm1, %v2064_v9 }
  0x12   : > { %1789 = vmatpush3.bf16.msra.mxu1 %v1924_v8  ;;  %1792 = vmatprep.mubr.msk.bf16.mxu1 %vm1967_vm0, %v1966_v3 }
  0x13   : > { %1790 = vmatprep.subr.bf16.mxu1 %v1966_v3 }
  0x16   : > { %1791 = vmatpush3.bf16.msra.mxu1 %v1926_v10 }
  0x17   : > { %1804 = vmatprep.subr.bf16.mxu1 %v1966_v3 }
  0x86   : > { %v335_v17 = vpop.permute.xlu0 %334 }
  0x87   : > { %v2077_v18 = vrot.slane %v335_v17, %v342_v16 }
  0x89   : > { %v344_v21 = vmul.bf16 %v2077_v18, %v2064_v9 }
  0x8a   : > { %v348_v22 = vpop.permute.xlu0 %347 }
  0x8b   : > { %1769 = vmatmul.mubr.msk.bf16.vlgmr.msra.gmra.mrb[0].mxu0 %vm374_vm1, %v344_v21  ;;  %1793 = vmatmul.mubr.msk.bf16.vlgmr.msra.gmra.mrb[4].mxu1 %vm374_vm1, %v344_v21  ;;  %v2095_v25 = vrot.slane %v348_v22, %v342_v16 }
  0x8c   : > { %1781 = vmatpush3.bf16.msra.mxu0 %v1927_v19  ;;  %1805 = vmatpush3.bf16.msra.mxu1 %v1928_v20 }
  0x8d   : > { %1782 = vmatprep.subr.bf16.mxu0 %v1966_v3  ;;  %1806 = vmatprep.subr.bf16.mxu1 %v1966_v3  ;;  %v357_v27 = vmul.bf16 %v2095_v25, %v2064_v9 }
  0x8e   : > { %1784 = vmatprep.mubr.msk.bf16.mxu0 %vm1967_vm0, %v1966_v3  ;;  %1808 = vmatprep.mubr.msk.bf16.mxu1 %vm1967_vm0, %v1966_v3 }
  0x90   : > { %1783 = vmatpush3.bf16.msra.mxu0 %v1929_v23  ;;  %1807 = vmatpush3.bf16.msra.mxu1 %v1930_v24 }
  0x91   : > { %1796 = vmatprep.subr.bf16.mxu0 %v1966_v3  ;;  %1820 = vmatprep.subr.bf16.mxu1 %v1966_v3 }
  0x93   : > { %1785 = vmatmul.mubr.msk.bf16.vlgmr.msra.gmra.mrb[4].mxu0 %vm374_vm1, %v357_v27  ;;  %1809 = vmatmul.mubr.msk.bf16.vlgmr.msra.gmra.mrb[8].mxu1 %vm374_vm1, %v357_v27 }
  0x94   : > { %1797 = vmatpush3.bf16.msra.mxu0 %v1931_v26  ;;  %1800 = vmatprep.mubr.msk.bf16.mxu0 %vm1967_vm0, %v1966_v3 }
  0x95   : > { %1798 = vmatprep.subr.bf16.mxu0 %v1966_v3  ;;  %1821 = vmatpush3.bf16.msra.mxu1 %v1934_v28 }
  0x96   : > { %1822 = vmatprep.subr.bf16.mxu1 %v1966_v3  ;;  %1824 = vmatprep.mubr.msk.bf16.mxu1 %vm1967_vm0, %v1966_v3 }
  0x98   : > { %1799 = vmatpush3.bf16.msra.mxu0 %v1932_v29 }
  0x99   : > { %1812 = vmatprep.subr.bf16.mxu0 %v1966_v3  ;;  %1823 = vmatpush3.bf16.msra.mxu1 %v1936_v30 }
  0x9a   : > { %1836 = vmatprep.subr.bf16.mxu1 %v1966_v3 }
  0x9b   : > { %1801 = vmatmul.mubr.msk.bf16.vlgmr.msra.gmra.mrb[8].mxu0 %vm374_vm1, %v2064_v9 }
  0x9c   : > { %1813 = vmatpush3.bf16.msra.mxu0 %v1933_v31  ;;  %1816 = vmatprep.mubr.msk.bf16.mxu0 %vm1967_vm0, %v1966_v3 }
  0x9d   : > { %1814 = vmatprep.subr.bf16.mxu0 %v1966_v3  ;;  %1825 = vmatmul.mubr.msk.bf16.vlgmr.msra.gmra.mrb[12].mxu1 %vm374_vm1, %v2064_v9 }
  0x9e   : > { %1840 = vmatprep.mubr.msk.bf16.mxu1 %vm1967_vm0, %v1966_v3  ;;  %1837 = vmatpush3.bf16.msra.mxu1 %v1940_v40  ;;  %v1646_v40 = vld [vmem:[%s2296_s5] ss:$0 sm:$0xff] }
  0x9f   : > { %1838 = vmatprep.subr.bf16.mxu1 %v1966_v3 }
  0xa0   : > { %1815 = vmatpush3.bf16.msra.mxu0 %v1935_v32 }
  0xa1   : > { %1828 = vmatprep.subr.bf16.mxu0 %v1966_v3 }
  0xa2   : > { %1839 = vmatpush3.bf16.msra.mxu1 %v1942_v42 }
  0xa3   : > { %1817 = vmatmul.mubr.msk.bf16.vlgmr.msra.gmra.mrb[12].mxu0 %vm374_vm1, %v344_v21  ;;  %1852 = vmatprep.subr.bf16.mxu1 %v1966_v3 }
  0xa4   : > { %1829 = vmatpush3.bf16.msra.mxu0 %v1937_v33  ;;  %1832 = vmatprep.mubr.msk.bf16.mxu0 %vm1967_vm0, %v1966_v3 }
  0xa5   : > { %1830 = vmatprep.subr.bf16.mxu0 %v1966_v3 }
  0xa8   : > { %1831 = vmatpush3.bf16.msra.mxu0 %v1938_v34 }
  0xa9   : > { %1844 = vmatprep.subr.bf16.mxu0 %v1966_v3 }
  0xab   : > { %1833 = vmatmul.mubr.msk.bf16.vlgmr.msra.gmra.mrb[16].mxu0 %vm374_vm1, %v357_v27 }
  0xac   : > { %1848 = vmatprep.mubr.msk.bf16.mxu0 %vm1967_vm0, %v1966_v3  ;;  %1845 = vmatpush3.bf16.msra.mxu0 %v1939_v39 }
  0xad   : > { %1846 = vmatprep.subr.bf16.mxu0 %v1966_v3 }
  0xb0   : > { %1847 = vmatpush3.bf16.msra.mxu0 %v1941_v41 }
  0xb1   : > { %1860 = vmatprep.subr.bf16.mxu0 %v1966_v3 }
  0xe4   : > { %v477_v35 = vpop.f32.mrb[0].mxu1 }
  0xe5   : > { %v1778_v36 = vpop.f32.mrb[1].mxu1  ;;  %v484_v43 = vrot.slane %v477_v35, 6 }
  0xe6   : > { %v480_v37 = vpop.f32.mrb[2].mxu1 }
  0xe7   : > { %v1779_v38 = vpop.f32.mrb[3].mxu1  ;;  %v487_v46 = vsel %vm486_vm2, 0.0, %v484_v43  ;;  %v1645_v37 = vld [vmem:[%s2295_s4] ss:$0 sm:$0xff] }
 0x15e   : > { %v412_v44 = vpop.f32.mrb[0].mxu0  ;;  %v606_v45 = vpop.f32.mrb[4].mxu1 }
 0x15f   : > { %v419_v47 = vrot.slane %v412_v44, 5  ;;  %v1770_v48 = vpop.f32.mrb[1].mxu0  ;;  %v1794_v49 = vpop.f32.mrb[5].mxu1  ;;  %v613_v58 = vrot.slane %v606_v45, 7  ;;  %v1943_v44 = vld [vmem:[%s2297_s6 + $0x30] sm:$0xff]  }
 0x160   : > { %v415_v50 = vpop.f32.mrb[2].mxu0  ;;  %v609_v51 = vpop.f32.mrb[6].mxu1  ;;  %v1945_v48 = vld [vmem:[%s2297_s6 + $0x38] sm:$0xff]   ;;  %v1946_v49 = vld [vmem:[%s2297_s6 + $0x28] sm:$0xff]  }
 0x161   : > { %v422_v52 = vsel %vm421_vm3, 0.0, %v419_v47  ;;  %v1771_v53 = vpop.f32.mrb[3].mxu0  ;;  %v1795_v54 = vpop.f32.mrb[7].mxu1  ;;  %v615_v5 = vsel %vm552_vm4, 0.0, %v613_v58  ;;  %v1948_v50 = vld [vmem:[%s2297_s6 + $0x40] sm:$0xff]   ;;  %v1956_v58 = vld [vmem:[%s2297_s6 + $0x88] sm:$0xff]  }
 0x162   : > { %v488_v55 = vadd.f32 %v487_v46, %v422_v52  ;;  %v1944_v46 = vld [vmem:[%s2297_s6 + $0x20] sm:$0xff]   ;;  %v1949_v52 = vld [vmem:[%s2297_s6 + $0x58] sm:$0xff]   ;;  %v1950_v53 = vld [vmem:[%s2297_s6 + $0x48] sm:$0xff]  }
 0x163   : > { %v1952_v54 = vld [vmem:[%s2297_s6 + $0x60] sm:$0xff]  }
 0x166   : > { %v543_v56 = vpop.f32.mrb[4].mxu0  ;;  %v726_v57 = vpop.f32.mrb[8].mxu1 }
 0x167   : > { %v550_v59 = vrot.slane %v543_v56, 7  ;;  %v1786_v60 = vpop.f32.mrb[5].mxu0  ;;  %v1810_v61 = vpop.f32.mrb[9].mxu1  ;;  %v733_v6 = vrot.slane %v726_v57, 1  ;;  %v1954_v56 = vld [vmem:[%s2297_s6 + $0x68] sm:$0xff]   ;;  %v1955_v57 = vld [vmem:[%s2297_s6 + $0x80] sm:$0xff]  }
 0x168   : > { %v546_v62 = vpop.f32.mrb[6].mxu0  ;;  %v729_v63 = vpop.f32.mrb[10].mxu1 }
 0x169   : > { %v553_v0 = vsel %vm552_vm4, 0.0, %v550_v59  ;;  %v1787_v1 = vpop.f32.mrb[7].mxu0  ;;  %v1811_v2 = vpop.f32.mrb[11].mxu1  ;;  %v735_v12 = vsel %vm421_vm3, %v733_v6, 0.0 }
 0x16a   : > { %v554_v4 = vadd.f32 %v553_v0, %v488_v55  ;;  %v1953_v55 = vld [vmem:[%s2297_s6 + $0x78] sm:$0xff]  }
 0x16c   : > { %v616_v7 = vadd.f32 %v615_v5, %v554_v4 }
 0x16e   : > { %v668_v8 = vpop.f32.mrb[8].mxu0 }
 0x16f   : > { %v674_v10 = vadd.f32 %v668_v8, %v616_v7  ;;  %v1802_v11 = vpop.f32.mrb[9].mxu0 }
 0x170   : > { %v671_v13 = vpop.f32.mrb[10].mxu0  ;;  %v850_v14 = vpop.f32.mrb[12].mxu1 }
 0x171   : > { %v736_v15 = vadd.f32 %v735_v12, %v674_v10  ;;  %v1803_v16 = vpop.f32.mrb[11].mxu0  ;;  %v1826_v17 = vpop.f32.mrb[13].mxu1  ;;  %v857_v21 = vrot.slane %v850_v14, 2 }
 0x172   : > { %v853_v19 = vpop.f32.mrb[14].mxu1 }
 0x173   : > { %v1827_v20 = vpop.f32.mrb[15].mxu1  ;;  %v859_v28 = vsel %vm486_vm2, %v857_v21, 0.0 }
 0x176   : > { %v788_v22 = vpop.f32.mrb[12].mxu0 }
 0x177   : > { %v795_v23 = vrot.slane %v788_v22, 1  ;;  %v1818_v24 = vpop.f32.mrb[13].mxu0 }
 0x178   : > { %v791_v26 = vpop.f32.mrb[14].mxu0 }
 0x179   : > { %v797_v27 = vsel %vm421_vm3, %v795_v23, 0.0  ;;  %v1819_v29 = vpop.f32.mrb[15].mxu0 }
 0x17a   : > { %v798_v30 = vadd.f32 %v797_v27, %v736_v15 }
 0x17c   : > { %v860_v31 = vadd.f32 %v859_v28, %v798_v30 }
 0x17e   : > { %v912_v32 = vpop.f32.mrb[16].mxu0 }
 0x17f   : > { %v919_v33 = vrot.slane %v912_v32, 3  ;;  %v1834_v34 = vpop.f32.mrb[17].mxu0 }
 0x180   : > { %v915_v35 = vpop.f32.mrb[18].mxu0 }
 0x181   : > { %v921_v36 = vsel %vm552_vm4, %v919_v33, 0.0  ;;  %v1835_v38 = vpop.f32.mrb[19].mxu0 }
 0x182   : > { %v922_v39 = vadd.f32 %v921_v36, %v860_v31 }
 0x184   : > { %v930_v41 = vmul.f32 %v1645_v37, %v922_v39 }
 0x186   : > { %v938_v42 = vadd.f32 %v1646_v40, %v930_v41 }
 0x188   : > { %v939_v43 = vmax.f32 %v938_v42, 0.0 }
 0x18a   : > { %v940_v45 = vpack.c.bf16 %v939_v43, %v939_v43 }
 0x18c   : > { %1849 = vmatmul.mubr.msk.bf16.vlgmr.msra.gmra.mrb[20].mxu0 %vm374_vm1, %v940_v45  ;;  %v941_v47 = vmul.bf16 %v940_v45, %v2077_v18  ;;  %v1947_v18 = vld [vmem:[%s2297_s6 + $0x50] sm:$0xff]   ;;  %v942_v51 = vmul.bf16 %v940_v45, %v2095_v25 }
 0x18d   : > { %1861 = vmatpush3.bf16.msra.mxu0 %v1943_v44  ;;  %1864 = vmatprep.mubr.msk.bf16.mxu0 %vm1967_vm0, %v1966_v3  ;;  %v1951_v25 = vld [vmem:[%s2297_s6 + $0x70] sm:$0xff]  }
 0x18e   : > { %1841 = vmatmul.mubr.msk.bf16.vlgmr.msra.gmra.mrb[16].mxu1 %vm374_vm1, %v941_v47  ;;  %1862 = vmatprep.subr.bf16.mxu0 %v1966_v3 }
 0x18f   : > { %1853 = vmatpush3.bf16.msra.mxu1 %v1944_v46  ;;  %1856 = vmatprep.mubr.msk.bf16.mxu1 %vm1967_vm0, %v1966_v3 }
 0x190   : > { %1854 = vmatprep.subr.bf16.mxu1 %v1966_v3 }
 0x191   : > { %1863 = vmatpush3.bf16.msra.mxu0 %v1945_v48 }
 0x192   : > { %1876 = vmatprep.subr.bf16.mxu0 %v1966_v3 }
 0x193   : > { %1855 = vmatpush3.bf16.msra.mxu1 %v1946_v49 }
 0x194   : > { %1865 = vmatmul.mubr.msk.bf16.vlgmr.msra.gmra.mrb[24].mxu0 %vm374_vm1, %v941_v47  ;;  %1868 = vmatprep.subr.bf16.mxu1 %v1966_v3 }
 0x195   : > { %1877 = vmatpush3.bf16.msra.mxu0 %v1947_v18  ;;  %1880 = vmatprep.mubr.msk.bf16.mxu0 %vm1967_vm0, %v1966_v3 }
 0x196   : > { %1857 = vmatmul.mubr.msk.bf16.vlgmr.msra.gmra.mrb[20].mxu1 %vm374_vm1, %v942_v51  ;;  %1878 = vmatprep.subr.bf16.mxu0 %v1966_v3 }
 0x197   : > { %1869 = vmatpush3.bf16.msra.mxu1 %v1948_v50  ;;  %1872 = vmatprep.mubr.msk.bf16.mxu1 %vm1967_vm0, %v1966_v3 }
 0x198   : > { %1870 = vmatprep.subr.bf16.mxu1 %v1966_v3 }
 0x199   : > { %1879 = vmatpush3.bf16.msra.mxu0 %v1949_v52 }
 0x19a   : > { %1892 = vmatprep.subr.bf16.mxu0 %v1966_v3 }
 0x19b   : > { %1871 = vmatpush3.bf16.msra.mxu1 %v1950_v53 }
 0x19c   : > { %1881 = vmatmul.mubr.msk.bf16.vlgmr.msra.gmra.mrb[28].mxu0 %vm374_vm1, %v942_v51  ;;  %1884 = vmatprep.subr.bf16.mxu1 %v1966_v3 }
 0x19d   : > { %1893 = vmatpush3.bf16.msra.mxu0 %v1951_v25  ;;  %1896 = vmatprep.mubr.msk.bf16.mxu0 %vm1967_vm0, %v1966_v3 }
 0x19e   : > { %1873 = vmatmul.mubr.msk.bf16.vlgmr.msra.gmra.mrb[24].mxu1 %vm374_vm1, %v940_v45  ;;  %1894 = vmatprep.subr.bf16.mxu0 %v1966_v3 }
 0x19f   : > { %1885 = vmatpush3.bf16.msra.mxu1 %v1952_v54  ;;  %1888 = vmatprep.mubr.msk.bf16.mxu1 %vm1967_vm0, %v1966_v3  ;;  %v1706_v54 = vld [vmem:[%s2298_s7] ss:$0 sm:$0xff] }
 0x1a0   : > { %1886 = vmatprep.subr.bf16.mxu1 %v1966_v3 }
 0x1a1   : > { %1895 = vmatpush3.bf16.msra.mxu0 %v1953_v55 }
 0x1a3   : > { %1887 = vmatpush3.bf16.msra.mxu1 %v1954_v56 }
 0x1a4   : > { %1897 = vmatmul.mubr.msk.bf16.vlgmr.msra.gmra.mrb[32].mxu0 %vm374_vm1, %v940_v45  ;;  %1900 = vmatprep.subr.bf16.mxu1 %v1966_v3 }
 0x1a6   : > { %1889 = vmatmul.mubr.msk.bf16.vlgmr.msra.gmra.mrb[28].mxu1 %vm374_vm1, %v941_v47 }
 0x1a7   : > { %1901 = vmatpush3.bf16.msra.mxu1 %v1955_v57  ;;  %1904 = vmatprep.mubr.msk.bf16.mxu1 %vm1967_vm0, %v1966_v3  ;;  %v1707_v57 = vld [vmem:[%s2299_s8] ss:$0 sm:$0xff] }
 0x1a8   : > { %1902 = vmatprep.subr.bf16.mxu1 %v1966_v3 }
 0x1ab   : > { %1903 = vmatpush3.bf16.msra.mxu1 %v1956_v58 }
 0x1ae   : > { %1905 = vmatmul.mubr.msk.bf16.vlgmr.msra.gmra.mrb[32].mxu1 %vm374_vm1, %v942_v51 }
 0x25f   : > { %v1060_v59 = vpop.f32.mrb[20].mxu0 }
 0x260   : > { %v1067_v60 = vrot.slane %v1060_v59, 6  ;;  %v1850_v61 = vpop.f32.mrb[21].mxu0  ;;  %v1520_v59 = vunpack.c.l.bf16 %v2064_v9 }
 0x261   : > { %v996_v62 = vpop.f32.mrb[16].mxu1  ;;  %v1063_v63 = vpop.f32.mrb[22].mxu0 }
 0x262   : > { %v1003_v0 = vrot.slane %v996_v62, 5  ;;  %v1842_v1 = vpop.f32.mrb[17].mxu1  ;;  %v1851_v2 = vpop.f32.mrb[23].mxu0  ;;  %v1069_v5 = vsel %vm486_vm2, 0.0, %v1067_v60 }
 0x263   : > { %v999_v4 = vpop.f32.mrb[18].mxu1 }
 0x264   : > { %v1005_v6 = vsel %vm421_vm3, 0.0, %v1003_v0  ;;  %v1843_v7 = vpop.f32.mrb[19].mxu1 }
 0x265   : > { %v1070_v8 = vadd.f32 %v1069_v5, %v1005_v6 }
 0x267   : > { %v1187_v10 = vpop.f32.mrb[24].mxu0 }
 0x268   : > { %v1866_v3 = vpop.f32.mrb[25].mxu0  ;;  %v1194_v13 = vrot.slane %v1187_v10, 7 }
 0x269   : > { %v1125_v11 = vpop.f32.mrb[20].mxu1  ;;  %v1190_v12 = vpop.f32.mrb[26].mxu0 }
 0x26a   : > { %v1132_v14 = vrot.slane %v1125_v11, 7  ;;  %v1858_v15 = vpop.f32.mrb[21].mxu1  ;;  %v1867_v16 = vpop.f32.mrb[27].mxu0  ;;  %v1196_v22 = vsel %vm552_vm4, 0.0, %v1194_v13 }
 0x26b   : > { %v1128_v17 = vpop.f32.mrb[22].mxu1 }
 0x26c   : > { %v1134_v19 = vsel %vm552_vm4, 0.0, %v1132_v14  ;;  %v1859_v20 = vpop.f32.mrb[23].mxu1 }
 0x26d   : > { %v1135_v21 = vadd.f32 %v1134_v19, %v1070_v8 }
 0x26f   : > { %v1307_v23 = vpop.f32.mrb[28].mxu0  ;;  %v1197_v24 = vadd.f32 %v1196_v22, %v1135_v21 }
 0x270   : > { %v1314_v26 = vrot.slane %v1307_v23, 1  ;;  %v1882_v27 = vpop.f32.mrb[29].mxu0 }
 0x271   : > { %v1249_v28 = vpop.f32.mrb[24].mxu1  ;;  %v1310_v29 = vpop.f32.mrb[30].mxu0 }
 0x272   : > { %v1316_v30 = vsel %vm421_vm3, %v1314_v26, 0.0  ;;  %v1255_v31 = vadd.f32 %v1249_v28, %v1197_v24  ;;  %v1874_v32 = vpop.f32.mrb[25].mxu1  ;;  %v1883_v33 = vpop.f32.mrb[31].mxu0 }
 0x273   : > { %v1252_v34 = vpop.f32.mrb[26].mxu1 }
 0x274   : > { %v1317_v35 = vadd.f32 %v1316_v30, %v1255_v31  ;;  %v1875_v36 = vpop.f32.mrb[27].mxu1 }
 0x277   : > { %v1431_v37 = vpop.f32.mrb[32].mxu0 }
 0x278   : > { %v1898_v38 = vpop.f32.mrb[33].mxu0  ;;  %v1438_v41 = vrot.slane %v1431_v37, 2 }
 0x279   : > { %v1369_v39 = vpop.f32.mrb[28].mxu1  ;;  %v1434_v40 = vpop.f32.mrb[34].mxu0 }
 0x27a   : > { %v1376_v42 = vrot.slane %v1369_v39, 1  ;;  %v1890_v43 = vpop.f32.mrb[29].mxu1  ;;  %v1899_v44 = vpop.f32.mrb[35].mxu0  ;;  %v1440_v49 = vsel %vm486_vm2, %v1438_v41, 0.0 }
 0x27b   : > { %v1372_v45 = vpop.f32.mrb[30].mxu1 }
 0x27c   : > { %v1378_v46 = vsel %vm421_vm3, %v1376_v42, 0.0  ;;  %v1891_v47 = vpop.f32.mrb[31].mxu1 }
 0x27d   : > { %v1379_v48 = vadd.f32 %v1378_v46, %v1317_v35 }
 0x27f   : > { %v1441_v18 = vadd.f32 %v1440_v49, %v1379_v48 }
 0x281   : > { %v1493_v50 = vpop.f32.mrb[32].mxu1 }
 0x282   : > { %v1500_v51 = vrot.slane %v1493_v50, 3  ;;  %v1906_v52 = vpop.f32.mrb[33].mxu1 }
 0x283   : > { %v1496_v53 = vpop.f32.mrb[34].mxu1 }
 0x284   : > { %v1502_v25 = vsel %vm552_vm4, %v1500_v51, 0.0  ;;  %v1907_v55 = vpop.f32.mrb[35].mxu1 }
 0x285   : > { %v1503_v56 = vadd.f32 %v1502_v25, %v1441_v18 }
 0x287   : > { %v1511_v58 = vmul.f32 %v1706_v54, %v1503_v56 }
 0x289   : > { %v1519_v60 = vadd.f32 %v1707_v57, %v1511_v58 }
 0x28b   : > { %v1521_v61 = vadd.f32 %v1520_v59, %v1519_v60 }
 0x28d   : > { %v1522_v62 = vmax.f32 %v1521_v61, 0.0 }
 0x28f   : > { %v1523_v63 = vpack.c.bf16 %v1522_v62, %v1522_v62 }
 0x291   : > { %1525 = vst.msk [vmem:[%s327_s29] sm:$0x3] %vm1524_vm5, %v1523_v63 }
 0x292 PF: > { %s19_s30 = sadd.s32 1, %s1963_s30  }
 0x293   : > { %p16_p4 = scmp.ge.s32.totalorder %s19_s30, 4  }
 0x295   :  { %18 = sbr.rel (!%p16_p4) target bundleno = 1 (0x1), region = 102 }

// kernel: audra_forward.19
= control target key start
LH: loop header
LB: loop body
LE: loop exit
PB: predicated region body
PF: predicated region fallthrough
CT: control target
= control target key end

     0   :  { %v36_v0 = vlaneseq  ;;  %v195_v1 = vmov 0.0   ;;  %vm196_vm0 = vmmov 0   ;;  %v197_v3 = vmov 1983009808   ;;  %s258_s3 = inlined_call_operand.vmem [shape: bf16[64,128], index: 3, kind: input, shape index: {}]   ;;  %s259_s0 = inlined_call_operand.vmem [shape: bf16[2,1,64], index: 0, kind: input, shape index: {}]   ;;  %s260_s1 = inlined_call_operand.vmem [shape: f32[1,64], index: 1, kind: input, shape index: {}]   ;;  %s261_s2 = inlined_call_operand.vmem [shape: f32[1,64], index: 2, kind: input, shape index: {}]   ;;  %s262_s4 = inlined_call_operand.vmem [shape: f32[1,128], index: 4, kind: input, shape index: {}]   ;;  %s263_s5 = inlined_call_operand.vmem [shape: f32[2,128], index: 5, kind: output, shape index: {}]  }
   0x1   :  { %176 = vmatprep.subr.bf16.mxu0 %v195_v1  ;;  %v191_v2 = vld [vmem:[%s258_s3] sm:$0xff]   ;;  %184 = vmatprep.mubr.msk.bf16.mxu0 %vm196_vm0, %v195_v1  ;;  %v34_v4 = vunpack.c.l.s4 %v197_v3  ;;  %v192_v6 = vld [vmem:[%s258_s3 + $0x8] sm:$0xff]   ;;  %v193_v14 = vld [vmem:[%s258_s3 + $0x10] sm:$0xff]   ;;  %vm87_vm1 = vcmask 1041409   ;;  %vm114_vm2 = vcmask 523264  }
   0x2   :  { %v37_v5 = vshrl.u32 %v36_v0, 7  ;;  %177 = vmatpush3.bf16.msra.mxu0 %v191_v2  ;;  %v21_v8 = vld [vmem:[%s259_s0] sm:$0x1]  ;;  %v22_v9 = vld [vmem:[%s259_s0 + $0x1] sm:$0x1]  ;;  %v194_v21 = vld [vmem:[%s258_s3 + $0x18] sm:$0xff]  }
   0x3   :  { %v35_v7 = vunpack.c.0.s8 %v34_v4  ;;  %178 = vmatprep.subr.bf16.mxu0 %v195_v1  ;;  %v163_v10 = vld [vmem:[%s260_s1] ss:$0 sm:$0xff]  ;;  %v23_v12 = vunpack.c.l.bf16 %v21_v8  ;;  %v24_v15 = vunpack.c.l.bf16 %v22_v9 }
   0x4   :  { %v164_v13 = vld [vmem:[%s261_s2] ss:$0 sm:$0xff] }
   0x5   :  { %v38_v11 = vsub.s32 %v35_v7, %v37_v5  ;;  %v165_v34 = vld [vmem:[%s262_s4] ss:$0 sm:$0xff] }
   0x6   :  { %179 = vmatpush3.bf16.msra.mxu0 %v192_v6 }
   0x7   :  { %v39_v16 = vrot.slane %v163_v10, %v38_v11  ;;  %v57_v17 = vrot.slane %v164_v13, %v38_v11  ;;  %180 = vmatprep.subr.bf16.mxu0 %v195_v1 }
   0x9   :  { %v40_v18 = vrot.slane %v39_v16, 1  ;;  %v43_v19 = vmul.f32 %v39_v16, %v23_v12  ;;  %v58_v20 = vrot.slane %v57_v17, 1 }
   0xa   :  { %181 = vmatpush3.bf16.msra.mxu0 %v193_v14 }
   0xb   :  { %v44_v22 = vmul.f32 %v40_v18, %v24_v15  ;;  %v61_v23 = vadd.f32 %v57_v17, %v43_v19  ;;  %182 = vmatprep.subr.bf16.mxu0 %v195_v1 }
   0xd   :  { %v62_v24 = vadd.f32 %v58_v20, %v44_v22  ;;  %v63_v25 = vmax.f32 %v61_v23, 0.0 }
   0xe   :  { %183 = vmatpush3.bf16.msra.mxu0 %v194_v21 }
   0xf   :  { %v64_v26 = vmax.f32 %v62_v24, 0.0  ;;  %v65_v27 = vpack.c.bf16 %v63_v25, %v63_v25 }
  0x11   :  { %v66_v28 = vpack.c.bf16 %v64_v26, %v64_v26  ;;  %v84_v29 = vunpack.c.l.b16 %v65_v27 }
  0x13   :  { %v85_v30 = vunpack.c.l.b16 %v66_v28 }
  0x15   :  { %v86_v31 = vrot.slane %v85_v30, 7 }
  0x17   :  { %v88_v32 = vsel %vm87_vm1, %v86_v31, %v84_v29 }
  0x18   :  { %v89_v33 = vpack.c.b16 %v88_v32, %v88_v32 }
  0x1a   :  { %185 = vmatmul.mubr.msk.bf16.vlgmr.msra.gmra.mrb[0].mxu0 %vm114_vm2, %v89_v33 }
  0xed   :  { %v152_v35 = vpop.f32.mrb[0].mxu0 }
  0xee   :  { %v153_v36 = vadd.f32 %v165_v34, %v152_v35  ;;  %v186_v37 = vpop.f32.mrb[1].mxu0 }
  0xef   :  { %v155_v38 = vpop.f32.mrb[2].mxu0 }
  0xf0   :  { %158 = vst [vmem:[%s263_s5] sm:$0x3] %v153_v36  ;;  %v187_v39 = vpop.f32.mrb[3].mxu0 }

</bundles_post_ra>
